<compile_context>
chip_gen: v5e
topology: v5e:2x2
jax: 0.10.0
libtpu: 0.0.40
codegen_flags: <defaults>
</compile_context>

<pallas_src>
import functools

import jax
import jax.numpy as jnp
from jax.experimental import pallas as pl
from jax.experimental.pallas import tpu as pltpu

LANE = 128
C_OUT = 1408  # 128 (pointfeat_1) + 256 (pointfeat_2) + 1024 (pooled, replicated)


# ----------------------------------------------------------------------------
# Kernel: one grid step == one batch element; all 1x1 Conv1d layers are
# (C_out, C_in) @ (C_in, N) MXU matmuls in NCW layout.
# ----------------------------------------------------------------------------
def posenet_feat_kernel(n_valid,
                        x_ref, emb_ref,
                        wax_ref, wae_ref, ba_ref,
                        wb_ref, bb_ref,
                        w5_ref, b5_ref,
                        w6_ref, b6_ref,
                        out_ref):
    f32 = jnp.float32
    bf16 = jnp.bfloat16

    def matrelu(w_ref, b_ref, a, out_dtype=f32):
        # bf16 operands on the MXU, f32 accumulation; bias + ReLU in f32.
        y = jnp.dot(w_ref[...], a.astype(bf16), preferred_element_type=f32)
        return jnp.maximum(y + b_ref[...], 0.0).astype(out_dtype)

    x = x_ref[0]        # (3,  Np) f32, zero-padded on the lane axis
    emb = emb_ref[0]    # (32, Np) f32, zero-padded on the lane axis

    # Fused conv1 / e_conv1: the fused (128, 35) block-diagonal weight is split
    # along the input channels into (128,3) and (128,32) pieces, so pointfeat_1
    # is produced directly from two small matmuls with no concat anywhere.
    y1 = (jnp.dot(wax_ref[...], x.astype(bf16), preferred_element_type=f32)
          + jnp.dot(wae_ref[...], emb.astype(bf16), preferred_element_type=f32))
    pf1 = jnp.maximum(y1 + ba_ref[...], 0.0)                 # (128, Np) f32

    # Fused conv2 / e_conv2 (block-diagonal) -> pointfeat_2 directly.
    pf2 = matrelu(wb_ref, bb_ref, pf1)                       # (256, Np) f32
    # conv5: only consumed by conv6's bf16 matmul -> store in bf16.
    x5 = matrelu(w5_ref, b5_ref, pf2, out_dtype=bf16)        # (512, Np) bf16
    # conv6
    x6 = matrelu(w6_ref, b6_ref, x5)                         # (1024, Np) f32

    # AvgPool1d(num_points): masked lane reduce on the XLU (MXU is the busy
    # unit here), divide by the TRUE point count, then lane-broadcast.
    n_pad = x6.shape[1]
    if n_valid != n_pad:
        lane_idx = jax.lax.broadcasted_iota(jnp.int32, (1, n_pad), 1)
        x6s = jnp.where(lane_idx < n_valid, x6, 0.0)
    else:
        x6s = x6
    ap = jnp.sum(x6s, axis=1, keepdims=True) * (1.0 / n_valid)   # (1024, 1)

    # Direct slice stores at sublane-aligned channel offsets (0 / 128 / 384);
    # the points axis is lane-aligned (Np % 128 == 0), so every store is a
    # full, unmasked vst.
    out_ref[0, 0:128, :] = pf1
    out_ref[0, 128:384, :] = pf2
    out_ref[0, 384:1408, :] = jnp.broadcast_to(ap, (1024, n_pad))


# ----------------------------------------------------------------------------
# Wrapper
# ----------------------------------------------------------------------------
def _vmem_capacity_bytes():
    try:
        info = pltpu.get_tpu_info()
        for attr in ("vmem_capacity_bytes", "vmem_bytes", "vmem_size_bytes"):
            v = getattr(info, attr, None)
            if v:
                return int(v)
    except Exception:
        pass
    return 64 * 2 ** 20  # conservative (v7x per-TensorCore)


def posenet_feat(x_ncw, emb_ncw, packed_params):
    """x_ncw: (B, 3, N) f32, emb_ncw: (B, 32, N) f32 -> (B, 1408, N) f32 (NCW,
    exactly matching the PyTorch module's output layout)."""
    B, _, N = x_ncw.shape
    n_pad = ((N + LANE - 1) // LANE) * LANE

    # Lane-align the points axis (zero pad); pad lanes are masked in the pool.
    if n_pad != N:
        widths = ((0, 0), (0, 0), (0, n_pad - N))
        x_p = jnp.pad(x_ncw, widths)
        emb_p = jnp.pad(emb_ncw, widths)
    else:
        x_p, emb_p = x_ncw, emb_ncw

    weight_args = tuple(packed_params)
    # Constant across the grid -> fully resident in VMEM, unpipelined (no
    # pointless double-buffering of ~1.4 MB of bf16 weights).
    weight_specs = [pl.BlockSpec(memory_space=pltpu.MemorySpace.VMEM)
                    for _ in weight_args]

    # VMEM budget: double-buffered input/output blocks + resident weights
    # (+ ~2 MiB lane/sublane layout padding slack for the small weight/bias
    # arrays) + live intermediates (pf1, pf2, x5 in bf16, x6, broadcast ap).
    weight_bytes = sum(int(w.size) * w.dtype.itemsize for w in weight_args)
    weight_bytes += 2 * 2 ** 20
    block_bytes = (2 * 35 * n_pad * 4            # x + emb blocks, 2x buffered
                   + 2 * C_OUT * n_pad * 4       # output block, 2x buffered
                   + (128 + 256 + 1024 + 1024) * n_pad * 4
                   + 512 * n_pad * 2)            # x5 kept in bf16
    need = int(1.25 * (block_bytes + weight_bytes))
    cap = _vmem_capacity_bytes()
    vmem_limit = int(max(16 * 2 ** 20, min(cap - 8 * 2 ** 20, need)))

    out_p = pl.pallas_call(
        functools.partial(posenet_feat_kernel, N),
        out_shape=jax.ShapeDtypeStruct((B, C_OUT, n_pad), jnp.float32),
        grid=(B,),
        in_specs=[pl.BlockSpec((1, 3, n_pad), lambda b: (b, 0, 0)),
                  pl.BlockSpec((1, 32, n_pad), lambda b: (b, 0, 0))]
                 + weight_specs,
        out_specs=pl.BlockSpec((1, C_OUT, n_pad), lambda b: (b, 0, 0)),
        compiler_params=pltpu.CompilerParams(
            dimension_semantics=("parallel",),
            vmem_limit_bytes=vmem_limit),
    )(x_p, emb_p, *weight_args)

    if n_pad == N:
        return out_p
    # TODO(synk): consumers that accept a lane-padded points axis should use
    # out_p directly and skip this trim copy.
    return out_p[:, :, :N]


# ----------------------------------------------------------------------------
# Parameters (PyTorch Conv1d(in, out, 1) weight is (out, in, 1); we store the
# squeezed (out, in) matrix and (out,) bias per layer, then pack/fuse).
# ----------------------------------------------------------------------------
def init_layer_params(key):
    specs = [("conv1", 3, 64), ("e_conv1", 32, 64), ("conv2", 64, 128),
             ("e_conv2", 64, 128), ("conv5", 256, 512), ("conv6", 512, 1024)]
    keys = jax.random.split(key, 2 * len(specs))
    params = {}
    for i, (name, cin, cout) in enumerate(specs):
        bound = 1.0 / (cin ** 0.5)
        w = jax.random.uniform(keys[2 * i], (cout, cin), jnp.float32, -bound, bound)
        b = jax.random.uniform(keys[2 * i + 1], (cout,), jnp.float32, -bound, bound)
        params[name] = (w, b)
    return params


def pack_params(p):
    """Fuse paired convs (block-diagonal), split the first fused weight by
    input channel group, cast weights to bf16 (biases stay f32)."""
    w1, b1 = p["conv1"]; we1, be1 = p["e_conv1"]
    w2, b2 = p["conv2"]; we2, be2 = p["e_conv2"]
    w5, b5 = p["conv5"]; w6, b6 = p["conv6"]

    # conv1 | e_conv1 fused output channels = 128; split by input source.
    wa_x = jnp.zeros((128, 3), jnp.float32).at[:64].set(w1)     # rows 64: are 0
    wa_e = jnp.zeros((128, 32), jnp.float32).at[64:].set(we1)   # rows :64 are 0
    ba = jnp.concatenate([b1, be1])[:, None]                    # (128, 1) f32

    wb = jnp.zeros((256, 128), jnp.float32)
    wb = wb.at[:128, :64].set(w2).at[128:, 64:].set(we2)        # conv2 | e_conv2
    bb = jnp.concatenate([b2, be2])[:, None]                    # (256, 1) f32

    bf = lambda w: w.astype(jnp.bfloat16)
    return (bf(wa_x), bf(wa_e), ba, bf(wb), bb,
            bf(w5), b5[:, None], bf(w6), b6[:, None])


# ----------------------------------------------------------------------------
# Pure-JAX reference of the PyTorch forward (NCW layout).
# dot_dtype=bf16 mirrors the kernel's MXU arithmetic (tight check);
# dot_dtype=f32 is the exact PyTorch-semantics reference (loose check).
# ----------------------------------------------------------------------------
def ref_forward(x, emb, p, dot_dtype=jnp.float32):
    def conv(a, w, b):
        y = jnp.einsum('oc,bcn->bon', w.astype(dot_dtype), a.astype(dot_dtype),
                       preferred_element_type=jnp.float32)
        return jnp.maximum(y + b[None, :, None], 0.0)

    w1, b1 = p["conv1"]; we1, be1 = p["e_conv1"]
    w2, b2 = p["conv2"]; we2, be2 = p["e_conv2"]
    w5, b5 = p["conv5"]; w6, b6 = p["conv6"]

    x1 = conv(x, w1, b1)
    e1 = conv(emb, we1, be1)
    pf1 = jnp.concatenate([x1, e1], axis=1)
    x2 = conv(x1, w2, b2)
    e2 = conv(e1, we2, be2)
    pf2 = jnp.concatenate([x2, e2], axis=1)
    x5 = conv(pf2, w5, b5)
    x6 = conv(x5, w6, b6)
    ap = jnp.mean(x6, axis=2, keepdims=True)
    ap = jnp.broadcast_to(ap, (x.shape[0], 1024, x.shape[2]))
    return jnp.concatenate([pf1, pf2, ap], axis=1)


if __name__ == "__main__":
    key = jax.random.PRNGKey(0)
    kx, kemb, kp, kx2, kemb2 = jax.random.split(key, 5)
    layer_params = init_layer_params(kp)
    packed = pack_params(layer_params)

    # Case 1: non-lane-aligned N (exercises the pad + masked-pool + trim path).
    B, num_points = 2, 100
    x = jax.random.normal(kx, (B, 3, num_points), jnp.float32)       # point cloud
    emb = jax.random.normal(kemb, (B, 32, num_points), jnp.float32)  # CNN embeddings

    out = jax.block_until_ready(posenet_feat(x, emb, packed))
    assert out.shape == (B, 1408, num_points), out.shape

    # Tight check vs a reference mirroring the kernel's bf16 MXU math.
    ref_bf16 = ref_forward(x, emb, layer_params, dot_dtype=jnp.bfloat16)
    assert jnp.allclose(out, ref_bf16, atol=1e-3, rtol=1e-3), "mismatch vs bf16 reference"
    # Loose check vs the exact f32 PyTorch-semantics reference.
    ref_f32 = ref_forward(x, emb, layer_params, dot_dtype=jnp.float32)
    assert jnp.allclose(out, ref_f32, atol=5e-2, rtol=5e-2), "mismatch vs f32 reference"

    # Case 2: lane-aligned N (no pad / no mask / no trim fast path).
    x2 = jax.random.normal(kx2, (1, 3, 128), jnp.float32)
    emb2 = jax.random.normal(kemb2, (1, 32, 128), jnp.float32)
    out2 = jax.block_until_ready(posenet_feat(x2, emb2, packed))
    assert out2.shape == (1, 1408, 128), out2.shape
    ref2 = ref_forward(x2, emb2, layer_params, dot_dtype=jnp.bfloat16)
    assert jnp.allclose(out2, ref2, atol=1e-3, rtol=1e-3), "mismatch (aligned path)"

    print("KERNEL_OK")
</pallas_src>

<mosaic_0001>
module attributes {stable_mosaic.version = 11 : i64} {
  func.func @posenet_feat_kernel(%arg0: i32, %arg1: memref<1x3x128xf32, #tpu.memory_space<vmem>>, %arg2: memref<1x32x128xf32, #tpu.memory_space<vmem>>, %arg3: memref<128x3xbf16, #tpu.memory_space<vmem>>, %arg4: memref<128x32xbf16, #tpu.memory_space<vmem>>, %arg5: memref<128x1xf32, #tpu.memory_space<vmem>>, %arg6: memref<256x128xbf16, #tpu.memory_space<vmem>>, %arg7: memref<256x1xf32, #tpu.memory_space<vmem>>, %arg8: memref<512x256xbf16, #tpu.memory_space<vmem>>, %arg9: memref<512x1xf32, #tpu.memory_space<vmem>>, %arg10: memref<1024x512xbf16, #tpu.memory_space<vmem>>, %arg11: memref<1024x1xf32, #tpu.memory_space<vmem>>, %arg12: memref<1x1408x128xf32, #tpu.memory_space<vmem>>) attributes {dimension_semantics = [#tpu.dimension_semantics<parallel>], iteration_bounds = array<i64: 2>, scalar_prefetch = 0 : i64, scratch_operands = 0 : i64, tpu.core_type = #tpu.core_type<tc>, window_params = [{transform_indices = @transform_0, window_bounds = array<i64: 1, 3, 128>}, {transform_indices = @transform_1, window_bounds = array<i64: 1, 32, 128>}, {pipeline_mode = #tpu.pipeline_mode<synchronous>, transform_indices = @transform_2, window_bounds = array<i64: 128, 3>}, {pipeline_mode = #tpu.pipeline_mode<synchronous>, transform_indices = @transform_3, window_bounds = array<i64: 128, 32>}, {pipeline_mode = #tpu.pipeline_mode<synchronous>, transform_indices = @transform_4, window_bounds = array<i64: 128, 1>}, {pipeline_mode = #tpu.pipeline_mode<synchronous>, transform_indices = @transform_5, window_bounds = array<i64: 256, 128>}, {pipeline_mode = #tpu.pipeline_mode<synchronous>, transform_indices = @transform_6, window_bounds = array<i64: 256, 1>}, {pipeline_mode = #tpu.pipeline_mode<synchronous>, transform_indices = @transform_7, window_bounds = array<i64: 512, 256>}, {pipeline_mode = #tpu.pipeline_mode<synchronous>, transform_indices = @transform_8, window_bounds = array<i64: 512, 1>}, {pipeline_mode = #tpu.pipeline_mode<synchronous>, transform_indices = @transform_9, window_bounds = array<i64: 1024, 512>}, {pipeline_mode = #tpu.pipeline_mode<synchronous>, transform_indices = @transform_10, window_bounds = array<i64: 1024, 1>}, {transform_indices = @transform_11, window_bounds = array<i64: 1, 1408, 128>}]} {
    %c0 = arith.constant 0 : index
    %c0_0 = arith.constant 0 : index
    %c0_1 = arith.constant 0 : index
    %0 = vector.load %arg1[%c0, %c0_0, %c0_1] : memref<1x3x128xf32, #tpu.memory_space<vmem>>, vector<1x3x128xf32>
    %1 = vector.shape_cast %0 : vector<1x3x128xf32> to vector<3x128xf32>
    %c0_2 = arith.constant 0 : index
    %c0_3 = arith.constant 0 : index
    %c0_4 = arith.constant 0 : index
    %2 = vector.load %arg2[%c0_2, %c0_3, %c0_4] : memref<1x32x128xf32, #tpu.memory_space<vmem>>, vector<1x32x128xf32>
    %3 = vector.shape_cast %2 : vector<1x32x128xf32> to vector<32x128xf32>
    %c0_5 = arith.constant 0 : index
    %c0_6 = arith.constant 0 : index
    %4 = vector.load %arg3[%c0_5, %c0_6] : memref<128x3xbf16, #tpu.memory_space<vmem>>, vector<128x3xbf16>
    %5 = arith.truncf %1 : vector<3x128xf32> to vector<3x128xbf16>
    %cst = arith.constant dense<0.000000e+00> : vector<128x128xf32>
    %6 = tpu.matmul %4, %5, %cst {dimension_numbers = #tpu.dot_dimension_numbers<[1], [0], [0], [1], [0, 0, 1, 1], [], []>} : vector<128x3xbf16>, vector<3x128xbf16>, vector<128x128xf32> -> vector<128x128xf32>
    %c0_7 = arith.constant 0 : index
    %c0_8 = arith.constant 0 : index
    %7 = vector.load %arg4[%c0_7, %c0_8] : memref<128x32xbf16, #tpu.memory_space<vmem>>, vector<128x32xbf16>
    %8 = arith.truncf %3 : vector<32x128xf32> to vector<32x128xbf16>
    %cst_9 = arith.constant dense<0.000000e+00> : vector<128x128xf32>
    %9 = tpu.matmul %7, %8, %cst_9 {dimension_numbers = #tpu.dot_dimension_numbers<[1], [0], [0], [1], [0, 0, 1, 1], [], []>} : vector<128x32xbf16>, vector<32x128xbf16>, vector<128x128xf32> -> vector<128x128xf32>
    %10 = arith.addf %6, %9 : vector<128x128xf32>
    %c0_10 = arith.constant 0 : index
    %c0_11 = arith.constant 0 : index
    %11 = vector.load %arg5[%c0_10, %c0_11] : memref<128x1xf32, #tpu.memory_space<vmem>>, vector<128x1xf32>
    %12 = vector.broadcast %11 : vector<128x1xf32> to vector<128x128xf32>
    %13 = arith.addf %10, %12 : vector<128x128xf32>
    %cst_12 = arith.constant 0.000000e+00 : f32
    %14 = vector.broadcast %cst_12 : f32 to vector<128x128xf32>
    %15 = arith.maximumf %13, %14 : vector<128x128xf32>
    %c0_13 = arith.constant 0 : index
    %c0_14 = arith.constant 0 : index
    %16 = vector.load %arg6[%c0_13, %c0_14] : memref<256x128xbf16, #tpu.memory_space<vmem>>, vector<256x128xbf16>
    %17 = arith.truncf %15 : vector<128x128xf32> to vector<128x128xbf16>
    %cst_15 = arith.constant dense<0.000000e+00> : vector<256x128xf32>
    %18 = tpu.matmul %16, %17, %cst_15 {dimension_numbers = #tpu.dot_dimension_numbers<[1], [0], [0], [1], [0, 0, 1, 1], [], []>} : vector<256x128xbf16>, vector<128x128xbf16>, vector<256x128xf32> -> vector<256x128xf32>
    %c0_16 = arith.constant 0 : index
    %c0_17 = arith.constant 0 : index
    %19 = vector.load %arg7[%c0_16, %c0_17] : memref<256x1xf32, #tpu.memory_space<vmem>>, vector<256x1xf32>
    %20 = vector.broadcast %19 : vector<256x1xf32> to vector<256x128xf32>
    %21 = arith.addf %18, %20 : vector<256x128xf32>
    %cst_18 = arith.constant 0.000000e+00 : f32
    %22 = vector.broadcast %cst_18 : f32 to vector<256x128xf32>
    %23 = arith.maximumf %21, %22 : vector<256x128xf32>
    %c0_19 = arith.constant 0 : index
    %c0_20 = arith.constant 0 : index
    %24 = vector.load %arg8[%c0_19, %c0_20] : memref<512x256xbf16, #tpu.memory_space<vmem>>, vector<512x256xbf16>
    %25 = arith.truncf %23 : vector<256x128xf32> to vector<256x128xbf16>
    %cst_21 = arith.constant dense<0.000000e+00> : vector<512x128xf32>
    %26 = tpu.matmul %24, %25, %cst_21 {dimension_numbers = #tpu.dot_dimension_numbers<[1], [0], [0], [1], [0, 0, 1, 1], [], []>} : vector<512x256xbf16>, vector<256x128xbf16>, vector<512x128xf32> -> vector<512x128xf32>
    %c0_22 = arith.constant 0 : index
    %c0_23 = arith.constant 0 : index
    %27 = vector.load %arg9[%c0_22, %c0_23] : memref<512x1xf32, #tpu.memory_space<vmem>>, vector<512x1xf32>
    %28 = vector.broadcast %27 : vector<512x1xf32> to vector<512x128xf32>
    %29 = arith.addf %26, %28 : vector<512x128xf32>
    %cst_24 = arith.constant 0.000000e+00 : f32
    %30 = vector.broadcast %cst_24 : f32 to vector<512x128xf32>
    %31 = arith.maximumf %29, %30 : vector<512x128xf32>
    %32 = arith.truncf %31 : vector<512x128xf32> to vector<512x128xbf16>
    %c0_25 = arith.constant 0 : index
    %c0_26 = arith.constant 0 : index
    %33 = vector.load %arg10[%c0_25, %c0_26] : memref<1024x512xbf16, #tpu.memory_space<vmem>>, vector<1024x512xbf16>
    %cst_27 = arith.constant dense<0.000000e+00> : vector<1024x128xf32>
    %34 = tpu.matmul %33, %32, %cst_27 {dimension_numbers = #tpu.dot_dimension_numbers<[1], [0], [0], [1], [0, 0, 1, 1], [], []>} : vector<1024x512xbf16>, vector<512x128xbf16>, vector<1024x128xf32> -> vector<1024x128xf32>
    %c0_28 = arith.constant 0 : index
    %c0_29 = arith.constant 0 : index
    %35 = vector.load %arg11[%c0_28, %c0_29] : memref<1024x1xf32, #tpu.memory_space<vmem>>, vector<1024x1xf32>
    %36 = vector.broadcast %35 : vector<1024x1xf32> to vector<1024x128xf32>
    %37 = arith.addf %34, %36 : vector<1024x128xf32>
    %cst_30 = arith.constant 0.000000e+00 : f32
    %38 = vector.broadcast %cst_30 : f32 to vector<1024x128xf32>
    %39 = arith.maximumf %37, %38 : vector<1024x128xf32>
    %40 = tpu.iota {dimensions = array<i32: 1>} : vector<1x128xi32>
    %c100_i32 = arith.constant 100 : i32
    %41 = vector.broadcast %c100_i32 : i32 to vector<1x128xi32>
    %42 = arith.cmpi slt, %40, %41 : vector<1x128xi32>
    %cst_31 = arith.constant 0.000000e+00 : f32
    %43 = vector.shape_cast %42 : vector<1x128xi1> to vector<1x128xi1>
    %44 = vector.broadcast %43 : vector<1x128xi1> to vector<1024x128xi1>
    %45 = vector.broadcast %cst_31 : f32 to vector<1024x128xf32>
    %46 = arith.select %44, %39, %45 : vector<1024x128xi1>, vector<1024x128xf32>
    %cst_32 = arith.constant dense<0.000000e+00> : vector<1024xf32>
    %47 = vector.multi_reduction <add>, %46, %cst_32 [1] : vector<1024x128xf32> to vector<1024xf32>
    %48 = vector.shape_cast %47 : vector<1024xf32> to vector<1024x1xf32>
    %cst_33 = arith.constant 0.00999999977 : f32
    %49 = vector.broadcast %cst_33 : f32 to vector<1024x1xf32>
    %50 = arith.mulf %48, %49 : vector<1024x1xf32>
    %c0_34 = arith.constant 0 : index
    %c0_35 = arith.constant 0 : index
    %c0_36 = arith.constant 0 : index
    %51 = vector.load %arg12[%c0_34, %c0_35, %c0_36] : memref<1x1408x128xf32, #tpu.memory_space<vmem>>, vector<1x128x128xf32>
    %52 = vector.shape_cast %51 : vector<1x128x128xf32> to vector<128x128xf32>
    %53 = vector.shape_cast %15 : vector<128x128xf32> to vector<1x128x128xf32>
    tpu.vector_store %arg12[%c0_34, %c0_35, %c0_36], %53 {strides = array<i32>} : memref<1x1408x128xf32, #tpu.memory_space<vmem>>, vector<1x128x128xf32>,
    %c0_37 = arith.constant 0 : index
    %c128 = arith.constant 128 : index
    %c0_38 = arith.constant 0 : index
    %54 = vector.load %arg12[%c0_37, %c128, %c0_38] : memref<1x1408x128xf32, #tpu.memory_space<vmem>>, vector<1x256x128xf32>
    %55 = vector.shape_cast %54 : vector<1x256x128xf32> to vector<256x128xf32>
    %56 = vector.shape_cast %23 : vector<256x128xf32> to vector<1x256x128xf32>
    tpu.vector_store %arg12[%c0_37, %c128, %c0_38], %56 {strides = array<i32>} : memref<1x1408x128xf32, #tpu.memory_space<vmem>>, vector<1x256x128xf32>,
    %57 = vector.shape_cast %50 : vector<1024x1xf32> to vector<1024x1xf32>
    %58 = vector.broadcast %57 : vector<1024x1xf32> to vector<1024x128xf32>
    %c0_39 = arith.constant 0 : index
    %c384 = arith.constant 384 : index
    %c0_40 = arith.constant 0 : index
    %59 = vector.load %arg12[%c0_39, %c384, %c0_40] : memref<1x1408x128xf32, #tpu.memory_space<vmem>>, vector<1x1024x128xf32>
    %60 = vector.shape_cast %59 : vector<1x1024x128xf32> to vector<1024x128xf32>
    %61 = vector.shape_cast %58 : vector<1024x128xf32> to vector<1x1024x128xf32>
    tpu.vector_store %arg12[%c0_39, %c384, %c0_40], %61 {strides = array<i32>} : memref<1x1408x128xf32, #tpu.memory_space<vmem>>, vector<1x1024x128xf32>,
    return
  }
  func.func @transform_0(%arg0: i32) -> (i32, i32, i32) {
    %c0_i32 = arith.constant 0 : i32
    %c0_i32_0 = arith.constant 0 : i32
    %c0_i32_1 = arith.constant 0 : i32
    return %arg0, %c0_i32, %c0_i32_0 : i32, i32, i32
  }
  func.func @transform_1(%arg0: i32) -> (i32, i32, i32) {
    %c0_i32 = arith.constant 0 : i32
    %c0_i32_0 = arith.constant 0 : i32
    %c0_i32_1 = arith.constant 0 : i32
    return %arg0, %c0_i32, %c0_i32_0 : i32, i32, i32
  }
  func.func @transform_2(%arg0: i32) -> (i32, i32) {
    %c0_i32 = arith.constant 0 : i32
    %c0_i32_0 = arith.constant 0 : i32
    %c0_i32_1 = arith.constant 0 : i32
    return %c0_i32, %c0_i32_0 : i32, i32
  }
  func.func @transform_3(%arg0: i32) -> (i32, i32) {
    %c0_i32 = arith.constant 0 : i32
    %c0_i32_0 = arith.constant 0 : i32
    %c0_i32_1 = arith.constant 0 : i32
    return %c0_i32, %c0_i32_0 : i32, i32
  }
  func.func @transform_4(%arg0: i32) -> (i32, i32) {
    %c0_i32 = arith.constant 0 : i32
    %c0_i32_0 = arith.constant 0 : i32
    %c0_i32_1 = arith.constant 0 : i32
    return %c0_i32, %c0_i32_0 : i32, i32
  }
  func.func @transform_5(%arg0: i32) -> (i32, i32) {
    %c0_i32 = arith.constant 0 : i32
    %c0_i32_0 = arith.constant 0 : i32
    %c0_i32_1 = arith.constant 0 : i32
    return %c0_i32, %c0_i32_0 : i32, i32
  }
  func.func @transform_6(%arg0: i32) -> (i32, i32) {
    %c0_i32 = arith.constant 0 : i32
    %c0_i32_0 = arith.constant 0 : i32
    %c0_i32_1 = arith.constant 0 : i32
    return %c0_i32, %c0_i32_0 : i32, i32
  }
  func.func @transform_7(%arg0: i32) -> (i32, i32) {
    %c0_i32 = arith.constant 0 : i32
    %c0_i32_0 = arith.constant 0 : i32
    %c0_i32_1 = arith.constant 0 : i32
    return %c0_i32, %c0_i32_0 : i32, i32
  }
  func.func @transform_8(%arg0: i32) -> (i32, i32) {
    %c0_i32 = arith.constant 0 : i32
    %c0_i32_0 = arith.constant 0 : i32
    %c0_i32_1 = arith.constant 0 : i32
    return %c0_i32, %c0_i32_0 : i32, i32
  }
  func.func @transform_9(%arg0: i32) -> (i32, i32) {
    %c0_i32 = arith.constant 0 : i32
    %c0_i32_0 = arith.constant 0 : i32
    %c0_i32_1 = arith.constant 0 : i32
    return %c0_i32, %c0_i32_0 : i32, i32
  }
  func.func @transform_10(%arg0: i32) -> (i32, i32) {
    %c0_i32 = arith.constant 0 : i32
    %c0_i32_0 = arith.constant 0 : i32
    %c0_i32_1 = arith.constant 0 : i32
    return %c0_i32, %c0_i32_0 : i32, i32
  }
  func.func @transform_11(%arg0: i32) -> (i32, i32, i32) {
    %c0_i32 = arith.constant 0 : i32
    %c0_i32_0 = arith.constant 0 : i32
    %c0_i32_1 = arith.constant 0 : i32
    return %arg0, %c0_i32, %c0_i32_0 : i32, i32, i32
  }
}

</mosaic_0001>

<bundles_post_ra>
// kernel: tpu_custom_call.1
= control target key start
LH: loop header
LB: loop body
LE: loop exit
PB: predicated region body
PF: predicated region fallthrough
CT: control target
= control target key end

     0   :  { %s12625_s0 = inlined_call_operand.vmem [shape: f32[2,3,128], index: 0, kind: input, shape index: {}]   ;;  %s12626_s1 = inlined_call_operand.hbm [shape: f32[2,32,128], index: 1, kind: input, shape index: {}]   ;;  %s12627_s2 = inlined_call_operand.vmem [shape: bf16[128,3], index: 2, kind: input, shape index: {}]   ;;  %s12628_s3 = inlined_call_operand.vmem [shape: bf16[128,32], index: 3, kind: input, shape index: {}]   ;;  %s12629_s4 = inlined_call_operand.vmem [shape: f32[128,1], index: 4, kind: input, shape index: {}]   ;;  %s12630_s5 = inlined_call_operand.hbm [shape: bf16[256,128], index: 5, kind: input, shape index: {}]   ;;  %s12631_s6 = inlined_call_operand.vmem [shape: f32[256,1], index: 6, kind: input, shape index: {}]   ;;  %s12632_s7 = inlined_call_operand.hbm [shape: bf16[512,256], index: 7, kind: input, shape index: {}]   ;;  %s12633_s8 = inlined_call_operand.vmem [shape: f32[512,1], index: 8, kind: input, shape index: {}]   ;;  %s12634_s9 = inlined_call_operand.hbm [shape: bf16[1024,512], index: 9, kind: input, shape index: {}]   ;;  %s12635_s10 = inlined_call_operand.vmem [shape: f32[1024,1], index: 10, kind: input, shape index: {}]   ;;  %s12636_s11 = inlined_call_operand.hbm [shape: f32[2,1408,128], index: 11, kind: output, shape index: {}]  }
   0x1   :  { %12642 = sst [smem:[#allocation114_spill]] %s12630_s5 }
   0x2   :  { %12643 = sst [smem:[#allocation115_spill]] %s12632_s7 }
   0x3   :  { %12644 = sst [smem:[#allocation116_spill]] %s12634_s9 }
   0x4   :  { %16 = vsyncpa [#allocation3], 0 }
   0x5   :  { %18 = vsyncpa [#allocation3 + $0x1], 0 }
   0x6   :  { %19 = vsyncpa [#allocation6], 0 }
   0x7   :  { %20 = vsyncpa [#allocation9], 0 }
   0x8   :  { %21 = vsyncpa [#allocation4], 0 }
   0x9   :  { %23 = vsyncpa [#allocation4 + $0x1], 0  ;;  %s9288_s17 = smov 0   ;;  %s9290_s18 = smov 0  }
   0xa   :  { %s9292_s19 = smov 0   ;;  %s9294_s20 = smov 0  }
   0xb LB: > { %12645 = sst [smem:[#allocation15_spill]] %s9209_s19  ;;  %s9309_s21 = sadd.s32 4294967295, %s9213_s20   ;;  %s9213_s20 = sphi %s9294_s20, %s12941_s20   ;;  %s9209_s19 = sphi %s9292_s19, %s12938_s19   ;;  %s9205_s18 = sphi %s9290_s18, %s12940_s18   ;;  %s9201_s17 = sphi %s9288_s17, %s12939_s17  }
   0xc   : > { %s7116_s22 = sadd.s32 4294967294, %s9213_s20   ;;  %p75_p0 = scmp.ne.s32.totalorder %s9205_s18, %s9201_s17 }
   0xd   : > { %p76_p1 = scmp.eq.s32.totalorder %s9309_s21, 0  ;;  %p288_p2 = scmp.eq.s32.totalorder %s9309_s21, 1 }
   0xe   : > { %p294_p3 = scmp.eq.s32.totalorder %s7116_s22, 1  ;;  %p7117_p5 = scmp.ge.s32.totalorder %s9213_s20, 1 }
   0xf   : > { %p9318_p4 = por %p76_p1, %p75_p0  ;;  %p301_p7 = scmp.lt.s32.totalorder %s9213_s20, 3 }
  0x10   : > { %p9323_p6 = por %p294_p3, %p75_p0  ;;  %s12648_s5 = sld [smem:[#allocation114_spill]] }
  0x11   : > { %p9331_p8 = pnand %p7117_p5, %p301_p7  ;;  %s9215_s29 = smov [#allocation5]  }
  0x12   : > { %s323_s30 = sshll.u32 %s9215_s29, 4  ;;  %s12651_s7 = sld [smem:[#allocation115_spill]]  ;;  %s324_s30 = int_to_ptr.vmem [resolvable:$true] %s323_s30 }
  0x13   : > { %p8945_p9 = pneg %p9331_p8  ;;  %s9216_s16 = smov 64  }
  0x14   : > { %s9217_s22 = smov 4   ;;  %s9218_s25 = smov [#allocation7]  }
  0x15   : > { %p9339_p10 = pnand %p8945_p9, %p76_p1  ;;  %s340_s26 = sshll.u32 %s9218_s25, 4  ;;  %s341_s26 = int_to_ptr.vmem [resolvable:$true] %s340_s26 }
  0x16   : > { %s321_s27 = sshll.u32 %s12648_s5, 4  ;;  %s12637_s29 = smov 128   ;;  %s322_s27 = int_to_ptr.hbm [resolvable:$true] %s321_s27 }
  0x17   : > { %8948 = dma.hbm_to_vmem [thread:$0]  (!%p9339_p10), %s322_s27, 2048, %s324_s30, [#allocation6], %s9216_s16, %s9216_s16, %s9217_s22  }
  0x18   : > { %s338_s15 = sshll.u32 %s12651_s7, 4  ;;  %s12638_s5 = smov 8   ;;  %s339_s15 = int_to_ptr.hbm [resolvable:$true] %s338_s15 }
  0x19   : > { %8951 = dma.hbm_to_vmem [thread:$0]  (!%p9339_p10), %s339_s15, 8192, %s341_s26, [#allocation6], %s12637_s29, %s12637_s29, %s12638_s5  }
  0x1a   : > { %s12652_s9 = sld [smem:[#allocation116_spill]]  ;;  %s9221_s30 = smov [#allocation8]  }
  0x1b   : > { %s357_s16 = sshll.u32 %s9221_s30, 4  ;;  %s9222_s22 = smov 256   ;;  %s358_s16 = int_to_ptr.vmem [resolvable:$true] %s357_s16 }
  0x1c   : > { %s9223_s25 = smov 16   ;;  %s9360_s7 = sadd.s32 1, %s9213_s20  }
  0x1d   : > { %s59_s15 = ssub.s32 %s9213_s20, %s9360_s7  ;;  %s62_s26 = sadd.s32 1, %s9209_s19 }
  0x1e   : > { %p60_p12 = scmp.eq.s32.totalorder %s59_s15, 0  ;;  %p69_p13 = scmp.ne.s32.totalorder %s9209_s19, %s9205_s18 }
  0x1f   : > { %p70_p0 = scmp.eq.s32.totalorder %s9213_s20, 0  ;;  %p8966_p5 = scmp.lt.s32.totalorder %s9213_s20, 2 }
  0x20   : > { %s355_s27 = sshll.u32 %s12652_s9, 4  ;;  %p9373_p3 = por %p288_p2, %p69_p13  ;;  %s356_s27 = int_to_ptr.hbm [resolvable:$true] %s355_s27 }
  0x21   : > { %8954 = dma.hbm_to_vmem [thread:$0]  (!%p9339_p10), %s356_s27, 32768, %s358_s16, [#allocation9], %s9222_s22, %s9222_s22, %s9223_s25  }
  0x22   : > { %s9369_s13 = scalar_select %p60_p12, %s9209_s19, %s62_s26  }
  0x23   : > { %s381_s30 = sand.u32 1, %s9209_s19   ;;  %s8558_s29 = sshll.u32 %s9213_s20, 5 }
  0x24   : > { %12653 = sst [smem:[#allocation16_spill]] %s9369_s13  ;;  %p71_p7 = por %p70_p0, %p69_p13 }
  0x25   : > { %s7122_s12 = sshll.u32 %s381_s30, 5  ;;  %s390_s22 = scalar_lea.hbm %s12626_s1, %s8558_s29 }
  0x26   : > { %s391_s25 = sshll.u32 %s390_s22, 4  ;;  %s385_s15 = scalar_lea.vmem [#allocation2], %s7122_s12  ;;  %s392_s25 = int_to_ptr.hbm [resolvable:$true] %s391_s25 }
  0x27   : > { %s393_s5 = sshll.u32 %s385_s15, 4  ;;  %p9383_p9 = pnand %p8966_p5, %p71_p7  ;;  %s394_s5 = int_to_ptr.vmem [resolvable:$true] %s393_s5 }
  0x28   : > { %s382_s9 = scalar_lea.sflag [#allocation3], %s381_s30  ;;  %s9109_s13 = sshra.s32 %s392_s25, 4  ;;  %s9110_s13 = int_to_ptr.hbm [resolvable:$true] %s9109_s13 }
  0x29   : > { %s9111_s19 = scalar_lea.hbm %s9110_s13, 32  ;;  %p9113_p10 = pneg %p9383_p9 }
  0x2a   : > { %p9112_p2 = scmp.ne.s32.totalorder %s9110_s13, %s9111_s19  ;;  %s9116_s12 = scalar_lea.hbm %s12626_s1, 64 }
  0x2b   : > { %p9117_p0 = scmp.lt.s32.totalorder %s9110_s13, %s12626_s1  ;;  %p9118_p5 = scmp.lt.s32.totalorder %s9116_s12, %s9111_s19 }
  0x2c   : > { %p9114_p12 = pnand %p9113_p10, %p9112_p2 }
  0x2d   : > { %p9119_p7 = por %p9118_p5, %p9117_p0 }
  0x2e   : > { %p9115_p13 = pneg %p9114_p12 }
  0x30   : > { %p9120_p11 = pnand %p9119_p7, %p9115_p13 }
  0x32   : > { %9123 = shalt.err (!%p9120_p11)
}
  0x33   : > { %s12656_s30 = smov 8   ;;  %s12657_s15 = smov 128  }
  0x34   : > { %8958 = dma.hbm_to_vmem [thread:$0]  (!%p9383_p9), %s392_s25, 512, %s394_s5, %s382_s9, %s12657_s15, %s12657_s15, %s12656_s30  }
  0x35   : > { %405 = sbr.rel (%p9331_p8) target bundleno = 2479 (0x9af), region = 64 }
  0x3a   : > { %s9403_s29 = sand.u32 1, %s9205_s18  }
  0x3b   : > { %s7126_s13 = sshll.u32 %s9403_s29, 5  ;;  %s408_s19 = scalar_lea.sflag [#allocation3], %s9403_s29 }
  0x3c   : > { %s9407_s27 = scalar_lea.vmem [#allocation2], %s7126_s13 }
  0x3d   : > { %9184 = dma.done.wait (%p9318_p4), %s408_s19, 512  }
  0x3e   : > { %9186 = vsyncadd (%p9318_p4), %s408_s19, 4294966784 }
  0x3f   : > { %9188 = dma.done.wait (%p76_p1), [#allocation6], 10240  }
  0x40   : > { %9190 = vsyncadd (%p76_p1), [#allocation6], 4294957056 }
  0x41   : > { %9192 = dma.done.wait (%p76_p1), [#allocation9], 32768  }
  0x42   : > { %9194 = vsyncadd (%p76_p1), [#allocation9], 4294934528  ;;  %p470_p8 = scmp.lt.s32.totalorder %s9309_s21, 1  ;;  %v9224_v0 = vmov 0   ;;  %vm694_vm0 = vcmask 1040384   ;;  %vm695_vm1 = vcmask 1041408  }
  0x43   : > { %9018 = vset.pattern.permute.xlu2 %v9224_v0  ;;  %9017 = vset.pattern.permute.xlu1 %v9224_v0  ;;  %v9225_v1 = vmov 65535   ;;  %v764_v3 = vld [vmem:[%s12629_s4 + $0x70] sm:$0xff]  ;;  %v762_v4 = vld [vmem:[%s12629_s4 + $0x60] sm:$0xff]  ;;  %v479_v7 = vld [vmem:[%s9407_s27 + $0x18] sm:$0xff]  ;;  %vm669_vm2 = vcmask 23552   ;;  %vm555_vm3 = vcmask 261120  }
  0x44   : > { %9016 = vset.pattern.permute.xlu0 %v9224_v0  ;;  %s471_s5 = scalar_select %p470_p8, %s9309_s21, 1  ;;  %v696_v2 = vsel %vm694_vm0, 4294967295, %v9225_v1  ;;  %v760_v5 = vld [vmem:[%s12629_s4 + $0x50] sm:$0xff]  ;;  %828 = vperm.xlu1 %9017, %v762_v4   ;;  %v476_v12 = vld [vmem:[%s9407_s27] sm:$0xff]  ;;  %v477_v13 = vld [vmem:[%s9407_s27 + $0x8] sm:$0xff] }
  0x45   : > { %838 = vperm.xlu0 %9016, %v764_v3   ;;  %v478_v6 = vld [vmem:[%s9407_s27 + $0x10] sm:$0xff]  ;;  %v697_v9 = vsel %vm695_vm1, %v696_v2, 0  ;;  %818 = vperm.xlu2 %9018, %v760_v5   ;;  %v513_v15 = vpack.c.bf16 %v477_v13, %v476_v12  ;;  %v8559_v16 = vld [vmem:[%s12627_s2] sm:$0xff]  ;;  %v765_v17 = vld [vmem:[%s12629_s4 + $0x78] sm:$0xff]  ;;  %s8927_s27 = smul.u32 1408, %s9403_s29  ;;  %s6987_s16 = scalar_lea.sflag [#allocation4], %s9403_s29 }
  0x46   : > { %s7130_s9 = sshll.u32 %s471_s5, 2  ;;  %v514_v10 = vpack.c.bf16 %v479_v7, %v478_v6  ;;  %v763_v18 = vld [vmem:[%s12629_s4 + $0x68] sm:$0xff]  ;;  %v761_v19 = vld [vmem:[%s12629_s4 + $0x58] sm:$0xff]  ;;  %v8567_v20 = vld [vmem:[%s12628_s3] sm:$0xff]  ;;  %s8928_s23 = smul.u32 1408, %s9309_s21 }
  0x47   : > { %s473_s25 = scalar_lea.vmem %s12625_s0, %s7130_s9  ;;  %v758_v21 = vld [vmem:[%s12629_s4 + $0x40] sm:$0xff]  ;;  %v759_v22 = vld [vmem:[%s12629_s4 + $0x48] sm:$0xff]  ;;  %v756_v23 = vld [vmem:[%s12629_s4 + $0x30] sm:$0xff]  ;;  %s9682_s22 = scalar_lea.vmem [#allocation10], %s8927_s27 }
  0x48   : > { %v475_v8 = vld [vmem:[%s473_s25] sm:$0x7]  ;;  %586 = vmatpush.bf16.msra.mxu0 %v514_v10  ;;  %v8560_v24 = vld [vmem:[%s12627_s2 + $0x8] sm:$0xff]  ;;  %v757_v25 = vld [vmem:[%s12629_s4 + $0x38] sm:$0xff]  ;;  %s6998_s26 = scalar_lea.hbm %s12636_s11, %s8928_s23  ;;  %s6999_s27 = sshll.u32 %s9682_s22, 4  ;;  %s7000_s27 = int_to_ptr.vmem [resolvable:$true] %s6999_s27 }
  0x49   : > { %v496_v11 = vpack.c.bf16 %v475_v8, %v475_v8  ;;  %v755_v26 = vld [vmem:[%s12629_s4 + $0x28] sm:$0xff]  ;;  %v754_v27 = vld [vmem:[%s12629_s4 + $0x20] sm:$0xff]  ;;  %v752_v29 = vld [vmem:[%s12629_s4 + $0x10] sm:$0xff]  ;;  %s7001_s12 = sshll.u32 %s6998_s26, 4  ;;  %s9159_s19 = scalar_lea.hbm %s12636_s11, 2816  ;;  %s7002_s12 = int_to_ptr.hbm [resolvable:$true] %s7001_s12 }
  0x4a   : > { %v8568_v28 = vld [vmem:[%s12628_s3 + $0x8] sm:$0xff]  ;;  %v753_v30 = vld [vmem:[%s12629_s4 + $0x18] sm:$0xff]  ;;  %v750_v31 = vld [vmem:[%s12629_s4] sm:$0xff]  ;;  %s9153_s30 = sshra.s32 %s7002_s12, 4  ;;  %s9154_s30 = int_to_ptr.hbm [resolvable:$true] %s9153_s30 }
  0x4b   : > { %v699_v14 = vand.u32 %v697_v9, %v496_v11  ;;  %v8561_v32 = vld [vmem:[%s12627_s2 + $0x10] sm:$0xff]  ;;  %v751_v33 = vld [vmem:[%s12629_s4 + $0x8] sm:$0xff]  ;;  %v933_v35 = vld [vmem:[%s12631_s6 + $0x78] sm:$0xff]  ;;  %s9155_s15 = scalar_lea.hbm %s9154_s30, 1408  ;;  %p9160_p9 = scmp.lt.s32.totalorder %s9154_s30, %s12636_s11 }
  0x4c   : > { %587 = vmatpush.bf16.msra.mxu0 %v513_v15  ;;  %833 = vperm.xlu1 %9017, %v763_v18   ;;  %v932_v34 = vld [vmem:[%s12631_s6 + $0x70] sm:$0xff]  ;;  %v930_v37 = vld [vmem:[%s12631_s6 + $0x60] sm:$0xff]  ;;  %v931_v38 = vld [vmem:[%s12631_s6 + $0x68] sm:$0xff]  ;;  %p9156_p1 = scmp.ne.s32.totalorder %s9154_s30, %s9155_s15  ;;  %p9161_p2 = scmp.lt.s32.totalorder %s9159_s19, %s9155_s15 }
  0x4d   : > { %708 = vmatpush.bf16.msra.mxu1 %v699_v14  ;;  %843 = vperm.xlu0 %9016, %v765_v17   ;;  %v8569_v36 = vld [vmem:[%s12628_s3 + $0x10] sm:$0xff]  ;;  %v8562_v40 = vld [vmem:[%s12627_s2 + $0x18] sm:$0xff]  ;;  %v926_v42 = vld [vmem:[%s12631_s6 + $0x40] sm:$0xff] }
  0x4e   : > { %823 = vperm.xlu2 %9018, %v761_v19   ;;  %v928_v39 = vld [vmem:[%s12631_s6 + $0x50] sm:$0xff]  ;;  %v929_v41 = vld [vmem:[%s12631_s6 + $0x58] sm:$0xff]  ;;  %v927_v43 = vld [vmem:[%s12631_s6 + $0x48] sm:$0xff]  ;;  %p9157_p4 = pnand %p9156_p1, %p9373_p3  ;;  %p9162_p10 = por %p9161_p2, %p9160_p9 }
  0x4f   : > { %7163 = vmatmul.msk.bf16.vlgmr.msra.gmra.mxu0 %vm555_vm3, %v8567_v20  ;;  %v8570_v44 = vld [vmem:[%s12628_s3 + $0x18] sm:$0xff]  ;;  %v924_v45 = vld [vmem:[%s12631_s6 + $0x30] sm:$0xff]  ;;  %v922_v47 = vld [vmem:[%s12631_s6 + $0x20] sm:$0xff] }
  0x50   : > { %7203 = vmatmul.msk.bf16.vlgmr.msra.gmra.mxu1 %vm669_vm2, %v8559_v16  ;;  %v925_v46 = vld [vmem:[%s12631_s6 + $0x38] sm:$0xff]  ;;  %v8563_v48 = vld [vmem:[%s12627_s2 + $0x20] sm:$0xff]  ;;  %v923_v49 = vld [vmem:[%s12631_s6 + $0x28] sm:$0xff]  ;;  %p9158_p11 = pneg %p9157_p4 }
  0x51   : > { %v920_v50 = vld [vmem:[%s12631_s6 + $0x10] sm:$0xff]  ;;  %v921_v51 = vld [vmem:[%s12631_s6 + $0x18] sm:$0xff]  ;;  %v8571_v52 = vld [vmem:[%s12628_s3 + $0x20] sm:$0xff] }
  0x52   : > { %v918_v53 = vld [vmem:[%s12631_s6] sm:$0xff]  ;;  %v919_v54 = vld [vmem:[%s12631_s6 + $0x8] sm:$0xff]  ;;  %v948_v55 = vld [vmem:[%s12631_s6 + $0xf0] sm:$0xff]  ;;  %p9163_p12 = pnand %p9162_p10, %p9158_p11 }
  0x53   : > { %v8564_v56 = vld [vmem:[%s12627_s2 + $0x28] sm:$0xff]  ;;  %v949_v57 = vld [vmem:[%s12631_s6 + $0xf8] sm:$0xff]  ;;  %v946_v58 = vld [vmem:[%s12631_s6 + $0xe0] sm:$0xff] }
  0x54   : > { %813 = vperm.xlu1 %9017, %v759_v22   ;;  %v947_v59 = vld [vmem:[%s12631_s6 + $0xe8] sm:$0xff]  ;;  %v944_v61 = vld [vmem:[%s12631_s6 + $0xd0] sm:$0xff]  ;;  %v945_v62 = vld [vmem:[%s12631_s6 + $0xd8] sm:$0xff] }
  0x55   : > { %808 = vperm.xlu0 %9016, %v758_v21   ;;  %v8572_v60 = vld [vmem:[%s12628_s3 + $0x28] sm:$0xff]  ;;  %v942_v63 = vld [vmem:[%s12631_s6 + $0xc0] sm:$0xff]  ;;  %v8565_v1 = vld [vmem:[%s12627_s2 + $0x30] sm:$0xff] }
  0x56   : > { %798 = vperm.xlu2 %9018, %v756_v23   ;;  %v943_v2 = vld [vmem:[%s12631_s6 + $0xc8] sm:$0xff]  ;;  %v940_v3 = vld [vmem:[%s12631_s6 + $0xb0] sm:$0xff]  ;;  %v941_v4 = vld [vmem:[%s12631_s6 + $0xb8] sm:$0xff] }
  0x57   : > { %v8573_v5 = vld [vmem:[%s12628_s3 + $0x30] sm:$0xff]  ;;  %v938_v7 = vld [vmem:[%s12631_s6 + $0xa0] sm:$0xff]  ;;  %v939_v8 = vld [vmem:[%s12631_s6 + $0xa8] sm:$0xff] }
  0x58   : > { %v936_v9 = vld [vmem:[%s12631_s6 + $0x90] sm:$0xff]  ;;  %v8566_v11 = vld [vmem:[%s12627_s2 + $0x38] sm:$0xff]  ;;  %v934_v14 = vld [vmem:[%s12631_s6 + $0x80] sm:$0xff] }
  0x59   : > { %v937_v13 = vld [vmem:[%s12631_s6 + $0x98] sm:$0xff]  ;;  %v935_v15 = vld [vmem:[%s12631_s6 + $0x88] sm:$0xff]  ;;  %v1407_v19 = vld [vmem:[%s12633_s8] sm:$0xff] }
  0x5a   : > { %v8574_v16 = vld [vmem:[%s12628_s3 + $0x38] sm:$0xff]  ;;  %v1408_v20 = vld [vmem:[%s12633_s8 + $0x8] sm:$0xff]  ;;  %v1409_v21 = vld [vmem:[%s12633_s8 + $0x10] sm:$0xff] }
  0x5c   : > { %788 = vperm.xlu1 %9017, %v754_v27   ;;  %v1411_v27 = vld [vmem:[%s12633_s8 + $0x20] sm:$0xff] }
  0x5d   : > { %803 = vperm.xlu0 %9016, %v757_v25  }
  0x5e   : > { %793 = vperm.xlu2 %9018, %v755_v26   ;;  %v1410_v26 = vld [vmem:[%s12633_s8 + $0x18] sm:$0xff] }
  0x5f   : > { %7164 = vmatmul.msk.bf16.gmra.mxu0 %vm555_vm3, %v8568_v28  ;;  %v1412_v28 = vld [vmem:[%s12633_s8 + $0x28] sm:$0xff] }
  0x60   : > { %7204 = vmatmul.msk.bf16.gmra.mxu1 %vm669_vm2, %v8560_v24 }
  0x64   : > { %783 = vperm.xlu1 %9017, %v753_v30  }
  0x65   : > { %778 = vperm.xlu0 %9016, %v752_v29  }
  0x66   : > { %768 = vperm.xlu2 %9018, %v750_v31  }
  0x6c   : > { %1022 = vperm.xlu1 %9017, %v932_v34  }
  0x6d   : > { %773 = vperm.xlu0 %9016, %v751_v33  }
  0x6e   : > { %1027 = vperm.xlu2 %9018, %v933_v35  }
  0x6f   : > { %7165 = vmatmul.msk.bf16.gmra.mxu0 %vm555_vm3, %v8569_v36 }
  0x70   : > { %7205 = vmatmul.msk.bf16.gmra.mxu1 %vm669_vm2, %v8561_v32 }
  0x74   : > { %1017 = vperm.xlu1 %9017, %v931_v38   ;;  %v1414_v38 = vld [vmem:[%s12633_s8 + $0x38] sm:$0xff] }
  0x75   : > { %1012 = vperm.xlu0 %9016, %v930_v37   ;;  %v1413_v37 = vld [vmem:[%s12633_s8 + $0x30] sm:$0xff] }
  0x76   : > { %1002 = vperm.xlu2 %9018, %v928_v39   ;;  %v1415_v39 = vld [vmem:[%s12633_s8 + $0x40] sm:$0xff] }
  0x7c   : > { %992 = vperm.xlu1 %9017, %v926_v42  }
  0x7d   : > { %1007 = vperm.xlu0 %9016, %v929_v41  }
  0x7e   : > { %997 = vperm.xlu2 %9018, %v927_v43   ;;  %v1416_v43 = vld [vmem:[%s12633_s8 + $0x48] sm:$0xff] }
  0x7f   : > { %7166 = vmatmul.msk.bf16.gmra.mxu0 %vm555_vm3, %v8570_v44  ;;  %v1417_v44 = vld [vmem:[%s12633_s8 + $0x50] sm:$0xff] }
  0x80   : > { %7206 = vmatmul.msk.bf16.gmra.mxu1 %vm669_vm2, %v8562_v40 }
  0x84   : > { %987 = vperm.xlu1 %9017, %v925_v46  }
  0x85   : > { %982 = vperm.xlu0 %9016, %v924_v45   ;;  %v1418_v45 = vld [vmem:[%s12633_s8 + $0x58] sm:$0xff] }
  0x86   : > { %972 = vperm.xlu2 %9018, %v922_v47  }
  0x8c   : > { %962 = vperm.xlu1 %9017, %v920_v50  }
  0x8d   : > { %977 = vperm.xlu0 %9016, %v923_v49  }
  0x8e   : > { %967 = vperm.xlu2 %9018, %v921_v51  }
  0x8f   : > { %7167 = vmatmul.msk.bf16.gmra.mxu0 %vm555_vm3, %v8571_v52 }
  0x90   : > { %7207 = vmatmul.msk.bf16.gmra.mxu1 %vm669_vm2, %v8563_v48 }
  0x94   : > { %957 = vperm.xlu1 %9017, %v919_v54  }
  0x95   : > { %952 = vperm.xlu0 %9016, %v918_v53  }
  0x96   : > { %1102 = vperm.xlu2 %9018, %v948_v55  }
  0x9c   : > { %1092 = vperm.xlu1 %9017, %v946_v58   ;;  %v1421_v58 = vld [vmem:[%s12633_s8 + $0x70] sm:$0xff] }
  0x9d   : > { %1107 = vperm.xlu0 %9016, %v949_v57   ;;  %v1420_v57 = vld [vmem:[%s12633_s8 + $0x68] sm:$0xff] }
  0x9e   : > { %1097 = vperm.xlu2 %9018, %v947_v59  }
  0x9f   : > { %7168 = vmatmul.msk.bf16.gmra.mxu0 %vm555_vm3, %v8572_v60  ;;  %v9595_v0 = vpop.permute.xlu2 %818 }
  0xa0   : > { %7208 = vmatmul.msk.bf16.gmra.mxu1 %vm669_vm2, %v8564_v56  ;;  %v1419_v56 = vld [vmem:[%s12633_s8 + $0x60] sm:$0xff] }
  0xa4   : > { %1087 = vperm.xlu1 %9017, %v945_v62  }
  0xa5   : > { %1082 = vperm.xlu0 %9016, %v944_v61  }
  0xa6   : > { %1072 = vperm.xlu2 %9018, %v942_v63  }
  0xa8   : > { %v9614_v6 = vpop.permute.xlu2 %823 }
  0xac   : > { %1062 = vperm.xlu1 %9017, %v940_v3   ;;  %v1422_v3 = vld [vmem:[%s12633_s8 + $0x78] sm:$0xff] }
  0xad   : > { %1077 = vperm.xlu0 %9016, %v943_v2  }
  0xae   : > { %1067 = vperm.xlu2 %9018, %v941_v4   ;;  %v1423_v4 = vld [vmem:[%s12633_s8 + $0x80] sm:$0xff] }
  0xaf   : > { %7169 = vmatmul.msk.bf16.gmra.mxu0 %vm555_vm3, %v8573_v5  ;;  %v1424_v5 = vld [vmem:[%s12633_s8 + $0x88] sm:$0xff] }
  0xb0   : > { %7209 = vmatmul.msk.bf16.gmra.mxu1 %vm669_vm2, %v8565_v1  ;;  %v9630_v12 = vpop.permute.xlu2 %798 }
  0xb4   : > { %1057 = vperm.xlu1 %9017, %v939_v8  }
  0xb5   : > { %1052 = vperm.xlu0 %9016, %v938_v7  }
  0xb6   : > { %1042 = vperm.xlu2 %9018, %v936_v9   ;;  %v9645_v17 = vpop.permute.xlu1 %828 }
  0xb7   : > { %v9625_v10 = vpop.permute.xlu0 %838 }
  0xb8   : > { %v9659_v22 = vpop.permute.xlu2 %793 }
  0xbc   : > { %1032 = vperm.xlu1 %9017, %v934_v14  }
  0xbd   : > { %1047 = vperm.xlu0 %9016, %v937_v13  }
  0xbe   : > { %1037 = vperm.xlu2 %9018, %v935_v15   ;;  %v9663_v24 = vpop.permute.xlu1 %833  ;;  %v1425_v15 = vld [vmem:[%s12633_s8 + $0x90] sm:$0xff] }
  0xbf   : > { %7170 = vmatmul.msk.bf16.gmra.mxu0 %vm555_vm3, %v8574_v16  ;;  %v9648_v18 = vpop.permute.xlu0 %843  ;;  %v1426_v16 = vld [vmem:[%s12633_s8 + $0x98] sm:$0xff] }
  0xc0   : > { %7210 = vmatmul.msk.bf16.gmra.mxu1 %vm669_vm2, %v8566_v11  ;;  %v769_v31 = vpop.permute.xlu2 %768 }
  0xc4   : > { %1478 = vperm.xlu1 %9017, %v1408_v20  }
  0xc5   : > { %1473 = vperm.xlu0 %9016, %v1407_v19   ;;  %v1427_v19 = vld [vmem:[%s12633_s8 + $0xa0] sm:$0xff] }
  0xc6   : > { %1483 = vperm.xlu2 %9018, %v1409_v21   ;;  %v9677_v35 = vpop.permute.xlu1 %813 }
  0xc7   : > { %v9661_v23 = vpop.permute.xlu0 %808 }
  0xcc   : > { %v589_v29 = vpop.f32.mrf.mxu0  ;;  %1493 = vperm.xlu1 %9017, %v1411_v27  }
  0xcd   : > { %v710_v25 = vpop.f32.mrf.mxu1  ;;  %1488 = vperm.xlu0 %9016, %v1410_v26  }
  0xce   : > { %v711_v30 = vadd.f32 %v710_v25, %v589_v29  ;;  %1498 = vperm.xlu2 %9018, %v1412_v28   ;;  %v789_v46 = vpop.permute.xlu1 %788  ;;  %v1428_v28 = vld [vmem:[%s12633_s8 + $0xa8] sm:$0xff]  ;;  %v1429_v29 = vld [vmem:[%s12633_s8 + $0xb0] sm:$0xff] }
  0xcf   : > { %v9675_v33 = vpop.permute.xlu0 %803 }
  0xd0   : > { %v846_v32 = vadd.f32 %v769_v31, %v711_v30  ;;  %v1430_v30 = vld [vmem:[%s12633_s8 + $0xb8] sm:$0xff] }
  0xd2   : > { %v862_v34 = vmax.f32 %v846_v32, 0.0 }
  0xd4   : > { %6810 = vst [vmem:[%s9682_s22] sm:$0xff] %v862_v34  ;;  %v591_v40 = vpop.f32.mrf.mxu0  ;;  %1508 = vperm.xlu1 %9017, %v1414_v38   ;;  %v1431_v38 = vld [vmem:[%s12633_s8 + $0xc0] sm:$0xff] }
  0xd5   : > { %v712_v36 = vpop.f32.mrf.mxu1  ;;  %1503 = vperm.xlu0 %9016, %v1413_v37  }
  0xd6   : > { %1513 = vperm.xlu2 %9018, %v1415_v39   ;;  %v713_v49 = vadd.f32 %v712_v36, %v591_v40  ;;  %v784_v62 = vpop.permute.xlu1 %783  ;;  %v1432_v39 = vld [vmem:[%s12633_s8 + $0xc8] sm:$0xff]  ;;  %v1433_v40 = vld [vmem:[%s12633_s8 + $0xd0] sm:$0xff] }
  0xd7   : > { %v779_v41 = vpop.permute.xlu0 %778 }
  0xdc   : > { %v594_v47 = vpop.f32.mrf.mxu0  ;;  %1523 = vperm.xlu1 %9017, %v1417_v44  }
  0xdd   : > { %v715_v42 = vpop.f32.mrf.mxu1  ;;  %1518 = vperm.xlu0 %9016, %v1416_v43  }
  0xde   : > { %v716_v48 = vadd.f32 %v715_v42, %v594_v47  ;;  %1528 = vperm.xlu2 %9018, %v1418_v45   ;;  %v1434_v45 = vld [vmem:[%s12633_s8 + $0xd8] sm:$0xff]  ;;  %v1436_v47 = vld [vmem:[%s12633_s8 + $0xe8] sm:$0xff] }
  0xdf   : > { %v774_v51 = vpop.permute.xlu0 %773 }
  0xe0   : > { %v848_v50 = vadd.f32 %v779_v41, %v716_v48  ;;  %v847_v52 = vadd.f32 %v774_v51, %v713_v49 }
  0xe2   : > { %v864_v53 = vmax.f32 %v848_v50, 0.0  ;;  %v863_v54 = vmax.f32 %v847_v52, 0.0 }
  0xe4   : > { %6812 = vst [vmem:[%s9682_s22 + $0x10] sm:$0xff] %v864_v53  ;;  %v596_v59 = vpop.f32.mrf.mxu0  ;;  %v9711_v60 = vpack.c.bf16 %v863_v54, %v862_v34  ;;  %1538 = vperm.xlu1 %9017, %v1420_v57  }
  0xe5   : > { %v717_v55 = vpop.f32.mrf.mxu1  ;;  %6811 = vst [vmem:[%s9682_s22 + $0x8] sm:$0xff] %v863_v54  ;;  %1533 = vperm.xlu0 %9016, %v1419_v56   ;;  %v1438_v54 = vld [vmem:[%s12633_s8 + $0xf8] sm:$0xff] }
  0xe6   : > { %v718_v61 = vadd.f32 %v717_v55, %v596_v59  ;;  %1543 = vperm.xlu2 %9018, %v1421_v58  }
  0xe8   : > { %v849_v63 = vadd.f32 %v784_v62, %v718_v61  ;;  %v1440_v61 = vld [vmem:[%s12633_s8 + $0x108] sm:$0xff]  ;;  %v1441_v62 = vld [vmem:[%s12633_s8 + $0x110] sm:$0xff] }
  0xea   : > { %v865_v1 = vmax.f32 %v849_v63, 0.0  ;;  %v1442_v63 = vld [vmem:[%s12633_s8 + $0x118] sm:$0xff] }
  0xec   : > { %v9722_v7 = vpack.c.bf16 %v865_v1, %v864_v53  ;;  %6813 = vst [vmem:[%s9682_s22 + $0x18] sm:$0xff] %v865_v1  ;;  %v599_v8 = vpop.f32.mrf.mxu0  ;;  %1553 = vperm.xlu1 %9017, %v1423_v4   ;;  %v1437_v53 = vld [vmem:[%s12633_s8 + $0xf0] sm:$0xff] }
  0xed   : > { %v720_v2 = vpop.f32.mrf.mxu1  ;;  %1548 = vperm.xlu0 %9016, %v1422_v3  }
  0xee   : > { %v721_v9 = vadd.f32 %v720_v2, %v599_v8  ;;  %1558 = vperm.xlu2 %9018, %v1424_v5   ;;  %v1443_v5 = vld [vmem:[%s12633_s8 + $0x120] sm:$0xff]  ;;  %v1444_v8 = vld [vmem:[%s12633_s8 + $0x128] sm:$0xff] }
  0xf0   : > { %v850_v11 = vadd.f32 %v789_v46, %v721_v9  ;;  %v1435_v46 = vld [vmem:[%s12633_s8 + $0xe0] sm:$0xff] }
  0xf2   : > { %v866_v13 = vmax.f32 %v850_v11, 0.0 }
  0xf4   : > { %6814 = vst [vmem:[%s9682_s22 + $0x20] sm:$0xff] %v866_v13  ;;  %v601_v20 = vpop.f32.mrf.mxu0  ;;  %1568 = vperm.xlu1 %9017, %v1426_v16   ;;  %v1446_v16 = vld [vmem:[%s12633_s8 + $0x138] sm:$0xff] }
  0xf5   : > { %v722_v14 = vpop.f32.mrf.mxu1  ;;  %1563 = vperm.xlu0 %9016, %v1425_v15  }
  0xf6   : > { %v723_v21 = vadd.f32 %v722_v14, %v601_v20  ;;  %1573 = vperm.xlu2 %9018, %v1427_v19   ;;  %v1447_v19 = vld [vmem:[%s12633_s8 + $0x140] sm:$0xff]  ;;  %v1448_v20 = vld [vmem:[%s12633_s8 + $0x148] sm:$0xff] }
  0xf8   : > { %v851_v25 = vadd.f32 %v9659_v22, %v723_v21 }
  0xfa   : > { %v867_v26 = vmax.f32 %v851_v25, 0.0 }
  0xfc   : > { %v9745_v31 = vpack.c.bf16 %v867_v26, %v866_v13  ;;  %6815 = vst [vmem:[%s9682_s22 + $0x28] sm:$0xff] %v867_v26  ;;  %v604_v32 = vpop.f32.mrf.mxu0  ;;  %1583 = vperm.xlu1 %9017, %v1429_v29   ;;  %v1450_v29 = vld [vmem:[%s12633_s8 + $0x158] sm:$0xff] }
  0xfd   : > { %v725_v27 = vpop.f32.mrf.mxu1  ;;  %1578 = vperm.xlu0 %9016, %v1428_v28   ;;  %v1449_v28 = vld [vmem:[%s12633_s8 + $0x150] sm:$0xff] }
  0xfe   : > { %v726_v22 = vadd.f32 %v725_v27, %v604_v32  ;;  %1588 = vperm.xlu2 %9018, %v1430_v30   ;;  %v1451_v30 = vld [vmem:[%s12633_s8 + $0x160] sm:$0xff] }
 0x100   : > { %v852_v34 = vadd.f32 %v9630_v12, %v726_v22 }
 0x102   : > { %v868_v36 = vmax.f32 %v852_v34, 0.0 }
 0x104   : > { %6816 = vst [vmem:[%s9682_s22 + $0x30] sm:$0xff] %v868_v36  ;;  %v606_v41 = vpop.f32.mrf.mxu0  ;;  %1598 = vperm.xlu1 %9017, %v1432_v39   ;;  %v1454_v39 = vld [vmem:[%s12633_s8 + $0x178] sm:$0xff] }
 0x105   : > { %v727_v37 = vpop.f32.mrf.mxu1  ;;  %1593 = vperm.xlu0 %9016, %v1431_v38   ;;  %v1453_v38 = vld [vmem:[%s12633_s8 + $0x170] sm:$0xff] }
 0x106   : > { %v728_v42 = vadd.f32 %v727_v37, %v606_v41  ;;  %1603 = vperm.xlu2 %9018, %v1433_v40   ;;  %v1452_v37 = vld [vmem:[%s12633_s8 + $0x168] sm:$0xff] }
 0x108   : > { %v853_v12 = vadd.f32 %v9675_v33, %v728_v42 }
 0x10a   : > { %v869_v43 = vmax.f32 %v853_v12, 0.0  ;;  %v1469_v12 = vld [vmem:[%s12633_s8 + $0x1f0] sm:$0xff] }
 0x10c   : > { %v9769_v48 = vpack.c.bf16 %v869_v43, %v868_v36  ;;  %6817 = vst [vmem:[%s9682_s22 + $0x38] sm:$0xff] %v869_v43  ;;  %v609_v49 = vpop.f32.mrf.mxu0  ;;  %1613 = vperm.xlu1 %9017, %v1435_v46   ;;  %v1470_v43 = vld [vmem:[%s12633_s8 + $0x1f8] sm:$0xff] }
 0x10d   : > { %v730_v44 = vpop.f32.mrf.mxu1  ;;  %1608 = vperm.xlu0 %9016, %v1434_v45  }
 0x10e   : > { %v731_v33 = vadd.f32 %v730_v44, %v609_v49  ;;  %1618 = vperm.xlu2 %9018, %v1436_v47   ;;  %v1467_v44 = vld [vmem:[%s12633_s8 + $0x1e0] sm:$0xff] }
 0x110   : > { %v9773_v50 = vadd.f32 %v9661_v23, %v731_v33  ;;  %v1439_v23 = vld [vmem:[%s12633_s8 + $0x100] sm:$0xff]  ;;  %v1468_v33 = vld [vmem:[%s12633_s8 + $0x1e8] sm:$0xff] }
 0x112   : > { %v870_v51 = vmax.f32 %v9773_v50, 0.0  ;;  %v1457_v50 = vld [vmem:[%s12633_s8 + $0x190] sm:$0xff] }
 0x114   : > { %6818 = vst [vmem:[%s9682_s22 + $0x40] sm:$0xff] %v870_v51  ;;  %v611_v55 = vpop.f32.mrf.mxu0  ;;  %1628 = vperm.xlu1 %9017, %v1438_v54   ;;  %v1466_v54 = vld [vmem:[%s12633_s8 + $0x1d8] sm:$0xff] }
 0x115   : > { %v732_v52 = vpop.f32.mrf.mxu1  ;;  %1623 = vperm.xlu0 %9016, %v1437_v53   ;;  %v1465_v53 = vld [vmem:[%s12633_s8 + $0x1d0] sm:$0xff] }
 0x116   : > { %v733_v56 = vadd.f32 %v732_v52, %v611_v55  ;;  %1633 = vperm.xlu2 %9018, %v1439_v23   ;;  %v1463_v23 = vld [vmem:[%s12633_s8 + $0x1c0] sm:$0xff] }
 0x118   : > { %v9789_v57 = vadd.f32 %v9677_v35, %v733_v56  ;;  %v1464_v56 = vld [vmem:[%s12633_s8 + $0x1c8] sm:$0xff] }
 0x11a   : > { %v871_v58 = vmax.f32 %v9789_v57, 0.0  ;;  %v1455_v57 = vld [vmem:[%s12633_s8 + $0x180] sm:$0xff] }
 0x11c   : > { %6819 = vst [vmem:[%s9682_s22 + $0x48] sm:$0xff] %v871_v58  ;;  %v614_v35 = vpop.f32.mrf.mxu0  ;;  %1643 = vperm.xlu1 %9017, %v1441_v62   ;;  %v1462_v62 = vld [vmem:[%s12633_s8 + $0x1b8] sm:$0xff] }
 0x11d   : > { %v735_v59 = vpop.f32.mrf.mxu1  ;;  %1638 = vperm.xlu0 %9016, %v1440_v61   ;;  %v914_v61 = vpack.c.bf16 %v871_v58, %v870_v51  ;;  %v1458_v51 = vld [vmem:[%s12633_s8 + $0x198] sm:$0xff]  ;;  %v2801_v58 = vld [vmem:[%s12635_s10] sm:$0xff] }
 0x11e   : > { %v736_v1 = vadd.f32 %v735_v59, %v614_v35  ;;  %1648 = vperm.xlu2 %9018, %v1442_v63   ;;  %v1461_v59 = vld [vmem:[%s12633_s8 + $0x1b0] sm:$0xff]  ;;  %v1459_v63 = vld [vmem:[%s12633_s8 + $0x1a0] sm:$0xff]  ;;  %v1460_v35 = vld [vmem:[%s12633_s8 + $0x1a8] sm:$0xff] }
 0x120   : > { %v9805_v2 = vadd.f32 %v9595_v0, %v736_v1  ;;  %v1445_v0 = vld [vmem:[%s12633_s8 + $0x130] sm:$0xff]  ;;  %v2802_v1 = vld [vmem:[%s12635_s10 + $0x8] sm:$0xff] }
 0x122   : > { %v872_v3 = vmax.f32 %v9805_v2, 0.0  ;;  %v2805_v2 = vld [vmem:[%s12635_s10 + $0x20] sm:$0xff] }
 0x124   : > { %6820 = vst [vmem:[%s9682_s22 + $0x50] sm:$0xff] %v872_v3  ;;  %v616_v9 = vpop.f32.mrf.mxu0  ;;  %1658 = vperm.xlu1 %9017, %v1444_v8   ;;  %v2808_v8 = vld [vmem:[%s12635_s10 + $0x38] sm:$0xff] }
 0x125   : > { %v737_v4 = vpop.f32.mrf.mxu1  ;;  %1653 = vperm.xlu0 %9016, %v1443_v5   ;;  %v2807_v5 = vld [vmem:[%s12635_s10 + $0x30] sm:$0xff] }
 0x126   : > { %v738_v11 = vadd.f32 %v737_v4, %v616_v9  ;;  %1663 = vperm.xlu2 %9018, %v1445_v0   ;;  %v2806_v4 = vld [vmem:[%s12635_s10 + $0x28] sm:$0xff]  ;;  %v2809_v0 = vld [vmem:[%s12635_s10 + $0x40] sm:$0xff] }
 0x127   : > { %v2810_v9 = vld [vmem:[%s12635_s10 + $0x48] sm:$0xff] }
 0x128   : > { %v9821_v13 = vadd.f32 %v9614_v6, %v738_v11  ;;  %v2811_v11 = vld [vmem:[%s12635_s10 + $0x50] sm:$0xff] }
 0x12a   : > { %v873_v14 = vmax.f32 %v9821_v13, 0.0  ;;  %v8577_v13 = vld [vmem:[#allocation5 + $0x10] sm:$0xff] }
 0x12c   : > { %6821 = vst [vmem:[%s9682_s22 + $0x58] sm:$0xff] %v873_v14  ;;  %v619_v21 = vpop.f32.mrf.mxu0  ;;  %1673 = vperm.xlu1 %9017, %v1447_v19   ;;  %v915_v55 = vpack.c.bf16 %v873_v14, %v872_v3  ;;  %v8576_v3 = vld [vmem:[#allocation5 + $0x8] sm:$0xff]  ;;  %v2812_v14 = vld [vmem:[%s12635_s10 + $0x58] sm:$0xff]  ;;  %v2815_v19 = vld [vmem:[%s12635_s10 + $0x70] sm:$0xff] }
 0x12d   : > { %v740_v15 = vpop.f32.mrf.mxu1  ;;  %1668 = vperm.xlu0 %9016, %v1446_v16   ;;  %v2814_v16 = vld [vmem:[%s12635_s10 + $0x68] sm:$0xff] }
 0x12e   : > { %v741_v6 = vadd.f32 %v740_v15, %v619_v21  ;;  %1678 = vperm.xlu2 %9018, %v1448_v20   ;;  %v2813_v15 = vld [vmem:[%s12635_s10 + $0x60] sm:$0xff]  ;;  %v2816_v20 = vld [vmem:[%s12635_s10 + $0x78] sm:$0xff] }
 0x12f   : > { %v2817_v21 = vld [vmem:[%s12635_s10 + $0x80] sm:$0xff] }
 0x130   : > { %v858_v25 = vadd.f32 %v9645_v17, %v741_v6  ;;  %v8578_v6 = vld [vmem:[#allocation5 + $0x18] sm:$0xff] }
 0x132   : > { %v874_v26 = vmax.f32 %v858_v25, 0.0  ;;  %v2818_v25 = vld [vmem:[%s12635_s10 + $0x88] sm:$0xff] }
 0x134   : > { %6822 = vst [vmem:[%s9682_s22 + $0x60] sm:$0xff] %v874_v26  ;;  %v621_v32 = vpop.f32.mrf.mxu0  ;;  %1688 = vperm.xlu1 %9017, %v1450_v29   ;;  %v2822_v29 = vld [vmem:[%s12635_s10 + $0xa8] sm:$0xff] }
 0x135   : > { %v742_v27 = vpop.f32.mrf.mxu1  ;;  %1683 = vperm.xlu0 %9016, %v1449_v28   ;;  %v2821_v28 = vld [vmem:[%s12635_s10 + $0xa0] sm:$0xff] }
 0x136   : > { %v743_v22 = vadd.f32 %v742_v27, %v621_v32  ;;  %1693 = vperm.xlu2 %9018, %v1451_v30   ;;  %v2820_v27 = vld [vmem:[%s12635_s10 + $0x98] sm:$0xff]  ;;  %v2823_v30 = vld [vmem:[%s12635_s10 + $0xb0] sm:$0xff]  ;;  %v8579_v32 = vld [vmem:[#allocation5 + $0x20] sm:$0xff] }
 0x138   : > { %v859_v17 = vadd.f32 %v9663_v24, %v743_v22  ;;  %v2824_v22 = vld [vmem:[%s12635_s10 + $0xb8] sm:$0xff] }
 0x13a   : > { %v875_v34 = vmax.f32 %v859_v17, 0.0  ;;  %v2825_v17 = vld [vmem:[%s12635_s10 + $0xc0] sm:$0xff] }
 0x13c   : > { %6823 = vst [vmem:[%s9682_s22 + $0x68] sm:$0xff] %v875_v34  ;;  %v624_v40 = vpop.f32.mrf.mxu0  ;;  %1703 = vperm.xlu1 %9017, %v1453_v38   ;;  %v2829_v38 = vld [vmem:[%s12635_s10 + $0xe0] sm:$0xff] }
 0x13d   : > { %v745_v36 = vpop.f32.mrf.mxu1  ;;  %1698 = vperm.xlu0 %9016, %v1452_v37   ;;  %v2828_v37 = vld [vmem:[%s12635_s10 + $0xd8] sm:$0xff] }
 0x13e   : > { %v746_v41 = vadd.f32 %v745_v36, %v624_v40  ;;  %1708 = vperm.xlu2 %9018, %v1454_v39   ;;  %v2827_v36 = vld [vmem:[%s12635_s10 + $0xd0] sm:$0xff]  ;;  %v8580_v39 = vld [vmem:[#allocation5 + $0x28] sm:$0xff] }
 0x13f   : > { %v2830_v40 = vld [vmem:[%s12635_s10 + $0xe8] sm:$0xff] }
 0x140   : > { %v860_v24 = vadd.f32 %v9625_v10, %v746_v41  ;;  %v2831_v41 = vld [vmem:[%s12635_s10 + $0xf0] sm:$0xff] }
 0x142   : > { %v876_v42 = vmax.f32 %v860_v24, 0.0  ;;  %v2832_v24 = vld [vmem:[%s12635_s10 + $0xf8] sm:$0xff] }
 0x144   : > { %6824 = vst [vmem:[%s9682_s22 + $0x70] sm:$0xff] %v876_v42  ;;  %v626_v46 = vpop.f32.mrf.mxu0  ;;  %1788 = vperm.xlu1 %9017, %v1470_v43   ;;  %v2835_v43 = vld [vmem:[%s12635_s10 + $0x110] sm:$0xff] }
 0x145   : > { %v747_v45 = vpop.f32.mrf.mxu1  ;;  %1783 = vperm.xlu0 %9016, %v1469_v12   ;;  %v2834_v12 = vld [vmem:[%s12635_s10 + $0x108] sm:$0xff] }
 0x146   : > { %v748_v47 = vadd.f32 %v747_v45, %v626_v46  ;;  %1773 = vperm.xlu2 %9018, %v1467_v44   ;;  %v10023_v44 = vpop.permute.xlu2 %1027  ;;  %v10025_v45 = vpop.permute.xlu1 %1022 }
 0x147   : > { %v10027_v46 = vpop.permute.xlu0 %1012 }
 0x148   : > { %v861_v10 = vadd.f32 %v9648_v18, %v748_v47  ;;  %v916_v18 = vpack.c.bf16 %v875_v34, %v874_v26  ;;  %v2819_v26 = vld [vmem:[%s12635_s10 + $0x90] sm:$0xff]  ;;  %v2826_v34 = vld [vmem:[%s12635_s10 + $0xc8] sm:$0xff] }
 0x149   : > { %v8581_v47 = vld [vmem:[#allocation5 + $0x30] sm:$0xff] }
 0x14a   : > { %v877_v49 = vmax.f32 %v861_v10, 0.0  ;;  %v2836_v10 = vld [vmem:[%s12635_s10 + $0x118] sm:$0xff] }
 0x14c   : > { %v917_v52 = vpack.c.bf16 %v877_v49, %v876_v42  ;;  %6825 = vst [vmem:[%s9682_s22 + $0x78] sm:$0xff] %v877_v49  ;;  %1763 = vperm.xlu1 %9017, %v1465_v53   ;;  %v2833_v42 = vld [vmem:[%s12635_s10 + $0x100] sm:$0xff] }
 0x14d   : > { %1778 = vperm.xlu0 %9016, %v1468_v33   ;;  %v2837_v49 = vld [vmem:[%s12635_s10 + $0x120] sm:$0xff]  ;;  %v2838_v33 = vld [vmem:[%s12635_s10 + $0x128] sm:$0xff] }
 0x14e   : > { %1206 = vmatpush.bf16.msra.mxu2 %v917_v52  ;;  %1768 = vperm.xlu2 %9018, %v1466_v54   ;;  %v10038_v52 = vpop.permute.xlu2 %1002  ;;  %v10040_v53 = vpop.permute.xlu1 %1017 }
 0x14f   : > { %v10042_v54 = vpop.permute.xlu0 %1007 }
 0x152   : > { %1207 = vmatpush.bf16.msra.mxu2 %v916_v18  ;;  %v2839_v18 = vld [vmem:[%s12635_s10 + $0x130] sm:$0xff] }
 0x154   : > { %1758 = vperm.xlu1 %9017, %v1464_v56  }
 0x155   : > { %1753 = vperm.xlu0 %9016, %v1463_v23   ;;  %v2840_v23 = vld [vmem:[%s12635_s10 + $0x138] sm:$0xff] }
 0x156   : > { %1208 = vmatpush.bf16.msra.mxu2 %v915_v55  ;;  %1743 = vperm.xlu2 %9018, %v1461_v59   ;;  %v2841_v55 = vld [vmem:[%s12635_s10 + $0x140] sm:$0xff]  ;;  %v10053_v56 = vpop.permute.xlu2 %997  ;;  %v8582_v59 = vld [vmem:[#allocation5 + $0x38] sm:$0xff] }
 0x15a   : > { %1209 = vmatpush.bf16.msra.mxu2 %v914_v61  ;;  %v10055_v61 = vpop.permute.xlu1 %992 }
 0x15c   : > { %1733 = vperm.xlu1 %9017, %v1459_v63   ;;  %v10060_v63 = vpop.permute.xlu0 %982 }
 0x15d   : > { %1748 = vperm.xlu0 %9016, %v1462_v62   ;;  %v2842_v62 = vld [vmem:[%s12635_s10 + $0x148] sm:$0xff] }
 0x15e   : > { %1210 = vmatpush.bf16.msra.mxu2 %v9769_v48  ;;  %1738 = vperm.xlu2 %9018, %v1460_v35   ;;  %v8575_v48 = vld [vmem:[#allocation5] sm:$0xff]  ;;  %v2843_v35 = vld [vmem:[%s12635_s10 + $0x150] sm:$0xff] }
 0x162   : > { %1211 = vmatpush.bf16.msra.mxu2 %v9745_v31  ;;  %v1456_v31 = vld [vmem:[%s12633_s8 + $0x188] sm:$0xff] }
 0x164   : > { %1728 = vperm.xlu1 %9017, %v1458_v51   ;;  %v10068_v51 = vpop.permute.xlu2 %972 }
 0x165   : > { %1723 = vperm.xlu0 %9016, %v1457_v50   ;;  %v2844_v50 = vld [vmem:[%s12635_s10 + $0x158] sm:$0xff] }
 0x166   : > { %1212 = vmatpush.bf16.msra.mxu2 %v9722_v7  ;;  %1713 = vperm.xlu2 %9018, %v1455_v57   ;;  %v2804_v7 = vld [vmem:[%s12635_s10 + $0x18] sm:$0xff]  ;;  %v2845_v57 = vld [vmem:[%s12635_s10 + $0x160] sm:$0xff] }
 0x16a   : > { %1213 = vmatpush.bf16.msra.mxu2 %v9711_v60  ;;  %v2803_v60 = vld [vmem:[%s12635_s10 + $0x10] sm:$0xff] }
 0x16c   : > { %2931 = vperm.xlu1 %9017, %v2801_v58   ;;  %v2847_v58 = vld [vmem:[%s12635_s10 + $0x170] sm:$0xff] }
 0x16d   : > { %1214 = vmatmul.bf16.vlgmr.msra.gmra.mxu2 %v8575_v48  ;;  %1718 = vperm.xlu0 %9016, %v1456_v31   ;;  %v10073_v48 = vpop.permute.xlu1 %987  ;;  %v2846_v31 = vld [vmem:[%s12635_s10 + $0x168] sm:$0xff] }
 0x16e   : > { %2936 = vperm.xlu2 %9018, %v2802_v1   ;;  %v10081_v1 = vpop.permute.xlu0 %977 }
 0x174   : > { %2946 = vperm.xlu1 %9017, %v2804_v7   ;;  %v2848_v7 = vld [vmem:[%s12635_s10 + $0x178] sm:$0xff] }
 0x175   : > { %2941 = vperm.xlu0 %9016, %v2803_v60   ;;  %v8583_v60 = vld [vmem:[#allocation5 + $0x40] sm:$0xff] }
 0x176   : > { %2951 = vperm.xlu2 %9018, %v2805_v2   ;;  %v2849_v2 = vld [vmem:[%s12635_s10 + $0x180] sm:$0xff] }
 0x17c   : > { %2961 = vperm.xlu1 %9017, %v2807_v5   ;;  %v963_v5 = vpop.permute.xlu1 %962 }
 0x17d   : > { %1219 = vmatmul.bf16.gmra.mxu2 %v8576_v3  ;;  %2956 = vperm.xlu0 %9016, %v2806_v4   ;;  %v2850_v3 = vld [vmem:[%s12635_s10 + $0x188] sm:$0xff]  ;;  %v968_v4 = vpop.permute.xlu2 %967 }
 0x17e   : > { %2966 = vperm.xlu2 %9018, %v2808_v8   ;;  %v953_v8 = vpop.permute.xlu0 %952 }
 0x184   : > { %2976 = vperm.xlu1 %9017, %v2810_v9  }
 0x185   : > { %2971 = vperm.xlu0 %9016, %v2809_v0  }
 0x186   : > { %2981 = vperm.xlu2 %9018, %v2811_v11  }
 0x18c   : > { %2991 = vperm.xlu1 %9017, %v2813_v15   ;;  %v2853_v15 = vld [vmem:[%s12635_s10 + $0x1a0] sm:$0xff] }
 0x18d   : > { %1224 = vmatmul.bf16.gmra.mxu2 %v8577_v13  ;;  %2986 = vperm.xlu0 %9016, %v2812_v14   ;;  %v2851_v13 = vld [vmem:[%s12635_s10 + $0x190] sm:$0xff]  ;;  %v2852_v14 = vld [vmem:[%s12635_s10 + $0x198] sm:$0xff] }
 0x18e   : > { %2996 = vperm.xlu2 %9018, %v2814_v16   ;;  %v10102_v16 = vpop.permute.xlu2 %1102 }
 0x194   : > { %3006 = vperm.xlu1 %9017, %v2816_v20  }
 0x195   : > { %3001 = vperm.xlu0 %9016, %v2815_v19   ;;  %v958_v19 = vpop.permute.xlu1 %957 }
 0x196   : > { %3011 = vperm.xlu2 %9018, %v2817_v21  }
 0x19c   : > { %3021 = vperm.xlu1 %9017, %v2819_v26   ;;  %v2854_v26 = vld [vmem:[%s12635_s10 + $0x1a8] sm:$0xff] }
 0x19d   : > { %1229 = vmatmul.bf16.gmra.mxu2 %v8578_v6  ;;  %3016 = vperm.xlu0 %9016, %v2818_v25   ;;  %v8584_v6 = vld [vmem:[#allocation5 + $0x48] sm:$0xff] }
 0x19e   : > { %3026 = vperm.xlu2 %9018, %v2820_v27   ;;  %v2855_v27 = vld [vmem:[%s12635_s10 + $0x1b0] sm:$0xff] }
 0x1a4   : > { %3036 = vperm.xlu1 %9017, %v2822_v29  }
 0x1a5   : > { %3031 = vperm.xlu0 %9016, %v2821_v28   ;;  %v2856_v28 = vld [vmem:[%s12635_s10 + $0x1b8] sm:$0xff] }
 0x1a6   : > { %3041 = vperm.xlu2 %9018, %v2823_v30   ;;  %v10116_v30 = vpop.permute.xlu0 %1107 }
 0x1ac   : > { %3051 = vperm.xlu1 %9017, %v2825_v17  }
 0x1ad   : > { %1234 = vmatmul.bf16.gmra.mxu2 %v8579_v32  ;;  %3046 = vperm.xlu0 %9016, %v2824_v22   ;;  %v10118_v22 = vpop.permute.xlu2 %1097 }
 0x1ae   : > { %3056 = vperm.xlu2 %9018, %v2826_v34   ;;  %v10120_v34 = vpop.permute.xlu1 %1092 }
 0x1b4   : > { %3066 = vperm.xlu1 %9017, %v2828_v37   ;;  %v2857_v37 = vld [vmem:[%s12635_s10 + $0x1c0] sm:$0xff] }
 0x1b5   : > { %3061 = vperm.xlu0 %9016, %v2827_v36  }
 0x1b6   : > { %3071 = vperm.xlu2 %9018, %v2829_v38   ;;  %v2858_v38 = vld [vmem:[%s12635_s10 + $0x1c8] sm:$0xff] }
 0x1bc   : > { %3081 = vperm.xlu1 %9017, %v2831_v41  }
 0x1bd   : > { %1239 = vmatmul.bf16.gmra.mxu2 %v8580_v39  ;;  %3076 = vperm.xlu0 %9016, %v2830_v40   ;;  %v2859_v39 = vld [vmem:[%s12635_s10 + $0x1d0] sm:$0xff] }
 0x1be   : > { %3086 = vperm.xlu2 %9018, %v2832_v24   ;;  %v8585_v24 = vld [vmem:[#allocation5 + $0x50] sm:$0xff] }
 0x1c4   : > { %3096 = vperm.xlu1 %9017, %v2834_v12   ;;  %v10134_v12 = vpop.permute.xlu2 %1072 }
 0x1c5   : > { %3091 = vperm.xlu0 %9016, %v2833_v42   ;;  %v10132_v42 = vpop.permute.xlu0 %1082 }
 0x1c6   : > { %3101 = vperm.xlu2 %9018, %v2835_v43  }
 0x1cc   : > { %3111 = vperm.xlu1 %9017, %v2837_v49   ;;  %v2861_v49 = vld [vmem:[%s12635_s10 + $0x1e0] sm:$0xff] }
 0x1cd   : > { %1244 = vmatmul.bf16.gmra.mxu2 %v8581_v47  ;;  %3106 = vperm.xlu0 %9016, %v2836_v10   ;;  %v2860_v47 = vld [vmem:[%s12635_s10 + $0x1d8] sm:$0xff]  ;;  %v10139_v10 = vpop.permute.xlu1 %1087 }
 0x1ce   : > { %3116 = vperm.xlu2 %9018, %v2838_v33   ;;  %v2862_v33 = vld [vmem:[%s12635_s10 + $0x1e8] sm:$0xff] }
 0x1d4   : > { %3126 = vperm.xlu1 %9017, %v2840_v23  }
 0x1d5   : > { %3121 = vperm.xlu0 %9016, %v2839_v18  }
 0x1d6   : > { %3131 = vperm.xlu2 %9018, %v2841_v55  }
 0x1dc   : > { %3141 = vperm.xlu1 %9017, %v2843_v35   ;;  %v10154_v35 = vpop.permute.xlu0 %1077 }
 0x1dd   : > { %1249 = vmatmul.bf16.gmra.mxu2 %v8582_v59  ;;  %3136 = vperm.xlu0 %9016, %v2842_v62   ;;  %v2863_v62 = vld [vmem:[%s12635_s10 + $0x1f0] sm:$0xff] }
 0x1de   : > { %3146 = vperm.xlu2 %9018, %v2844_v50   ;;  %v2864_v50 = vld [vmem:[%s12635_s10 + $0x1f8] sm:$0xff] }
 0x1e4   : > { %3156 = vperm.xlu1 %9017, %v2846_v31   ;;  %v10162_v31 = vpop.permute.xlu2 %1067 }
 0x1e5   : > { %3151 = vperm.xlu0 %9016, %v2845_v57   ;;  %v2865_v57 = vld [vmem:[%s12635_s10 + $0x200] sm:$0xff] }
 0x1e6   : > { %3161 = vperm.xlu2 %9018, %v2847_v58  }
 0x1ec   : > { %3171 = vperm.xlu1 %9017, %v2849_v2  }
 0x1ed   : > { %1254 = vmatmul.bf16.gmra.mxu2 %v8583_v60  ;;  %3166 = vperm.xlu0 %9016, %v2848_v7   ;;  %v8586_v7 = vld [vmem:[#allocation5 + $0x58] sm:$0xff] }
 0x1ee   : > { %3176 = vperm.xlu2 %9018, %v2850_v3   ;;  %v2866_v3 = vld [vmem:[%s12635_s10 + $0x208] sm:$0xff] }
 0x1f0   : > { %v1215_v0 = vpop.f32.mrf.mxu2 }
 0x1f1   : > { %v1216_v9 = vadd.f32 %v1215_v0, %v953_v8  ;;  %v10182_v0 = vpop.permute.xlu2 %1042 }
 0x1f3   : > { %v1295_v11 = vmax.f32 %v1216_v9, 0.0 }
 0x1f4   : > { %3186 = vperm.xlu1 %9017, %v2852_v14  }
 0x1f5   : > { %6826 = vst [vmem:[%s9682_s22 + $0x80] sm:$0xff] %v1295_v11  ;;  %3181 = vperm.xlu0 %9016, %v2851_v13  }
 0x1f6   : > { %3191 = vperm.xlu2 %9018, %v2853_v15   ;;  %v2869_v15 = vld [vmem:[%s12635_s10 + $0x220] sm:$0xff] }
 0x1f8   : > { %v1217_v20 = vpop.f32.mrf.mxu2 }
 0x1f9   : > { %v1218_v21 = vadd.f32 %v1217_v20, %v958_v19  ;;  %v2870_v19 = vld [vmem:[%s12635_s10 + $0x228] sm:$0xff]  ;;  %v2871_v20 = vld [vmem:[%s12635_s10 + $0x230] sm:$0xff] }
 0x1fb   : > { %v1296_v25 = vmax.f32 %v1218_v21, 0.0 }
 0x1fc   : > { %3201 = vperm.xlu1 %9017, %v2855_v27  }
 0x1fd   : > { %6827 = vst [vmem:[%s9682_s22 + $0x88] sm:$0xff] %v1296_v25  ;;  %1259 = vmatmul.bf16.gmra.mxu2 %v8584_v6  ;;  %v10114_v29 = vpack.c.bf16 %v1296_v25, %v1295_v11  ;;  %3196 = vperm.xlu0 %9016, %v2854_v26   ;;  %v10199_v6 = vpop.permute.xlu2 %1037  ;;  %v8587_v26 = vld [vmem:[#allocation5 + $0x60] sm:$0xff] }
 0x1fe   : > { %3206 = vperm.xlu2 %9018, %v2856_v28  }
 0x200   : > { %v1220_v32 = vpop.f32.mrf.mxu2 }
 0x201   : > { %v1221_v17 = vadd.f32 %v1220_v32, %v963_v5  ;;  %v2868_v5 = vld [vmem:[%s12635_s10 + $0x218] sm:$0xff] }
 0x202   : > { %v2872_v32 = vld [vmem:[%s12635_s10 + $0x238] sm:$0xff] }
 0x203   : > { %v1297_v36 = vmax.f32 %v1221_v17, 0.0  ;;  %v2873_v17 = vld [vmem:[%s12635_s10 + $0x240] sm:$0xff] }
 0x204   : > { %3216 = vperm.xlu1 %9017, %v2858_v38  }
 0x205   : > { %6828 = vst [vmem:[%s9682_s22 + $0x90] sm:$0xff] %v1297_v36  ;;  %3211 = vperm.xlu0 %9016, %v2857_v37  }
 0x206   : > { %3221 = vperm.xlu2 %9018, %v2859_v39  }
 0x208   : > { %v1222_v40 = vpop.f32.mrf.mxu2 }
 0x209   : > { %v1223_v41 = vadd.f32 %v1222_v40, %v968_v4  ;;  %v2867_v4 = vld [vmem:[%s12635_s10 + $0x210] sm:$0xff]  ;;  %v10219_v40 = vpop.permute.xlu2 %1483 }
 0x20b   : > { %v1298_v43 = vmax.f32 %v1223_v41, 0.0 }
 0x20c   : > { %3231 = vperm.xlu1 %9017, %v2861_v49  }
 0x20d   : > { %6829 = vst [vmem:[%s9682_s22 + $0x98] sm:$0xff] %v1298_v43  ;;  %1264 = vmatmul.bf16.gmra.mxu2 %v8585_v24  ;;  %v10148_v18 = vpack.c.bf16 %v1298_v43, %v1297_v36  ;;  %3226 = vperm.xlu0 %9016, %v2860_v47   ;;  %v2874_v36 = vld [vmem:[%s12635_s10 + $0x248] sm:$0xff]  ;;  %v2875_v24 = vld [vmem:[%s12635_s10 + $0x250] sm:$0xff]  ;;  %v2876_v47 = vld [vmem:[%s12635_s10 + $0x258] sm:$0xff] }
 0x20e   : > { %3236 = vperm.xlu2 %9018, %v2862_v33  }
 0x210   : > { %v1225_v23 = vpop.f32.mrf.mxu2 }
 0x211   : > { %v1226_v55 = vadd.f32 %v1225_v23, %v10068_v51  ;;  %v10165_v51 = vpop.permute.xlu1 %1062  ;;  %v8588_v23 = vld [vmem:[#allocation5 + $0x68] sm:$0xff] }
 0x213   : > { %v1299_v59 = vmax.f32 %v1226_v55, 0.0 }
 0x214   : > { %3246 = vperm.xlu1 %9017, %v2864_v50   ;;  %v2879_v50 = vld [vmem:[%s12635_s10 + $0x270] sm:$0xff] }
 0x215   : > { %6830 = vst [vmem:[%s9682_s22 + $0xa0] sm:$0xff] %v1299_v59  ;;  %3241 = vperm.xlu0 %9016, %v2863_v62  }
 0x216   : > { %3251 = vperm.xlu2 %9018, %v2865_v57   ;;  %v2880_v57 = vld [vmem:[%s12635_s10 + $0x278] sm:$0xff] }
 0x218   : > { %v1227_v58 = vpop.f32.mrf.mxu2 }
 0x219   : > { %v1228_v60 = vadd.f32 %v1227_v58, %v10081_v1  ;;  %v10180_v1 = vpop.permute.xlu0 %1052  ;;  %v10184_v9 = vpop.permute.xlu1 %1057 }
 0x21a   : > { %v10245_v58 = vpop.permute.xlu2 %1498 }
 0x21b   : > { %v1300_v2 = vmax.f32 %v1228_v60, 0.0 }
 0x21c   : > { %3261 = vperm.xlu1 %9017, %v2867_v4   ;;  %v2881_v4 = vld [vmem:[%s12635_s10 + $0x280] sm:$0xff] }
 0x21d   : > { %6831 = vst [vmem:[%s9682_s22 + $0xa8] sm:$0xff] %v1300_v2  ;;  %1269 = vmatmul.bf16.gmra.mxu2 %v8586_v7  ;;  %v10178_v8 = vpack.c.bf16 %v1300_v2, %v1299_v59  ;;  %3256 = vperm.xlu0 %9016, %v2866_v3   ;;  %v2878_v59 = vld [vmem:[%s12635_s10 + $0x268] sm:$0xff] }
 0x21e   : > { %3266 = vperm.xlu2 %9018, %v2868_v5   ;;  %v2882_v5 = vld [vmem:[%s12635_s10 + $0x288] sm:$0xff] }
 0x220   : > { %v1230_v11 = vpop.f32.mrf.mxu2 }
 0x221   : > { %v1231_v13 = vadd.f32 %v1230_v11, %v10060_v63  ;;  %v10197_v21 = vpop.permute.xlu0 %1047  ;;  %v10202_v27 = vpop.permute.xlu1 %1032  ;;  %v2883_v11 = vld [vmem:[%s12635_s10 + $0x290] sm:$0xff] }
 0x223   : > { %v1301_v14 = vmax.f32 %v1231_v13, 0.0  ;;  %v10270_v13 = vpop.permute.xlu2 %1513 }
 0x224   : > { %3276 = vperm.xlu1 %9017, %v2870_v19  }
 0x225   : > { %6832 = vst [vmem:[%s9682_s22 + $0xb0] sm:$0xff] %v1301_v14  ;;  %3271 = vperm.xlu0 %9016, %v2869_v15  }
 0x226   : > { %3281 = vperm.xlu2 %9018, %v2871_v20   ;;  %v8589_v20 = vld [vmem:[#allocation5 + $0x70] sm:$0xff] }
 0x228   : > { %v1232_v63 = vpop.f32.mrf.mxu2 }
 0x229   : > { %v1233_v25 = vadd.f32 %v1232_v63, %v10073_v48  ;;  %v10217_v39 = vpop.permute.xlu0 %1473  ;;  %v10224_v43 = vpop.permute.xlu1 %1478 }
 0x22b   : > { %v1302_v28 = vmax.f32 %v1233_v25, 0.0  ;;  %v2884_v25 = vld [vmem:[%s12635_s10 + $0x298] sm:$0xff] }
 0x22c   : > { %3291 = vperm.xlu1 %9017, %v2873_v17   ;;  %v10292_v17 = vpop.permute.xlu2 %1528 }
 0x22d   : > { %6833 = vst [vmem:[%s9682_s22 + $0xb8] sm:$0xff] %v1302_v28  ;;  %1274 = vmatmul.bf16.gmra.mxu2 %v8587_v26  ;;  %v10214_v48 = vpack.c.bf16 %v1302_v28, %v1301_v14  ;;  %3286 = vperm.xlu0 %9016, %v2872_v32   ;;  %v2885_v26 = vld [vmem:[%s12635_s10 + $0x2a0] sm:$0xff]  ;;  %v2886_v28 = vld [vmem:[%s12635_s10 + $0x2a8] sm:$0xff] }
 0x22e   : > { %3296 = vperm.xlu2 %9018, %v2874_v36  }
 0x230   : > { %v1235_v37 = vpop.f32.mrf.mxu2 }
 0x231   : > { %v1236_v38 = vadd.f32 %v1235_v37, %v10055_v61  ;;  %v2877_v61 = vld [vmem:[%s12635_s10 + $0x260] sm:$0xff]  ;;  %v10237_v62 = vpop.permute.xlu0 %1488  ;;  %v10250_v60 = vpop.permute.xlu1 %1493 }
 0x233   : > { %v1303_v41 = vmax.f32 %v1236_v38, 0.0 }
 0x234   : > { %3306 = vperm.xlu1 %9017, %v2876_v47   ;;  %v2889_v47 = vld [vmem:[%s12635_s10 + $0x2c0] sm:$0xff] }
 0x235   : > { %6834 = vst [vmem:[%s9682_s22 + $0xc0] sm:$0xff] %v1303_v41  ;;  %3301 = vperm.xlu0 %9016, %v2875_v24   ;;  %v2888_v24 = vld [vmem:[%s12635_s10 + $0x2b8] sm:$0xff] }
 0x236   : > { %3311 = vperm.xlu2 %9018, %v2877_v61  }
 0x238   : > { %v1237_v49 = vpop.f32.mrf.mxu2 }
 0x239   : > { %v1238_v33 = vadd.f32 %v1237_v49, %v10053_v56  ;;  %v10272_v14 = vpop.permute.xlu1 %1508  ;;  %v8590_v49 = vld [vmem:[#allocation5 + $0x78] sm:$0xff] }
 0x23b   : > { %v1304_v55 = vmax.f32 %v1238_v33, 0.0 }
 0x23c   : > { %3321 = vperm.xlu1 %9017, %v2879_v50  }
 0x23d   : > { %6835 = vst [vmem:[%s9682_s22 + $0xc8] sm:$0xff] %v1304_v55  ;;  %1279 = vmatmul.bf16.gmra.mxu2 %v8588_v23  ;;  %v10248_v56 = vpack.c.bf16 %v1304_v55, %v1303_v41  ;;  %3316 = vperm.xlu0 %9016, %v2878_v59   ;;  %v2887_v41 = vld [vmem:[%s12635_s10 + $0x2b0] sm:$0xff]  ;;  %v10310_v23 = vpop.permute.xlu2 %1543  ;;  %v2890_v59 = vld [vmem:[%s12635_s10 + $0x2c8] sm:$0xff] }
 0x23e   : > { %3326 = vperm.xlu2 %9018, %v2880_v57   ;;  %v2891_v57 = vld [vmem:[%s12635_s10 + $0x2d0] sm:$0xff] }
 0x240   : > { %v1240_v7 = vpop.f32.mrf.mxu2 }
 0x241   : > { %v10253_v2 = vadd.f32 %v1240_v7, %v10038_v52  ;;  %v10268_v52 = vpop.permute.xlu0 %1503  ;;  %v10295_v37 = vpop.permute.xlu1 %1523 }
 0x243   : > { %v1305_v3 = vmax.f32 %v10253_v2, 0.0  ;;  %v2902_v2 = vld [vmem:[%s12635_s10 + $0x328] sm:$0xff] }
 0x244   : > { %3336 = vperm.xlu1 %9017, %v2882_v5  }
 0x245   : > { %6836 = vst [vmem:[%s9682_s22 + $0xd0] sm:$0xff] %v1305_v3  ;;  %3331 = vperm.xlu0 %9016, %v2881_v4  }
 0x246   : > { %3341 = vperm.xlu2 %9018, %v2883_v11   ;;  %v2893_v11 = vld [vmem:[%s12635_s10 + $0x2e0] sm:$0xff] }
 0x248   : > { %v1242_v15 = vpop.f32.mrf.mxu2 }
 0x249   : > { %v10275_v19 = vadd.f32 %v1242_v15, %v10042_v54  ;;  %v10290_v54 = vpop.permute.xlu0 %1518  ;;  %v10315_v50 = vpop.permute.xlu1 %1538 }
 0x24b   : > { %v1306_v63 = vmax.f32 %v10275_v19, 0.0  ;;  %v2904_v19 = vld [vmem:[%s12635_s10 + $0x338] sm:$0xff] }
 0x24c   : > { %3351 = vperm.xlu1 %9017, %v2885_v26   ;;  %v10336_v26 = vpop.permute.xlu2 %1558 }
 0x24d   : > { %6837 = vst [vmem:[%s9682_s22 + $0xd8] sm:$0xff] %v1306_v63  ;;  %1284 = vmatmul.bf16.gmra.mxu2 %v8589_v20  ;;  %3346 = vperm.xlu0 %9016, %v2884_v25   ;;  %v2894_v20 = vld [vmem:[%s12635_s10 + $0x2e8] sm:$0xff]  ;;  %v2895_v25 = vld [vmem:[%s12635_s10 + $0x2f0] sm:$0xff] }
 0x24e   : > { %3356 = vperm.xlu2 %9018, %v2886_v28  }
 0x250   : > { %v1245_v32 = vpop.f32.mrf.mxu2 }
 0x251   : > { %v1246_v36 = vadd.f32 %v1245_v32, %v10027_v46  ;;  %v10308_v33 = vpop.permute.xlu0 %1533 }
 0x253   : > { %v1307_v38 = vmax.f32 %v1246_v36, 0.0 }
 0x254   : > { %3366 = vperm.xlu1 %9017, %v2888_v24   ;;  %v2897_v24 = vld [vmem:[%s12635_s10 + $0x300] sm:$0xff] }
 0x255   : > { %6838 = vst [vmem:[%s9682_s22 + $0xe0] sm:$0xff] %v1307_v38  ;;  %3361 = vperm.xlu0 %9016, %v2887_v41   ;;  %v2896_v41 = vld [vmem:[%s12635_s10 + $0x2f8] sm:$0xff] }
 0x256   : > { %3371 = vperm.xlu2 %9018, %v2889_v47   ;;  %v2898_v47 = vld [vmem:[%s12635_s10 + $0x308] sm:$0xff] }
 0x258   : > { %v1247_v46 = vpop.f32.mrf.mxu2 }
 0x259   : > { %v1248_v61 = vadd.f32 %v1247_v46, %v10040_v53  ;;  %v2892_v53 = vld [vmem:[%s12635_s10 + $0x2d8] sm:$0xff]  ;;  %v10328_v15 = vpop.permute.xlu0 %1548 }
 0x25b   : > { %v1308_v55 = vmax.f32 %v1248_v61, 0.0 }
 0x25c   : > { %3381 = vperm.xlu1 %9017, %v2891_v57  }
 0x25d   : > { %6839 = vst [vmem:[%s9682_s22 + $0xe8] sm:$0xff] %v1308_v55  ;;  %1289 = vmatmul.bf16.gmra.mxu2 %v8590_v49  ;;  %3376 = vperm.xlu0 %9016, %v2890_v59  }
 0x25e   : > { %3386 = vperm.xlu2 %9018, %v2892_v53   ;;  %v1397_v53 = vpack.c.bf16 %v1308_v55, %v1307_v38 }
 0x260   : > { %v1250_v7 = vpop.f32.mrf.mxu2 }
 0x261   : > { %v1251_v4 = vadd.f32 %v1250_v7, %v10025_v45  ;;  %v10339_v45 = vpop.permute.xlu1 %1553  ;;  %v10352_v61 = vpop.permute.xlu0 %1563 }
 0x263   : > { %v1309_v5 = vmax.f32 %v1251_v4, 0.0  ;;  %v2899_v4 = vld [vmem:[%s12635_s10 + $0x310] sm:$0xff] }
 0x264   : > { %3396 = vperm.xlu1 %9017, %v2894_v20  }
 0x265   : > { %6840 = vst [vmem:[%s9682_s22 + $0xf0] sm:$0xff] %v1309_v5  ;;  %3391 = vperm.xlu0 %9016, %v2893_v11   ;;  %v2901_v11 = vld [vmem:[%s12635_s10 + $0x320] sm:$0xff] }
 0x266   : > { %3401 = vperm.xlu2 %9018, %v2895_v25  }
 0x268   : > { %v1252_v28 = vpop.f32.mrf.mxu2 }
 0x269   : > { %v1253_v32 = vadd.f32 %v1252_v28, %v10023_v44  ;;  %v10354_v44 = vpop.permute.xlu2 %1573  ;;  %v10356_v49 = vpop.permute.xlu1 %1568 }
 0x26a   : > { %12658 = vst [vmem:[#allocation17_spill] sm:$0xff] %v10354_v44  ;;  %v10373_v38 = vpop.permute.xlu0 %1578  ;;  %v8618_v44 = vld [vmem:[#allocation7 + $0xd4] sm:$0xf0] }
 0x26b   : > { %v1310_v36 = vmax.f32 %v1253_v32, 0.0  ;;  %12659 = vst [vmem:[#allocation18_spill] sm:$0xff] %v10356_v49 }
 0x26c   : > { %3411 = vperm.xlu1 %9017, %v2897_v24   ;;  %12660 = vst [vmem:[#allocation19_spill] sm:$0xff] %v10373_v38  ;;  %v7381_v38 = vld [vmem:[#allocation7 + $0xd0] sm:$0xf] }
 0x26d   : > { %6841 = vst [vmem:[%s9682_s22 + $0xf8] sm:$0xff] %v1310_v36  ;;  %v1398_v46 = vpack.c.bf16 %v1310_v36, %v1309_v5  ;;  %3406 = vperm.xlu0 %9016, %v2896_v41   ;;  %v2900_v5 = vld [vmem:[%s12635_s10 + $0x318] sm:$0xff] }
 0x26e   : > { %3416 = vperm.xlu2 %9018, %v2898_v47   ;;  %v2905_v47 = vld [vmem:[%s12635_s10 + $0x340] sm:$0xff] }
 0x26f   : > { %2111 = vmatpush.bf16.msrb.mxu2 %v1398_v46  ;;  %8911 = vmatpush.bf16.msra.mxu3 %v1398_v46 }
 0x270   : > { %v1255_v59 = vpop.f32.mrf.mxu2 }
 0x271   : > { %v1256_v57 = vadd.f32 %v1255_v59, %v10202_v27  ;;  %v1396_v27 = vpack.c.bf16 %v1306_v63, %v1305_v3  ;;  %v10375_v20 = vpop.permute.xlu2 %1588  ;;  %v10378_v28 = vpop.permute.xlu1 %1583  ;;  %v2903_v3 = vld [vmem:[%s12635_s10 + $0x330] sm:$0xff]  ;;  %v7277_v59 = vld [vmem:[#allocation7] sm:$0xf] }
 0x272   : > { %12661 = vst [vmem:[#allocation20_spill] sm:$0xff] %v10375_v20  ;;  %v10397_v36 = vpop.permute.xlu0 %1593 }
 0x273   : > { %v1311_v7 = vmax.f32 %v1256_v57, 0.0  ;;  %2112 = vmatpush.bf16.msrb.mxu2 %v1397_v53  ;;  %8912 = vmatpush.bf16.msra.mxu3 %v1397_v53  ;;  %12662 = vst [vmem:[#allocation21_spill] sm:$0xff] %v10378_v28  ;;  %v7341_v53 = vld [vmem:[#allocation7 + $0x80] sm:$0xf]  ;;  %v8602_v28 = vld [vmem:[#allocation7 + $0x54] sm:$0xf0] }
 0x274   : > { %3426 = vperm.xlu1 %9017, %v2900_v5   ;;  %12663 = vst [vmem:[#allocation22_spill] sm:$0xff] %v10397_v36 }
 0x275   : > { %6842 = vst [vmem:[%s9682_s22 + $0x100] sm:$0xff] %v1311_v7  ;;  %3421 = vperm.xlu0 %9016, %v2899_v4  }
 0x276   : > { %3431 = vperm.xlu2 %9018, %v2901_v11  }
 0x277   : > { %2113 = vmatpush.bf16.msrb.mxu2 %v1396_v27  ;;  %8913 = vmatpush.bf16.msra.mxu3 %v1396_v27 }
 0x278   : > { %v1257_v55 = vpop.f32.mrf.mxu2 }
 0x279   : > { %v1258_v25 = vadd.f32 %v1257_v55, %v10199_v6  ;;  %v10399_v41 = vpop.permute.xlu2 %1603  ;;  %v10404_v46 = vpop.permute.xlu1 %1598  ;;  %v2908_v55 = vld [vmem:[%s12635_s10 + $0x358] sm:$0xff] }
 0x27a   : > { %12664 = vst [vmem:[#allocation23_spill] sm:$0xff] %v10399_v41  ;;  %v8600_v41 = vld [vmem:[#allocation7 + $0x44] sm:$0xf0] }
 0x27b   : > { %v1312_v32 = vmax.f32 %v1258_v25, 0.0  ;;  %2114 = vmatpush.bf16.msrb.mxu2 %v10248_v56  ;;  %8914 = vmatpush.bf16.msra.mxu3 %v10248_v56  ;;  %12665 = vst [vmem:[#allocation24_spill] sm:$0xff] %v10404_v46  ;;  %v10421_v25 = vpop.permute.xlu0 %1608  ;;  %v7373_v46 = vld [vmem:[#allocation7 + $0xc0] sm:$0xf] }
 0x27c   : > { %3441 = vperm.xlu1 %9017, %v2903_v3   ;;  %12666 = vst [vmem:[#allocation25_spill] sm:$0xff] %v10421_v25  ;;  %v2926_v25 = vld [vmem:[%s12635_s10 + $0x3e8] sm:$0xff] }
 0x27d   : > { %6843 = vst [vmem:[%s9682_s22 + $0x108] sm:$0xff] %v1312_v32  ;;  %v10392_v6 = vpack.c.bf16 %v1312_v32, %v1311_v7  ;;  %3436 = vperm.xlu0 %9016, %v2902_v2   ;;  %v8608_v7 = vld [vmem:[#allocation7 + $0x84] sm:$0xf0] }
 0x27e   : > { %3446 = vperm.xlu2 %9018, %v2904_v19   ;;  %v7342_v27 = vor.u32 %v8608_v7, %v7341_v53  ;;  %v2910_v32 = vld [vmem:[%s12635_s10 + $0x368] sm:$0xff]  ;;  %v7349_v53 = vld [vmem:[#allocation7 + $0x90] sm:$0xf]  ;;  %v8610_v7 = vld [vmem:[#allocation7 + $0x94] sm:$0xf0] }
 0x27f   : > { %2115 = vmatpush.bf16.msrb.mxu2 %v10214_v48  ;;  %8915 = vmatpush.bf16.msra.mxu3 %v10214_v48  ;;  %v2906_v48 = vld [vmem:[%s12635_s10 + $0x348] sm:$0xff] }
 0x280   : > { %v1260_v56 = vpop.f32.mrf.mxu2 }
 0x281   : > { %v1261_v63 = vadd.f32 %v1260_v56, %v10182_v0  ;;  %v2907_v0 = vld [vmem:[%s12635_s10 + $0x350] sm:$0xff]  ;;  %v10436_v3 = vpop.permute.xlu1 %1613 }
 0x282   : > { %12668 = vst [vmem:[#allocation27_spill] sm:$0xff] %v10436_v3 }
 0x283   : > { %v1313_v24 = vmax.f32 %v1261_v63, 0.0  ;;  %2116 = vmatpush.bf16.msrb.mxu2 %v10178_v8  ;;  %8916 = vmatpush.bf16.msra.mxu3 %v10178_v8  ;;  %v8592_v8 = vld [vmem:[#allocation7 + $0x4] sm:$0xf0]  ;;  %v2911_v63 = vld [vmem:[%s12635_s10 + $0x370] sm:$0xff] }
 0x284   : > { %3456 = vperm.xlu1 %9017, %v2906_v48   ;;  %v7278_v11 = vor.u32 %v8592_v8, %v7277_v59  ;;  %v10449_v48 = vpop.permute.xlu0 %1623  ;;  %v8594_v8 = vld [vmem:[#allocation7 + $0x14] sm:$0xf0] }
 0x285   : > { %6844 = vst [vmem:[%s9682_s22 + $0x110] sm:$0xff] %v1313_v24  ;;  %3451 = vperm.xlu0 %9016, %v2905_v47   ;;  %v2913_v47 = vld [vmem:[%s12635_s10 + $0x380] sm:$0xff] }
 0x286   : > { %3461 = vperm.xlu2 %9018, %v2907_v0  }
 0x287   : > { %2117 = vmatpush.bf16.msrb.mxu2 %v10148_v18  ;;  %8917 = vmatpush.bf16.msra.mxu3 %v10148_v18  ;;  %v10425_v18 = vpop.permute.xlu2 %1618 }
 0x288   : > { %v1262_v57 = vpop.f32.mrf.mxu2  ;;  %12667 = vst [vmem:[#allocation26_spill] sm:$0xff] %v10425_v18 }
 0x289   : > { %v1263_v4 = vadd.f32 %v1262_v57, %v10197_v21  ;;  %v2909_v21 = vld [vmem:[%s12635_s10 + $0x360] sm:$0xff]  ;;  %v10453_v59 = vpop.permute.xlu1 %1628 }
 0x28b   : > { %v1314_v5 = vmax.f32 %v1263_v4, 0.0  ;;  %2118 = vmatpush.bf16.msrb.mxu2 %v10114_v29  ;;  %8918 = vmatpush.bf16.msra.mxu3 %v10114_v29 }
 0x28c   : > { %3471 = vperm.xlu1 %9017, %v2909_v21   ;;  %v2915_v21 = vld [vmem:[%s12635_s10 + $0x390] sm:$0xff] }
 0x28d   : > { %6845 = vst [vmem:[%s9682_s22 + $0x118] sm:$0xff] %v1314_v5  ;;  %v10434_v2 = vpack.c.bf16 %v1314_v5, %v1313_v24  ;;  %3466 = vperm.xlu0 %9016, %v2908_v55   ;;  %v2912_v24 = vld [vmem:[%s12635_s10 + $0x378] sm:$0xff]  ;;  %v2914_v55 = vld [vmem:[%s12635_s10 + $0x388] sm:$0xff] }
 0x28e   : > { %2119 = vmatmul.bf16.vlgmr.msrb.gmra.mxu2 %v7278_v11  ;;  %2159 = vmatmul.bf16.vlgmr.msra.gmra.mxu3 %v7342_v27  ;;  %v7350_v27 = vor.u32 %v8610_v7, %v7349_v53  ;;  %v7293_v53 = vld [vmem:[#allocation7 + $0x20] sm:$0xf]  ;;  %v8596_v7 = vld [vmem:[#allocation7 + $0x24] sm:$0xf0] }
 0x28f   : > { %3476 = vperm.xlu2 %9018, %v2910_v32   ;;  %v10451_v0 = vpop.permute.xlu2 %1633  ;;  %v2916_v32 = vld [vmem:[%s12635_s10 + $0x398] sm:$0xff] }
 0x290   : > { %v1265_v29 = vpop.f32.mrf.mxu2 }
 0x291   : > { %v1266_v19 = vadd.f32 %v1265_v29, %v10180_v1  ;;  %v7285_v1 = vld [vmem:[#allocation7 + $0x10] sm:$0xf] }
 0x292   : > { %v7286_v11 = vor.u32 %v8594_v8, %v7285_v1  ;;  %v2919_v8 = vld [vmem:[%s12635_s10 + $0x3b0] sm:$0xff] }
 0x293   : > { %v1315_v56 = vmax.f32 %v1266_v19, 0.0 }
 0x294   : > { %3486 = vperm.xlu1 %9017, %v2912_v24  }
 0x295   : > { %6846 = vst [vmem:[%s9682_s22 + $0x120] sm:$0xff] %v1315_v56  ;;  %3481 = vperm.xlu0 %9016, %v2911_v63  }
 0x297   : > { %3491 = vperm.xlu2 %9018, %v2913_v47   ;;  %v10470_v63 = vpop.permute.xlu2 %1648  ;;  %v10473_v47 = vpop.permute.xlu1 %1643 }
 0x298   : > { %v1267_v57 = vpop.f32.mrf.mxu2 }
 0x299   : > { %v1268_v4 = vadd.f32 %v1267_v57, %v10184_v9  ;;  %v10468_v9 = vpop.permute.xlu0 %1638  ;;  %v2918_v57 = vld [vmem:[%s12635_s10 + $0x3a8] sm:$0xff] }
 0x29b   : > { %v1316_v5 = vmax.f32 %v1268_v4, 0.0  ;;  %v7357_v4 = vld [vmem:[#allocation7 + $0xa0] sm:$0xf] }
 0x29c   : > { %3501 = vperm.xlu1 %9017, %v2915_v21  }
 0x29d   : > { %6847 = vst [vmem:[%s9682_s22 + $0x128] sm:$0xff] %v1316_v5  ;;  %v10466_v29 = vpack.c.bf16 %v1316_v5, %v1315_v56  ;;  %3496 = vperm.xlu0 %9016, %v2914_v55   ;;  %v2917_v56 = vld [vmem:[%s12635_s10 + $0x3a0] sm:$0xff]  ;;  %v8612_v5 = vld [vmem:[#allocation7 + $0xa4] sm:$0xf0] }
 0x29e   : > { %2124 = vmatmul.bf16.gmra.mxu2 %v7286_v11  ;;  %2164 = vmatmul.bf16.gmra.mxu3 %v7350_v27 }
 0x29f   : > { %3506 = vperm.xlu2 %9018, %v2916_v32   ;;  %v10488_v55 = vpop.permute.xlu2 %1663  ;;  %v7294_v32 = vor.u32 %v8596_v7, %v7293_v53 }
 0x2a0   : > { %v1270_v19 = vpop.f32.mrf.mxu2 }
 0x2a1   : > { %v1271_v24 = vadd.f32 %v1270_v19, %v10165_v51  ;;  %v10486_v27 = vpop.permute.xlu0 %1653  ;;  %v7358_v19 = vor.u32 %v8612_v5, %v7357_v4  ;;  %v2923_v4 = vld [vmem:[%s12635_s10 + $0x3d0] sm:$0xff] }
 0x2a3   : > { %v1317_v1 = vmax.f32 %v1271_v24, 0.0  ;;  %v2920_v24 = vld [vmem:[%s12635_s10 + $0x3b8] sm:$0xff] }
 0x2a4   : > { %3516 = vperm.xlu1 %9017, %v2918_v57   ;;  %v2921_v57 = vld [vmem:[%s12635_s10 + $0x3c0] sm:$0xff] }
 0x2a5   : > { %6848 = vst [vmem:[%s9682_s22 + $0x130] sm:$0xff] %v1317_v1  ;;  %3511 = vperm.xlu0 %9016, %v2917_v56   ;;  %v10493_v56 = vpop.permute.xlu1 %1658 }
 0x2a7   : > { %3521 = vperm.xlu2 %9018, %v2919_v8  }
 0x2a8   : > { %v1272_v51 = vpop.f32.mrf.mxu2 }
 0x2a9   : > { %v1273_v11 = vadd.f32 %v1272_v51, %v10162_v31  ;;  %v2922_v31 = vld [vmem:[%s12635_s10 + $0x3c8] sm:$0xff]  ;;  %v10511_v5 = vpop.permute.xlu0 %1668 }
 0x2ab   : > { %v1318_v21 = vmax.f32 %v1273_v11, 0.0  ;;  %v10513_v11 = vpop.permute.xlu2 %1678 }
 0x2ac   : > { %3531 = vperm.xlu1 %9017, %v2921_v57   ;;  %v7365_v57 = vld [vmem:[#allocation7 + $0xb0] sm:$0xf] }
 0x2ad   : > { %6849 = vst [vmem:[%s9682_s22 + $0x138] sm:$0xff] %v1318_v21  ;;  %v10502_v8 = vpack.c.bf16 %v1318_v21, %v1317_v1  ;;  %3526 = vperm.xlu0 %9016, %v2920_v24   ;;  %v2924_v1 = vld [vmem:[%s12635_s10 + $0x3d8] sm:$0xff]  ;;  %v10524_v21 = vpop.permute.xlu1 %1673 }
 0x2ae   : > { %2129 = vmatmul.bf16.gmra.mxu2 %v7294_v32  ;;  %2169 = vmatmul.bf16.gmra.mxu3 %v7358_v19  ;;  %v7301_v32 = vld [vmem:[#allocation7 + $0x30] sm:$0xf]  ;;  %v8598_v24 = vld [vmem:[#allocation7 + $0x34] sm:$0xf0] }
 0x2af   : > { %3536 = vperm.xlu2 %9018, %v2922_v31   ;;  %v8614_v31 = vld [vmem:[#allocation7 + $0xb4] sm:$0xf0]  ;;  %v7302_v18 = vor.u32 %v8598_v24, %v7301_v32 }
 0x2b0   : > { %v1275_v53 = vpop.f32.mrf.mxu2  ;;  %v7366_v3 = vor.u32 %v8614_v31, %v7365_v57  ;;  %v7309_v31 = vld [vmem:[#allocation7 + $0x40] sm:$0xf] }
 0x2b1   : > { %v10505_v51 = vadd.f32 %v1275_v53, %v10134_v12  ;;  %v2925_v12 = vld [vmem:[%s12635_s10 + $0x3e0] sm:$0xff] }
 0x2b3   : > { %v12640_v7 = vmax.f32 %v10505_v51, 0.0 }
 0x2b4   : > { %3546 = vperm.xlu1 %9017, %v2924_v1   ;;  %v10542_v1 = vpop.permute.xlu0 %1683 }
 0x2b5   : > { %6850 = vst [vmem:[%s9682_s22 + $0x140] sm:$0xff] %v12640_v7  ;;  %3541 = vperm.xlu0 %9016, %v2923_v4   ;;  %v2927_v4 = vld [vmem:[%s12635_s10 + $0x3f0] sm:$0xff]  ;;  %v10546_v32 = vpop.permute.xlu1 %1688 }
 0x2b7   : > { %3551 = vperm.xlu2 %9018, %v2925_v12   ;;  %v10544_v12 = vpop.permute.xlu2 %1693 }
 0x2b8   : > { %v1277_v19 = vpop.f32.mrf.mxu2 }
 0x2b9   : > { %v10527_v53 = vadd.f32 %v1277_v19, %v10154_v35  ;;  %v2928_v35 = vld [vmem:[%s12635_s10 + $0x3f8] sm:$0xff] }
 0x2bb   : > { %v12641_v7 = vmax.f32 %v10527_v53, 0.0 }
 0x2bc   : > { %3561 = vperm.xlu1 %9017, %v2927_v4  }
 0x2bd   : > { %6851 = vst [vmem:[%s9682_s22 + $0x148] sm:$0xff] %v12641_v7  ;;  %3556 = vperm.xlu0 %9016, %v2926_v25   ;;  %v8616_v25 = vld [vmem:[#allocation7 + $0xc4] sm:$0xf0] }
 0x2be   : > { %2134 = vmatmul.bf16.gmra.mxu2 %v7302_v18  ;;  %2174 = vmatmul.bf16.gmra.mxu3 %v7366_v3  ;;  %v7310_v3 = vor.u32 %v8600_v41, %v7309_v31  ;;  %v7374_v20 = vor.u32 %v8616_v25, %v7373_v46  ;;  %v7382_v46 = vor.u32 %v8618_v44, %v7381_v38  ;;  %v7325_v31 = vld [vmem:[#allocation7 + $0x60] sm:$0xf] }
 0x2bf   : > { %3566 = vperm.xlu2 %9018, %v2928_v35  }
 0x2c0   : > { %v1280_v19 = vpop.f32.mrf.mxu2 }
 0x2c1   : > { %v1281_v24 = vadd.f32 %v1280_v19, %v10132_v42  ;;  %v7317_v19 = vld [vmem:[#allocation7 + $0x50] sm:$0xf] }
 0x2c2   : > { %v7318_v41 = vor.u32 %v8602_v28, %v7317_v19  ;;  %v7333_v19 = vld [vmem:[#allocation7 + $0x70] sm:$0xf] }
 0x2c3   : > { %v1321_v57 = vmax.f32 %v1281_v24, 0.0 }
 0x2c5   : > { %6852 = vst [vmem:[%s9682_s22 + $0x150] sm:$0xff] %v1321_v57 }
 0x2c8   : > { %v1282_v7 = vpop.f32.mrf.mxu2 }
 0x2c9   : > { %v1283_v36 = vadd.f32 %v1282_v7, %v10139_v10 }
 0x2cb   : > { %v1322_v18 = vmax.f32 %v1283_v36, 0.0 }
 0x2cd   : > { %6853 = vst [vmem:[%s9682_s22 + $0x158] sm:$0xff] %v1322_v18 }
 0x2ce   : > { %2139 = vmatmul.bf16.gmra.mxu2 %v7310_v3  ;;  %2179 = vmatmul.bf16.gmra.mxu3 %v7374_v20  ;;  %v8604_v3 = vld [vmem:[#allocation7 + $0x64] sm:$0xf0] }
 0x2d0   : > { %v1285_v4 = vpop.f32.mrf.mxu2 }
 0x2d1   : > { %v1286_v42 = vadd.f32 %v1285_v4, %v10120_v34  ;;  %v7389_v4 = vld [vmem:[#allocation7 + $0xe0] sm:$0xf] }
 0x2d3   : > { %v1323_v35 = vmax.f32 %v1286_v42, 0.0  ;;  %v8620_v42 = vld [vmem:[#allocation7 + $0xe4] sm:$0xf0] }
 0x2d4   : > { %v7390_v28 = vor.u32 %v8620_v42, %v7389_v4  ;;  %v8626_v4 = vld [vmem:[#allocation7 + $0x114] sm:$0xf0]  ;;  %v7287_v42 = vld [vmem:[#allocation7 + $0x18] sm:$0xf0] }
 0x2d5   : > { %6854 = vst [vmem:[%s9682_s22 + $0x160] sm:$0xff] %v1323_v35 }
 0x2d8   : > { %v1287_v24 = vpop.f32.mrf.mxu2 }
 0x2d9   : > { %v1288_v10 = vadd.f32 %v1287_v24, %v10118_v22  ;;  %v7326_v24 = vor.u32 %v8604_v3, %v7325_v31  ;;  %v7413_v3 = vld [vmem:[#allocation7 + $0x110] sm:$0xf] }
 0x2db   : > { %v1324_v36 = vmax.f32 %v1288_v10, 0.0  ;;  %v8606_v10 = vld [vmem:[#allocation7 + $0x74] sm:$0xf0] }
 0x2dd   : > { %6855 = vst [vmem:[%s9682_s22 + $0x168] sm:$0xff] %v1324_v36  ;;  %v1405_v38 = vpack.c.bf16 %v1324_v36, %v1323_v35  ;;  %v8621_v35 = vld [vmem:[#allocation7 + $0xf4] sm:$0xf]  ;;  %v7399_v36 = vld [vmem:[#allocation7 + $0xf8] sm:$0xf0] }
 0x2de   : > { %2144 = vmatmul.bf16.gmra.mxu2 %v7318_v41  ;;  %2184 = vmatmul.bf16.gmra.mxu3 %v7382_v46  ;;  %v7397_v41 = vld [vmem:[#allocation7 + $0xf0] sm:$0xf]  ;;  %v8622_v46 = vld [vmem:[#allocation7 + $0xf4] sm:$0xf0] }
 0x2e0   : > { %v1290_v20 = vpop.f32.mrf.mxu2 }
 0x2e1   : > { %v1291_v34 = vadd.f32 %v1290_v20, %v10102_v16  ;;  %v1404_v16 = vpack.c.bf16 %v1322_v18, %v1321_v57  ;;  %v7405_v57 = vld [vmem:[#allocation7 + $0x100] sm:$0xf]  ;;  %v7279_v18 = vld [vmem:[#allocation7 + $0x8] sm:$0xf0] }
 0x2e3   : > { %v1325_v7 = vmax.f32 %v1291_v34, 0.0  ;;  %v7334_v34 = vor.u32 %v8606_v10, %v7333_v19  ;;  %v7421_v19 = vld [vmem:[#allocation7 + $0x120] sm:$0xf]  ;;  %v8628_v10 = vld [vmem:[#allocation7 + $0x124] sm:$0xf0] }
 0x2e5   : > { %6856 = vst [vmem:[%s9682_s22 + $0x170] sm:$0xff] %v1325_v7 }
 0x2e8   : > { %v1292_v25 = vpop.f32.mrf.mxu2 }
 0x2e9   : > { %v1293_v49 = vadd.f32 %v1292_v25, %v10116_v30  ;;  %v12669_v30 = vmax.f32 %v10505_v51, 0.0  ;;  %v8624_v51 = vld [vmem:[#allocation7 + $0x104] sm:$0xf0] }
 0x2ea   : > { %v7406_v31 = vor.u32 %v8624_v51, %v7405_v57 }
 0x2eb   : > { %v1326_v22 = vmax.f32 %v1293_v49, 0.0  ;;  %v12670_v49 = vmax.f32 %v10527_v53, 0.0  ;;  %v8591_v53 = vld [vmem:[#allocation7 + $0x4] sm:$0xf] }
 0x2ec   : > { %v7282_v25 = vor.u32 %v8591_v53, %v7279_v18  ;;  %v7429_v53 = vld [vmem:[#allocation7 + $0x130] sm:$0xf]  ;;  %v8630_v18 = vld [vmem:[#allocation7 + $0x134] sm:$0xf0] }
 0x2ed   : > { %6857 = vst [vmem:[%s9682_s22 + $0x178] sm:$0xff] %v1326_v22  ;;  %v1406_v44 = vpack.c.bf16 %v1326_v22, %v1325_v7  ;;  %v1403_v20 = vpack.c.bf16 %v12670_v49, %v12669_v30  ;;  %v7398_v7 = vor.u32 %v8622_v46, %v7397_v41  ;;  %v8623_v22 = vld [vmem:[#allocation7 + $0x104] sm:$0xf]  ;;  %v7295_v46 = vld [vmem:[#allocation7 + $0x28] sm:$0xf0] }
 0x2ee   : > { %2149 = vmatmul.bf16.gmra.mxu2 %v7326_v24  ;;  %2189 = vmatmul.bf16.gmra.mxu3 %v7390_v28  ;;  %v7407_v24 = vld [vmem:[#allocation7 + $0x108] sm:$0xf0]  ;;  %v8595_v41 = vld [vmem:[#allocation7 + $0x24] sm:$0xf]  ;;  %v8625_v30 = vld [vmem:[#allocation7 + $0x114] sm:$0xf] }
 0x2ef   : > { %2280 = vmatpush.bf16.msrb.mxu0 %v1406_v44  ;;  %8919 = vmatpush.bf16.msrb.mxu1 %v1406_v44  ;;  %v7414_v44 = vor.u32 %v8626_v4, %v7413_v3  ;;  %v7415_v49 = vld [vmem:[#allocation7 + $0x118] sm:$0xf0]  ;;  %v7430_v3 = vor.u32 %v8630_v18, %v7429_v53  ;;  %v8631_v18 = vld [vmem:[#allocation7 + $0x144] sm:$0xf] }
 0x2f0   : > { %v7418_v57 = vor.u32 %v8625_v30, %v7415_v49  ;;  %v7319_v53 = vld [vmem:[#allocation7 + $0x58] sm:$0xf0] }
 0x2f3   : > { %2281 = vmatpush.bf16.msrb.mxu0 %v1405_v38  ;;  %8920 = vmatpush.bf16.msrb.mxu1 %v1405_v38 }
 0x2f7   : > { %2282 = vmatpush.bf16.msrb.mxu0 %v1404_v16  ;;  %8921 = vmatpush.bf16.msrb.mxu1 %v1404_v16  ;;  %v7410_v16 = vor.u32 %v8623_v22, %v7407_v24  ;;  %v7437_v22 = vld [vmem:[#allocation7 + $0x140] sm:$0xf]  ;;  %v8632_v24 = vld [vmem:[#allocation7 + $0x144] sm:$0xf0] }
 0x2fb   : > { %2283 = vmatpush.bf16.msrb.mxu0 %v1403_v20  ;;  %8922 = vmatpush.bf16.msrb.mxu1 %v1403_v20 }
 0x2fe   : > { %2154 = vmatmul.bf16.gmra.mxu2 %v7334_v34  ;;  %2194 = vmatmul.bf16.gmra.mxu3 %v7398_v7  ;;  %v7422_v34 = vor.u32 %v8628_v10, %v7421_v19  ;;  %v7298_v7 = vor.u32 %v8595_v41, %v7295_v46  ;;  %v7431_v19 = vld [vmem:[#allocation7 + $0x138] sm:$0xf0]  ;;  %v7438_v41 = vor.u32 %v8632_v24, %v7437_v22  ;;  %v8636_v22 = vld [vmem:[#allocation7 + $0x164] sm:$0xf0]  ;;  %v8603_v24 = vld [vmem:[#allocation7 + $0x64] sm:$0xf] }
 0x2ff   : > { %2284 = vmatpush.bf16.msrb.mxu0 %v10502_v8  ;;  %8923 = vmatpush.bf16.msrb.mxu1 %v10502_v8  ;;  %v7402_v8 = vor.u32 %v8621_v35, %v7399_v36  ;;  %v8597_v35 = vld [vmem:[#allocation7 + $0x34] sm:$0xf]  ;;  %v7303_v36 = vld [vmem:[#allocation7 + $0x38] sm:$0xf0] }
 0x300   : > { %v7306_v4 = vor.u32 %v8597_v35, %v7303_v36  ;;  %v7439_v35 = vld [vmem:[#allocation7 + $0x148] sm:$0xf0] }
 0x303   : > { %2285 = vmatpush.bf16.msrb.mxu0 %v10466_v29  ;;  %8924 = vmatpush.bf16.msrb.mxu1 %v10466_v29 }
 0x307   : > { %2286 = vmatpush.bf16.msrb.mxu0 %v10434_v2  ;;  %8925 = vmatpush.bf16.msrb.mxu1 %v10434_v2  ;;  %v8593_v2 = vld [vmem:[#allocation7 + $0x14] sm:$0xf] }
 0x308   : > { %v7290_v38 = vor.u32 %v8593_v2, %v7287_v42 }
 0x30b   : > { %2287 = vmatpush.bf16.msrb.mxu0 %v10392_v6  ;;  %8926 = vmatpush.bf16.msrb.mxu1 %v10392_v6 }
 0x30e   : > { %2199 = vmatmul.bf16.gmra.mxu3 %v7406_v31  ;;  %2288 = vmatmul.bf16.vlgmr.msrb.gmra.mxu0 %v7282_v25  ;;  %v8627_v31 = vld [vmem:[#allocation7 + $0x124] sm:$0xf]  ;;  %v7423_v25 = vld [vmem:[#allocation7 + $0x128] sm:$0xf0] }
 0x30f   : > { %2363 = vmatmul.bf16.vlgmr.msrb.gmra.mxu1 %v7402_v8  ;;  %v7426_v2 = vor.u32 %v8627_v31, %v7423_v25 }
 0x311   : > { %v10572_v29 = vpop.f32.mrf.mxu3 }
 0x319   : > { %v10574_v28 = vpop.f32.mrf.mxu3 }
 0x31e   : > { %2204 = vmatmul.bf16.gmra.mxu3 %v7414_v44  ;;  %2293 = vmatmul.bf16.gmra.mxu0 %v7290_v38  ;;  %v8599_v44 = vld [vmem:[#allocation7 + $0x44] sm:$0xf]  ;;  %v7311_v38 = vld [vmem:[#allocation7 + $0x48] sm:$0xf0] }
 0x31f   : > { %2368 = vmatmul.bf16.gmra.mxu1 %v7410_v16  ;;  %v8629_v16 = vld [vmem:[#allocation7 + $0x134] sm:$0xf]  ;;  %v7314_v46 = vor.u32 %v8599_v44, %v7311_v38  ;;  %v7327_v44 = vld [vmem:[#allocation7 + $0x68] sm:$0xf0] }
 0x320   : > { %v7434_v30 = vor.u32 %v8629_v16, %v7431_v19  ;;  %v8633_v38 = vld [vmem:[#allocation7 + $0x154] sm:$0xf]  ;;  %v7447_v16 = vld [vmem:[#allocation7 + $0x158] sm:$0xf0]  ;;  %v2120_v19 = vpop.f32.mrf.mxu2 }
 0x321   : > { %v10576_v6 = vpop.f32.mrf.mxu3 }
 0x329   : > { %v10578_v20 = vpop.f32.mrf.mxu3 }
 0x32e   : > { %2209 = vmatmul.bf16.gmra.mxu3 %v7422_v34  ;;  %2298 = vmatmul.bf16.gmra.mxu0 %v7298_v7  ;;  %v7445_v34 = vld [vmem:[#allocation7 + $0x150] sm:$0xf]  ;;  %v8634_v7 = vld [vmem:[#allocation7 + $0x154] sm:$0xf0] }
 0x32f   : > { %2373 = vmatmul.bf16.gmra.mxu1 %v7418_v57  ;;  %v8601_v57 = vld [vmem:[#allocation7 + $0x54] sm:$0xf]  ;;  %v7446_v31 = vor.u32 %v8634_v7, %v7445_v34  ;;  %v2122_v7 = vpop.f32.mrf.mxu2 }
 0x330   : > { %v7322_v25 = vor.u32 %v8601_v57, %v7319_v53  ;;  %v7461_v57 = vld [vmem:[#allocation7 + $0x170] sm:$0xf]  ;;  %v8638_v53 = vld [vmem:[#allocation7 + $0x174] sm:$0xf0] }
 0x331   : > { %v10580_v51 = vpop.f32.mrf.mxu3 }
 0x332   : > { %12671 = vst [vmem:[#allocation28_spill] sm:$0xff] %v10580_v51 }
 0x339   : > { %v10582_v8 = vpop.f32.mrf.mxu3 }
 0x33a   : > { %12672 = vst [vmem:[#allocation29_spill] sm:$0xff] %v10582_v8 }
 0x33e   : > { %2214 = vmatmul.bf16.gmra.mxu3 %v7430_v3  ;;  %2303 = vmatmul.bf16.gmra.mxu0 %v7306_v4  ;;  %v7442_v3 = vor.u32 %v8631_v18, %v7439_v35  ;;  %v8605_v18 = vld [vmem:[#allocation7 + $0x74] sm:$0xf]  ;;  %v7335_v35 = vld [vmem:[#allocation7 + $0x78] sm:$0xf0] }
 0x33f   : > { %2378 = vmatmul.bf16.gmra.mxu1 %v7426_v2  ;;  %v7453_v2 = vld [vmem:[#allocation7 + $0x160] sm:$0xf] }
 0x341   : > { %v10584_v42 = vpop.f32.mrf.mxu3 }
 0x342   : > { %12673 = vst [vmem:[#allocation30_spill] sm:$0xff] %v10584_v42 }
 0x349   : > { %v10586_v10 = vpop.f32.mrf.mxu3 }
 0x34a   : > { %12674 = vst [vmem:[#allocation31_spill] sm:$0xff] %v10586_v10 }
 0x34e   : > { %2219 = vmatmul.bf16.gmra.mxu3 %v7438_v41  ;;  %2308 = vmatmul.bf16.gmra.mxu0 %v7314_v46  ;;  %v7454_v46 = vor.u32 %v8636_v22, %v7453_v2  ;;  %v2125_v2 = vpop.f32.mrf.mxu2 }
 0x34f   : > { %2383 = vmatmul.bf16.gmra.mxu1 %v7434_v30  ;;  %v7330_v30 = vor.u32 %v8603_v24, %v7327_v44  ;;  %v8640_v44 = vld [vmem:[#allocation7 + $0x184] sm:$0xf0] }
 0x351   : > { %v10588_v49 = vpop.f32.mrf.mxu3 }
 0x352   : > { %12675 = vst [vmem:[#allocation32_spill] sm:$0xff] %v10588_v49  ;;  %v7338_v49 = vor.u32 %v8605_v18, %v7335_v35 }
 0x356   : > { %v2127_v24 = vpop.f32.mrf.mxu2 }
 0x359   : > { %v10590_v36 = vpop.f32.mrf.mxu3 }
 0x35a   : > { %12676 = vst [vmem:[#allocation33_spill] sm:$0xff] %v10590_v36  ;;  %v7450_v36 = vor.u32 %v8633_v38, %v7447_v16  ;;  %v8607_v38 = vld [vmem:[#allocation7 + $0x84] sm:$0xf]  ;;  %v7343_v16 = vld [vmem:[#allocation7 + $0x88] sm:$0xf0] }
 0x35e   : > { %2224 = vmatmul.bf16.gmra.mxu3 %v7446_v31  ;;  %2313 = vmatmul.bf16.gmra.mxu0 %v7322_v25  ;;  %v8635_v31 = vld [vmem:[#allocation7 + $0x164] sm:$0xf]  ;;  %v7455_v25 = vld [vmem:[#allocation7 + $0x168] sm:$0xf0] }
 0x35f   : > { %2388 = vmatmul.bf16.gmra.mxu1 %v7442_v3 }
 0x361   : > { %v10592_v4 = vpop.f32.mrf.mxu3 }
 0x362   : > { %12677 = vst [vmem:[#allocation34_spill] sm:$0xff] %v10592_v4  ;;  %v7462_v4 = vor.u32 %v8638_v53, %v7461_v57 }
 0x369   : > { %v10594_v41 = vpop.f32.mrf.mxu3 }
 0x36a   : > { %12678 = vst [vmem:[#allocation35_spill] sm:$0xff] %v10594_v41  ;;  %v7458_v41 = vor.u32 %v8635_v31, %v7455_v25 }
 0x36e   : > { %2229 = vmatmul.bf16.gmra.mxu3 %v7454_v46  ;;  %2318 = vmatmul.bf16.gmra.mxu0 %v7330_v30  ;;  %v8637_v46 = vld [vmem:[#allocation7 + $0x174] sm:$0xf]  ;;  %v7463_v30 = vld [vmem:[#allocation7 + $0x178] sm:$0xf0] }
 0x36f   : > { %2393 = vmatmul.bf16.gmra.mxu1 %v7450_v36  ;;  %v7469_v36 = vld [vmem:[#allocation7 + $0x180] sm:$0xf]  ;;  %v7466_v53 = vor.u32 %v8637_v46, %v7463_v30  ;;  %v8642_v46 = vld [vmem:[#allocation7 + $0x194] sm:$0xf0]  ;;  %v8609_v30 = vld [vmem:[#allocation7 + $0x94] sm:$0xf] }
 0x370   : > { %v7470_v42 = vor.u32 %v8640_v44, %v7469_v36 }
 0x371   : > { %v10596_v34 = vpop.f32.mrf.mxu3 }
 0x372   : > { %12679 = vst [vmem:[#allocation36_spill] sm:$0xff] %v10596_v34  ;;  %v2121_v34 = vadd.f32 %v2120_v19, %v10217_v39 }
 0x379   : > { %v10598_v3 = vpop.f32.mrf.mxu3 }
 0x37a   : > { %12680 = vst [vmem:[#allocation37_spill] sm:$0xff] %v10598_v3  ;;  %v7346_v3 = vor.u32 %v8607_v38, %v7343_v16 }
 0x37e   : > { %2234 = vmatmul.bf16.gmra.mxu3 %v7462_v4  ;;  %2323 = vmatmul.bf16.gmra.mxu0 %v7338_v49  ;;  %v2130_v49 = vpop.f32.mrf.mxu2 }
 0x37f   : > { %2398 = vmatmul.bf16.gmra.mxu1 %v7458_v41  ;;  %v2123_v41 = vadd.f32 %v2122_v7, %v10224_v43 }
 0x381   : > { %v2195_v22 = vpop.f32.mrf.mxu3 }
 0x382   : > { %v2196_v4 = vadd.f32 %v2195_v22, %v10449_v48  ;;  %v7471_v48 = vld [vmem:[#allocation7 + $0x188] sm:$0xf0] }
 0x389   : > { %v2197_v10 = vpop.f32.mrf.mxu3 }
 0x38a   : > { %v2198_v25 = vadd.f32 %v2197_v10, %v10453_v59  ;;  %v2126_v59 = vadd.f32 %v2125_v2, %v10219_v40 }
 0x38b   : > { %v2289_v57 = vpop.f32.mrf.mxu0 }
 0x38c   : > { %v2290_v18 = vadd.f32 %v2289_v57, %v2121_v34  ;;  %v2364_v35 = vpop.f32.mrf.mxu1  ;;  %v7477_v34 = vld [vmem:[#allocation7 + $0x190] sm:$0xf]  ;;  %v7351_v57 = vld [vmem:[#allocation7 + $0x98] sm:$0xf0] }
 0x38d   : > { %v2365_v8 = vadd.f32 %v2364_v35, %v2196_v4  ;;  %v7478_v7 = vor.u32 %v8642_v46, %v7477_v34  ;;  %v7354_v35 = vor.u32 %v8609_v30, %v7351_v57  ;;  %v2132_v4 = vpop.f32.mrf.mxu2 }
 0x38e   : > { %2239 = vmatmul.bf16.gmra.mxu3 %v7470_v42  ;;  %2328 = vmatmul.bf16.gmra.mxu0 %v7346_v3  ;;  %v2449_v38 = vmax.f32 %v2290_v18, 0.0 }
 0x38f   : > { %2403 = vmatmul.bf16.gmra.mxu1 %v7466_v53  ;;  %v2479_v42 = vmax.f32 %v2365_v8, 0.0  ;;  %v8639_v53 = vld [vmem:[#allocation7 + $0x184] sm:$0xf] }
 0x391   : > { %v2200_v31 = vpop.f32.mrf.mxu3 }
 0x392   : > { %v2201_v18 = vadd.f32 %v2200_v31, %v10451_v0 }
 0x393   : > { %v2291_v39 = vpop.f32.mrf.mxu0 }
 0x394   : > { %v2292_v19 = vadd.f32 %v2291_v39, %v2123_v41  ;;  %v2366_v36 = vpop.f32.mrf.mxu1 }
 0x395   : > { %v2367_v44 = vadd.f32 %v2366_v36, %v2198_v25  ;;  %v7474_v25 = vor.u32 %v8639_v53, %v7471_v48  ;;  %v2128_v36 = vadd.f32 %v2127_v24, %v10237_v62  ;;  %v2135_v34 = vpop.f32.mrf.mxu2  ;;  %v8611_v53 = vld [vmem:[#allocation7 + $0xa4] sm:$0xf]  ;;  %v7359_v48 = vld [vmem:[#allocation7 + $0xa8] sm:$0xf0] }
 0x396   : > { %v2450_v16 = vmax.f32 %v2292_v19, 0.0 }
 0x397   : > { %v2480_v3 = vmax.f32 %v2367_v44, 0.0 }
 0x398   : > { %v10604_v22 = vpack.c.bf16 %v2450_v16, %v2449_v38 }
 0x399   : > { %v2528_v43 = vpack.c.bf16 %v2480_v3, %v2479_v42  ;;  %v2202_v10 = vpop.f32.mrf.mxu3  ;;  %v7485_v42 = vld [vmem:[#allocation7 + $0x1a0] sm:$0xf]  ;;  %v8644_v3 = vld [vmem:[#allocation7 + $0x1a4] sm:$0xf0] }
 0x39a   : > { %12681 = vst [vmem:[#allocation38_spill] sm:$0xff] %v10604_v22  ;;  %v2203_v40 = vadd.f32 %v2202_v10, %v10468_v9  ;;  %v2131_v9 = vadd.f32 %v2130_v49, %v10250_v60  ;;  %v7486_v10 = vor.u32 %v8644_v3, %v7485_v42 }
 0x39b   : > { %5178 = vmatpush.bf16.msra.mxu2 %v2528_v43  ;;  %v2294_v41 = vpop.f32.mrf.mxu0  ;;  %v8641_v43 = vld [vmem:[#allocation7 + $0x194] sm:$0xf] }
 0x39c   : > { %v2295_v8 = vadd.f32 %v2294_v41, %v2126_v59  ;;  %v2369_v39 = vpop.f32.mrf.mxu1  ;;  %v7479_v59 = vld [vmem:[#allocation7 + $0x198] sm:$0xf0] }
 0x39d   : > { %v2370_v19 = vadd.f32 %v2369_v39, %v2201_v18 }
 0x39e   : > { %2244 = vmatmul.bf16.gmra.mxu3 %v7478_v7  ;;  %2333 = vmatmul.bf16.gmra.mxu0 %v7354_v35  ;;  %v2451_v0 = vmax.f32 %v2295_v8, 0.0  ;;  %v7362_v35 = vor.u32 %v8611_v53, %v7359_v48  ;;  %v8643_v53 = vld [vmem:[#allocation7 + $0x1a4] sm:$0xf]  ;;  %v7487_v48 = vld [vmem:[#allocation7 + $0x1a8] sm:$0xf0] }
 0x39f   : > { %2408 = vmatmul.bf16.gmra.mxu1 %v7474_v25  ;;  %v2481_v30 = vmax.f32 %v2370_v19, 0.0  ;;  %v7482_v25 = vor.u32 %v8641_v43, %v7479_v59 }
 0x3a1   : > { %v2205_v44 = vpop.f32.mrf.mxu3 }
 0x3a2   : > { %v2206_v18 = vadd.f32 %v2205_v44, %v10473_v47 }
 0x3a3   : > { %v2296_v2 = vpop.f32.mrf.mxu0 }
 0x3a4   : > { %v2297_v38 = vadd.f32 %v2296_v2, %v2128_v36  ;;  %v2371_v16 = vpop.f32.mrf.mxu1  ;;  %v10616_v36 = vpop.f32.mrf.mxu2 }
 0x3a5   : > { %v2372_v46 = vadd.f32 %v2371_v16, %v2203_v40  ;;  %v2133_v40 = vadd.f32 %v2132_v4, %v10245_v58 }
 0x3a6   : > { %v2452_v31 = vmax.f32 %v2297_v38, 0.0 }
 0x3a7   : > { %v2482_v57 = vmax.f32 %v2372_v46, 0.0 }
 0x3a8   : > { %v10610_v7 = vpack.c.bf16 %v2452_v31, %v2451_v0  ;;  %v7493_v0 = vld [vmem:[#allocation7 + $0x1b0] sm:$0xf]  ;;  %v8646_v31 = vld [vmem:[#allocation7 + $0x1b4] sm:$0xf0] }
 0x3a9   : > { %v10612_v62 = vpack.c.bf16 %v2482_v57, %v2481_v30  ;;  %v2207_v24 = vpop.f32.mrf.mxu3  ;;  %v8613_v30 = vld [vmem:[#allocation7 + $0xb4] sm:$0xf]  ;;  %v7367_v57 = vld [vmem:[#allocation7 + $0xb8] sm:$0xf0] }
 0x3aa   : > { %v2208_v60 = vadd.f32 %v2207_v24, %v10470_v63  ;;  %v2136_v63 = vadd.f32 %v2135_v34, %v10268_v52  ;;  %v7370_v24 = vor.u32 %v8613_v30, %v7367_v57 }
 0x3ab   : > { %12682 = vst [vmem:[#allocation39_spill] sm:$0xff] %v10612_v62  ;;  %v2299_v41 = vpop.f32.mrf.mxu0 }
 0x3ac   : > { %v2300_v8 = vadd.f32 %v2299_v41, %v2131_v9  ;;  %v2374_v39 = vpop.f32.mrf.mxu1  ;;  %v2140_v58 = vpop.f32.mrf.mxu2  ;;  %v7494_v9 = vor.u32 %v8646_v31, %v7493_v0  ;;  %v7495_v0 = vld [vmem:[#allocation7 + $0x1b8] sm:$0xf0] }
 0x3ad   : > { %v2375_v19 = vadd.f32 %v2374_v39, %v2206_v18  ;;  %v7490_v18 = vor.u32 %v8643_v53, %v7487_v48 }
 0x3ae   : > { %2249 = vmatmul.bf16.gmra.mxu3 %v7486_v10  ;;  %2338 = vmatmul.bf16.gmra.mxu0 %v7362_v35  ;;  %v2453_v47 = vmax.f32 %v2300_v8, 0.0 }
 0x3af   : > { %2413 = vmatmul.bf16.gmra.mxu1 %v7482_v25  ;;  %v2483_v42 = vmax.f32 %v2375_v19, 0.0 }
 0x3b1   : > { %v2210_v2 = vpop.f32.mrf.mxu3 }
 0x3b2   : > { %v2211_v10 = vadd.f32 %v2210_v2, %v10486_v27  ;;  %v8648_v27 = vld [vmem:[#allocation7 + $0x1c4] sm:$0xf0]  ;;  %v10633_v2 = vpop.permute.xlu0 %1698 }
 0x3b3   : > { %v2301_v49 = vpop.f32.mrf.mxu0 }
 0x3b4   : > { %v2302_v38 = vadd.f32 %v2301_v49, %v2133_v40  ;;  %v2376_v16 = vpop.f32.mrf.mxu1  ;;  %v10628_v19 = vpop.f32.mrf.mxu2  ;;  %v7501_v49 = vld [vmem:[#allocation7 + $0x1c0] sm:$0xf] }
 0x3b5   : > { %v2377_v46 = vadd.f32 %v2376_v16, %v2208_v60 }
 0x3b6   : > { %v2454_v44 = vmax.f32 %v2302_v38, 0.0 }
 0x3b7   : > { %v2484_v3 = vmax.f32 %v2377_v46, 0.0  ;;  %v8615_v46 = vld [vmem:[#allocation7 + $0xc4] sm:$0xf] }
 0x3b8   : > { %v10620_v43 = vpack.c.bf16 %v2454_v44, %v2453_v47  ;;  %v7375_v47 = vld [vmem:[#allocation7 + $0xc8] sm:$0xf0]  ;;  %v8645_v44 = vld [vmem:[#allocation7 + $0x1b4] sm:$0xf] }
 0x3b9   : > { %v10622_v4 = vpack.c.bf16 %v2484_v3, %v2483_v42  ;;  %v2212_v59 = vpop.f32.mrf.mxu3  ;;  %v2141_v42 = vadd.f32 %v2140_v58, %v10270_v13  ;;  %v7378_v30 = vor.u32 %v8615_v46, %v7375_v47  ;;  %v7498_v48 = vor.u32 %v8645_v44, %v7495_v0  ;;  %v7503_v46 = vld [vmem:[#allocation7 + $0x1c8] sm:$0xf0] }
 0x3ba   : > { %v2213_v40 = vadd.f32 %v2212_v59, %v10493_v56  ;;  %v7502_v56 = vor.u32 %v8648_v27, %v7501_v49  ;;  %v8617_v27 = vld [vmem:[#allocation7 + $0xd4] sm:$0xf] }
 0x3bb   : > { %12683 = vst [vmem:[#allocation40_spill] sm:$0xff] %v10622_v4  ;;  %v2304_v35 = vpop.f32.mrf.mxu0 }
 0x3bc   : > { %v10626_v41 = vadd.f32 %v2304_v35, %v2136_v63  ;;  %v2379_v25 = vpop.f32.mrf.mxu1  ;;  %v10645_v35 = vpop.permute.xlu0 %1783 }
 0x3bd   : > { %v2380_v8 = vadd.f32 %v2379_v25, %v2211_v10  ;;  %v10643_v10 = vpop.permute.xlu1 %1703  ;;  %12685 = vst [vmem:[#allocation42_spill] sm:$0xff] %v10645_v35 }
 0x3be   : > { %2254 = vmatmul.bf16.gmra.mxu3 %v7494_v9  ;;  %2343 = vmatmul.bf16.gmra.mxu0 %v7370_v24  ;;  %v10641_v9 = vpop.f32.mrf.mxu2 }
 0x3bf   : > { %2418 = vmatmul.bf16.gmra.mxu1 %v7490_v18  ;;  %v2485_v38 = vmax.f32 %v2380_v8, 0.0  ;;  %v10650_v8 = vpop.permute.xlu2 %1708 }
 0x3c1   : > { %v2215_v39 = vpop.f32.mrf.mxu3 }
 0x3c2   : > { %v2216_v57 = vadd.f32 %v2215_v39, %v10488_v55  ;;  %v7509_v39 = vld [vmem:[#allocation7 + $0x1d0] sm:$0xf] }
 0x3c3   : > { %v10631_v52 = vpop.f32.mrf.mxu0 }
 0x3c4   : > { %v2381_v34 = vpop.f32.mrf.mxu1 }
 0x3c5   : > { %v2382_v60 = vadd.f32 %v2381_v34, %v2213_v40  ;;  %v8650_v40 = vld [vmem:[#allocation7 + $0x1d4] sm:$0xf0]  ;;  %v10654_v47 = vpop.permute.xlu1 %1788 }
 0x3c6   : > { %v10652_v34 = vpop.f32.mrf.mxu2  ;;  %12686 = vst [vmem:[#allocation43_spill] sm:$0xff] %v10654_v47  ;;  %v7510_v0 = vor.u32 %v8650_v40, %v7509_v39  ;;  %v8652_v40 = vld [vmem:[#allocation7 + $0x1e4] sm:$0xf0] }
 0x3c7   : > { %v2486_v16 = vmax.f32 %v2382_v60, 0.0 }
 0x3c9   : > { %v10635_v31 = vpack.c.bf16 %v2486_v16, %v2485_v38  ;;  %v2217_v3 = vpop.f32.mrf.mxu3  ;;  %v7383_v38 = vld [vmem:[#allocation7 + $0xd8] sm:$0xf0]  ;;  %v8647_v16 = vld [vmem:[#allocation7 + $0x1c4] sm:$0xf] }
 0x3ca   : > { %v2218_v58 = vadd.f32 %v2217_v3, %v10511_v5  ;;  %v10660_v3 = vpop.permute.xlu0 %1778 }
 0x3cb   : > { %12684 = vst [vmem:[#allocation41_spill] sm:$0xff] %v10635_v31  ;;  %v2309_v53 = vpop.f32.mrf.mxu0 }
 0x3cc   : > { %v10639_v63 = vadd.f32 %v2309_v53, %v2141_v42  ;;  %v2384_v59 = vpop.f32.mrf.mxu1  ;;  %v7386_v42 = vor.u32 %v8617_v27, %v7383_v38  ;;  %12688 = vst [vmem:[#allocation45_spill] sm:$0xff] %v10660_v3  ;;  %v8649_v27 = vld [vmem:[#allocation7 + $0x1d4] sm:$0xf]  ;;  %v7511_v38 = vld [vmem:[#allocation7 + $0x1d8] sm:$0xf0] }
 0x3cd   : > { %v2385_v24 = vadd.f32 %v2384_v59, %v2216_v57  ;;  %v7506_v57 = vor.u32 %v8647_v16, %v7503_v46  ;;  %v10667_v59 = vpop.permute.xlu2 %1773 }
 0x3ce   : > { %2259 = vmatmul.bf16.gmra.mxu3 %v7502_v56  ;;  %2348 = vmatmul.bf16.gmra.mxu0 %v7378_v30  ;;  %12689 = vst [vmem:[#allocation46_spill] sm:$0xff] %v10667_v59 }
 0x3cf   : > { %2423 = vmatmul.bf16.gmra.mxu1 %v7498_v48  ;;  %v2487_v60 = vmax.f32 %v2385_v24, 0.0  ;;  %v2150_v24 = vpop.f32.mrf.mxu2 }
 0x3d1   : > { %v2220_v13 = vpop.f32.mrf.mxu3 }
 0x3d2   : > { %v2221_v56 = vadd.f32 %v2220_v13, %v10524_v21  ;;  %v10675_v21 = vpop.permute.xlu0 %1753  ;;  %v7517_v13 = vld [vmem:[#allocation7 + $0x1e0] sm:$0xf] }
 0x3d3   : > { %v10648_v18 = vpop.f32.mrf.mxu0  ;;  %12691 = vst [vmem:[#allocation48_spill] sm:$0xff] %v10675_v21 }
 0x3d4   : > { %v2386_v55 = vpop.f32.mrf.mxu1 }
 0x3d5   : > { %v2387_v25 = vadd.f32 %v2386_v55, %v2218_v58  ;;  %v10671_v55 = vpop.permute.xlu1 %1763  ;;  %v10677_v16 = vpop.permute.xlu2 %1768 }
 0x3d6   : > { %12690 = vst [vmem:[#allocation47_spill] sm:$0xff] %v10671_v55 }
 0x3d7   : > { %v2488_v49 = vmax.f32 %v2387_v25, 0.0  ;;  %12692 = vst [vmem:[#allocation49_spill] sm:$0xff] %v10677_v16 }
 0x3d9   : > { %v10656_v44 = vpack.c.bf16 %v2488_v49, %v2487_v60  ;;  %v10658_v5 = vpop.f32.mrf.mxu3  ;;  %v8619_v60 = vld [vmem:[#allocation7 + $0xe4] sm:$0xf]  ;;  %v7391_v49 = vld [vmem:[#allocation7 + $0xe8] sm:$0xf0] }
 0x3da   : > { %v10685_v47 = vpop.permute.xlu0 %1748 }
 0x3db   : > { %12687 = vst [vmem:[#allocation44_spill] sm:$0xff] %v10656_v44  ;;  %v10663_v30 = vpop.f32.mrf.mxu0 }
 0x3dc   : > { %v2389_v53 = vpop.f32.mrf.mxu1  ;;  %12694 = vst [vmem:[#allocation51_spill] sm:$0xff] %v10685_v47 }
 0x3dd   : > { %v10665_v48 = vadd.f32 %v2389_v53, %v2221_v56  ;;  %v2152_v56 = vpop.f32.mrf.mxu2  ;;  %v7514_v53 = vor.u32 %v8649_v27, %v7511_v38  ;;  %v10683_v59 = vpop.permute.xlu1 %1758  ;;  %v8651_v27 = vld [vmem:[#allocation7 + $0x1e4] sm:$0xf]  ;;  %v7519_v38 = vld [vmem:[#allocation7 + $0x1e8] sm:$0xf0] }
 0x3de   : > { %2264 = vmatmul.bf16.gmra.mxu3 %v7510_v0  ;;  %2353 = vmatmul.bf16.gmra.mxu0 %v7386_v42  ;;  %v7518_v0 = vor.u32 %v8652_v40, %v7517_v13  ;;  %v7394_v42 = vor.u32 %v8619_v60, %v7391_v49  ;;  %12693 = vst [vmem:[#allocation50_spill] sm:$0xff] %v10683_v59  ;;  %v10691_v21 = vpop.permute.xlu2 %1743  ;;  %v7525_v60 = vld [vmem:[#allocation7 + $0x1f0] sm:$0xf]  ;;  %v8654_v49 = vld [vmem:[#allocation7 + $0x1f4] sm:$0xf0] }
 0x3df   : > { %2428 = vmatmul.bf16.gmra.mxu1 %v7506_v57  ;;  %12695 = vst [vmem:[#allocation52_spill] sm:$0xff] %v10691_v21  ;;  %v2153_v44 = vadd.f32 %v2152_v56, %v10315_v50  ;;  %v2146_v50 = vadd.f32 %v10641_v9, %v10295_v37  ;;  %v7527_v56 = vld [vmem:[#allocation7 + $0x1f8] sm:$0xf0] }
 0x3e1   : > { %v10669_v58 = vpop.f32.mrf.mxu3 }
 0x3e2   : > { %v10695_v59 = vpop.permute.xlu0 %1723 }
 0x3e3   : > { %v2316_v25 = vpop.f32.mrf.mxu0  ;;  %12697 = vst [vmem:[#allocation54_spill] sm:$0xff] %v10695_v59 }
 0x3e4   : > { %v10673_v39 = vpop.f32.mrf.mxu1 }
 0x3e5   : > { %v2155_v13 = vpop.f32.mrf.mxu2  ;;  %v10693_v40 = vpop.permute.xlu1 %1733 }
 0x3e6   : > { %12696 = vst [vmem:[#allocation53_spill] sm:$0xff] %v10693_v40  ;;  %v10699_v4 = vpop.permute.xlu2 %1738  ;;  %v2156_v21 = vadd.f32 %v2155_v13, %v10310_v23 }
 0x3e7   : > { %12698 = vst [vmem:[#allocation55_spill] sm:$0xff] %v10699_v4 }
 0x3e9   : > { %v10679_v46 = vpop.f32.mrf.mxu3 }
 0x3eb   : > { %v2319_v57 = vpop.f32.mrf.mxu0 }
 0x3ec   : > { %v10681_v55 = vpop.f32.mrf.mxu1 }
 0x3ed   : > { %v2157_v31 = vpop.f32.mrf.mxu2  ;;  %v10702_v40 = vpop.permute.xlu1 %1728 }
 0x3ee   : > { %2269 = vmatmul.bf16.gmra.mxu3 %v7518_v0  ;;  %2358 = vmatmul.bf16.gmra.mxu0 %v7394_v42  ;;  %v7526_v42 = vor.u32 %v8654_v49, %v7525_v60  ;;  %12699 = vst [vmem:[#allocation56_spill] sm:$0xff] %v10702_v40  ;;  %v2158_v51 = vadd.f32 %v2157_v31, %v10328_v15  ;;  %v10706_v60 = vpop.permute.xlu0 %1718 }
 0x3ef   : > { %2433 = vmatmul.bf16.gmra.mxu1 %v7514_v53  ;;  %v7522_v53 = vor.u32 %v8651_v27, %v7519_v38  ;;  %12700 = vst [vmem:[#allocation57_spill] sm:$0xff] %v10706_v60  ;;  %v2151_v27 = vadd.f32 %v2150_v24, %v10308_v33  ;;  %v1714_v60 = vpop.permute.xlu2 %1713  ;;  %v2161_v33 = vadd.f32 %v10572_v29, %v10339_v45 }
 0x3f1   : > { %v10687_v3 = vpop.f32.mrf.mxu3  ;;  %v2320_v23 = vadd.f32 %v2319_v57, %v2151_v27 }
 0x3f3   : > { %v2321_v35 = vpop.f32.mrf.mxu0 }
 0x3f4   : > { %v10689_v16 = vpop.f32.mrf.mxu1  ;;  %v2322_v38 = vadd.f32 %v2321_v35, %v2153_v44  ;;  %v2461_v35 = vmax.f32 %v2320_v23, 0.0 }
 0x3f5   : > { %v10718_v44 = vpop.permute.xlu1 %2931 }
 0x3f6   : > { %v2462_v31 = vmax.f32 %v2322_v38, 0.0  ;;  %v2457_v38 = vmax.f32 %v10639_v63, 0.0 }
 0x3f9   : > { %v2232_v0 = vpop.f32.mrf.mxu3 }
 0x3fb   : > { %v2324_v47 = vpop.f32.mrf.mxu0 }
 0x3fc   : > { %v10697_v62 = vpop.f32.mrf.mxu1  ;;  %v2325_v59 = vadd.f32 %v2324_v47, %v2156_v21  ;;  %v8653_v21 = vld [vmem:[#allocation7 + $0x1f4] sm:$0xf] }
 0x3fd   : > { %v7530_v9 = vor.u32 %v8653_v21, %v7527_v56 }
 0x3fe   : > { %2274 = vmatmul.bf16.gmra.mxu3 %v7526_v42  ;;  %v2463_v13 = vmax.f32 %v2325_v59, 0.0 }
 0x3ff   : > { %2438 = vmatmul.bf16.gmra.mxu1 %v7522_v53  ;;  %v2148_v53 = vadd.f32 %v10652_v34, %v10292_v17  ;;  %v2315_v17 = vadd.f32 %v10663_v30, %v2146_v50 }
 0x401   : > { %v2235_v22 = vpop.f32.mrf.mxu3  ;;  %v2317_v15 = vadd.f32 %v2316_v25, %v2148_v53  ;;  %v2459_v45 = vmax.f32 %v2315_v17, 0.0  ;;  %v10730_v53 = vpop.permute.xlu2 %2936 }
 0x402   : > { %v2236_v27 = vadd.f32 %v2235_v22, %v10643_v10  ;;  %v10734_v22 = vpop.permute.xlu1 %2946  ;;  %v2455_v10 = vmax.f32 %v10626_v41, 0.0 }
 0x403   : > { %v2326_v49 = vpop.f32.mrf.mxu0  ;;  %v2460_v24 = vmax.f32 %v2317_v15, 0.0 }
 0x404   : > { %v2327_v42 = vadd.f32 %v2326_v49, %v2158_v51  ;;  %v2401_v4 = vpop.f32.mrf.mxu1  ;;  %v2143_v51 = vadd.f32 %v10628_v19, %v10290_v54  ;;  %v10721_v49 = vpop.permute.xlu0 %2941  ;;  %v2138_v54 = vadd.f32 %v10616_v36, %v10272_v14  ;;  %v2233_v14 = vadd.f32 %v2232_v0, %v10633_v2 }
 0x405   : > { %v2518_v30 = vpack.c.bf16 %v2460_v24, %v2459_v45  ;;  %v8657_v45 = vld [vmem:[#allocation8 + $0xc] sm:$0xf0] }
 0x406   : > { %v2464_v40 = vmax.f32 %v2327_v42, 0.0  ;;  %v2312_v59 = vadd.f32 %v10648_v18, %v2143_v51  ;;  %v2307_v29 = vadd.f32 %v10631_v52, %v2138_v54  ;;  %v2163_v18 = vadd.f32 %v10574_v28, %v10336_v26 }
 0x407   : > { %v2231_v26 = vadd.f32 %v10687_v3, %v10544_v12  ;;  %v2402_v28 = vadd.f32 %v2401_v4, %v2233_v14  ;;  %v2226_v12 = vadd.f32 %v10669_v58, %v10542_v1  ;;  %v12702_v14 = vld [vmem:[#allocation38_spill] sm:$0xff] }
 0x408   : > { %v2520_v47 = vpack.c.bf16 %v2464_v40, %v2463_v13  ;;  %v2519_v40 = vpack.c.bf16 %v2462_v31, %v2461_v35  ;;  %v2458_v19 = vmax.f32 %v2312_v59, 0.0  ;;  %v2456_v52 = vmax.f32 %v2307_v29, 0.0 }
 0x409   : > { %v2237_v34 = vpop.f32.mrf.mxu3  ;;  %v2400_v0 = vadd.f32 %v10697_v62, %v2231_v26  ;;  %v2494_v41 = vmax.f32 %v2402_v28, 0.0  ;;  %v2166_v35 = vadd.f32 %v10576_v6, %v10352_v61  ;;  %v2395_v62 = vadd.f32 %v10681_v55, %v2226_v12  ;;  %v12706_v26 = vld [vmem:[#allocation44_spill] sm:$0xff]  ;;  %v7549_v12 = vld [vmem:[#allocation8 + $0x20] sm:$0xf] }
 0x40a   : > { %4849 = vmatpush.bf16.msra.mxu0 %v2520_v47  ;;  %v2238_v36 = vadd.f32 %v2237_v34, %v10650_v8  ;;  %v2517_v31 = vpack.c.bf16 %v2458_v19, %v2457_v38  ;;  %v2228_v8 = vadd.f32 %v10679_v46, %v10546_v32  ;;  %v2516_v51 = vpack.c.bf16 %v2456_v52, %v2455_v10 }
 0x40b   : > { %v2329_v37 = vpop.f32.mrf.mxu0  ;;  %v2223_v32 = vadd.f32 %v10658_v5, %v10513_v11  ;;  %v2493_v46 = vmax.f32 %v2400_v0, 0.0  ;;  %v2491_v11 = vmax.f32 %v2395_v62, 0.0  ;;  %v2489_v29 = vmax.f32 %v10665_v48, 0.0  ;;  %v12703_v48 = vld [vmem:[#allocation17_spill] sm:$0xff]  ;;  %v12708_v0 = vld [vmem:[#allocation19_spill] sm:$0xff] }
 0x40c   : > { %v2330_v25 = vadd.f32 %v2329_v37, %v2161_v33  ;;  %v2404_v57 = vpop.f32.mrf.mxu1  ;;  %v10739_v2 = vpop.permute.xlu0 %2956  ;;  %v2397_v4 = vadd.f32 %v10689_v16, %v2228_v8 }
 0x40d   : > { %v2405_v23 = vadd.f32 %v2404_v57, %v2236_v27  ;;  %v10756_v16 = vpop.permute.xlu2 %2951  ;;  %v2392_v59 = vadd.f32 %v10673_v39, %v2223_v32  ;;  %v2535_v6 = vpack.c.bf16 %v2494_v41, %v2493_v46  ;;  %v12701_v57 = vld [vmem:[#allocation18_spill] sm:$0xff]  ;;  %v7533_v39 = vld [vmem:[#allocation8] sm:$0xf] }
 0x40e   : > { %4850 = vmatpush.bf16.msra.mxu0 %v2519_v40  ;;  %v2465_v47 = vmax.f32 %v2330_v25, 0.0  ;;  %v2492_v24 = vmax.f32 %v2397_v4, 0.0  ;;  %v10762_v25 = vpop.permute.xlu1 %2961  ;;  %v2168_v40 = vadd.f32 %v10578_v20, %v12701_v57  ;;  %v8661_v4 = vld [vmem:[#allocation8 + $0x2c] sm:$0xf0]  ;;  %v12714_v57 = vld [vmem:[#allocation53_spill] sm:$0xff] }
 0x40f   : > { %2443 = vmatmul.bf16.gmra.mxu1 %v7530_v9  ;;  %v2495_v56 = vmax.f32 %v2405_v23, 0.0  ;;  %v2490_v55 = vmax.f32 %v2392_v59, 0.0  ;;  %v12704_v23 = vld [vmem:[#allocation28_spill] sm:$0xff] }
 0x411   : > { %v2240_v42 = vpop.f32.mrf.mxu3  ;;  %v2533_v27 = vpack.c.bf16 %v2490_v55, %v2489_v29 }
 0x412   : > { %4851 = vmatpush.bf16.msra.mxu0 %v2518_v30  ;;  %v2241_v37 = vadd.f32 %v2240_v42, %v1714_v60  ;;  %v2534_v60 = vpack.c.bf16 %v2492_v24, %v2491_v11  ;;  %v12712_v24 = vld [vmem:[#allocation21_spill] sm:$0xff] }
 0x413   : > { %v2331_v13 = vpop.f32.mrf.mxu0 }
 0x414   : > { %v2332_v50 = vadd.f32 %v2331_v13, %v2163_v18  ;;  %v2406_v15 = vpop.f32.mrf.mxu1  ;;  %v10764_v5 = vpop.permute.xlu0 %2971  ;;  %v7534_v18 = vor.u32 %v8657_v45, %v7533_v39  ;;  %v2171_v13 = vadd.f32 %v12704_v23, %v12703_v48  ;;  %v8665_v48 = vld [vmem:[#allocation8 + $0x4c] sm:$0xf0] }
 0x415   : > { %v2407_v63 = vadd.f32 %v2406_v15, %v2238_v36  ;;  %v10773_v36 = vpop.permute.xlu2 %2966  ;;  %v12705_v15 = vld [vmem:[#allocation54_spill] sm:$0xff] }
 0x416   : > { %v2466_v21 = vmax.f32 %v2332_v50, 0.0  ;;  %4852 = vmatpush.bf16.msra.mxu0 %v2517_v31 }
 0x417   : > { %v2496_v33 = vmax.f32 %v2407_v63, 0.0 }
 0x418   : > { %v10744_v17 = vpack.c.bf16 %v2466_v21, %v2465_v47  ;;  %v12707_v21 = vld [vmem:[#allocation41_spill] sm:$0xff] }
 0x419   : > { %v2536_v3 = vpack.c.bf16 %v2496_v33, %v2495_v56  ;;  %v10751_v34 = vpop.f32.mrf.mxu3  ;;  %v12709_v56 = vld [vmem:[#allocation29_spill] sm:$0xff] }
 0x41a   : > { %4853 = vmatpush.bf16.msra.mxu0 %v2516_v51  ;;  %v2173_v33 = vadd.f32 %v12709_v56, %v12708_v0 }
 0x41b   : > { %5507 = vmatpush.bf16.msrb.mxu3 %v2536_v3  ;;  %v2334_v9 = vpop.f32.mrf.mxu0  ;;  %v12710_v3 = vld [vmem:[#allocation40_spill] sm:$0xff] }
 0x41c   : > { %v2335_v1 = vadd.f32 %v2334_v9, %v2166_v35  ;;  %v2409_v58 = vpop.f32.mrf.mxu1  ;;  %v10783_v50 = vpop.permute.xlu0 %2986 }
 0x41d   : > { %v10759_v61 = vadd.f32 %v2409_v58, %v2241_v37  ;;  %v10790_v8 = vpop.permute.xlu2 %2981  ;;  %v7550_v37 = vor.u32 %v8661_v4, %v7549_v12  ;;  %v12711_v58 = vld [vmem:[#allocation39_spill] sm:$0xff] }
 0x41e   : > { %4854 = vmatpush.bf16.msra.mxu0 %v10620_v43  ;;  %v2467_v38 = vmax.f32 %v2335_v1, 0.0 }
 0x41f   : > { %5508 = vmatpush.bf16.msrb.mxu3 %v2535_v6  ;;  %v12713_v6 = vld [vmem:[#allocation30_spill] sm:$0xff] }
 0x420   : > { %v2176_v11 = vadd.f32 %v12713_v6, %v12712_v24  ;;  %v12725_v24 = vld [vmem:[#allocation33_spill] sm:$0xff] }
 0x421   : > { %v2245_v54 = vpop.f32.mrf.mxu3 }
 0x422   : > { %4855 = vmatpush.bf16.msra.mxu0 %v10610_v7  ;;  %v10777_v7 = vpop.permute.xlu1 %2976  ;;  %v2246_v31 = vadd.f32 %v2245_v54, %v12705_v15 }
 0x423   : > { %5509 = vmatpush.bf16.msrb.mxu3 %v2534_v60  ;;  %v2336_v43 = vpop.f32.mrf.mxu0 }
 0x424   : > { %v2337_v19 = vadd.f32 %v2336_v43, %v2168_v40  ;;  %v10770_v30 = vpop.f32.mrf.mxu1  ;;  %v10799_v46 = vpop.permute.xlu0 %3001 }
 0x425   : > { %v10808_v60 = vpop.permute.xlu2 %2996 }
 0x426   : > { %v2468_v42 = vmax.f32 %v2337_v19, 0.0  ;;  %4856 = vmatpush.bf16.msra.mxu0 %v12702_v14  ;;  %v7565_v14 = vld [vmem:[#allocation8 + $0x40] sm:$0xf] }
 0x427   : > { %5510 = vmatpush.bf16.msrb.mxu3 %v2533_v27  ;;  %v12715_v27 = vld [vmem:[#allocation20_spill] sm:$0xff] }
 0x428   : > { %v10775_v20 = vpack.c.bf16 %v2468_v42, %v2467_v38 }
 0x429   : > { %4857 = vmatmul.bf16.vlgmr.msra.gmra.mxu0 %v7534_v18  ;;  %v10781_v52 = vpop.f32.mrf.mxu3  ;;  %v12716_v18 = vld [vmem:[#allocation31_spill] sm:$0xff] }
 0x42a   : > { %v10794_v41 = vpop.permute.xlu1 %2991  ;;  %v2178_v38 = vadd.f32 %v12716_v18, %v12715_v27 }
 0x42b   : > { %5511 = vmatpush.bf16.msrb.mxu3 %v12706_v26  ;;  %v2339_v28 = vpop.f32.mrf.mxu0  ;;  %v7566_v26 = vor.u32 %v8665_v48, %v7565_v14 }
 0x42c   : > { %v2340_v63 = vadd.f32 %v2339_v28, %v2171_v13  ;;  %v2414_v10 = vpop.f32.mrf.mxu1  ;;  %v10815_v19 = vpop.permute.xlu0 %3016 }
 0x42d   : > { %v10787_v47 = vadd.f32 %v2414_v10, %v2246_v31  ;;  %v10821_v31 = vpop.permute.xlu2 %3011 }
 0x42e   : > { %v2469_v9 = vmax.f32 %v2340_v63, 0.0 }
 0x42f   : > { %5512 = vmatpush.bf16.msrb.mxu3 %v12707_v21 }
 0x431   : > { %v2250_v51 = vpop.f32.mrf.mxu3 }
 0x432   : > { %v2251_v40 = vadd.f32 %v2250_v51, %v12714_v57  ;;  %v10811_v29 = vpop.permute.xlu1 %3006 }
 0x433   : > { %5513 = vmatpush.bf16.msrb.mxu3 %v12710_v3  ;;  %v2341_v35 = vpop.f32.mrf.mxu0 }
 0x434   : > { %v2342_v32 = vadd.f32 %v2341_v35, %v2173_v33  ;;  %v10797_v62 = vpop.f32.mrf.mxu1  ;;  %v10827_v0 = vpop.permute.xlu0 %3031  ;;  %v12719_v33 = vld [vmem:[#allocation52_spill] sm:$0xff] }
 0x435   : > { %12718 = vst [vmem:[#allocation38_spill] sm:$0xff] %v10827_v0  ;;  %v10834_v35 = vpop.permute.xlu2 %3026 }
 0x436   : > { %v2470_v1 = vmax.f32 %v2342_v32, 0.0  ;;  %12720 = vst [vmem:[#allocation17_spill] sm:$0xff] %v10834_v35  ;;  %v12721_v32 = vld [vmem:[#allocation22_spill] sm:$0xff] }
 0x437   : > { %5514 = vmatpush.bf16.msrb.mxu3 %v12711_v58  ;;  %v12724_v58 = vld [vmem:[#allocation24_spill] sm:$0xff] }
 0x438   : > { %v10802_v59 = vpack.c.bf16 %v2470_v1, %v2469_v9  ;;  %v2183_v6 = vadd.f32 %v12725_v24, %v12724_v58  ;;  %v12733_v58 = vld [vmem:[#allocation25_spill] sm:$0xff]  ;;  %v12734_v24 = vld [vmem:[#allocation35_spill] sm:$0xff] }
 0x439   : > { %4862 = vmatmul.bf16.gmra.mxu0 %v7550_v37  ;;  %v10806_v55 = vpop.f32.mrf.mxu3  ;;  %v12722_v37 = vld [vmem:[#allocation32_spill] sm:$0xff] }
 0x43a   : > { %v10823_v10 = vpop.permute.xlu1 %3021  ;;  %v2181_v9 = vadd.f32 %v12722_v37, %v12721_v32  ;;  %v12731_v32 = vld [vmem:[#allocation23_spill] sm:$0xff]  ;;  %v12732_v37 = vld [vmem:[#allocation34_spill] sm:$0xff] }
 0x43b   : > { %v2344_v54 = vpop.f32.mrf.mxu0  ;;  %12717 = vst [vmem:[#allocation18_spill] sm:$0xff] %v10823_v10 }
 0x43c   : > { %v2345_v39 = vadd.f32 %v2344_v54, %v2176_v11  ;;  %v2419_v45 = vpop.f32.mrf.mxu1  ;;  %v8669_v54 = vld [vmem:[#allocation8 + $0x6c] sm:$0xf0] }
 0x43d   : > { %v10813_v43 = vadd.f32 %v2419_v45, %v2251_v40  ;;  %v7581_v40 = vld [vmem:[#allocation8 + $0x60] sm:$0xf] }
 0x43e   : > { %v2471_v28 = vmax.f32 %v2345_v39, 0.0  ;;  %v10842_v39 = vpop.permute.xlu0 %3046 }
 0x43f   : > { %12726 = vst [vmem:[#allocation54_spill] sm:$0xff] %v10842_v39 }
 0x441   : > { %v2255_v42 = vpop.f32.mrf.mxu3 }
 0x442   : > { %v2256_v51 = vadd.f32 %v2255_v42, %v12719_v33  ;;  %v10838_v1 = vpop.permute.xlu1 %3036 }
 0x443   : > { %v2346_v23 = vpop.f32.mrf.mxu0  ;;  %12723 = vst [vmem:[#allocation28_spill] sm:$0xff] %v10838_v1  ;;  %v8658_v1 = vld [vmem:[#allocation8 + $0x14] sm:$0xf0] }
 0x444   : > { %v2347_v13 = vadd.f32 %v2346_v23, %v2178_v38  ;;  %v10819_v15 = vpop.f32.mrf.mxu1  ;;  %v7582_v38 = vor.u32 %v8669_v54, %v7581_v40  ;;  %v10846_v23 = vpop.permute.xlu2 %3041  ;;  %v7597_v54 = vld [vmem:[#allocation8 + $0x80] sm:$0xf] }
 0x445   : > { %12727 = vst [vmem:[#allocation44_spill] sm:$0xff] %v10846_v23 }
 0x446   : > { %v2472_v63 = vmax.f32 %v2347_v13, 0.0 }
 0x448   : > { %v10825_v21 = vpack.c.bf16 %v2472_v63, %v2471_v28  ;;  %v12729_v28 = vld [vmem:[#allocation48_spill] sm:$0xff] }
 0x449   : > { %4867 = vmatmul.bf16.gmra.mxu0 %v7566_v26  ;;  %v10829_v56 = vpop.f32.mrf.mxu3 }
 0x44a   : > { %v10850_v26 = vpop.permute.xlu1 %3051 }
 0x44b   : > { %v2349_v12 = vpop.f32.mrf.mxu0  ;;  %12728 = vst [vmem:[#allocation41_spill] sm:$0xff] %v10850_v26 }
 0x44c   : > { %v2424_v4 = vpop.f32.mrf.mxu1  ;;  %v2350_v11 = vadd.f32 %v2349_v12, %v2181_v9  ;;  %v10853_v12 = vpop.permute.xlu0 %3061  ;;  %v2186_v9 = vadd.f32 %v12732_v37, %v12731_v32 }
 0x44d   : > { %v10832_v3 = vadd.f32 %v2424_v4, %v2256_v51  ;;  %12730 = vst [vmem:[#allocation19_spill] sm:$0xff] %v10853_v12 }
 0x44e   : > { %v2473_v42 = vmax.f32 %v2350_v11, 0.0 }
 0x451   : > { %v2260_v57 = vpop.f32.mrf.mxu3 }
 0x452   : > { %v2261_v63 = vadd.f32 %v2260_v57, %v12729_v28 }
 0x453   : > { %v2351_v45 = vpop.f32.mrf.mxu0 }
 0x454   : > { %v2352_v27 = vadd.f32 %v2351_v45, %v2183_v6  ;;  %v10844_v18 = vpop.f32.mrf.mxu1  ;;  %v2188_v6 = vadd.f32 %v12734_v24, %v12733_v58  ;;  %v8673_v45 = vld [vmem:[#allocation8 + $0x8c] sm:$0xf0]  ;;  %v10869_v32 = vpop.permute.xlu0 %3076 }
 0x455   : > { %v7598_v28 = vor.u32 %v8673_v45, %v7597_v54  ;;  %12737 = vst [vmem:[#allocation39_spill] sm:$0xff] %v10869_v32  ;;  %v12744_v54 = vld [vmem:[#allocation37_spill] sm:$0xff] }
 0x456   : > { %v2474_v14 = vmax.f32 %v2352_v27, 0.0  ;;  %v10863_v27 = vpop.permute.xlu2 %3056 }
 0x457   : > { %12735 = vst [vmem:[#allocation29_spill] sm:$0xff] %v10863_v27 }
 0x458   : > { %v2525_v48 = vpack.c.bf16 %v2474_v14, %v2473_v42  ;;  %v10867_v14 = vpop.permute.xlu1 %3066 }
 0x459   : > { %4872 = vmatmul.bf16.gmra.mxu0 %v7582_v38  ;;  %v10848_v13 = vpop.f32.mrf.mxu3  ;;  %12736 = vst [vmem:[#allocation40_spill] sm:$0xff] %v10867_v14 }
 0x45b   : > { %v2354_v33 = vpop.f32.mrf.mxu0 }
 0x45c   : > { %v2429_v51 = vpop.f32.mrf.mxu1  ;;  %v2355_v11 = vadd.f32 %v2354_v33, %v2186_v9  ;;  %v10881_v14 = vpop.permute.xlu0 %3091 }
 0x45d   : > { %v10855_v4 = vadd.f32 %v2429_v51, %v2261_v63  ;;  %12742 = vst [vmem:[#allocation53_spill] sm:$0xff] %v10881_v14 }
 0x45e   : > { %v2475_v63 = vmax.f32 %v2355_v11, 0.0  ;;  %v10875_v24 = vpop.permute.xlu2 %3071  ;;  %v12743_v11 = vld [vmem:[#allocation26_spill] sm:$0xff] }
 0x45f   : > { %12738 = vst [vmem:[#allocation21_spill] sm:$0xff] %v10875_v24  ;;  %v2193_v45 = vadd.f32 %v12744_v54, %v12743_v11  ;;  %v7541_v24 = vld [vmem:[#allocation8 + $0x8] sm:$0xf]  ;;  %v7629_v54 = vld [vmem:[#allocation8 + $0xc0] sm:$0xf] }
 0x460   : > { %v10877_v12 = vpop.permute.xlu1 %3081  ;;  %v7542_v35 = vor.u32 %v8658_v1, %v7541_v24 }
 0x461   : > { %v10861_v40 = vpop.f32.mrf.mxu3  ;;  %12739 = vst [vmem:[#allocation30_spill] sm:$0xff] %v10877_v12 }
 0x462   : > { %5515 = vmatmul.bf16.vlgmr.msrb.gmra.mxu3 %v7542_v35  ;;  %v8662_v35 = vld [vmem:[#allocation8 + $0x34] sm:$0xf0] }
 0x463   : > { %v2356_v57 = vpop.f32.mrf.mxu0 }
 0x464   : > { %v2357_v38 = vadd.f32 %v2356_v57, %v2188_v6  ;;  %v10865_v42 = vpop.f32.mrf.mxu1  ;;  %v12740_v6 = vld [vmem:[#allocation27_spill] sm:$0xff]  ;;  %v12741_v57 = vld [vmem:[#allocation36_spill] sm:$0xff] }
 0x465   : > { %v2191_v27 = vadd.f32 %v12741_v57, %v12740_v6 }
 0x466   : > { %v2476_v51 = vmax.f32 %v2357_v38, 0.0  ;;  %v10887_v6 = vpop.permute.xlu2 %3086 }
 0x467   : > { %12745 = vst [vmem:[#allocation20_spill] sm:$0xff] %v10887_v6 }
 0x468   : > { %v2526_v37 = vpack.c.bf16 %v2476_v51, %v2475_v63  ;;  %v8677_v51 = vld [vmem:[#allocation8 + $0xac] sm:$0xf0]  ;;  %v10889_v14 = vpop.permute.xlu1 %3096 }
 0x469   : > { %4877 = vmatmul.bf16.gmra.mxu0 %v7598_v28  ;;  %v10871_v33 = vpop.f32.mrf.mxu3  ;;  %v7613_v28 = vld [vmem:[#allocation8 + $0xa0] sm:$0xf]  ;;  %12746 = vst [vmem:[#allocation31_spill] sm:$0xff] %v10889_v14 }
 0x46a   : > { %v7614_v23 = vor.u32 %v8677_v51, %v7613_v28  ;;  %v8655_v51 = vld [vmem:[#allocation8 + $0x4] sm:$0xf] }
 0x46b   : > { %v2359_v9 = vpop.f32.mrf.mxu0 }
 0x46c   : > { %v10873_v58 = vpop.f32.mrf.mxu1  ;;  %v2360_v38 = vadd.f32 %v2359_v9, %v2191_v27  ;;  %v10891_v27 = vpop.permute.xlu0 %3106 }
 0x46d   : > { %12747 = vst [vmem:[#allocation52_spill] sm:$0xff] %v10891_v27 }
 0x46e   : > { %v2477_v12 = vmax.f32 %v2360_v38, 0.0  ;;  %v10893_v11 = vpop.permute.xlu2 %3101 }
 0x46f   : > { %12748 = vst [vmem:[#allocation22_spill] sm:$0xff] %v10893_v11 }
 0x471   : > { %v2270_v63 = vpop.f32.mrf.mxu3 }
 0x473   : > { %v2361_v32 = vpop.f32.mrf.mxu0 }
 0x474   : > { %v2362_v26 = vadd.f32 %v2361_v32, %v2193_v45  ;;  %v10885_v39 = vpop.f32.mrf.mxu1  ;;  %v8681_v45 = vld [vmem:[#allocation8 + $0xcc] sm:$0xf0] }
 0x475   : > { %v7630_v24 = vor.u32 %v8681_v45, %v7629_v54 }
 0x476   : > { %v2478_v0 = vmax.f32 %v2362_v26, 0.0  ;;  %v10895_v26 = vpop.permute.xlu1 %3111 }
 0x477   : > { %12749 = vst [vmem:[#allocation32_spill] sm:$0xff] %v10895_v26 }
 0x478   : > { %v2527_v57 = vpack.c.bf16 %v2478_v0, %v2477_v12  ;;  %v7557_v0 = vld [vmem:[#allocation8 + $0x28] sm:$0xf]  ;;  %v10897_v12 = vpop.permute.xlu0 %3121 }
 0x479   : > { %4882 = vmatmul.bf16.gmra.mxu0 %v7614_v23  ;;  %v2272_v9 = vpop.f32.mrf.mxu3  ;;  %12750 = vst [vmem:[#allocation24_spill] sm:$0xff] %v10897_v12  ;;  %v7558_v38 = vor.u32 %v8662_v35, %v7557_v0  ;;  %v12754_v12 = vld [vmem:[#allocation42_spill] sm:$0xff]  ;;  %v8685_v0 = vld [vmem:[#allocation8 + $0xec] sm:$0xf0] }
 0x47a   : > { %5179 = vmatpush.bf16.msra.mxu2 %v2527_v57  ;;  %v7535_v57 = vld [vmem:[#allocation8 + $0x10] sm:$0xf0] }
 0x47b   : > { %5520 = vmatmul.bf16.gmra.mxu3 %v7558_v38  ;;  %v12756_v38 = vld [vmem:[#allocation43_spill] sm:$0xff] }
 0x47c   : > { %v2439_v32 = vpop.f32.mrf.mxu1 }
 0x47e   : > { %5180 = vmatpush.bf16.msra.mxu2 %v2526_v37  ;;  %v10901_v37 = vpop.permute.xlu2 %3116  ;;  %v10903_v28 = vpop.permute.xlu1 %3126 }
 0x47f   : > { %12751 = vst [vmem:[#allocation33_spill] sm:$0xff] %v10901_v37 }
 0x480   : > { %12752 = vst [vmem:[#allocation48_spill] sm:$0xff] %v10903_v28  ;;  %v10906_v54 = vpop.permute.xlu0 %3136 }
 0x481   : > { %v2275_v23 = vpop.f32.mrf.mxu3  ;;  %12753 = vst [vmem:[#allocation23_spill] sm:$0xff] %v10906_v54 }
 0x482   : > { %5181 = vmatpush.bf16.msra.mxu2 %v2525_v48  ;;  %v2276_v26 = vadd.f32 %v2275_v23, %v12754_v12  ;;  %v7573_v12 = vld [vmem:[#allocation8 + $0x48] sm:$0xf]  ;;  %v8666_v23 = vld [vmem:[#allocation8 + $0x54] sm:$0xf0] }
 0x484   : > { %v2441_v1 = vpop.f32.mrf.mxu1 }
 0x486   : > { %5182 = vmatpush.bf16.msra.mxu2 %v10825_v21  ;;  %v7538_v21 = vor.u32 %v8655_v51, %v7535_v57  ;;  %v10912_v11 = vpop.permute.xlu2 %3131  ;;  %v7574_v51 = vor.u32 %v8666_v23, %v7573_v12  ;;  %v12760_v57 = vld [vmem:[#allocation49_spill] sm:$0xff] }
 0x487   : > { %12757 = vst [vmem:[#allocation34_spill] sm:$0xff] %v10912_v11 }
 0x489   : > { %4887 = vmatmul.bf16.gmra.mxu0 %v7630_v24  ;;  %v2277_v45 = vpop.f32.mrf.mxu3  ;;  %v7645_v24 = vld [vmem:[#allocation8 + $0xe0] sm:$0xf] }
 0x48a   : > { %5183 = vmatpush.bf16.msra.mxu2 %v10802_v59  ;;  %v12755_v59 = vld [vmem:[#allocation45_spill] sm:$0xff]  ;;  %v2278_v37 = vadd.f32 %v2277_v45, %v12756_v38  ;;  %v7646_v10 = vor.u32 %v8685_v0, %v7645_v24 }
 0x48b   : > { %v2273_v35 = vadd.f32 %v2272_v9, %v12755_v59  ;;  %v2268_v9 = vadd.f32 %v10871_v33, %v12760_v57  ;;  %5525 = vmatmul.bf16.gmra.mxu3 %v7574_v51  ;;  %v7661_v51 = vld [vmem:[#allocation8 + $0x100] sm:$0xf]  ;;  %v12767_v57 = vld [vmem:[#allocation55_spill] sm:$0xff] }
 0x48c   : > { %v2444_v48 = vpop.f32.mrf.mxu1 }
 0x48d   : > { %v2445_v27 = vadd.f32 %v2444_v48, %v2276_v26  ;;  %v2442_v6 = vadd.f32 %v2441_v1, %v2273_v35  ;;  %v12761_v48 = vld [vmem:[#allocation47_spill] sm:$0xff] }
 0x48e   : > { %5184 = vmatpush.bf16.msra.mxu2 %v10775_v20  ;;  %v12758_v20 = vld [vmem:[#allocation46_spill] sm:$0xff]  ;;  %v2266_v38 = vadd.f32 %v10861_v40, %v12761_v48  ;;  %v7551_v40 = vld [vmem:[#allocation8 + $0x30] sm:$0xf0]  ;;  %v10928_v35 = vpop.permute.xlu2 %3146 }
 0x48f   : > { %v2271_v14 = vadd.f32 %v2270_v63, %v12758_v20  ;;  %v2511_v45 = vmax.f32 %v2445_v27, 0.0  ;;  %v2437_v63 = vadd.f32 %v10885_v39, %v2268_v9  ;;  %v2510_v1 = vmax.f32 %v2442_v6, 0.0  ;;  %12764 = vst [vmem:[#allocation27_spill] sm:$0xff] %v10928_v35  ;;  %v12765_v39 = vld [vmem:[#allocation51_spill] sm:$0xff] }
 0x490   : > { %v2435_v0 = vadd.f32 %v10873_v58, %v2266_v38  ;;  %v2253_v9 = vadd.f32 %v10806_v55, %v12767_v57  ;;  %v2503_v55 = vmax.f32 %v10832_v3, 0.0  ;;  %v7543_v57 = vld [vmem:[#allocation8 + $0x18] sm:$0xf0] }
 0x491   : > { %v2440_v59 = vadd.f32 %v2439_v32, %v2271_v14  ;;  %v2508_v27 = vmax.f32 %v2437_v63, 0.0  ;;  %v8670_v63 = vld [vmem:[#allocation8 + $0x74] sm:$0xf0] }
 0x492   : > { %5185 = vmatpush.bf16.msra.mxu2 %v10744_v17  ;;  %v10915_v17 = vpop.permute.xlu1 %3141  ;;  %v2507_v6 = vmax.f32 %v2435_v0, 0.0 }
 0x493   : > { %12759 = vst [vmem:[#allocation25_spill] sm:$0xff] %v10915_v17  ;;  %v2509_v33 = vmax.f32 %v2440_v59, 0.0  ;;  %v2505_v59 = vmax.f32 %v10855_v4, 0.0  ;;  %v8706_v17 = vld [vmem:[#allocation8 + $0x194] sm:$0xf0] }
 0x494   : > { %v2446_v28 = vpop.f32.mrf.mxu1  ;;  %v2542_v12 = vpack.c.bf16 %v2508_v27, %v2507_v6  ;;  %v12772_v27 = vld [vmem:[#allocation57_spill] sm:$0xff]  ;;  %v7567_v6 = vld [vmem:[#allocation8 + $0x50] sm:$0xf0] }
 0x495   : > { %v2447_v54 = vadd.f32 %v2446_v28, %v2278_v37  ;;  %5186 = vmatmul.bf16.vlgmr.msra.gmra.mxu2 %v7538_v21  ;;  %v10922_v28 = vpop.permute.xlu0 %3151  ;;  %v12763_v21 = vld [vmem:[#allocation50_spill] sm:$0xff]  ;;  %v2543_v32 = vpack.c.bf16 %v2510_v1, %v2509_v33 }
 0x496   : > { %12762 = vst [vmem:[#allocation35_spill] sm:$0xff] %v10922_v28  ;;  %v2263_v24 = vadd.f32 %v10848_v13, %v12763_v21  ;;  %v12769_v21 = vld [vmem:[#allocation56_spill] sm:$0xff]  ;;  %v10946_v4 = vpop.permute.xlu2 %3161 }
 0x497   : > { %v2512_v26 = vmax.f32 %v2447_v54, 0.0  ;;  %v8659_v54 = vld [vmem:[#allocation8 + $0x24] sm:$0xf]  ;;  %12770 = vst [vmem:[#allocation37_spill] sm:$0xff] %v10946_v4 }
 0x498   : > { %v2432_v14 = vadd.f32 %v10865_v42, %v2263_v24  ;;  %v7554_v23 = vor.u32 %v8659_v54, %v7551_v40  ;;  %v8689_v42 = vld [vmem:[#allocation8 + $0x10c] sm:$0xf0]  ;;  %v2248_v24 = vadd.f32 %v10781_v52, %v12769_v21  ;;  %v2501_v54 = vmax.f32 %v10813_v43, 0.0  ;;  %v8667_v21 = vld [vmem:[#allocation8 + $0x64] sm:$0xf] }
 0x499   : > { %v2544_v37 = vpack.c.bf16 %v2512_v26, %v2511_v45  ;;  %4892 = vmatmul.bf16.gmra.mxu0 %v7646_v10  ;;  %v2258_v10 = vadd.f32 %v10829_v56, %v12765_v39  ;;  %v2422_v56 = vadd.f32 %v10819_v15, %v2253_v9  ;;  %v7662_v38 = vor.u32 %v8689_v42, %v7661_v51  ;;  %v8693_v51 = vld [vmem:[#allocation8 + $0x12c] sm:$0xf0]  ;;  %v8656_v42 = vld [vmem:[#allocation8 + $0xc] sm:$0xf] }
 0x49a   : > { %v10932_v20 = vpop.permute.xlu1 %3156  ;;  %v2506_v58 = vmax.f32 %v2432_v14, 0.0  ;;  %v2417_v15 = vadd.f32 %v10797_v62, %v2248_v24  ;;  %v8663_v62 = vld [vmem:[#allocation8 + $0x44] sm:$0xf]  ;;  %v7583_v24 = vld [vmem:[#allocation8 + $0x70] sm:$0xf0] }
 0x49b   : > { %5836 = vmatpush.bf16.msra.mxu1 %v2544_v37  ;;  %12766 = vst [vmem:[#allocation36_spill] sm:$0xff] %v10932_v20  ;;  %v2427_v13 = vadd.f32 %v10844_v18, %v2258_v10  ;;  %v7589_v18 = vld [vmem:[#allocation8 + $0x68] sm:$0xf]  ;;  %v2502_v0 = vmax.f32 %v2422_v56, 0.0 }
 0x49c   : > { %v2541_v48 = vpack.c.bf16 %v2506_v58, %v2505_v59  ;;  %v7590_v37 = vor.u32 %v8670_v63, %v7589_v18  ;;  %v2500_v3 = vmax.f32 %v2417_v15, 0.0  ;;  %v7586_v15 = vor.u32 %v8667_v21, %v7583_v24  ;;  %v7637_v21 = vld [vmem:[#allocation8 + $0xc8] sm:$0xf]  ;;  %v8682_v24 = vld [vmem:[#allocation8 + $0xd4] sm:$0xf0] }
 0x49d   : > { %v10938_v45 = vpop.permute.xlu0 %3166  ;;  %v2504_v26 = vmax.f32 %v2427_v13, 0.0  ;;  %v2539_v40 = vpack.c.bf16 %v2502_v0, %v2501_v54  ;;  %v2499_v13 = vmax.f32 %v10787_v47, 0.0  ;;  %v8674_v47 = vld [vmem:[#allocation8 + $0x94] sm:$0xf0]  ;;  %v7559_v54 = vld [vmem:[#allocation8 + $0x38] sm:$0xf0] }
 0x49e   : > { %12768 = vst [vmem:[#allocation26_spill] sm:$0xff] %v10938_v45  ;;  %5530 = vmatmul.bf16.gmra.mxu3 %v7590_v37  ;;  %v10960_v43 = vpop.permute.xlu2 %3176 }
 0x49f   : > { %5837 = vmatpush.bf16.msra.mxu1 %v2543_v32  ;;  %v2540_v33 = vpack.c.bf16 %v2504_v26, %v2503_v55  ;;  %v2243_v32 = vadd.f32 %v10751_v34, %v12772_v27  ;;  %v7677_v34 = vld [vmem:[#allocation8 + $0x120] sm:$0xf]  ;;  %12774 = vst [vmem:[#allocation43_spill] sm:$0xff] %v10960_v43  ;;  %v7605_v26 = vld [vmem:[#allocation8 + $0x88] sm:$0xf] }
 0x4a0   : > { %v7678_v56 = vor.u32 %v8693_v51, %v7677_v34  ;;  %v7606_v18 = vor.u32 %v8674_v47, %v7605_v26  ;;  %v8697_v27 = vld [vmem:[#allocation8 + $0x14c] sm:$0xf0]  ;;  %v8671_v51 = vld [vmem:[#allocation8 + $0x84] sm:$0xf]  ;;  %v8664_v47 = vld [vmem:[#allocation8 + $0x4c] sm:$0xf] }
 0x4a1   : > { %v2412_v52 = vadd.f32 %v10770_v30, %v2243_v32  ;;  %v2497_v30 = vmax.f32 %v10759_v61, 0.0  ;;  %v8660_v32 = vld [vmem:[#allocation8 + $0x2c] sm:$0xf] }
 0x4a2   : > { %v10949_v14 = vpop.permute.xlu1 %3171 }
 0x4a3   : > { %5838 = vmatpush.bf16.msra.mxu1 %v2542_v12  ;;  %12771 = vst [vmem:[#allocation42_spill] sm:$0xff] %v10949_v14  ;;  %v2498_v58 = vmax.f32 %v2412_v52, 0.0  ;;  %v2538_v12 = vpack.c.bf16 %v2500_v3, %v2499_v13  ;;  %v7621_v3 = vld [vmem:[#allocation8 + $0xa8] sm:$0xf] }
 0x4a5   : > { %5191 = vmatmul.bf16.gmra.mxu2 %v7554_v23  ;;  %v10955_v39 = vpop.permute.xlu0 %3181  ;;  %v7570_v23 = vor.u32 %v8663_v62, %v7567_v6  ;;  %v2537_v59 = vpack.c.bf16 %v2498_v58, %v2497_v30  ;;  %v7562_v6 = vor.u32 %v8660_v32, %v7559_v54  ;;  %v7599_v30 = vld [vmem:[#allocation8 + $0x90] sm:$0xf0]  ;;  %v7638_v32 = vor.u32 %v8682_v24, %v7637_v21  ;;  %v8686_v21 = vld [vmem:[#allocation8 + $0xf4] sm:$0xf0] }
 0x4a6   : > { %v10941_v1 = vpop.f32.mrf.mxu0  ;;  %12773 = vst [vmem:[#allocation45_spill] sm:$0xff] %v10955_v39  ;;  %v10969_v61 = vpop.permute.xlu2 %3191 }
 0x4a7   : > { %5839 = vmatpush.bf16.msra.mxu1 %v2541_v48  ;;  %12777 = vst [vmem:[#allocation47_spill] sm:$0xff] %v10969_v61 }
 0x4a9   : > { %4897 = vmatmul.bf16.gmra.mxu0 %v7662_v38  ;;  %v7546_v38 = vor.u32 %v8656_v42, %v7543_v57  ;;  %v7602_v57 = vor.u32 %v8671_v51, %v7599_v30  ;;  %v7725_v30 = vld [vmem:[#allocation8 + $0x180] sm:$0xf] }
 0x4aa   : > { %v10963_v9 = vpop.permute.xlu1 %3186 }
 0x4ab   : > { %5840 = vmatpush.bf16.msra.mxu1 %v2540_v33  ;;  %12775 = vst [vmem:[#allocation46_spill] sm:$0xff] %v10963_v9  ;;  %v7693_v33 = vld [vmem:[#allocation8 + $0x140] sm:$0xf] }
 0x4ac   : > { %v7694_v52 = vor.u32 %v8697_v27, %v7693_v33 }
 0x4ad   : > { %v10967_v63 = vpop.permute.xlu0 %3196 }
 0x4ae   : > { %v10957_v10 = vpop.f32.mrf.mxu0  ;;  %12776 = vst [vmem:[#allocation49_spill] sm:$0xff] %v10967_v63  ;;  %5535 = vmatmul.bf16.gmra.mxu3 %v7606_v18  ;;  %v10979_v58 = vpop.permute.xlu2 %3206 }
 0x4af   : > { %5841 = vmatpush.bf16.msra.mxu1 %v2539_v40  ;;  %v8678_v40 = vld [vmem:[#allocation8 + $0xb4] sm:$0xf0]  ;;  %12780 = vst [vmem:[#allocation55_spill] sm:$0xff] %v10979_v58  ;;  %v4861_v11 = vadd.f32 %v10957_v10, %v10730_v53  ;;  %v8699_v10 = vld [vmem:[#allocation8 + $0x164] sm:$0xf] }
 0x4b0   : > { %v7622_v13 = vor.u32 %v8678_v40, %v7621_v3  ;;  %v8675_v40 = vld [vmem:[#allocation8 + $0xa4] sm:$0xf] }
 0x4b2   : > { %v10973_v55 = vpop.permute.xlu1 %3201 }
 0x4b3   : > { %5842 = vmatpush.bf16.msra.mxu1 %v2538_v12  ;;  %12778 = vst [vmem:[#allocation50_spill] sm:$0xff] %v10973_v55 }
 0x4b5   : > { %5196 = vmatmul.bf16.gmra.mxu2 %v7570_v23  ;;  %v10975_v0 = vpop.permute.xlu0 %3211 }
 0x4b6   : > { %v10965_v48 = vpop.f32.mrf.mxu0  ;;  %12779 = vst [vmem:[#allocation51_spill] sm:$0xff] %v10975_v0  ;;  %v10987_v42 = vpop.permute.xlu2 %3221 }
 0x4b7   : > { %5843 = vmatpush.bf16.msra.mxu1 %v2537_v59  ;;  %12783 = vst [vmem:[#allocation58_spill] sm:$0xff] %v10987_v42  ;;  %v7709_v59 = vld [vmem:[#allocation8 + $0x160] sm:$0xf] }
 0x4b9   : > { %4902 = vmatmul.bf16.gmra.mxu0 %v7678_v56  ;;  %v8701_v56 = vld [vmem:[#allocation8 + $0x16c] sm:$0xf0] }
 0x4ba   : > { %5844 = vmatmul.bf16.vlgmr.msra.gmra.mxu1 %v7546_v38  ;;  %v10981_v12 = vpop.permute.xlu1 %3216  ;;  %v7575_v38 = vld [vmem:[#allocation8 + $0x58] sm:$0xf0]  ;;  %v7710_v18 = vor.u32 %v8701_v56, %v7709_v59  ;;  %v8668_v59 = vld [vmem:[#allocation8 + $0x6c] sm:$0xf] }
 0x4bb   : > { %12781 = vst [vmem:[#allocation56_spill] sm:$0xff] %v10981_v12  ;;  %v7578_v27 = vor.u32 %v8664_v47, %v7575_v38  ;;  %v7591_v56 = vld [vmem:[#allocation8 + $0x78] sm:$0xf0] }
 0x4bd   : > { %v10983_v23 = vpop.permute.xlu0 %3226 }
 0x4be   : > { %v10971_v37 = vpop.f32.mrf.mxu0  ;;  %5540 = vmatmul.bf16.gmra.mxu3 %v7622_v13  ;;  %12782 = vst [vmem:[#allocation57_spill] sm:$0xff] %v10983_v23  ;;  %v10995_v54 = vpop.permute.xlu2 %3236  ;;  %v8713_v23 = vld [vmem:[#allocation8 + $0x1cc] sm:$0xf0] }
 0x4bf   : > { %12786 = vst [vmem:[#allocation61_spill] sm:$0xff] %v10995_v54  ;;  %v8709_v54 = vld [vmem:[#allocation8 + $0x1ac] sm:$0xf0] }
 0x4c2   : > { %v10989_v26 = vpop.permute.xlu1 %3231 }
 0x4c3   : > { %12784 = vst [vmem:[#allocation59_spill] sm:$0xff] %v10989_v26 }
 0x4c5   : > { %5201 = vmatmul.bf16.gmra.mxu2 %v7586_v15  ;;  %v10991_v15 = vpop.permute.xlu0 %3241 }
 0x4c6   : > { %v10977_v62 = vpop.f32.mrf.mxu0  ;;  %12785 = vst [vmem:[#allocation60_spill] sm:$0xff] %v10991_v15  ;;  %v11003_v47 = vpop.permute.xlu2 %3251  ;;  %v7631_v15 = vld [vmem:[#allocation8 + $0xd0] sm:$0xf0] }
 0x4c7   : > { %12789 = vst [vmem:[#allocation64_spill] sm:$0xff] %v11003_v47 }
 0x4c9   : > { %4907 = vmatmul.bf16.gmra.mxu0 %v7694_v52 }
 0x4ca   : > { %5849 = vmatmul.bf16.gmra.mxu1 %v7562_v6  ;;  %v10997_v52 = vpop.permute.xlu1 %3246  ;;  %v7615_v6 = vld [vmem:[#allocation8 + $0xb0] sm:$0xf0] }
 0x4cb   : > { %12787 = vst [vmem:[#allocation62_spill] sm:$0xff] %v10997_v52  ;;  %v7618_v51 = vor.u32 %v8675_v40, %v7615_v6  ;;  %v8679_v6 = vld [vmem:[#allocation8 + $0xc4] sm:$0xf] }
 0x4cd   : > { %v11001_v13 = vpop.permute.xlu0 %3256 }
 0x4ce   : > { %v10985_v34 = vpop.f32.mrf.mxu0  ;;  %5545 = vmatmul.bf16.gmra.mxu3 %v7638_v32  ;;  %12788 = vst [vmem:[#allocation63_spill] sm:$0xff] %v11001_v13  ;;  %v11013_v47 = vpop.permute.xlu2 %3266 }
 0x4cf   : > { %12792 = vst [vmem:[#allocation67_spill] sm:$0xff] %v11013_v47  ;;  %v7757_v47 = vld [vmem:[#allocation8 + $0x1c0] sm:$0xf] }
 0x4d2   : > { %v11007_v52 = vpop.permute.xlu1 %3261 }
 0x4d3   : > { %12790 = vst [vmem:[#allocation65_spill] sm:$0xff] %v11007_v52 }
 0x4d5   : > { %5206 = vmatmul.bf16.gmra.mxu2 %v7602_v57  ;;  %v8705_v57 = vld [vmem:[#allocation8 + $0x18c] sm:$0xf0]  ;;  %v11009_v13 = vpop.permute.xlu0 %3271 }
 0x4d6   : > { %v10993_v33 = vpop.f32.mrf.mxu0  ;;  %v7726_v38 = vor.u32 %v8705_v57, %v7725_v30  ;;  %12791 = vst [vmem:[#allocation66_spill] sm:$0xff] %v11009_v13  ;;  %v7634_v30 = vor.u32 %v8679_v6, %v7631_v15  ;;  %v7741_v57 = vld [vmem:[#allocation8 + $0x1a0] sm:$0xf]  ;;  %v11021_v26 = vpop.permute.xlu2 %3281 }
 0x4d7   : > { %12795 = vst [vmem:[#allocation70_spill] sm:$0xff] %v11021_v26 }
 0x4d9   : > { %4912 = vmatmul.bf16.gmra.mxu0 %v7710_v18  ;;  %v7653_v18 = vld [vmem:[#allocation8 + $0xe8] sm:$0xf] }
 0x4da   : > { %5854 = vmatmul.bf16.gmra.mxu1 %v7578_v27  ;;  %v7594_v27 = vor.u32 %v8668_v59, %v7591_v56  ;;  %v7654_v32 = vor.u32 %v8686_v21, %v7653_v18  ;;  %v8672_v59 = vld [vmem:[#allocation8 + $0x8c] sm:$0xf]  ;;  %v7607_v56 = vld [vmem:[#allocation8 + $0x98] sm:$0xf0]  ;;  %v7669_v21 = vld [vmem:[#allocation8 + $0x108] sm:$0xf] }
 0x4db   : > { %v7610_v13 = vor.u32 %v8672_v59, %v7607_v56  ;;  %v7623_v56 = vld [vmem:[#allocation8 + $0xb8] sm:$0xf0] }
 0x4dd   : > { %v11017_v18 = vpop.permute.xlu0 %3286 }
 0x4de   : > { %v10999_v3 = vpop.f32.mrf.mxu0  ;;  %5550 = vmatmul.bf16.gmra.mxu3 %v7654_v32  ;;  %12794 = vst [vmem:[#allocation69_spill] sm:$0xff] %v11017_v18  ;;  %v8690_v32 = vld [vmem:[#allocation8 + $0x114] sm:$0xf0]  ;;  %v11031_v59 = vpop.permute.xlu2 %3296 }
 0x4df   : > { %v7670_v52 = vor.u32 %v8690_v32, %v7669_v21  ;;  %12798 = vst [vmem:[#allocation73_spill] sm:$0xff] %v11031_v59  ;;  %v7685_v32 = vld [vmem:[#allocation8 + $0x128] sm:$0xf] }
 0x4e5   : > { %5211 = vmatmul.bf16.gmra.mxu2 %v7618_v51  ;;  %v11015_v51 = vpop.permute.xlu1 %3276  ;;  %v11025_v6 = vpop.f32.mrf.mxu3 }
 0x4e6   : > { %v11005_v24 = vpop.f32.mrf.mxu0  ;;  %12793 = vst [vmem:[#allocation68_spill] sm:$0xff] %v11015_v51  ;;  %v11027_v51 = vpop.permute.xlu0 %3301 }
 0x4e7   : > { %12797 = vst [vmem:[#allocation72_spill] sm:$0xff] %v11027_v51 }
 0x4e9   : > { %4917 = vmatmul.bf16.gmra.mxu0 %v7726_v38  ;;  %v7742_v38 = vor.u32 %v8709_v54, %v7741_v57  ;;  %v8683_v54 = vld [vmem:[#allocation8 + $0xe4] sm:$0xf] }
 0x4ea   : > { %5859 = vmatmul.bf16.gmra.mxu1 %v7594_v27 }
 0x4ed   : > { %v11023_v15 = vpop.permute.xlu1 %3291  ;;  %v11033_v21 = vpop.f32.mrf.mxu3 }
 0x4ee   : > { %v11011_v40 = vpop.f32.mrf.mxu0  ;;  %5555 = vmatmul.bf16.gmra.mxu3 %v7670_v52  ;;  %12796 = vst [vmem:[#allocation71_spill] sm:$0xff] %v11023_v15  ;;  %v8676_v52 = vld [vmem:[#allocation8 + $0xac] sm:$0xf]  ;;  %v8694_v15 = vld [vmem:[#allocation8 + $0x134] sm:$0xf0]  ;;  %v11039_v12 = vpop.permute.xlu0 %3316 }
 0x4ef   : > { %v7626_v26 = vor.u32 %v8676_v52, %v7623_v56  ;;  %v7686_v42 = vor.u32 %v8694_v15, %v7685_v32  ;;  %12800 = vst [vmem:[#allocation75_spill] sm:$0xff] %v11039_v12  ;;  %v7773_v52 = vld [vmem:[#allocation8 + $0x1e0] sm:$0xf]  ;;  %v8717_v15 = vld [vmem:[#allocation8 + $0x1ec] sm:$0xf0] }
 0x4f0   : > { %v8680_v56 = vld [vmem:[#allocation8 + $0xcc] sm:$0xf]  ;;  %v7639_v32 = vld [vmem:[#allocation8 + $0xd8] sm:$0xf0]  ;;  %v8698_v12 = vld [vmem:[#allocation8 + $0x154] sm:$0xf0] }
 0x4f1   : > { %v7642_v58 = vor.u32 %v8680_v56, %v7639_v32  ;;  %v7789_v56 = vld [vmem:[#allocation8 + $0x200] sm:$0xf]  ;;  %v8721_v32 = vld [vmem:[#allocation8 + $0x20c] sm:$0xf0] }
 0x4f5   : > { %5216 = vmatmul.bf16.gmra.mxu2 %v7634_v30  ;;  %v7647_v30 = vld [vmem:[#allocation8 + $0xf0] sm:$0xf0] }
 0x4f6   : > { %v11019_v27 = vpop.f32.mrf.mxu0  ;;  %v7650_v57 = vor.u32 %v8683_v54, %v7647_v30  ;;  %v11043_v30 = vpop.permute.xlu2 %3311 }
 0x4f7   : > { %12801 = vst [vmem:[#allocation76_spill] sm:$0xff] %v11043_v30  ;;  %v11049_v0 = vpop.permute.xlu0 %3331 }
 0x4f8   : > { %12803 = vst [vmem:[#allocation78_spill] sm:$0xff] %v11049_v0 }
 0x4f9   : > { %4922 = vmatmul.bf16.gmra.mxu0 %v7742_v38  ;;  %v7758_v38 = vor.u32 %v8713_v23, %v7757_v47 }
 0x4fa   : > { %5864 = vmatmul.bf16.gmra.mxu1 %v7610_v13  ;;  %v11035_v13 = vpop.permute.xlu1 %3306 }
 0x4fb   : > { %12799 = vst [vmem:[#allocation74_spill] sm:$0xff] %v11035_v13  ;;  %v8687_v13 = vld [vmem:[#allocation8 + $0x104] sm:$0xf] }
 0x4fe   : > { %v11029_v18 = vpop.f32.mrf.mxu0  ;;  %5560 = vmatmul.bf16.gmra.mxu3 %v7686_v42  ;;  %v11041_v54 = vpop.f32.mrf.mxu3 }
 0x4ff   : > { %v11055_v63 = vpop.permute.xlu2 %3326  ;;  %v11061_v0 = vpop.permute.xlu0 %3346 }
 0x500   : > { %12804 = vst [vmem:[#allocation79_spill] sm:$0xff] %v11055_v63  ;;  %v7717_v63 = vld [vmem:[#allocation8 + $0x168] sm:$0xf] }
 0x501   : > { %12806 = vst [vmem:[#allocation81_spill] sm:$0xff] %v11061_v0  ;;  %v8702_v0 = vld [vmem:[#allocation8 + $0x174] sm:$0xf0] }
 0x502   : > { %v11047_v23 = vpop.permute.xlu1 %3321  ;;  %v7718_v45 = vor.u32 %v8702_v0, %v7717_v63  ;;  %v6293_v0 = vlaneseq }
 0x503   : > { %12802 = vst [vmem:[#allocation77_spill] sm:$0xff] %v11047_v23 }
 0x504   : > { %v11093_v35 = vand.u32 127, %v6293_v0 }
 0x505   : > { %5221 = vmatmul.bf16.gmra.mxu2 %v7650_v57  ;;  %v7663_v57 = vld [vmem:[#allocation8 + $0x110] sm:$0xf0] }
 0x506   : > { %v11037_v51 = vpop.f32.mrf.mxu0  ;;  %v7666_v47 = vor.u32 %v8687_v13, %v7663_v57  ;;  %v11051_v42 = vpop.f32.mrf.mxu3  ;;  %vm6295_vm4 = vcmp.lt.s32.totalorder %v11093_v35, 100 }
 0x507   : > { %v11065_v9 = vpop.permute.xlu2 %3341  ;;  %v11071_v39 = vpop.permute.xlu0 %3361 }
 0x508   : > { %12807 = vst [vmem:[#allocation82_spill] sm:$0xff] %v11065_v9 }
 0x509   : > { %4927 = vmatmul.bf16.gmra.mxu0 %v7758_v38  ;;  %v7701_v38 = vld [vmem:[#allocation8 + $0x148] sm:$0xf]  ;;  %12809 = vst [vmem:[#allocation84_spill] sm:$0xff] %v11071_v39  ;;  %v8688_v39 = vld [vmem:[#allocation8 + $0x10c] sm:$0xf] }
 0x50a   : > { %5869 = vmatmul.bf16.gmra.mxu1 %v7626_v26  ;;  %v7774_v26 = vor.u32 %v8717_v15, %v7773_v52  ;;  %v7702_v55 = vor.u32 %v8698_v12, %v7701_v38  ;;  %v11057_v13 = vpop.permute.xlu1 %3336  ;;  %v8691_v52 = vld [vmem:[#allocation8 + $0x124] sm:$0xf]  ;;  %v7679_v15 = vld [vmem:[#allocation8 + $0x130] sm:$0xf0] }
 0x50b   : > { %12805 = vst [vmem:[#allocation80_spill] sm:$0xff] %v11057_v13  ;;  %v7682_v12 = vor.u32 %v8691_v52, %v7679_v15  ;;  %v7655_v13 = vld [vmem:[#allocation8 + $0xf8] sm:$0xf0] }
 0x50e   : > { %v11045_v59 = vpop.f32.mrf.mxu0  ;;  %5565 = vmatmul.bf16.gmra.mxu3 %v7702_v55  ;;  %v11059_v57 = vpop.f32.mrf.mxu3  ;;  %v8684_v55 = vld [vmem:[#allocation8 + $0xec] sm:$0xf] }
 0x50f   : > { %v7658_v14 = vor.u32 %v8684_v55, %v7655_v13  ;;  %v11075_v52 = vpop.permute.xlu2 %3356  ;;  %v11083_v4 = vpop.permute.xlu0 %3376  ;;  %v4859_v13 = vadd.f32 %v10941_v1, %v10718_v44  ;;  %v7805_v55 = vld [vmem:[#allocation8 + $0x220] sm:$0xf] }
 0x510   : > { %12810 = vst [vmem:[#allocation85_spill] sm:$0xff] %v11075_v52  ;;  %v7671_v52 = vld [vmem:[#allocation8 + $0x118] sm:$0xf0] }
 0x511   : > { %12813 = vst [vmem:[#allocation88_spill] sm:$0xff] %v11083_v4  ;;  %v7733_v4 = vld [vmem:[#allocation8 + $0x188] sm:$0xf] }
 0x512   : > { %v11067_v38 = vpop.permute.xlu1 %3351 }
 0x513   : > { %12808 = vst [vmem:[#allocation83_spill] sm:$0xff] %v11067_v38 }
 0x515   : > { %5226 = vmatmul.bf16.gmra.mxu2 %v7666_v47 }
 0x516   : > { %v11053_v30 = vpop.f32.mrf.mxu0 }
 0x518   : > { %v5187_v23 = vpop.f32.mrf.mxu2 }
 0x519   : > { %4932 = vmatmul.bf16.gmra.mxu0 %v7774_v26  ;;  %v11069_v26 = vpop.f32.mrf.mxu3 }
 0x51a   : > { %5874 = vmatmul.bf16.gmra.mxu1 %v7642_v58  ;;  %v7790_v58 = vor.u32 %v8721_v32, %v7789_v56  ;;  %v11079_v38 = vpop.permute.xlu1 %3366  ;;  %v8695_v56 = vld [vmem:[#allocation8 + $0x144] sm:$0xf]  ;;  %v7695_v32 = vld [vmem:[#allocation8 + $0x150] sm:$0xf0] }
 0x51b   : > { %12811 = vst [vmem:[#allocation86_spill] sm:$0xff] %v11079_v38  ;;  %v11091_v38 = vpop.permute.xlu2 %3371 }
 0x51c   : > { %12814 = vst [vmem:[#allocation89_spill] sm:$0xff] %v11091_v38 }
 0x51e   : > { %v11063_v47 = vpop.f32.mrf.mxu0  ;;  %5570 = vmatmul.bf16.gmra.mxu3 %v7718_v45  ;;  %v7698_v45 = vor.u32 %v8695_v56, %v7695_v32  ;;  %v7674_v56 = vor.u32 %v8688_v39, %v7671_v52  ;;  %v7711_v52 = vld [vmem:[#allocation8 + $0x170] sm:$0xf0] }
 0x520   : > { %v5189_v61 = vpop.f32.mrf.mxu2 }
 0x521   : > { %v11077_v15 = vpop.f32.mrf.mxu3 }
 0x522   : > { %v11098_v32 = vpop.permute.xlu1 %3381 }
 0x525   : > { %5231 = vmatmul.bf16.gmra.mxu2 %v7682_v12 }
 0x526   : > { %v11073_v43 = vpop.f32.mrf.mxu0 }
 0x528   : > { %v5192_v9 = vpop.f32.mrf.mxu2 }
 0x529   : > { %4937 = vmatmul.bf16.gmra.mxu0 %v7790_v58  ;;  %v8725_v58 = vld [vmem:[#allocation8 + $0x22c] sm:$0xf0]  ;;  %v11089_v20 = vpop.f32.mrf.mxu3 }
 0x52a   : > { %5879 = vmatmul.bf16.gmra.mxu1 %v7658_v14  ;;  %v5188_v14 = vadd.f32 %v5187_v23, %v4859_v13  ;;  %v7806_v28 = vor.u32 %v8725_v58, %v7805_v55  ;;  %v7734_v23 = vor.u32 %v8706_v17, %v7733_v4  ;;  %v11120_v55 = vpop.permute.xlu1 %3396  ;;  %v7714_v58 = vor.u32 %v8699_v10, %v7711_v52 }
 0x52b   : > { %12816 = vst [vmem:[#allocation91_spill] sm:$0xff] %v11120_v55 }
 0x52c   : > { %v5517_v44 = vadd.f32 %v11025_v6, %v5188_v14  ;;  %v5190_v6 = vadd.f32 %v5189_v61, %v4861_v11  ;;  %v4864_v11 = vadd.f32 %v10965_v48, %v10721_v49  ;;  %v7749_v48 = vld [vmem:[#allocation8 + $0x1a8] sm:$0xf] }
 0x52e   : > { %v11081_v12 = vpop.f32.mrf.mxu0  ;;  %5575 = vmatmul.bf16.gmra.mxu3 %v7734_v23  ;;  %v5519_v53 = vadd.f32 %v11033_v21, %v5190_v6  ;;  %v7821_v23 = vld [vmem:[#allocation8 + $0x240] sm:$0xf]  ;;  %v8729_v21 = vld [vmem:[#allocation8 + $0x24c] sm:$0xf0]  ;;  %v7687_v6 = vld [vmem:[#allocation8 + $0x138] sm:$0xf0] }
 0x52f   : > { %12812 = vst [vmem:[#allocation87_spill] sm:$0xff] %v11081_v12  ;;  %v7822_v49 = vor.u32 %v8729_v21, %v7821_v23 }
 0x530   : > { %v11087_v63 = vpop.f32.mrf.mxu2 }
 0x531   : > { %v11107_v39 = vpop.f32.mrf.mxu3 }
 0x535   : > { %5236 = vmatmul.bf16.gmra.mxu2 %v7698_v45  ;;  %v11105_v45 = vpop.permute.xlu0 %3391 }
 0x536   : > { %v11096_v1 = vpop.f32.mrf.mxu0  ;;  %12815 = vst [vmem:[#allocation90_spill] sm:$0xff] %v11105_v45 }
 0x537   : > { %v5845_v13 = vpop.f32.mrf.mxu1 }
 0x538   : > { %v5846_v12 = vadd.f32 %v5845_v13, %v5517_v44  ;;  %v11102_v38 = vpop.f32.mrf.mxu2  ;;  %v5193_v44 = vadd.f32 %v5192_v9, %v4864_v11  ;;  %v8692_v13 = vld [vmem:[#allocation8 + $0x12c] sm:$0xf] }
 0x539   : > { %4942 = vmatmul.bf16.gmra.mxu0 %v7806_v28  ;;  %v11114_v28 = vpop.permute.xlu2 %3386  ;;  %v7690_v52 = vor.u32 %v8692_v13, %v7687_v6  ;;  %v8703_v13 = vld [vmem:[#allocation8 + $0x184] sm:$0xf]  ;;  %v7727_v6 = vld [vmem:[#allocation8 + $0x190] sm:$0xf0] }
 0x53a   : > { %v6165_v0 = vmax.f32 %v5846_v12, 0.0  ;;  %5884 = vmatmul.bf16.gmra.mxu1 %v7674_v56  ;;  %v5522_v10 = vadd.f32 %v11041_v54, %v5193_v44  ;;  %v11138_v54 = vpop.permute.xlu1 %3411 }
 0x53b   : > { %12818 = vst [vmem:[#allocation93_spill] sm:$0xff] %v11138_v54 }
 0x53c   : > { %v6298_v17 = vsel %vm6295_vm4, %v6165_v0, 0.0  ;;  %v11122_v0 = vpop.f32.mrf.mxu3 }
 0x53d   : > { %6426 = vadd.xlane.f32.xlu0 %v6298_v17  ;;  %v11124_v17 = vpop.permute.xlu0 %3406 }
 0x53e   : > { %v11112_v4 = vpop.f32.mrf.mxu0  ;;  %12817 = vst [vmem:[#allocation92_spill] sm:$0xff] %v11124_v17 }
 0x53f   : > { %v5847_v14 = vpop.f32.mrf.mxu1 }
 0x540   : > { %v5848_v61 = vadd.f32 %v5847_v14, %v5519_v53  ;;  %v11118_v12 = vpop.f32.mrf.mxu2  ;;  %v8710_v53 = vld [vmem:[#allocation8 + $0x1b4] sm:$0xf0] }
 0x541   : > { %v7750_v14 = vor.u32 %v8710_v53, %v7749_v48  ;;  %v7730_v53 = vor.u32 %v8703_v13, %v7727_v6 }
 0x542   : > { %v6166_v56 = vmax.f32 %v5848_v61, 0.0  ;;  %v4866_v61 = vadd.f32 %v10971_v37, %v10734_v22 }
 0x543   : > { %5580 = vmatmul.bf16.gmra.mxu3 %v7750_v14  ;;  %v7837_v14 = vld [vmem:[#allocation8 + $0x260] sm:$0xf] }
 0x544   : > { %v6299_v45 = vsel %vm6295_vm4, %v6166_v56, 0.0  ;;  %v11135_v56 = vpop.permute.xlu2 %3401  ;;  %v11140_v44 = vpop.f32.mrf.mxu3 }
 0x545   : > { %6428 = vadd.xlane.f32.xlu1 %v6299_v45  ;;  %5241 = vmatmul.bf16.gmra.mxu2 %v7714_v58  ;;  %v5195_v45 = vadd.f32 %v11087_v63, %v4866_v61  ;;  %v11144_v22 = vpop.permute.xlu0 %3421  ;;  %v4869_v63 = vadd.f32 %v10977_v62, %v10756_v16  ;;  %v7765_v62 = vld [vmem:[#allocation8 + $0x1c8] sm:$0xf] }
 0x546   : > { %v11129_v9 = vpop.f32.mrf.mxu0  ;;  %12819 = vst [vmem:[#allocation94_spill] sm:$0xff] %v11144_v22  ;;  %v11160_v22 = vpop.permute.xlu1 %3426 }
 0x547   : > { %v5850_v11 = vpop.f32.mrf.mxu1  ;;  %v5524_v37 = vadd.f32 %v11051_v42, %v5195_v45  ;;  %v8696_v42 = vld [vmem:[#allocation8 + $0x14c] sm:$0xf]  ;;  %v7703_v45 = vld [vmem:[#allocation8 + $0x158] sm:$0xf0] }
 0x548   : > { %v5851_v55 = vadd.f32 %v5850_v11, %v5522_v10  ;;  %v11133_v17 = vpop.f32.mrf.mxu2  ;;  %v5198_v10 = vadd.f32 %v11102_v38, %v4869_v63  ;;  %v8733_v11 = vld [vmem:[#allocation8 + $0x26c] sm:$0xf0]  ;;  %v7706_v6 = vor.u32 %v8696_v42, %v7703_v45  ;;  %v7743_v45 = vld [vmem:[#allocation8 + $0x1b0] sm:$0xf0] }
 0x549   : > { %4947 = vmatmul.bf16.gmra.mxu0 %v7822_v49  ;;  %v7838_v16 = vor.u32 %v8733_v11, %v7837_v14 }
 0x54a   : > { %v6167_v58 = vmax.f32 %v5851_v55, 0.0  ;;  %5889 = vmatmul.bf16.gmra.mxu1 %v7690_v52  ;;  %v5527_v38 = vadd.f32 %v11059_v57, %v5198_v10 }
 0x54c   : > { %v6300_v23 = vsel %vm6295_vm4, %v6167_v58, 0.0  ;;  %v11154_v61 = vpop.permute.xlu2 %3416  ;;  %v11156_v58 = vpop.f32.mrf.mxu3 }
 0x54d   : > { %6430 = vadd.xlane.f32.xlu2 %v6300_v23  ;;  %12820 = vst [vmem:[#allocation95_spill] sm:$0xff] %v11154_v61  ;;  %v4871_v61 = vadd.f32 %v10985_v34, %v10739_v2  ;;  %v8707_v34 = vld [vmem:[#allocation8 + $0x1a4] sm:$0xf] }
 0x54e   : > { %v11147_v21 = vpop.f32.mrf.mxu0 }
 0x54f   : > { %v5852_v49 = vpop.f32.mrf.mxu1 }
 0x550   : > { %v5853_v55 = vadd.f32 %v5852_v49, %v5524_v37  ;;  %v11151_v48 = vpop.f32.mrf.mxu2  ;;  %v8714_v37 = vld [vmem:[#allocation8 + $0x1d4] sm:$0xf0] }
 0x551   : > { %v7766_v49 = vor.u32 %v8714_v37, %v7765_v62  ;;  %v7746_v37 = vor.u32 %v8707_v34, %v7743_v45 }
 0x552   : > { %v6168_v52 = vmax.f32 %v5853_v55, 0.0  ;;  %v11165_v55 = vpop.permute.xlu0 %3436 }
 0x553   : > { %12821 = vst [vmem:[#allocation96_spill] sm:$0xff] %v11165_v55  ;;  %5585 = vmatmul.bf16.gmra.mxu3 %v7766_v49 }
 0x554   : > { %v6301_v23 = vsel %vm6295_vm4, %v6168_v52, 0.0  ;;  %v11172_v57 = vpop.f32.mrf.mxu3  ;;  %v11176_v11 = vpop.permute.xlu2 %3431 }
 0x555   : > { %6432 = vadd.xlane.f32.xlu2 %v6301_v23  ;;  %5246 = vmatmul.bf16.gmra.mxu2 %v7730_v53  ;;  %v5200_v53 = vadd.f32 %v11118_v12, %v4871_v61  ;;  %v11181_v23 = vpop.permute.xlu1 %3441  ;;  %v4874_v12 = vadd.f32 %v10993_v33, %v10762_v25  ;;  %v7781_v33 = vld [vmem:[#allocation8 + $0x1e8] sm:$0xf] }
 0x556   : > { %v11163_v13 = vpop.f32.mrf.mxu0  ;;  %12822 = vst [vmem:[#allocation97_spill] sm:$0xff] %v11181_v23 }
 0x557   : > { %v5855_v63 = vpop.f32.mrf.mxu1  ;;  %v5529_v42 = vadd.f32 %v11069_v26, %v5200_v53  ;;  %v7853_v26 = vld [vmem:[#allocation8 + $0x280] sm:$0xf]  ;;  %v7719_v53 = vld [vmem:[#allocation8 + $0x178] sm:$0xf0] }
 0x558   : > { %v5856_v52 = vadd.f32 %v5855_v63, %v5527_v38  ;;  %v11169_v54 = vpop.f32.mrf.mxu2  ;;  %v8737_v63 = vld [vmem:[#allocation8 + $0x28c] sm:$0xf0] }
 0x559   : > { %4952 = vmatmul.bf16.gmra.mxu0 %v7838_v16  ;;  %v7854_v25 = vor.u32 %v8737_v63, %v7853_v26 }
 0x55a   : > { %v6169_v14 = vmax.f32 %v5856_v52, 0.0  ;;  %5894 = vmatmul.bf16.gmra.mxu1 %v7706_v6  ;;  %v11187_v38 = vpop.permute.xlu0 %3451  ;;  %v5203_v6 = vadd.f32 %v11133_v17, %v4874_v12  ;;  %v8700_v52 = vld [vmem:[#allocation8 + $0x16c] sm:$0xf] }
 0x55b   : > { %12823 = vst [vmem:[#allocation98_spill] sm:$0xff] %v11187_v38  ;;  %v7722_v17 = vor.u32 %v8700_v52, %v7719_v53  ;;  %v4876_v38 = vadd.f32 %v10999_v3, %v10773_v36  ;;  %v8711_v52 = vld [vmem:[#allocation8 + $0x1c4] sm:$0xf]  ;;  %v7759_v53 = vld [vmem:[#allocation8 + $0x1d0] sm:$0xf0] }
 0x55c   : > { %v6302_v10 = vsel %vm6295_vm4, %v6169_v14, 0.0  ;;  %v11190_v14 = vpop.f32.mrf.mxu3  ;;  %v5532_v34 = vadd.f32 %v11077_v15, %v5203_v6  ;;  %v11197_v12 = vpop.permute.xlu2 %3446 }
 0x55d   : > { %6434 = vadd.xlane.f32.xlu0 %v6302_v10 }
 0x55e   : > { %v11179_v2 = vpop.f32.mrf.mxu0 }
 0x55f   : > { %v5857_v16 = vpop.f32.mrf.mxu1 }
 0x560   : > { %v5858_v61 = vadd.f32 %v5857_v16, %v5529_v42  ;;  %v11185_v62 = vpop.f32.mrf.mxu2  ;;  %v8718_v42 = vld [vmem:[#allocation8 + $0x1f4] sm:$0xf0] }
 0x561   : > { %v7782_v16 = vor.u32 %v8718_v42, %v7781_v33  ;;  %v7762_v33 = vor.u32 %v8711_v52, %v7759_v53 }
 0x562   : > { %v6170_v49 = vmax.f32 %v5858_v61, 0.0  ;;  %v11208_v26 = vpop.permute.xlu0 %3466 }
 0x563   : > { %5590 = vmatmul.bf16.gmra.mxu3 %v7782_v16  ;;  %12824 = vst [vmem:[#allocation99_spill] sm:$0xff] %v11208_v26  ;;  %v8741_v16 = vld [vmem:[#allocation8 + $0x2ac] sm:$0xf0] }
 0x564   : > { %v6303_v10 = vsel %vm6295_vm4, %v6170_v49, 0.0  ;;  %v5205_v49 = vadd.f32 %v11151_v48, %v4876_v38  ;;  %v11206_v6 = vpop.f32.mrf.mxu3  ;;  %v4879_v48 = vadd.f32 %v11005_v24, %v10764_v5 }
 0x565   : > { %6436 = vadd.xlane.f32.xlu1 %v6303_v10  ;;  %5251 = vmatmul.bf16.gmra.mxu2 %v7746_v37  ;;  %v11203_v37 = vpop.permute.xlu1 %3456 }
 0x566   : > { %v11195_v45 = vpop.f32.mrf.mxu0  ;;  %v5534_v36 = vadd.f32 %v11089_v20, %v5205_v49  ;;  %v5208_v42 = vadd.f32 %v11169_v54, %v4879_v48  ;;  %v7735_v49 = vld [vmem:[#allocation8 + $0x198] sm:$0xf0] }
 0x567   : > { %v5860_v61 = vpop.f32.mrf.mxu1 }
 0x568   : > { %v5861_v23 = vadd.f32 %v5860_v61, %v5532_v34  ;;  %v11201_v55 = vpop.f32.mrf.mxu2  ;;  %v8704_v61 = vld [vmem:[#allocation8 + $0x18c] sm:$0xf]  ;;  %v5537_v54 = vadd.f32 %v11107_v39, %v5208_v42 }
 0x569   : > { %4957 = vmatmul.bf16.gmra.mxu0 %v7854_v25  ;;  %v11219_v25 = vpop.permute.xlu2 %3461 }
 0x56a   : > { %v6171_v15 = vmax.f32 %v5861_v23, 0.0  ;;  %5899 = vmatmul.bf16.gmra.mxu1 %v7722_v17  ;;  %12825 = vst [vmem:[#allocation100_spill] sm:$0xff] %v11219_v25  ;;  %v7869_v17 = vld [vmem:[#allocation8 + $0x2a0] sm:$0xf]  ;;  %v11228_v52 = vpop.permute.xlu0 %3481 }
 0x56b   : > { %v7870_v24 = vor.u32 %v8741_v16, %v7869_v17 }
 0x56c   : > { %v6304_v63 = vsel %vm6295_vm4, %v6171_v15, 0.0  ;;  %v11224_v15 = vpop.f32.mrf.mxu3 }
 0x56d   : > { %6438 = vadd.xlane.f32.xlu2 %v6304_v63  ;;  %v11222_v20 = vpop.permute.xlu1 %3471  ;;  %v7797_v63 = vld [vmem:[#allocation8 + $0x208] sm:$0xf] }
 0x56e   : > { %v11213_v3 = vpop.f32.mrf.mxu0  ;;  %12826 = vst [vmem:[#allocation101_spill] sm:$0xff] %v11222_v20  ;;  %v4881_v20 = vadd.f32 %v11011_v40, %v10777_v7 }
 0x56f   : > { %v5862_v10 = vpop.f32.mrf.mxu1 }
 0x570   : > { %v5863_v23 = vadd.f32 %v5862_v10, %v5534_v36  ;;  %v11217_v38 = vpop.f32.mrf.mxu2  ;;  %v8722_v36 = vld [vmem:[#allocation8 + $0x214] sm:$0xf0]  ;;  %v7738_v10 = vor.u32 %v8704_v61, %v7735_v49  ;;  %v8715_v61 = vld [vmem:[#allocation8 + $0x1e4] sm:$0xf]  ;;  %v7775_v49 = vld [vmem:[#allocation8 + $0x1f0] sm:$0xf0] }
 0x571   : > { %v7798_v48 = vor.u32 %v8722_v36, %v7797_v63  ;;  %v11238_v17 = vpop.permute.xlu2 %3476  ;;  %v7778_v63 = vor.u32 %v8715_v61, %v7775_v49 }
 0x572   : > { %v6172_v34 = vmax.f32 %v5863_v23, 0.0 }
 0x573   : > { %5595 = vmatmul.bf16.gmra.mxu3 %v7798_v48  ;;  %v8745_v48 = vld [vmem:[#allocation8 + $0x2cc] sm:$0xf0] }
 0x574   : > { %v6305_v5 = vsel %vm6295_vm4, %v6172_v34, 0.0  ;;  %v11240_v39 = vpop.f32.mrf.mxu3 }
 0x575   : > { %6440 = vadd.xlane.f32.xlu0 %v6305_v5  ;;  %5256 = vmatmul.bf16.gmra.mxu2 %v7762_v33  ;;  %v5210_v33 = vadd.f32 %v11185_v62, %v4881_v20  ;;  %v11244_v16 = vpop.permute.xlu1 %3486  ;;  %v11249_v62 = vpop.permute.xlu0 %3496 }
 0x576   : > { %v11231_v53 = vpop.f32.mrf.mxu0  ;;  %12827 = vst [vmem:[#allocation102_spill] sm:$0xff] %v11244_v16 }
 0x577   : > { %v5865_v23 = vpop.f32.mrf.mxu1  ;;  %v5539_v7 = vadd.f32 %v11122_v0, %v5210_v33  ;;  %12828 = vst [vmem:[#allocation103_spill] sm:$0xff] %v11249_v62  ;;  %v8708_v0 = vld [vmem:[#allocation8 + $0x1ac] sm:$0xf]  ;;  %v4886_v62 = vadd.f32 %v11029_v18, %v10783_v50  ;;  %v8719_v18 = vld [vmem:[#allocation8 + $0x204] sm:$0xf] }
 0x578   : > { %v5866_v26 = vadd.f32 %v5865_v23, %v5537_v54  ;;  %v11235_v25 = vpop.f32.mrf.mxu2  ;;  %v7751_v23 = vld [vmem:[#allocation8 + $0x1b8] sm:$0xf0] }
 0x579   : > { %4962 = vmatmul.bf16.gmra.mxu0 %v7870_v24  ;;  %v7754_v49 = vor.u32 %v8708_v0, %v7751_v23  ;;  %v7791_v23 = vld [vmem:[#allocation8 + $0x210] sm:$0xf0] }
 0x57a   : > { %v6173_v34 = vmax.f32 %v5866_v26, 0.0  ;;  %5904 = vmatmul.bf16.gmra.mxu1 %v7738_v10  ;;  %v4884_v26 = vadd.f32 %v11019_v27, %v10790_v8  ;;  %v7885_v10 = vld [vmem:[#allocation8 + $0x2c0] sm:$0xf]  ;;  %v7813_v27 = vld [vmem:[#allocation8 + $0x228] sm:$0xf] }
 0x57b   : > { %v7886_v8 = vor.u32 %v8745_v48, %v7885_v10  ;;  %v5215_v10 = vadd.f32 %v11217_v38, %v4886_v62  ;;  %v4889_v38 = vadd.f32 %v11037_v51, %v10794_v41 }
 0x57c   : > { %v6306_v42 = vsel %vm6295_vm4, %v6173_v34, 0.0  ;;  %v5213_v36 = vadd.f32 %v11201_v55, %v4884_v26  ;;  %v11256_v33 = vpop.f32.mrf.mxu3 }
 0x57d   : > { %6442 = vadd.xlane.f32.xlu1 %v6306_v42  ;;  %v11260_v42 = vpop.permute.xlu2 %3491  ;;  %v11265_v26 = vpop.permute.xlu1 %3501  ;;  %v5544_v0 = vadd.f32 %v11156_v58, %v5215_v10  ;;  %v7901_v58 = vld [vmem:[#allocation8 + $0x2e0] sm:$0xf]  ;;  %v7767_v10 = vld [vmem:[#allocation8 + $0x1d8] sm:$0xf0] }
 0x57e   : > { %v11247_v40 = vpop.f32.mrf.mxu0  ;;  %v5542_v61 = vadd.f32 %v11140_v44, %v5213_v36 }
 0x57f   : > { %v5867_v5 = vpop.f32.mrf.mxu1 }
 0x580   : > { %v5868_v20 = vadd.f32 %v5867_v5, %v5539_v7  ;;  %v11253_v24 = vpop.f32.mrf.mxu2  ;;  %v8726_v7 = vld [vmem:[#allocation8 + $0x234] sm:$0xf0] }
 0x581   : > { %v7814_v5 = vor.u32 %v8726_v7, %v7813_v27 }
 0x582   : > { %v6174_v54 = vmax.f32 %v5868_v20, 0.0 }
 0x583   : > { %5600 = vmatmul.bf16.gmra.mxu3 %v7814_v5 }
 0x584   : > { %v6307_v34 = vsel %vm6295_vm4, %v6174_v54, 0.0  ;;  %v11274_v36 = vpop.f32.mrf.mxu3 }
 0x585   : > { %6444 = vadd.xlane.f32.xlu2 %v6307_v34  ;;  %5261 = vmatmul.bf16.gmra.mxu2 %v7778_v63  ;;  %v11271_v63 = vpop.permute.xlu0 %3511  ;;  %v11281_v34 = vpop.permute.xlu2 %3506 }
 0x586   : > { %v11263_v55 = vpop.f32.mrf.mxu0  ;;  %12829 = vst [vmem:[#allocation104_spill] sm:$0xff] %v11271_v63  ;;  %v11287_v7 = vpop.permute.xlu1 %3516 }
 0x587   : > { %v5870_v20 = vpop.f32.mrf.mxu1  ;;  %12830 = vst [vmem:[#allocation105_spill] sm:$0xff] %v11287_v7  ;;  %v4891_v7 = vadd.f32 %v11045_v59, %v10808_v60 }
 0x588   : > { %v5871_v54 = vadd.f32 %v5870_v20, %v5542_v61  ;;  %v11269_v16 = vpop.f32.mrf.mxu2  ;;  %v7794_v61 = vor.u32 %v8719_v18, %v7791_v23  ;;  %v8749_v20 = vld [vmem:[#allocation8 + $0x2ec] sm:$0xf0] }
 0x589   : > { %4967 = vmatmul.bf16.gmra.mxu0 %v7886_v8  ;;  %v7902_v51 = vor.u32 %v8749_v20, %v7901_v58 }
 0x58a   : > { %v6175_v44 = vmax.f32 %v5871_v54, 0.0  ;;  %5909 = vmatmul.bf16.gmra.mxu1 %v7754_v49  ;;  %v5218_v49 = vadd.f32 %v11235_v25, %v4889_v38  ;;  %v8712_v54 = vld [vmem:[#allocation8 + $0x1cc] sm:$0xf] }
 0x58b   : > { %v7770_v23 = vor.u32 %v8712_v54, %v7767_v10  ;;  %v8723_v10 = vld [vmem:[#allocation8 + $0x224] sm:$0xf] }
 0x58c   : > { %v6308_v48 = vsel %vm6295_vm4, %v6175_v44, 0.0  ;;  %v11290_v44 = vpop.f32.mrf.mxu3  ;;  %v5547_v18 = vadd.f32 %v11172_v57, %v5218_v49 }
 0x58d   : > { %6446 = vadd.xlane.f32.xlu0 %v6308_v48  ;;  %v11292_v48 = vpop.permute.xlu0 %3526 }
 0x58e   : > { %v11279_v50 = vpop.f32.mrf.mxu0  ;;  %12831 = vst [vmem:[#allocation106_spill] sm:$0xff] %v11292_v48  ;;  %v11306_v57 = vpop.permute.xlu1 %3531 }
 0x58f   : > { %v5872_v8 = vpop.f32.mrf.mxu1  ;;  %12832 = vst [vmem:[#allocation107_spill] sm:$0xff] %v11306_v57 }
 0x590   : > { %v5873_v62 = vadd.f32 %v5872_v8, %v5544_v0  ;;  %v11285_v27 = vpop.f32.mrf.mxu2  ;;  %v7829_v0 = vld [vmem:[#allocation8 + $0x248] sm:$0xf]  ;;  %v8730_v8 = vld [vmem:[#allocation8 + $0x254] sm:$0xf0] }
 0x591   : > { %v7830_v38 = vor.u32 %v8730_v8, %v7829_v0 }
 0x592   : > { %v6176_v5 = vmax.f32 %v5873_v62, 0.0 }
 0x593   : > { %5605 = vmatmul.bf16.gmra.mxu3 %v7830_v38  ;;  %v8753_v38 = vld [vmem:[#allocation8 + $0x30c] sm:$0xf0] }
 0x594   : > { %v6309_v41 = vsel %vm6295_vm4, %v6176_v5, 0.0  ;;  %v11303_v5 = vpop.permute.xlu2 %3521  ;;  %v11308_v49 = vpop.f32.mrf.mxu3 }
 0x595   : > { %6448 = vadd.xlane.f32.xlu1 %v6309_v41  ;;  %5266 = vmatmul.bf16.gmra.mxu2 %v7794_v61  ;;  %v5220_v61 = vadd.f32 %v11253_v24, %v4891_v7  ;;  %v11312_v60 = vpop.permute.xlu0 %3541  ;;  %v7807_v41 = vld [vmem:[#allocation8 + $0x230] sm:$0xf0]  ;;  %v4894_v24 = vadd.f32 %v11053_v30, %v10799_v46  ;;  %v7845_v30 = vld [vmem:[#allocation8 + $0x268] sm:$0xf] }
 0x596   : > { %v11297_v25 = vpop.f32.mrf.mxu0  ;;  %12833 = vst [vmem:[#allocation108_spill] sm:$0xff] %v11312_v60  ;;  %v7810_v0 = vor.u32 %v8723_v10, %v7807_v41  ;;  %v11328_v60 = vpop.permute.xlu1 %3546 }
 0x597   : > { %v5875_v62 = vpop.f32.mrf.mxu1  ;;  %v5549_v59 = vadd.f32 %v11190_v14, %v5220_v61  ;;  %v5223_v8 = vadd.f32 %v11269_v16, %v4894_v24  ;;  %v8716_v14 = vld [vmem:[#allocation8 + $0x1ec] sm:$0xf]  ;;  %v7783_v61 = vld [vmem:[#allocation8 + $0x1f8] sm:$0xf0] }
 0x598   : > { %v5876_v63 = vadd.f32 %v5875_v62, %v5547_v18  ;;  %v11301_v48 = vpop.f32.mrf.mxu2  ;;  %v7786_v41 = vor.u32 %v8716_v14, %v7783_v61  ;;  %v7823_v61 = vld [vmem:[#allocation8 + $0x250] sm:$0xf0] }
 0x599   : > { %4972 = vmatmul.bf16.gmra.mxu0 %v7902_v51  ;;  %v5552_v16 = vadd.f32 %v11206_v6, %v5223_v8 }
 0x59a   : > { %v6177_v58 = vmax.f32 %v5876_v63, 0.0  ;;  %5914 = vmatmul.bf16.gmra.mxu1 %v7770_v23  ;;  %v7917_v23 = vld [vmem:[#allocation8 + $0x300] sm:$0xf] }
 0x59b   : > { %v7918_v46 = vor.u32 %v8753_v38, %v7917_v23 }
 0x59c   : > { %v6310_v20 = vsel %vm6295_vm4, %v6177_v58, 0.0  ;;  %v11322_v62 = vpop.permute.xlu2 %3536  ;;  %v11324_v58 = vpop.f32.mrf.mxu3 }
 0x59d   : > { %6450 = vadd.xlane.f32.xlu2 %v6310_v20  ;;  %12834 = vst [vmem:[#allocation109_spill] sm:$0xff] %v11322_v62  ;;  %v4896_v62 = vadd.f32 %v11063_v47, %v10811_v29  ;;  %v8727_v47 = vld [vmem:[#allocation8 + $0x244] sm:$0xf] }
 0x59e   : > { %v11315_v54 = vpop.f32.mrf.mxu0 }
 0x59f   : > { %v5877_v51 = vpop.f32.mrf.mxu1 }
 0x5a0   : > { %v5878_v63 = vadd.f32 %v5877_v51, %v5549_v59  ;;  %v11319_v7 = vpop.f32.mrf.mxu2  ;;  %v8734_v59 = vld [vmem:[#allocation8 + $0x274] sm:$0xf0] }
 0x5a1   : > { %v7846_v51 = vor.u32 %v8734_v59, %v7845_v30 }
 0x5a2   : > { %v6178_v18 = vmax.f32 %v5878_v63, 0.0  ;;  %v11333_v63 = vpop.permute.xlu0 %3556 }
 0x5a3   : > { %12835 = vst [vmem:[#allocation110_spill] sm:$0xff] %v11333_v63  ;;  %5610 = vmatmul.bf16.gmra.mxu3 %v7846_v51 }
 0x5a4   : > { %v6311_v20 = vsel %vm6295_vm4, %v6178_v18, 0.0  ;;  %v11340_v6 = vpop.f32.mrf.mxu3  ;;  %v11344_v38 = vpop.permute.xlu2 %3551 }
 0x5a5   : > { %6452 = vadd.xlane.f32.xlu0 %v6311_v20  ;;  %5271 = vmatmul.bf16.gmra.mxu2 %v7810_v0  ;;  %v5225_v0 = vadd.f32 %v11285_v27, %v4896_v62  ;;  %12836 = vst [vmem:[#allocation111_spill] sm:$0xff] %v11344_v38  ;;  %v11349_v20 = vpop.permute.xlu1 %3561  ;;  %v4899_v62 = vadd.f32 %v11073_v43, %v10821_v31  ;;  %v7861_v43 = vld [vmem:[#allocation8 + $0x288] sm:$0xf] }
 0x5a6   : > { %v11331_v10 = vpop.f32.mrf.mxu0  ;;  %12837 = vst [vmem:[#allocation112_spill] sm:$0xff] %v11349_v20 }
 0x5a7   : > { %v5880_v24 = vpop.f32.mrf.mxu1  ;;  %v5554_v14 = vadd.f32 %v11224_v15, %v5225_v0  ;;  %v5228_v51 = vadd.f32 %v11301_v48, %v4899_v62  ;;  %v8720_v0 = vld [vmem:[#allocation8 + $0x20c] sm:$0xf] }
 0x5a8   : > { %v5881_v18 = vadd.f32 %v5880_v24, %v5552_v16  ;;  %v11337_v57 = vpop.f32.mrf.mxu2  ;;  %v7933_v24 = vld [vmem:[#allocation8 + $0x320] sm:$0xf] }
 0x5a9   : > { %4977 = vmatmul.bf16.gmra.mxu0 %v7918_v46 }
 0x5aa   : > { %v6179_v23 = vmax.f32 %v5881_v18, 0.0  ;;  %5919 = vmatmul.bf16.gmra.mxu1 %v7786_v41  ;;  %v7826_v41 = vor.u32 %v8727_v47, %v7823_v61  ;;  %v8757_v18 = vld [vmem:[#allocation8 + $0x32c] sm:$0xf0]  ;;  %v5557_v47 = vadd.f32 %v11240_v39, %v5228_v51 }
 0x5ab   : > { %v7934_v31 = vor.u32 %v8757_v18, %v7933_v24 }
 0x5ac   : > { %v6312_v8 = vsel %vm6295_vm4, %v6179_v23, 0.0  ;;  %v7799_v23 = vld [vmem:[#allocation8 + $0x218] sm:$0xf0]  ;;  %v11364_v62 = vpop.permute.xlu2 %3566 }
 0x5ad   : > { %6454 = vadd.xlane.f32.xlu1 %v6312_v8  ;;  %v11357_v8 = vpop.f32.mrf.mxu3  ;;  %v7802_v61 = vor.u32 %v8720_v0, %v7799_v23  ;;  %12838 = vst [vmem:[#allocation113_spill] sm:$0xff] %v11364_v62  ;;  %v8731_v23 = vld [vmem:[#allocation8 + $0x264] sm:$0xf] }
 0x5ae   : > { %v11347_v29 = vpop.f32.mrf.mxu0 }
 0x5af   : > { %v5882_v27 = vpop.f32.mrf.mxu1 }
 0x5b0   : > { %v5883_v46 = vadd.f32 %v5882_v27, %v5554_v14  ;;  %v6427_v30 = vpop.xlane.xlu0 %6426  ;;  %v11353_v59 = vpop.f32.mrf.mxu2  ;;  %v8738_v14 = vld [vmem:[#allocation8 + $0x294] sm:$0xf0] }
 0x5b1   : > { %v6682_v16 = vmul.f32 0.01, %v6427_v30  ;;  %v7862_v27 = vor.u32 %v8738_v14, %v7861_v43  ;;  %v12839_v30 = vld [vmem:[#allocation87_spill] sm:$0xff] }
 0x5b2   : > { %v6180_v15 = vmax.f32 %v5883_v46, 0.0  ;;  %v7839_v43 = vld [vmem:[#allocation8 + $0x270] sm:$0xf0] }
 0x5b3   : > { %6858 = vst [vmem:[%s9682_s22 + $0x180] sm:$0xff] %v6682_v16  ;;  %v4901_v16 = vadd.f32 %v12839_v30, %v10815_v19  ;;  %5615 = vmatmul.bf16.gmra.mxu3 %v7862_v27 }
 0x5b4   : > { %v6313_v20 = vsel %vm6295_vm4, %v6180_v15, 0.0 }
 0x5b5   : > { %6456 = vadd.xlane.f32.xlu2 %v6313_v20  ;;  %5276 = vmatmul.bf16.gmra.mxu2 %v7826_v41  ;;  %v5230_v39 = vadd.f32 %v11319_v7, %v4901_v16  ;;  %v11372_v24 = vpop.f32.mrf.mxu3 }
 0x5b6   : > { %v11362_v48 = vpop.f32.mrf.mxu0 }
 0x5b7   : > { %v5885_v46 = vpop.f32.mrf.mxu1  ;;  %v5559_v19 = vadd.f32 %v11256_v33, %v5230_v39  ;;  %v8724_v33 = vld [vmem:[#allocation8 + $0x22c] sm:$0xf]  ;;  %v7815_v39 = vld [vmem:[#allocation8 + $0x238] sm:$0xf0] }
 0x5b8   : > { %v5886_v63 = vadd.f32 %v5885_v46, %v5557_v47  ;;  %v6429_v15 = vpop.xlane.xlu1 %6428  ;;  %v11368_v20 = vpop.f32.mrf.mxu2  ;;  %v7842_v46 = vor.u32 %v8731_v23, %v7839_v43  ;;  %v7818_v43 = vor.u32 %v8724_v33, %v7815_v39  ;;  %v8735_v33 = vld [vmem:[#allocation8 + $0x284] sm:$0xf]  ;;  %v7855_v39 = vld [vmem:[#allocation8 + $0x290] sm:$0xf0] }
 0x5b9   : > { %v6683_v41 = vmul.f32 0.01, %v6429_v15  ;;  %4982 = vmatmul.bf16.gmra.mxu0 %v7934_v31  ;;  %v12840_v31 = vld [vmem:[#allocation18_spill] sm:$0xff]  ;;  %v7949_v15 = vld [vmem:[#allocation8 + $0x340] sm:$0xf] }
 0x5ba   : > { %v6181_v51 = vmax.f32 %v5886_v63, 0.0  ;;  %5924 = vmatmul.bf16.gmra.mxu1 %v7802_v61  ;;  %v4904_v7 = vadd.f32 %v11096_v1, %v12840_v31 }
 0x5bb   : > { %6859 = vst [vmem:[%s9682_s22 + $0x188] sm:$0xff] %v6683_v41  ;;  %v8761_v41 = vld [vmem:[#allocation8 + $0x34c] sm:$0xf0] }
 0x5bc   : > { %v6314_v18 = vsel %vm6295_vm4, %v6181_v51, 0.0  ;;  %v5233_v30 = vadd.f32 %v11337_v57, %v4904_v7  ;;  %v7950_v1 = vor.u32 %v8761_v41, %v7949_v15 }
 0x5bd   : > { %6458 = vadd.xlane.f32.xlu0 %v6314_v18  ;;  %v11385_v51 = vpop.f32.mrf.mxu3 }
 0x5be   : > { %v11377_v0 = vpop.f32.mrf.mxu0  ;;  %v5562_v23 = vadd.f32 %v11274_v36, %v5233_v30 }
 0x5bf   : > { %v5887_v14 = vpop.f32.mrf.mxu1 }
 0x5c0   : > { %v5888_v63 = vadd.f32 %v5887_v14, %v5559_v19  ;;  %v6431_v47 = vpop.xlane.xlu2 %6430  ;;  %v11381_v61 = vpop.f32.mrf.mxu2  ;;  %v7877_v19 = vld [vmem:[#allocation8 + $0x2a8] sm:$0xf]  ;;  %v8742_v14 = vld [vmem:[#allocation8 + $0x2b4] sm:$0xf0] }
 0x5c1   : > { %v6684_v27 = vmul.f32 0.01, %v6431_v47  ;;  %v7878_v31 = vor.u32 %v8742_v14, %v7877_v19 }
 0x5c2   : > { %v6182_v16 = vmax.f32 %v5888_v63, 0.0  ;;  %v12841_v63 = vld [vmem:[#allocation17_spill] sm:$0xff] }
 0x5c3   : > { %6860 = vst [vmem:[%s9682_s22 + $0x190] sm:$0xff] %v6684_v27  ;;  %v4906_v47 = vadd.f32 %v11112_v4, %v12841_v63  ;;  %5620 = vmatmul.bf16.gmra.mxu3 %v7878_v31  ;;  %v7965_v63 = vld [vmem:[#allocation8 + $0x360] sm:$0xf] }
 0x5c4   : > { %v6315_v18 = vsel %vm6295_vm4, %v6182_v16, 0.0 }
 0x5c5   : > { %6460 = vadd.xlane.f32.xlu1 %v6315_v18  ;;  %5281 = vmatmul.bf16.gmra.mxu2 %v7842_v46  ;;  %v5235_v16 = vadd.f32 %v11353_v59, %v4906_v47  ;;  %v12842_v18 = vld [vmem:[#allocation38_spill] sm:$0xff]  ;;  %v8765_v47 = vld [vmem:[#allocation8 + $0x36c] sm:$0xf0] }
 0x5c6   : > { %v11390_v57 = vpop.f32.mrf.mxu0  ;;  %v11398_v36 = vpop.f32.mrf.mxu3  ;;  %v4909_v59 = vadd.f32 %v11129_v9, %v12842_v18  ;;  %v7966_v9 = vor.u32 %v8765_v47, %v7965_v63  ;;  %v12843_v18 = vld [vmem:[#allocation28_spill] sm:$0xff] }
 0x5c7   : > { %v5890_v7 = vpop.f32.mrf.mxu1  ;;  %v5564_v4 = vadd.f32 %v11290_v44, %v5235_v16  ;;  %v8728_v44 = vld [vmem:[#allocation8 + $0x24c] sm:$0xf] }
 0x5c8   : > { %v5891_v27 = vadd.f32 %v5890_v7, %v5562_v23  ;;  %v6433_v62 = vpop.xlane.xlu2 %6432  ;;  %v11394_v38 = vpop.f32.mrf.mxu2  ;;  %v5238_v31 = vadd.f32 %v11368_v20, %v4909_v59  ;;  %v4911_v59 = vadd.f32 %v11147_v21, %v12843_v18 }
 0x5c9   : > { %v6685_v46 = vmul.f32 0.01, %v6433_v62  ;;  %4987 = vmatmul.bf16.gmra.mxu0 %v7950_v1 }
 0x5ca   : > { %v6183_v15 = vmax.f32 %v5891_v27, 0.0  ;;  %5929 = vmatmul.bf16.gmra.mxu1 %v7818_v43  ;;  %v7858_v43 = vor.u32 %v8735_v33, %v7855_v39  ;;  %v7831_v27 = vld [vmem:[#allocation8 + $0x258] sm:$0xf0] }
 0x5cb   : > { %6861 = vst [vmem:[%s9682_s22 + $0x198] sm:$0xff] %v6685_v46  ;;  %v7834_v33 = vor.u32 %v8728_v44, %v7831_v27  ;;  %v8739_v44 = vld [vmem:[#allocation8 + $0x2a4] sm:$0xf]  ;;  %v7871_v27 = vld [vmem:[#allocation8 + $0x2b0] sm:$0xf0] }
 0x5cc   : > { %v6316_v30 = vsel %vm6295_vm4, %v6183_v15, 0.0  ;;  %v7893_v15 = vld [vmem:[#allocation8 + $0x2c8] sm:$0xf] }
 0x5cd   : > { %6462 = vadd.xlane.f32.xlu2 %v6316_v30  ;;  %v8746_v30 = vld [vmem:[#allocation8 + $0x2d4] sm:$0xf0] }
 0x5ce   : > { %v11403_v41 = vpop.f32.mrf.mxu0  ;;  %v11411_v46 = vpop.f32.mrf.mxu3  ;;  %v7894_v39 = vor.u32 %v8746_v30, %v7893_v15 }
 0x5cf   : > { %v5892_v62 = vpop.f32.mrf.mxu1 }
 0x5d0   : > { %v5893_v1 = vadd.f32 %v5892_v62, %v5564_v4  ;;  %v6435_v19 = vpop.xlane.xlu0 %6434  ;;  %v11407_v14 = vpop.f32.mrf.mxu2  ;;  %v5567_v4 = vadd.f32 %v11308_v49, %v5238_v31 }
 0x5d1   : > { %v6686_v23 = vmul.f32 0.01, %v6435_v19 }
 0x5d2   : > { %v6184_v7 = vmax.f32 %v5893_v1, 0.0 }
 0x5d3   : > { %6862 = vst [vmem:[%s9682_s22 + $0x1a0] sm:$0xff] %v6686_v23  ;;  %5625 = vmatmul.bf16.gmra.mxu3 %v7894_v39  ;;  %v7874_v39 = vor.u32 %v8739_v44, %v7871_v27 }
 0x5d4   : > { %v6317_v16 = vsel %vm6295_vm4, %v6184_v7, 0.0  ;;  %v5240_v7 = vadd.f32 %v11381_v61, %v4911_v59  ;;  %v7981_v59 = vld [vmem:[#allocation8 + $0x380] sm:$0xf] }
 0x5d5   : > { %6464 = vadd.xlane.f32.xlu0 %v6317_v16  ;;  %5286 = vmatmul.bf16.gmra.mxu2 %v7858_v43 }
 0x5d6   : > { %v11416_v20 = vpop.f32.mrf.mxu0  ;;  %v11424_v49 = vpop.f32.mrf.mxu3  ;;  %v5569_v21 = vadd.f32 %v11324_v58, %v5240_v7  ;;  %v8732_v58 = vld [vmem:[#allocation8 + $0x26c] sm:$0xf] }
 0x5d7   : > { %v5895_v62 = vpop.f32.mrf.mxu1 }
 0x5d8   : > { %v5896_v1 = vadd.f32 %v5895_v62, %v5567_v4  ;;  %v6437_v19 = vpop.xlane.xlu1 %6436  ;;  %v11420_v23 = vpop.f32.mrf.mxu2 }
 0x5d9   : > { %v6687_v43 = vmul.f32 0.01, %v6437_v19  ;;  %4992 = vmatmul.bf16.gmra.mxu0 %v7966_v9  ;;  %v12844_v9 = vld [vmem:[#allocation44_spill] sm:$0xff] }
 0x5da   : > { %v6185_v63 = vmax.f32 %v5896_v1, 0.0  ;;  %5934 = vmatmul.bf16.gmra.mxu1 %v7834_v33  ;;  %v4914_v61 = vadd.f32 %v11163_v13, %v12844_v9  ;;  %v8769_v1 = vld [vmem:[#allocation8 + $0x38c] sm:$0xf0]  ;;  %v7847_v19 = vld [vmem:[#allocation8 + $0x278] sm:$0xf0]  ;;  %v12845_v9 = vld [vmem:[#allocation54_spill] sm:$0xff] }
 0x5db   : > { %6863 = vst [vmem:[%s9682_s22 + $0x1a8] sm:$0xff] %v6687_v43  ;;  %v7982_v13 = vor.u32 %v8769_v1, %v7981_v59  ;;  %v7850_v44 = vor.u32 %v8732_v58, %v7847_v19  ;;  %v8743_v58 = vld [vmem:[#allocation8 + $0x2c4] sm:$0xf]  ;;  %v7887_v19 = vld [vmem:[#allocation8 + $0x2d0] sm:$0xf0] }
 0x5dc   : > { %v6318_v31 = vsel %vm6295_vm4, %v6185_v63, 0.0  ;;  %v5243_v62 = vadd.f32 %v11394_v38, %v4914_v61  ;;  %v7909_v63 = vld [vmem:[#allocation8 + $0x2e8] sm:$0xf]  ;;  %v4916_v61 = vadd.f32 %v11179_v2, %v12845_v9 }
 0x5dd   : > { %6466 = vadd.xlane.f32.xlu1 %v6318_v31  ;;  %v8750_v31 = vld [vmem:[#allocation8 + $0x2f4] sm:$0xf0] }
 0x5de   : > { %v11429_v47 = vpop.f32.mrf.mxu0  ;;  %v11437_v43 = vpop.f32.mrf.mxu3  ;;  %v7910_v27 = vor.u32 %v8750_v31, %v7909_v63 }
 0x5df   : > { %v5897_v16 = vpop.f32.mrf.mxu1 }
 0x5e0   : > { %v5898_v15 = vadd.f32 %v5897_v16, %v5569_v21  ;;  %v6439_v30 = vpop.xlane.xlu2 %6438  ;;  %v11433_v4 = vpop.f32.mrf.mxu2  ;;  %v5572_v21 = vadd.f32 %v11340_v6, %v5243_v62 }
 0x5e1   : > { %v6688_v33 = vmul.f32 0.01, %v6439_v30 }
 0x5e2   : > { %v6186_v18 = vmax.f32 %v5898_v15, 0.0 }
 0x5e3   : > { %6864 = vst [vmem:[%s9682_s22 + $0x1b0] sm:$0xff] %v6688_v33  ;;  %5630 = vmatmul.bf16.gmra.mxu3 %v7910_v27  ;;  %v7890_v27 = vor.u32 %v8743_v58, %v7887_v19 }
 0x5e4   : > { %v6319_v7 = vsel %vm6295_vm4, %v6186_v18, 0.0  ;;  %v5245_v18 = vadd.f32 %v11407_v14, %v4916_v61  ;;  %v7997_v61 = vld [vmem:[#allocation8 + $0x3a0] sm:$0xf] }
 0x5e5   : > { %6468 = vadd.xlane.f32.xlu2 %v6319_v7  ;;  %5291 = vmatmul.bf16.gmra.mxu2 %v7874_v39 }
 0x5e6   : > { %v11442_v38 = vpop.f32.mrf.mxu0  ;;  %v11450_v6 = vpop.f32.mrf.mxu3  ;;  %v5574_v2 = vadd.f32 %v11357_v8, %v5245_v18  ;;  %v8736_v8 = vld [vmem:[#allocation8 + $0x28c] sm:$0xf] }
 0x5e7   : > { %v5900_v16 = vpop.f32.mrf.mxu1 }
 0x5e8   : > { %v5901_v15 = vadd.f32 %v5900_v16, %v5572_v21  ;;  %v6441_v30 = vpop.xlane.xlu0 %6440  ;;  %v11446_v33 = vpop.f32.mrf.mxu2 }
 0x5e9   : > { %v6689_v39 = vmul.f32 0.01, %v6441_v30  ;;  %4997 = vmatmul.bf16.gmra.mxu0 %v7982_v13  ;;  %v12846_v13 = vld [vmem:[#allocation41_spill] sm:$0xff]  ;;  %v7863_v30 = vld [vmem:[#allocation8 + $0x298] sm:$0xf0] }
 0x5ea   : > { %v6187_v59 = vmax.f32 %v5901_v15, 0.0  ;;  %5939 = vmatmul.bf16.gmra.mxu1 %v7850_v44  ;;  %v4919_v14 = vadd.f32 %v11195_v45, %v12846_v13  ;;  %v8773_v15 = vld [vmem:[#allocation8 + $0x3ac] sm:$0xf0]  ;;  %v7866_v58 = vor.u32 %v8736_v8, %v7863_v30  ;;  %v12847_v13 = vld [vmem:[#allocation29_spill] sm:$0xff]  ;;  %v7903_v30 = vld [vmem:[#allocation8 + $0x2f0] sm:$0xf0] }
 0x5eb   : > { %6865 = vst [vmem:[%s9682_s22 + $0x1b8] sm:$0xff] %v6689_v39  ;;  %v7998_v45 = vor.u32 %v8773_v15, %v7997_v61  ;;  %v8747_v8 = vld [vmem:[#allocation8 + $0x2e4] sm:$0xf] }
 0x5ec   : > { %v6320_v62 = vsel %vm6295_vm4, %v6187_v59, 0.0  ;;  %v5248_v16 = vadd.f32 %v11420_v23, %v4919_v14  ;;  %v7925_v59 = vld [vmem:[#allocation8 + $0x308] sm:$0xf]  ;;  %v4921_v14 = vadd.f32 %v11213_v3, %v12847_v13 }
 0x5ed   : > { %6470 = vadd.xlane.f32.xlu0 %v6320_v62  ;;  %v8754_v62 = vld [vmem:[#allocation8 + $0x314] sm:$0xf0] }
 0x5ee   : > { %v11455_v1 = vpop.f32.mrf.mxu0  ;;  %v11463_v39 = vpop.f32.mrf.mxu3  ;;  %v7926_v19 = vor.u32 %v8754_v62, %v7925_v59 }
 0x5ef   : > { %v5902_v7 = vpop.f32.mrf.mxu1 }
 0x5f0   : > { %v5903_v63 = vadd.f32 %v5902_v7, %v5574_v2  ;;  %v6443_v31 = vpop.xlane.xlu1 %6442  ;;  %v11459_v21 = vpop.f32.mrf.mxu2  ;;  %v5577_v2 = vadd.f32 %v11372_v24, %v5248_v16 }
 0x5f1   : > { %v6690_v44 = vmul.f32 0.01, %v6443_v31 }
 0x5f2   : > { %v6188_v9 = vmax.f32 %v5903_v63, 0.0 }
 0x5f3   : > { %6866 = vst [vmem:[%s9682_s22 + $0x1c0] sm:$0xff] %v6690_v44  ;;  %5635 = vmatmul.bf16.gmra.mxu3 %v7926_v19  ;;  %v7906_v19 = vor.u32 %v8747_v8, %v7903_v30 }
 0x5f4   : > { %v6321_v18 = vsel %vm6295_vm4, %v6188_v9, 0.0  ;;  %v5250_v9 = vadd.f32 %v11433_v4, %v4921_v14  ;;  %v8013_v14 = vld [vmem:[#allocation8 + $0x3c0] sm:$0xf] }
 0x5f5   : > { %6472 = vadd.xlane.f32.xlu1 %v6321_v18  ;;  %5296 = vmatmul.bf16.gmra.mxu2 %v7890_v27 }
 0x5f6   : > { %v11468_v23 = vpop.f32.mrf.mxu0  ;;  %v11476_v24 = vpop.f32.mrf.mxu3  ;;  %v5579_v3 = vadd.f32 %v11385_v51, %v5250_v9  ;;  %v8740_v51 = vld [vmem:[#allocation8 + $0x2ac] sm:$0xf] }
 0x5f7   : > { %v5905_v7 = vpop.f32.mrf.mxu1 }
 0x5f8   : > { %v5906_v63 = vadd.f32 %v5905_v7, %v5577_v2  ;;  %v6445_v31 = vpop.xlane.xlu2 %6444  ;;  %v11472_v44 = vpop.f32.mrf.mxu2 }
 0x5f9   : > { %v6691_v27 = vmul.f32 0.01, %v6445_v31  ;;  %5002 = vmatmul.bf16.gmra.mxu0 %v7998_v45  ;;  %v12848_v45 = vld [vmem:[#allocation19_spill] sm:$0xff]  ;;  %v7879_v31 = vld [vmem:[#allocation8 + $0x2b8] sm:$0xf0] }
 0x5fa   : > { %v6189_v61 = vmax.f32 %v5906_v63, 0.0  ;;  %5944 = vmatmul.bf16.gmra.mxu1 %v7866_v58  ;;  %v4924_v4 = vadd.f32 %v11231_v53, %v12848_v45  ;;  %v8777_v63 = vld [vmem:[#allocation8 + $0x3cc] sm:$0xf0]  ;;  %v7882_v8 = vor.u32 %v8740_v51, %v7879_v31  ;;  %v12849_v45 = vld [vmem:[#allocation40_spill] sm:$0xff]  ;;  %v8751_v51 = vld [vmem:[#allocation8 + $0x304] sm:$0xf] }
 0x5fb   : > { %6867 = vst [vmem:[%s9682_s22 + $0x1c8] sm:$0xff] %v6691_v27  ;;  %v8014_v53 = vor.u32 %v8777_v63, %v8013_v14  ;;  %v7919_v31 = vld [vmem:[#allocation8 + $0x310] sm:$0xf0] }
 0x5fc   : > { %v6322_v16 = vsel %vm6295_vm4, %v6189_v61, 0.0  ;;  %v5253_v7 = vadd.f32 %v11446_v33, %v4924_v4  ;;  %v7941_v61 = vld [vmem:[#allocation8 + $0x328] sm:$0xf]  ;;  %v4926_v4 = vadd.f32 %v11247_v40, %v12849_v45 }
 0x5fd   : > { %6474 = vadd.xlane.f32.xlu2 %v6322_v16  ;;  %v8758_v16 = vld [vmem:[#allocation8 + $0x334] sm:$0xf0] }
 0x5fe   : > { %v11481_v15 = vpop.f32.mrf.mxu0  ;;  %v11489_v27 = vpop.f32.mrf.mxu3  ;;  %v7942_v30 = vor.u32 %v8758_v16, %v7941_v61 }
 0x5ff   : > { %v5907_v18 = vpop.f32.mrf.mxu1 }
 0x600   : > { %v5908_v59 = vadd.f32 %v5907_v18, %v5579_v3  ;;  %v6447_v62 = vpop.xlane.xlu0 %6446  ;;  %v11485_v2 = vpop.f32.mrf.mxu2  ;;  %v5582_v3 = vadd.f32 %v11398_v36, %v5253_v7 }
 0x601   : > { %v6692_v58 = vmul.f32 0.01, %v6447_v62 }
 0x602   : > { %v6190_v13 = vmax.f32 %v5908_v59, 0.0 }
 0x603   : > { %6868 = vst [vmem:[%s9682_s22 + $0x1d0] sm:$0xff] %v6692_v58  ;;  %5640 = vmatmul.bf16.gmra.mxu3 %v7942_v30  ;;  %v7922_v30 = vor.u32 %v8751_v51, %v7919_v31 }
 0x604   : > { %v6323_v9 = vsel %vm6295_vm4, %v6190_v13, 0.0  ;;  %v5255_v13 = vadd.f32 %v11459_v21, %v4926_v4  ;;  %v8029_v4 = vld [vmem:[#allocation8 + $0x3e0] sm:$0xf] }
 0x605   : > { %6476 = vadd.xlane.f32.xlu0 %v6323_v9  ;;  %5301 = vmatmul.bf16.gmra.mxu2 %v7906_v19 }
 0x606   : > { %v11494_v33 = vpop.f32.mrf.mxu0  ;;  %v11502_v36 = vpop.f32.mrf.mxu3  ;;  %v5584_v40 = vadd.f32 %v11411_v46, %v5255_v13  ;;  %v8744_v46 = vld [vmem:[#allocation8 + $0x2cc] sm:$0xf] }
 0x607   : > { %v5910_v18 = vpop.f32.mrf.mxu1 }
 0x608   : > { %v5911_v59 = vadd.f32 %v5910_v18, %v5582_v3  ;;  %v6449_v62 = vpop.xlane.xlu1 %6448  ;;  %v11498_v58 = vpop.f32.mrf.mxu2 }
 0x609   : > { %v6693_v19 = vmul.f32 0.01, %v6449_v62  ;;  %5007 = vmatmul.bf16.gmra.mxu0 %v8014_v53  ;;  %v12850_v53 = vld [vmem:[#allocation21_spill] sm:$0xff]  ;;  %v7895_v62 = vld [vmem:[#allocation8 + $0x2d8] sm:$0xf0] }
 0x60a   : > { %v6191_v14 = vmax.f32 %v5911_v59, 0.0  ;;  %5949 = vmatmul.bf16.gmra.mxu1 %v7882_v8  ;;  %v4929_v21 = vadd.f32 %v11263_v55, %v12850_v53  ;;  %v8781_v59 = vld [vmem:[#allocation8 + $0x3ec] sm:$0xf0]  ;;  %v7898_v51 = vor.u32 %v8744_v46, %v7895_v62  ;;  %v8755_v46 = vld [vmem:[#allocation8 + $0x324] sm:$0xf] }
 0x60b   : > { %6869 = vst [vmem:[%s9682_s22 + $0x1d8] sm:$0xff] %v6693_v19  ;;  %v8030_v55 = vor.u32 %v8781_v59, %v8029_v4  ;;  %v12851_v53 = vld [vmem:[#allocation39_spill] sm:$0xff] }
 0x60c   : > { %v6324_v7 = vsel %vm6295_vm4, %v6191_v14, 0.0  ;;  %v5258_v18 = vadd.f32 %v11472_v44, %v4929_v21  ;;  %v7957_v14 = vld [vmem:[#allocation8 + $0x348] sm:$0xf]  ;;  %v4931_v21 = vadd.f32 %v11279_v50, %v12851_v53  ;;  %v7935_v62 = vld [vmem:[#allocation8 + $0x330] sm:$0xf0] }
 0x60d   : > { %6478 = vadd.xlane.f32.xlu1 %v6324_v7  ;;  %v8762_v7 = vld [vmem:[#allocation8 + $0x354] sm:$0xf0] }
 0x60e   : > { %v11507_v63 = vpop.f32.mrf.mxu0  ;;  %v11515_v19 = vpop.f32.mrf.mxu3  ;;  %v7958_v31 = vor.u32 %v8762_v7, %v7957_v14 }
 0x60f   : > { %v5912_v9 = vpop.f32.mrf.mxu1 }
 0x610   : > { %v5913_v61 = vadd.f32 %v5912_v9, %v5584_v40  ;;  %v6451_v16 = vpop.xlane.xlu2 %6450  ;;  %v11511_v3 = vpop.f32.mrf.mxu2  ;;  %v5587_v40 = vadd.f32 %v11424_v49, %v5258_v18 }
 0x611   : > { %v6694_v8 = vmul.f32 0.01, %v6451_v16 }
 0x612   : > { %v6192_v45 = vmax.f32 %v5913_v61, 0.0 }
 0x613   : > { %6870 = vst [vmem:[%s9682_s22 + $0x1e0] sm:$0xff] %v6694_v8  ;;  %5645 = vmatmul.bf16.gmra.mxu3 %v7958_v31  ;;  %v7938_v31 = vor.u32 %v8755_v46, %v7935_v62 }
 0x614   : > { %v6325_v13 = vsel %vm6295_vm4, %v6192_v45, 0.0  ;;  %v5260_v45 = vadd.f32 %v11485_v2, %v4931_v21  ;;  %v8045_v21 = vld [vmem:[#allocation8 + $0x400] sm:$0xf] }
 0x615   : > { %6480 = vadd.xlane.f32.xlu2 %v6325_v13  ;;  %5306 = vmatmul.bf16.gmra.mxu2 %v7922_v30 }
 0x616   : > { %v11520_v44 = vpop.f32.mrf.mxu0  ;;  %v11528_v49 = vpop.f32.mrf.mxu3  ;;  %v5589_v50 = vadd.f32 %v11437_v43, %v5260_v45  ;;  %v8748_v43 = vld [vmem:[#allocation8 + $0x2ec] sm:$0xf] }
 0x617   : > { %v5915_v9 = vpop.f32.mrf.mxu1 }
 0x618   : > { %v5916_v61 = vadd.f32 %v5915_v9, %v5587_v40  ;;  %v6453_v16 = vpop.xlane.xlu0 %6452  ;;  %v11524_v8 = vpop.f32.mrf.mxu2 }
 0x619   : > { %v6695_v30 = vmul.f32 0.01, %v6453_v16  ;;  %5012 = vmatmul.bf16.gmra.mxu0 %v8030_v55  ;;  %v12852_v55 = vld [vmem:[#allocation30_spill] sm:$0xff]  ;;  %v7911_v16 = vld [vmem:[#allocation8 + $0x2f8] sm:$0xf0] }
 0x61a   : > { %v6193_v4 = vmax.f32 %v5916_v61, 0.0  ;;  %5954 = vmatmul.bf16.gmra.mxu1 %v7898_v51  ;;  %v4934_v2 = vadd.f32 %v11297_v25, %v12852_v55  ;;  %v8785_v61 = vld [vmem:[#allocation8 + $0x40c] sm:$0xf0]  ;;  %v7914_v46 = vor.u32 %v8748_v43, %v7911_v16  ;;  %v12853_v55 = vld [vmem:[#allocation20_spill] sm:$0xff]  ;;  %v8759_v43 = vld [vmem:[#allocation8 + $0x344] sm:$0xf] }
 0x61b   : > { %6871 = vst [vmem:[%s9682_s22 + $0x1e8] sm:$0xff] %v6695_v30  ;;  %v8046_v25 = vor.u32 %v8785_v61, %v8045_v21  ;;  %v7951_v16 = vld [vmem:[#allocation8 + $0x350] sm:$0xf0] }
 0x61c   : > { %v6326_v18 = vsel %vm6295_vm4, %v6193_v4, 0.0  ;;  %v5263_v9 = vadd.f32 %v11498_v58, %v4934_v2  ;;  %v7973_v4 = vld [vmem:[#allocation8 + $0x368] sm:$0xf]  ;;  %v4936_v2 = vadd.f32 %v11315_v54, %v12853_v55 }
 0x61d   : > { %6482 = vadd.xlane.f32.xlu0 %v6326_v18  ;;  %v8766_v18 = vld [vmem:[#allocation8 + $0x374] sm:$0xf0] }
 0x61e   : > { %v11533_v59 = vpop.f32.mrf.mxu0  ;;  %v11541_v30 = vpop.f32.mrf.mxu3  ;;  %v7974_v62 = vor.u32 %v8766_v18, %v7973_v4 }
 0x61f   : > { %v5917_v13 = vpop.f32.mrf.mxu1 }
 0x620   : > { %v5918_v14 = vadd.f32 %v5917_v13, %v5589_v50  ;;  %v6455_v7 = vpop.xlane.xlu1 %6454  ;;  %v11537_v40 = vpop.f32.mrf.mxu2  ;;  %v5592_v50 = vadd.f32 %v11450_v6, %v5263_v9 }
 0x621   : > { %v6696_v51 = vmul.f32 0.01, %v6455_v7 }
 0x622   : > { %v6194_v53 = vmax.f32 %v5918_v14, 0.0 }
 0x623   : > { %6872 = vst [vmem:[%s9682_s22 + $0x1f0] sm:$0xff] %v6696_v51  ;;  %5650 = vmatmul.bf16.gmra.mxu3 %v7974_v62  ;;  %v7954_v62 = vor.u32 %v8759_v43, %v7951_v16 }
 0x624   : > { %v6327_v45 = vsel %vm6295_vm4, %v6194_v53, 0.0  ;;  %v5265_v53 = vadd.f32 %v11511_v3, %v4936_v2  ;;  %v8061_v2 = vld [vmem:[#allocation8 + $0x420] sm:$0xf] }
 0x625   : > { %6484 = vadd.xlane.f32.xlu1 %v6327_v45  ;;  %5311 = vmatmul.bf16.gmra.mxu2 %v7938_v31 }
 0x626   : > { %v11546_v58 = vpop.f32.mrf.mxu0  ;;  %v11554_v6 = vpop.f32.mrf.mxu3  ;;  %v5594_v54 = vadd.f32 %v11463_v39, %v5265_v53  ;;  %v8752_v39 = vld [vmem:[#allocation8 + $0x30c] sm:$0xf] }
 0x627   : > { %v5920_v13 = vpop.f32.mrf.mxu1 }
 0x628   : > { %v5921_v14 = vadd.f32 %v5920_v13, %v5592_v50  ;;  %v6457_v7 = vpop.xlane.xlu2 %6456  ;;  %v11550_v51 = vpop.f32.mrf.mxu2 }
 0x629   : > { %v6697_v31 = vmul.f32 0.01, %v6457_v7  ;;  %5017 = vmatmul.bf16.gmra.mxu0 %v8046_v25  ;;  %v12854_v25 = vld [vmem:[#allocation53_spill] sm:$0xff]  ;;  %v7927_v7 = vld [vmem:[#allocation8 + $0x318] sm:$0xf0] }
 0x62a   : > { %v6195_v21 = vmax.f32 %v5921_v14, 0.0  ;;  %5959 = vmatmul.bf16.gmra.mxu1 %v7914_v46  ;;  %v4939_v3 = vadd.f32 %v11331_v10, %v12854_v25  ;;  %v8789_v14 = vld [vmem:[#allocation8 + $0x42c] sm:$0xf0]  ;;  %v7930_v43 = vor.u32 %v8752_v39, %v7927_v7  ;;  %v8763_v39 = vld [vmem:[#allocation8 + $0x364] sm:$0xf] }
 0x62b   : > { %6873 = vst [vmem:[%s9682_s22 + $0x1f8] sm:$0xff] %v6697_v31  ;;  %v8062_v10 = vor.u32 %v8789_v14, %v8061_v2  ;;  %v12855_v25 = vld [vmem:[#allocation31_spill] sm:$0xff] }
 0x62c   : > { %v6328_v9 = vsel %vm6295_vm4, %v6195_v21, 0.0  ;;  %v5268_v13 = vadd.f32 %v11524_v8, %v4939_v3  ;;  %v7989_v21 = vld [vmem:[#allocation8 + $0x388] sm:$0xf]  ;;  %v4941_v3 = vadd.f32 %v11347_v29, %v12855_v25  ;;  %v7967_v7 = vld [vmem:[#allocation8 + $0x370] sm:$0xf0] }
 0x62d   : > { %6486 = vadd.xlane.f32.xlu2 %v6328_v9  ;;  %v8770_v9 = vld [vmem:[#allocation8 + $0x394] sm:$0xf0] }
 0x62e   : > { %v11559_v61 = vpop.f32.mrf.mxu0  ;;  %v11567_v31 = vpop.f32.mrf.mxu3  ;;  %v7990_v16 = vor.u32 %v8770_v9, %v7989_v21 }
 0x62f   : > { %v5922_v45 = vpop.f32.mrf.mxu1 }
 0x630   : > { %v5923_v4 = vadd.f32 %v5922_v45, %v5594_v54  ;;  %v6459_v18 = vpop.xlane.xlu0 %6458  ;;  %v11563_v50 = vpop.f32.mrf.mxu2  ;;  %v5597_v54 = vadd.f32 %v11476_v24, %v5268_v13 }
 0x631   : > { %v6698_v46 = vmul.f32 0.01, %v6459_v18 }
 0x632   : > { %v6196_v55 = vmax.f32 %v5923_v4, 0.0 }
 0x633   : > { %6874 = vst [vmem:[%s9682_s22 + $0x200] sm:$0xff] %v6698_v46  ;;  %5655 = vmatmul.bf16.gmra.mxu3 %v7990_v16  ;;  %v7970_v16 = vor.u32 %v8763_v39, %v7967_v7 }
 0x634   : > { %v6329_v53 = vsel %vm6295_vm4, %v6196_v55, 0.0  ;;  %v5270_v55 = vadd.f32 %v11537_v40, %v4941_v3  ;;  %v8077_v3 = vld [vmem:[#allocation8 + $0x440] sm:$0xf] }
 0x635   : > { %6488 = vadd.xlane.f32.xlu0 %v6329_v53  ;;  %5316 = vmatmul.bf16.gmra.mxu2 %v7954_v62 }
 0x636   : > { %v11572_v8 = vpop.f32.mrf.mxu0  ;;  %v11580_v24 = vpop.f32.mrf.mxu3  ;;  %v5599_v29 = vadd.f32 %v11489_v27, %v5270_v55  ;;  %v8756_v27 = vld [vmem:[#allocation8 + $0x32c] sm:$0xf] }
 0x637   : > { %v5925_v45 = vpop.f32.mrf.mxu1 }
 0x638   : > { %v5926_v4 = vadd.f32 %v5925_v45, %v5597_v54  ;;  %v6461_v18 = vpop.xlane.xlu1 %6460  ;;  %v11576_v46 = vpop.f32.mrf.mxu2 }
 0x639   : > { %v6699_v62 = vmul.f32 0.01, %v6461_v18  ;;  %5022 = vmatmul.bf16.gmra.mxu0 %v8062_v10  ;;  %v12856_v10 = vld [vmem:[#allocation22_spill] sm:$0xff]  ;;  %v7943_v18 = vld [vmem:[#allocation8 + $0x338] sm:$0xf0] }
 0x63a   : > { %v6197_v2 = vmax.f32 %v5926_v4, 0.0  ;;  %5964 = vmatmul.bf16.gmra.mxu1 %v7930_v43  ;;  %v4944_v40 = vadd.f32 %v11362_v48, %v12856_v10  ;;  %v8793_v4 = vld [vmem:[#allocation8 + $0x44c] sm:$0xf0]  ;;  %v7946_v39 = vor.u32 %v8756_v27, %v7943_v18  ;;  %v12857_v10 = vld [vmem:[#allocation52_spill] sm:$0xff]  ;;  %v8767_v27 = vld [vmem:[#allocation8 + $0x384] sm:$0xf] }
 0x63b   : > { %6875 = vst [vmem:[%s9682_s22 + $0x208] sm:$0xff] %v6699_v62  ;;  %v8078_v48 = vor.u32 %v8793_v4, %v8077_v3  ;;  %v7983_v18 = vld [vmem:[#allocation8 + $0x390] sm:$0xf0] }
 0x63c   : > { %v6330_v13 = vsel %vm6295_vm4, %v6197_v2, 0.0  ;;  %v5273_v45 = vadd.f32 %v11550_v51, %v4944_v40  ;;  %v8005_v2 = vld [vmem:[#allocation8 + $0x3a8] sm:$0xf]  ;;  %v4946_v40 = vadd.f32 %v11377_v0, %v12857_v10 }
 0x63d   : > { %6490 = vadd.xlane.f32.xlu1 %v6330_v13  ;;  %v8774_v13 = vld [vmem:[#allocation8 + $0x3b4] sm:$0xf0] }
 0x63e   : > { %v11585_v14 = vpop.f32.mrf.mxu0  ;;  %v11593_v62 = vpop.f32.mrf.mxu3  ;;  %v8006_v7 = vor.u32 %v8774_v13, %v8005_v2 }
 0x63f   : > { %v5927_v53 = vpop.f32.mrf.mxu1 }
 0x640   : > { %v5928_v21 = vadd.f32 %v5927_v53, %v5599_v29  ;;  %v6463_v9 = vpop.xlane.xlu2 %6462  ;;  %v11589_v54 = vpop.f32.mrf.mxu2  ;;  %v5602_v29 = vadd.f32 %v11502_v36, %v5273_v45 }
 0x641   : > { %v6700_v43 = vmul.f32 0.01, %v6463_v9 }
 0x642   : > { %v6198_v25 = vmax.f32 %v5928_v21, 0.0 }
 0x643   : > { %6876 = vst [vmem:[%s9682_s22 + $0x210] sm:$0xff] %v6700_v43  ;;  %5660 = vmatmul.bf16.gmra.mxu3 %v8006_v7  ;;  %v7986_v7 = vor.u32 %v8767_v27, %v7983_v18 }
 0x644   : > { %v6331_v55 = vsel %vm6295_vm4, %v6198_v25, 0.0  ;;  %v5275_v25 = vadd.f32 %v11563_v50, %v4946_v40  ;;  %v8093_v40 = vld [vmem:[#allocation8 + $0x460] sm:$0xf] }
 0x645   : > { %6492 = vadd.xlane.f32.xlu2 %v6331_v55  ;;  %5321 = vmatmul.bf16.gmra.mxu2 %v7970_v16 }
 0x646   : > { %v11598_v51 = vpop.f32.mrf.mxu0  ;;  %v11606_v36 = vpop.f32.mrf.mxu3  ;;  %v5604_v0 = vadd.f32 %v11515_v19, %v5275_v25  ;;  %v8760_v19 = vld [vmem:[#allocation8 + $0x34c] sm:$0xf] }
 0x647   : > { %v5930_v53 = vpop.f32.mrf.mxu1 }
 0x648   : > { %v5931_v21 = vadd.f32 %v5930_v53, %v5602_v29  ;;  %v6465_v9 = vpop.xlane.xlu0 %6464  ;;  %v11602_v43 = vpop.f32.mrf.mxu2 }
 0x649   : > { %v6701_v16 = vmul.f32 0.01, %v6465_v9  ;;  %5027 = vmatmul.bf16.gmra.mxu0 %v8078_v48  ;;  %v12858_v48 = vld [vmem:[#allocation32_spill] sm:$0xff] }
 0x64a   : > { %v6199_v3 = vmax.f32 %v5931_v21, 0.0  ;;  %5969 = vmatmul.bf16.gmra.mxu1 %v7946_v39  ;;  %v4949_v50 = vadd.f32 %v11390_v57, %v12858_v48  ;;  %v8797_v21 = vld [vmem:[#allocation8 + $0x46c] sm:$0xf0]  ;;  %v7959_v9 = vld [vmem:[#allocation8 + $0x358] sm:$0xf0]  ;;  %v12859_v48 = vld [vmem:[#allocation33_spill] sm:$0xff] }
 0x64b   : > { %6877 = vst [vmem:[%s9682_s22 + $0x218] sm:$0xff] %v6701_v16  ;;  %v8094_v57 = vor.u32 %v8797_v21, %v8093_v40  ;;  %v7962_v27 = vor.u32 %v8760_v19, %v7959_v9  ;;  %v8771_v19 = vld [vmem:[#allocation8 + $0x3a4] sm:$0xf]  ;;  %v7999_v9 = vld [vmem:[#allocation8 + $0x3b0] sm:$0xf0] }
 0x64c   : > { %v6332_v45 = vsel %vm6295_vm4, %v6199_v3, 0.0  ;;  %v5278_v53 = vadd.f32 %v11576_v46, %v4949_v50  ;;  %v8021_v3 = vld [vmem:[#allocation8 + $0x3c8] sm:$0xf]  ;;  %v4951_v50 = vadd.f32 %v11403_v41, %v12859_v48 }
 0x64d   : > { %6494 = vadd.xlane.f32.xlu0 %v6332_v45  ;;  %v8778_v45 = vld [vmem:[#allocation8 + $0x3d4] sm:$0xf0] }
 0x64e   : > { %v11611_v4 = vpop.f32.mrf.mxu0  ;;  %v11619_v16 = vpop.f32.mrf.mxu3  ;;  %v8022_v18 = vor.u32 %v8778_v45, %v8021_v3 }
 0x64f   : > { %v5932_v55 = vpop.f32.mrf.mxu1 }
 0x650   : > { %v5933_v2 = vadd.f32 %v5932_v55, %v5604_v0  ;;  %v6467_v13 = vpop.xlane.xlu1 %6466  ;;  %v11615_v29 = vpop.f32.mrf.mxu2  ;;  %v5607_v0 = vadd.f32 %v11528_v49, %v5278_v53 }
 0x651   : > { %v6702_v39 = vmul.f32 0.01, %v6467_v13 }
 0x652   : > { %v6200_v10 = vmax.f32 %v5933_v2, 0.0 }
 0x653   : > { %6878 = vst [vmem:[%s9682_s22 + $0x220] sm:$0xff] %v6702_v39  ;;  %5665 = vmatmul.bf16.gmra.mxu3 %v8022_v18  ;;  %v8002_v18 = vor.u32 %v8771_v19, %v7999_v9 }
 0x654   : > { %v6333_v25 = vsel %vm6295_vm4, %v6200_v10, 0.0  ;;  %v5280_v10 = vadd.f32 %v11589_v54, %v4951_v50  ;;  %v8109_v50 = vld [vmem:[#allocation8 + $0x480] sm:$0xf] }
 0x655   : > { %6496 = vadd.xlane.f32.xlu1 %v6333_v25  ;;  %5326 = vmatmul.bf16.gmra.mxu2 %v7986_v7 }
 0x656   : > { %v11624_v46 = vpop.f32.mrf.mxu0  ;;  %v11632_v49 = vpop.f32.mrf.mxu3  ;;  %v5609_v41 = vadd.f32 %v11541_v30, %v5280_v10  ;;  %v8764_v30 = vld [vmem:[#allocation8 + $0x36c] sm:$0xf] }
 0x657   : > { %v5935_v55 = vpop.f32.mrf.mxu1 }
 0x658   : > { %v5936_v2 = vadd.f32 %v5935_v55, %v5607_v0  ;;  %v6469_v13 = vpop.xlane.xlu2 %6468  ;;  %v11628_v39 = vpop.f32.mrf.mxu2 }
 0x659   : > { %v6703_v7 = vmul.f32 0.01, %v6469_v13  ;;  %5032 = vmatmul.bf16.gmra.mxu0 %v8094_v57  ;;  %v12860_v57 = vld [vmem:[#allocation24_spill] sm:$0xff] }
 0x65a   : > { %v6201_v40 = vmax.f32 %v5936_v2, 0.0  ;;  %5974 = vmatmul.bf16.gmra.mxu1 %v7962_v27  ;;  %v4954_v54 = vadd.f32 %v11416_v20, %v12860_v57  ;;  %v8801_v2 = vld [vmem:[#allocation8 + $0x48c] sm:$0xf0]  ;;  %v7975_v13 = vld [vmem:[#allocation8 + $0x378] sm:$0xf0] }
 0x65b   : > { %6879 = vst [vmem:[%s9682_s22 + $0x228] sm:$0xff] %v6703_v7  ;;  %v8110_v20 = vor.u32 %v8801_v2, %v8109_v50  ;;  %v7978_v19 = vor.u32 %v8764_v30, %v7975_v13  ;;  %v12861_v57 = vld [vmem:[#allocation48_spill] sm:$0xff]  ;;  %v8775_v30 = vld [vmem:[#allocation8 + $0x3c4] sm:$0xf]  ;;  %v8015_v13 = vld [vmem:[#allocation8 + $0x3d0] sm:$0xf0] }
 0x65c   : > { %v6334_v53 = vsel %vm6295_vm4, %v6201_v40, 0.0  ;;  %v5283_v55 = vadd.f32 %v11602_v43, %v4954_v54  ;;  %v8037_v40 = vld [vmem:[#allocation8 + $0x3e8] sm:$0xf]  ;;  %v4956_v54 = vadd.f32 %v11429_v47, %v12861_v57 }
 0x65d   : > { %6498 = vadd.xlane.f32.xlu2 %v6334_v53  ;;  %v8782_v53 = vld [vmem:[#allocation8 + $0x3f4] sm:$0xf0] }
 0x65e   : > { %v11637_v21 = vpop.f32.mrf.mxu0  ;;  %v11645_v7 = vpop.f32.mrf.mxu3  ;;  %v8038_v9 = vor.u32 %v8782_v53, %v8037_v40 }
 0x65f   : > { %v5937_v25 = vpop.f32.mrf.mxu1 }
 0x660   : > { %v5938_v3 = vadd.f32 %v5937_v25, %v5609_v41  ;;  %v6471_v45 = vpop.xlane.xlu0 %6470  ;;  %v11641_v0 = vpop.f32.mrf.mxu2  ;;  %v5612_v41 = vadd.f32 %v11554_v6, %v5283_v55 }
 0x661   : > { %v6704_v27 = vmul.f32 0.01, %v6471_v45 }
 0x662   : > { %v6202_v48 = vmax.f32 %v5938_v3, 0.0 }
 0x663   : > { %6880 = vst [vmem:[%s9682_s22 + $0x230] sm:$0xff] %v6704_v27  ;;  %5670 = vmatmul.bf16.gmra.mxu3 %v8038_v9  ;;  %v8018_v9 = vor.u32 %v8775_v30, %v8015_v13 }
 0x664   : > { %v6335_v10 = vsel %vm6295_vm4, %v6202_v48, 0.0  ;;  %v5285_v48 = vadd.f32 %v11615_v29, %v4956_v54  ;;  %v8125_v54 = vld [vmem:[#allocation8 + $0x4a0] sm:$0xf] }
 0x665   : > { %6500 = vadd.xlane.f32.xlu0 %v6335_v10  ;;  %5331 = vmatmul.bf16.gmra.mxu2 %v8002_v18 }
 0x666   : > { %v11650_v43 = vpop.f32.mrf.mxu0  ;;  %v11658_v6 = vpop.f32.mrf.mxu3  ;;  %v5614_v47 = vadd.f32 %v11567_v31, %v5285_v48  ;;  %v8768_v31 = vld [vmem:[#allocation8 + $0x38c] sm:$0xf] }
 0x667   : > { %v5940_v25 = vpop.f32.mrf.mxu1 }
 0x668   : > { %v5941_v3 = vadd.f32 %v5940_v25, %v5612_v41  ;;  %v6473_v45 = vpop.xlane.xlu1 %6472  ;;  %v11654_v27 = vpop.f32.mrf.mxu2 }
 0x669   : > { %v6705_v18 = vmul.f32 0.01, %v6473_v45  ;;  %5037 = vmatmul.bf16.gmra.mxu0 %v8110_v20  ;;  %v12862_v20 = vld [vmem:[#allocation34_spill] sm:$0xff]  ;;  %v7991_v45 = vld [vmem:[#allocation8 + $0x398] sm:$0xf0] }
 0x66a   : > { %v6203_v50 = vmax.f32 %v5941_v3, 0.0  ;;  %5979 = vmatmul.bf16.gmra.mxu1 %v7978_v19  ;;  %v4959_v29 = vadd.f32 %v11442_v38, %v12862_v20  ;;  %v8805_v3 = vld [vmem:[#allocation8 + $0x4ac] sm:$0xf0]  ;;  %v7994_v30 = vor.u32 %v8768_v31, %v7991_v45  ;;  %v8779_v31 = vld [vmem:[#allocation8 + $0x3e4] sm:$0xf] }
 0x66b   : > { %6881 = vst [vmem:[%s9682_s22 + $0x238] sm:$0xff] %v6705_v18  ;;  %v8126_v38 = vor.u32 %v8805_v3, %v8125_v54  ;;  %v12863_v20 = vld [vmem:[#allocation23_spill] sm:$0xff] }
 0x66c   : > { %v6336_v55 = vsel %vm6295_vm4, %v6203_v50, 0.0  ;;  %v5288_v25 = vadd.f32 %v11628_v39, %v4959_v29  ;;  %v8053_v50 = vld [vmem:[#allocation8 + $0x408] sm:$0xf]  ;;  %v4961_v29 = vadd.f32 %v11455_v1, %v12863_v20  ;;  %v8031_v45 = vld [vmem:[#allocation8 + $0x3f0] sm:$0xf0] }
 0x66d   : > { %6502 = vadd.xlane.f32.xlu1 %v6336_v55  ;;  %v8786_v55 = vld [vmem:[#allocation8 + $0x414] sm:$0xf0] }
 0x66e   : > { %v11663_v2 = vpop.f32.mrf.mxu0  ;;  %v11671_v18 = vpop.f32.mrf.mxu3  ;;  %v8054_v13 = vor.u32 %v8786_v55, %v8053_v50 }
 0x66f   : > { %v5942_v10 = vpop.f32.mrf.mxu1 }
 0x670   : > { %v5943_v40 = vadd.f32 %v5942_v10, %v5614_v47  ;;  %v6475_v53 = vpop.xlane.xlu2 %6474  ;;  %v11667_v41 = vpop.f32.mrf.mxu2  ;;  %v5617_v47 = vadd.f32 %v11580_v24, %v5288_v25 }
 0x671   : > { %v6706_v19 = vmul.f32 0.01, %v6475_v53 }
 0x672   : > { %v6204_v57 = vmax.f32 %v5943_v40, 0.0 }
 0x673   : > { %6882 = vst [vmem:[%s9682_s22 + $0x240] sm:$0xff] %v6706_v19  ;;  %5675 = vmatmul.bf16.gmra.mxu3 %v8054_v13  ;;  %v8034_v13 = vor.u32 %v8779_v31, %v8031_v45 }
 0x674   : > { %v6337_v48 = vsel %vm6295_vm4, %v6204_v57, 0.0  ;;  %v5290_v57 = vadd.f32 %v11641_v0, %v4961_v29  ;;  %v8141_v29 = vld [vmem:[#allocation8 + $0x4c0] sm:$0xf] }
 0x675   : > { %6504 = vadd.xlane.f32.xlu2 %v6337_v48  ;;  %5336 = vmatmul.bf16.gmra.mxu2 %v8018_v9 }
 0x676   : > { %v11676_v39 = vpop.f32.mrf.mxu0  ;;  %v11684_v24 = vpop.f32.mrf.mxu3  ;;  %v5619_v1 = vadd.f32 %v11593_v62, %v5290_v57  ;;  %v8772_v62 = vld [vmem:[#allocation8 + $0x3ac] sm:$0xf] }
 0x677   : > { %v5945_v10 = vpop.f32.mrf.mxu1 }
 0x678   : > { %v5946_v40 = vadd.f32 %v5945_v10, %v5617_v47  ;;  %v6477_v53 = vpop.xlane.xlu0 %6476  ;;  %v11680_v19 = vpop.f32.mrf.mxu2 }
 0x679   : > { %v6707_v9 = vmul.f32 0.01, %v6477_v53  ;;  %5042 = vmatmul.bf16.gmra.mxu0 %v8126_v38  ;;  %v12864_v38 = vld [vmem:[#allocation25_spill] sm:$0xff]  ;;  %v8007_v53 = vld [vmem:[#allocation8 + $0x3b8] sm:$0xf0] }
 0x67a   : > { %v6205_v54 = vmax.f32 %v5946_v40, 0.0  ;;  %5984 = vmatmul.bf16.gmra.mxu1 %v7994_v30  ;;  %v4964_v0 = vadd.f32 %v11468_v23, %v12864_v38  ;;  %v8809_v40 = vld [vmem:[#allocation8 + $0x4cc] sm:$0xf0]  ;;  %v8010_v31 = vor.u32 %v8772_v62, %v8007_v53  ;;  %v8783_v62 = vld [vmem:[#allocation8 + $0x404] sm:$0xf] }
 0x67b   : > { %6883 = vst [vmem:[%s9682_s22 + $0x248] sm:$0xff] %v6707_v9  ;;  %v8142_v23 = vor.u32 %v8809_v40, %v8141_v29  ;;  %v12865_v38 = vld [vmem:[#allocation27_spill] sm:$0xff] }
 0x67c   : > { %v6338_v25 = vsel %vm6295_vm4, %v6205_v54, 0.0  ;;  %v5293_v10 = vadd.f32 %v11654_v27, %v4964_v0  ;;  %v8069_v54 = vld [vmem:[#allocation8 + $0x428] sm:$0xf]  ;;  %v4966_v0 = vadd.f32 %v11481_v15, %v12865_v38  ;;  %v8047_v53 = vld [vmem:[#allocation8 + $0x410] sm:$0xf0] }
 0x67d   : > { %6506 = vadd.xlane.f32.xlu0 %v6338_v25  ;;  %v8790_v25 = vld [vmem:[#allocation8 + $0x434] sm:$0xf0] }
 0x67e   : > { %v11689_v3 = vpop.f32.mrf.mxu0  ;;  %v11697_v9 = vpop.f32.mrf.mxu3  ;;  %v8070_v45 = vor.u32 %v8790_v25, %v8069_v54 }
 0x67f   : > { %v5947_v48 = vpop.f32.mrf.mxu1 }
 0x680   : > { %v5948_v50 = vadd.f32 %v5947_v48, %v5619_v1  ;;  %v6479_v55 = vpop.xlane.xlu1 %6478  ;;  %v11693_v47 = vpop.f32.mrf.mxu2  ;;  %v5622_v1 = vadd.f32 %v11606_v36, %v5293_v10 }
 0x681   : > { %v6708_v30 = vmul.f32 0.01, %v6479_v55 }
 0x682   : > { %v6206_v20 = vmax.f32 %v5948_v50, 0.0 }
 0x683   : > { %6884 = vst [vmem:[%s9682_s22 + $0x250] sm:$0xff] %v6708_v30  ;;  %5680 = vmatmul.bf16.gmra.mxu3 %v8070_v45  ;;  %v8050_v45 = vor.u32 %v8783_v62, %v8047_v53 }
 0x684   : > { %v6339_v57 = vsel %vm6295_vm4, %v6206_v20, 0.0  ;;  %v5295_v20 = vadd.f32 %v11667_v41, %v4966_v0  ;;  %v8157_v0 = vld [vmem:[#allocation8 + $0x4e0] sm:$0xf] }
 0x685   : > { %6508 = vadd.xlane.f32.xlu1 %v6339_v57  ;;  %5341 = vmatmul.bf16.gmra.mxu2 %v8034_v13 }
 0x686   : > { %v11702_v27 = vpop.f32.mrf.mxu0  ;;  %v11710_v36 = vpop.f32.mrf.mxu3  ;;  %v5624_v15 = vadd.f32 %v11619_v16, %v5295_v20  ;;  %v8776_v16 = vld [vmem:[#allocation8 + $0x3cc] sm:$0xf] }
 0x687   : > { %v5950_v48 = vpop.f32.mrf.mxu1 }
 0x688   : > { %v5951_v50 = vadd.f32 %v5950_v48, %v5622_v1  ;;  %v6481_v55 = vpop.xlane.xlu2 %6480  ;;  %v11706_v30 = vpop.f32.mrf.mxu2 }
 0x689   : > { %v6709_v13 = vmul.f32 0.01, %v6481_v55  ;;  %5047 = vmatmul.bf16.gmra.mxu0 %v8142_v23  ;;  %v12866_v23 = vld [vmem:[#allocation35_spill] sm:$0xff]  ;;  %v8023_v55 = vld [vmem:[#allocation8 + $0x3d8] sm:$0xf0] }
 0x68a   : > { %v6207_v29 = vmax.f32 %v5951_v50, 0.0  ;;  %5989 = vmatmul.bf16.gmra.mxu1 %v8010_v31  ;;  %v4969_v41 = vadd.f32 %v11494_v33, %v12866_v23  ;;  %v8813_v50 = vld [vmem:[#allocation8 + $0x4ec] sm:$0xf0]  ;;  %v8026_v62 = vor.u32 %v8776_v16, %v8023_v55  ;;  %v12867_v23 = vld [vmem:[#allocation36_spill] sm:$0xff]  ;;  %v8787_v16 = vld [vmem:[#allocation8 + $0x424] sm:$0xf] }
 0x68b   : > { %6885 = vst [vmem:[%s9682_s22 + $0x258] sm:$0xff] %v6709_v13  ;;  %v8158_v33 = vor.u32 %v8813_v50, %v8157_v0  ;;  %v8063_v55 = vld [vmem:[#allocation8 + $0x430] sm:$0xf0] }
 0x68c   : > { %v6340_v10 = vsel %vm6295_vm4, %v6207_v29, 0.0  ;;  %v5298_v48 = vadd.f32 %v11680_v19, %v4969_v41  ;;  %v8085_v29 = vld [vmem:[#allocation8 + $0x448] sm:$0xf]  ;;  %v4971_v41 = vadd.f32 %v11507_v63, %v12867_v23 }
 0x68d   : > { %6510 = vadd.xlane.f32.xlu2 %v6340_v10  ;;  %v8794_v10 = vld [vmem:[#allocation8 + $0x454] sm:$0xf0] }
 0x68e   : > { %v11715_v40 = vpop.f32.mrf.mxu0  ;;  %v11723_v13 = vpop.f32.mrf.mxu3  ;;  %v8086_v53 = vor.u32 %v8794_v10, %v8085_v29 }
 0x68f   : > { %v5952_v57 = vpop.f32.mrf.mxu1 }
 0x690   : > { %v5953_v54 = vadd.f32 %v5952_v57, %v5624_v15  ;;  %v6483_v25 = vpop.xlane.xlu0 %6482  ;;  %v11719_v1 = vpop.f32.mrf.mxu2  ;;  %v5627_v15 = vadd.f32 %v11632_v49, %v5298_v48 }
 0x691   : > { %v6710_v31 = vmul.f32 0.01, %v6483_v25 }
 0x692   : > { %v6208_v38 = vmax.f32 %v5953_v54, 0.0 }
 0x693   : > { %6886 = vst [vmem:[%s9682_s22 + $0x260] sm:$0xff] %v6710_v31  ;;  %5685 = vmatmul.bf16.gmra.mxu3 %v8086_v53  ;;  %v8066_v53 = vor.u32 %v8787_v16, %v8063_v55 }
 0x694   : > { %v6341_v20 = vsel %vm6295_vm4, %v6208_v38, 0.0  ;;  %v5300_v38 = vadd.f32 %v11693_v47, %v4971_v41  ;;  %v8173_v41 = vld [vmem:[#allocation8 + $0x500] sm:$0xf] }
 0x695   : > { %6512 = vadd.xlane.f32.xlu0 %v6341_v20  ;;  %5346 = vmatmul.bf16.gmra.mxu2 %v8050_v45 }
 0x696   : > { %v11728_v19 = vpop.f32.mrf.mxu0  ;;  %v11736_v49 = vpop.f32.mrf.mxu3  ;;  %v5629_v63 = vadd.f32 %v11645_v7, %v5300_v38  ;;  %v8780_v7 = vld [vmem:[#allocation8 + $0x3ec] sm:$0xf] }
 0x697   : > { %v5955_v57 = vpop.f32.mrf.mxu1 }
 0x698   : > { %v5956_v54 = vadd.f32 %v5955_v57, %v5627_v15  ;;  %v6485_v25 = vpop.xlane.xlu1 %6484  ;;  %v11732_v31 = vpop.f32.mrf.mxu2 }
 0x699   : > { %v6711_v45 = vmul.f32 0.01, %v6485_v25  ;;  %5052 = vmatmul.bf16.gmra.mxu0 %v8158_v33  ;;  %v12868_v33 = vld [vmem:[#allocation37_spill] sm:$0xff]  ;;  %v8039_v25 = vld [vmem:[#allocation8 + $0x3f8] sm:$0xf0] }
 0x69a   : > { %v6209_v0 = vmax.f32 %v5956_v54, 0.0  ;;  %5994 = vmatmul.bf16.gmra.mxu1 %v8026_v62  ;;  %v4974_v47 = vadd.f32 %v11520_v44, %v12868_v33  ;;  %v8817_v54 = vld [vmem:[#allocation8 + $0x50c] sm:$0xf0]  ;;  %v8042_v16 = vor.u32 %v8780_v7, %v8039_v25  ;;  %v12869_v33 = vld [vmem:[#allocation26_spill] sm:$0xff]  ;;  %v8791_v7 = vld [vmem:[#allocation8 + $0x444] sm:$0xf] }
 0x69b   : > { %6887 = vst [vmem:[%s9682_s22 + $0x268] sm:$0xff] %v6711_v45  ;;  %v8174_v44 = vor.u32 %v8817_v54, %v8173_v41  ;;  %v8079_v25 = vld [vmem:[#allocation8 + $0x450] sm:$0xf0] }
 0x69c   : > { %v6342_v48 = vsel %vm6295_vm4, %v6209_v0, 0.0  ;;  %v5303_v57 = vadd.f32 %v11706_v30, %v4974_v47  ;;  %v8101_v0 = vld [vmem:[#allocation8 + $0x468] sm:$0xf]  ;;  %v4976_v47 = vadd.f32 %v11533_v59, %v12869_v33 }
 0x69d   : > { %6514 = vadd.xlane.f32.xlu1 %v6342_v48  ;;  %v8798_v48 = vld [vmem:[#allocation8 + $0x474] sm:$0xf0] }
 0x69e   : > { %v11741_v50 = vpop.f32.mrf.mxu0  ;;  %v11749_v45 = vpop.f32.mrf.mxu3  ;;  %v8102_v55 = vor.u32 %v8798_v48, %v8101_v0 }
 0x69f   : > { %v5957_v20 = vpop.f32.mrf.mxu1 }
 0x6a0   : > { %v5958_v29 = vadd.f32 %v5957_v20, %v5629_v63  ;;  %v6487_v10 = vpop.xlane.xlu2 %6486  ;;  %v11745_v15 = vpop.f32.mrf.mxu2  ;;  %v5632_v63 = vadd.f32 %v11658_v6, %v5303_v57 }
 0x6a1   : > { %v6712_v62 = vmul.f32 0.01, %v6487_v10 }
 0x6a2   : > { %v6210_v23 = vmax.f32 %v5958_v29, 0.0 }
 0x6a3   : > { %6888 = vst [vmem:[%s9682_s22 + $0x270] sm:$0xff] %v6712_v62  ;;  %5690 = vmatmul.bf16.gmra.mxu3 %v8102_v55  ;;  %v8082_v55 = vor.u32 %v8791_v7, %v8079_v25 }
 0x6a4   : > { %v6343_v38 = vsel %vm6295_vm4, %v6210_v23, 0.0  ;;  %v5305_v23 = vadd.f32 %v11719_v1, %v4976_v47  ;;  %v8189_v47 = vld [vmem:[#allocation8 + $0x520] sm:$0xf] }
 0x6a5   : > { %6516 = vadd.xlane.f32.xlu2 %v6343_v38  ;;  %5351 = vmatmul.bf16.gmra.mxu2 %v8066_v53 }
 0x6a6   : > { %v11754_v30 = vpop.f32.mrf.mxu0  ;;  %v11762_v6 = vpop.f32.mrf.mxu3  ;;  %v5634_v59 = vadd.f32 %v11671_v18, %v5305_v23  ;;  %v8784_v18 = vld [vmem:[#allocation8 + $0x40c] sm:$0xf] }
 0x6a7   : > { %v5960_v20 = vpop.f32.mrf.mxu1 }
 0x6a8   : > { %v5961_v29 = vadd.f32 %v5960_v20, %v5632_v63  ;;  %v6489_v10 = vpop.xlane.xlu0 %6488  ;;  %v11758_v62 = vpop.f32.mrf.mxu2 }
 0x6a9   : > { %v6713_v53 = vmul.f32 0.01, %v6489_v10  ;;  %5057 = vmatmul.bf16.gmra.mxu0 %v8174_v44  ;;  %v12870_v44 = vld [vmem:[#allocation42_spill] sm:$0xff]  ;;  %v8055_v10 = vld [vmem:[#allocation8 + $0x418] sm:$0xf0] }
 0x6aa   : > { %v6211_v41 = vmax.f32 %v5961_v29, 0.0  ;;  %5999 = vmatmul.bf16.gmra.mxu1 %v8042_v16  ;;  %v4979_v1 = vadd.f32 %v11546_v58, %v12870_v44  ;;  %v8821_v29 = vld [vmem:[#allocation8 + $0x52c] sm:$0xf0]  ;;  %v8058_v7 = vor.u32 %v8784_v18, %v8055_v10  ;;  %v8795_v18 = vld [vmem:[#allocation8 + $0x464] sm:$0xf] }
 0x6ab   : > { %6889 = vst [vmem:[%s9682_s22 + $0x278] sm:$0xff] %v6713_v53  ;;  %v8190_v58 = vor.u32 %v8821_v29, %v8189_v47  ;;  %v12871_v44 = vld [vmem:[#allocation43_spill] sm:$0xff] }
 0x6ac   : > { %v6344_v57 = vsel %vm6295_vm4, %v6211_v41, 0.0  ;;  %v5308_v20 = vadd.f32 %v11732_v31, %v4979_v1  ;;  %v8117_v41 = vld [vmem:[#allocation8 + $0x488] sm:$0xf]  ;;  %v4981_v1 = vadd.f32 %v11559_v61, %v12871_v44  ;;  %v8095_v10 = vld [vmem:[#allocation8 + $0x470] sm:$0xf0] }
 0x6ad   : > { %6518 = vadd.xlane.f32.xlu0 %v6344_v57  ;;  %v8802_v57 = vld [vmem:[#allocation8 + $0x494] sm:$0xf0] }
 0x6ae   : > { %v11767_v54 = vpop.f32.mrf.mxu0  ;;  %v11775_v53 = vpop.f32.mrf.mxu3  ;;  %v8118_v25 = vor.u32 %v8802_v57, %v8117_v41 }
 0x6af   : > { %v5962_v38 = vpop.f32.mrf.mxu1 }
 0x6b0   : > { %v5963_v0 = vadd.f32 %v5962_v38, %v5634_v59  ;;  %v6491_v48 = vpop.xlane.xlu1 %6490  ;;  %v11771_v63 = vpop.f32.mrf.mxu2  ;;  %v5637_v59 = vadd.f32 %v11684_v24, %v5308_v20 }
 0x6b1   : > { %v6714_v16 = vmul.f32 0.01, %v6491_v48 }
 0x6b2   : > { %v6212_v33 = vmax.f32 %v5963_v0, 0.0 }
 0x6b3   : > { %6890 = vst [vmem:[%s9682_s22 + $0x280] sm:$0xff] %v6714_v16  ;;  %5695 = vmatmul.bf16.gmra.mxu3 %v8118_v25  ;;  %v8098_v25 = vor.u32 %v8795_v18, %v8095_v10 }
 0x6b4   : > { %v6345_v23 = vsel %vm6295_vm4, %v6212_v33, 0.0  ;;  %v5310_v33 = vadd.f32 %v11745_v15, %v4981_v1  ;;  %v8205_v1 = vld [vmem:[#allocation8 + $0x540] sm:$0xf] }
 0x6b5   : > { %6520 = vadd.xlane.f32.xlu1 %v6345_v23  ;;  %5356 = vmatmul.bf16.gmra.mxu2 %v8082_v55 }
 0x6b6   : > { %v11780_v31 = vpop.f32.mrf.mxu0  ;;  %v11788_v24 = vpop.f32.mrf.mxu3  ;;  %v5639_v61 = vadd.f32 %v11697_v9, %v5310_v33  ;;  %v8788_v9 = vld [vmem:[#allocation8 + $0x42c] sm:$0xf] }
 0x6b7   : > { %v5965_v38 = vpop.f32.mrf.mxu1 }
 0x6b8   : > { %v5966_v0 = vadd.f32 %v5965_v38, %v5637_v59  ;;  %v6493_v48 = vpop.xlane.xlu2 %6492  ;;  %v11784_v16 = vpop.f32.mrf.mxu2 }
 0x6b9   : > { %v6715_v55 = vmul.f32 0.01, %v6493_v48  ;;  %5062 = vmatmul.bf16.gmra.mxu0 %v8190_v58  ;;  %v12872_v58 = vld [vmem:[#allocation45_spill] sm:$0xff]  ;;  %v8071_v48 = vld [vmem:[#allocation8 + $0x438] sm:$0xf0] }
 0x6ba   : > { %v6213_v47 = vmax.f32 %v5966_v0, 0.0  ;;  %6004 = vmatmul.bf16.gmra.mxu1 %v8058_v7  ;;  %v4984_v15 = vadd.f32 %v11572_v8, %v12872_v58  ;;  %v8825_v0 = vld [vmem:[#allocation8 + $0x54c] sm:$0xf0]  ;;  %v8074_v18 = vor.u32 %v8788_v9, %v8071_v48  ;;  %v12873_v58 = vld [vmem:[#allocation46_spill] sm:$0xff]  ;;  %v8799_v9 = vld [vmem:[#allocation8 + $0x484] sm:$0xf] }
 0x6bb   : > { %6891 = vst [vmem:[%s9682_s22 + $0x288] sm:$0xff] %v6715_v55  ;;  %v8206_v8 = vor.u32 %v8825_v0, %v8205_v1  ;;  %v8111_v48 = vld [vmem:[#allocation8 + $0x490] sm:$0xf0] }
 0x6bc   : > { %v6346_v20 = vsel %vm6295_vm4, %v6213_v47, 0.0  ;;  %v5313_v38 = vadd.f32 %v11758_v62, %v4984_v15  ;;  %v8133_v47 = vld [vmem:[#allocation8 + $0x4a8] sm:$0xf]  ;;  %v4986_v15 = vadd.f32 %v11585_v14, %v12873_v58 }
 0x6bd   : > { %6522 = vadd.xlane.f32.xlu2 %v6346_v20  ;;  %v8806_v20 = vld [vmem:[#allocation8 + $0x4b4] sm:$0xf0] }
 0x6be   : > { %v11793_v29 = vpop.f32.mrf.mxu0  ;;  %v11801_v55 = vpop.f32.mrf.mxu3  ;;  %v8134_v10 = vor.u32 %v8806_v20, %v8133_v47 }
 0x6bf   : > { %v5967_v23 = vpop.f32.mrf.mxu1 }
 0x6c0   : > { %v5968_v41 = vadd.f32 %v5967_v23, %v5639_v61  ;;  %v6495_v57 = vpop.xlane.xlu0 %6494  ;;  %v11797_v59 = vpop.f32.mrf.mxu2  ;;  %v5642_v61 = vadd.f32 %v11710_v36, %v5313_v38 }
 0x6c1   : > { %v6716_v7 = vmul.f32 0.01, %v6495_v57 }
 0x6c2   : > { %v6214_v44 = vmax.f32 %v5968_v41, 0.0 }
 0x6c3   : > { %6892 = vst [vmem:[%s9682_s22 + $0x290] sm:$0xff] %v6716_v7  ;;  %5700 = vmatmul.bf16.gmra.mxu3 %v8134_v10  ;;  %v8114_v10 = vor.u32 %v8799_v9, %v8111_v48 }
 0x6c4   : > { %v6347_v33 = vsel %vm6295_vm4, %v6214_v44, 0.0  ;;  %v5315_v44 = vadd.f32 %v11771_v63, %v4986_v15  ;;  %v8221_v15 = vld [vmem:[#allocation8 + $0x560] sm:$0xf] }
 0x6c5   : > { %6524 = vadd.xlane.f32.xlu0 %v6347_v33  ;;  %5361 = vmatmul.bf16.gmra.mxu2 %v8098_v25 }
 0x6c6   : > { %v11806_v62 = vpop.f32.mrf.mxu0  ;;  %v11814_v36 = vpop.f32.mrf.mxu3  ;;  %v5644_v14 = vadd.f32 %v11723_v13, %v5315_v44  ;;  %v8792_v13 = vld [vmem:[#allocation8 + $0x44c] sm:$0xf] }
 0x6c7   : > { %v5970_v23 = vpop.f32.mrf.mxu1 }
 0x6c8   : > { %v5971_v41 = vadd.f32 %v5970_v23, %v5642_v61  ;;  %v6497_v57 = vpop.xlane.xlu1 %6496  ;;  %v11810_v7 = vpop.f32.mrf.mxu2 }
 0x6c9   : > { %v6717_v25 = vmul.f32 0.01, %v6497_v57  ;;  %5067 = vmatmul.bf16.gmra.mxu0 %v8206_v8  ;;  %v12874_v8 = vld [vmem:[#allocation47_spill] sm:$0xff]  ;;  %v8087_v57 = vld [vmem:[#allocation8 + $0x458] sm:$0xf0] }
 0x6ca   : > { %v6215_v1 = vmax.f32 %v5971_v41, 0.0  ;;  %6009 = vmatmul.bf16.gmra.mxu1 %v8074_v18  ;;  %v4989_v63 = vadd.f32 %v11598_v51, %v12874_v8  ;;  %v8829_v41 = vld [vmem:[#allocation8 + $0x56c] sm:$0xf0]  ;;  %v8090_v9 = vor.u32 %v8792_v13, %v8087_v57  ;;  %v12875_v8 = vld [vmem:[#allocation49_spill] sm:$0xff]  ;;  %v8127_v57 = vld [vmem:[#allocation8 + $0x4b0] sm:$0xf0] }
 0x6cb   : > { %6893 = vst [vmem:[%s9682_s22 + $0x298] sm:$0xff] %v6717_v25  ;;  %v8222_v51 = vor.u32 %v8829_v41, %v8221_v15  ;;  %v8803_v13 = vld [vmem:[#allocation8 + $0x4a4] sm:$0xf] }
 0x6cc   : > { %v6348_v38 = vsel %vm6295_vm4, %v6215_v1, 0.0  ;;  %v5318_v23 = vadd.f32 %v11784_v16, %v4989_v63  ;;  %v8149_v1 = vld [vmem:[#allocation8 + $0x4c8] sm:$0xf]  ;;  %v4991_v63 = vadd.f32 %v11611_v4, %v12875_v8 }
 0x6cd   : > { %6526 = vadd.xlane.f32.xlu1 %v6348_v38  ;;  %v8810_v38 = vld [vmem:[#allocation8 + $0x4d4] sm:$0xf0] }
 0x6ce   : > { %v11819_v0 = vpop.f32.mrf.mxu0  ;;  %v11827_v25 = vpop.f32.mrf.mxu3  ;;  %v8150_v48 = vor.u32 %v8810_v38, %v8149_v1 }
 0x6cf   : > { %v5972_v33 = vpop.f32.mrf.mxu1 }
 0x6d0   : > { %v5973_v47 = vadd.f32 %v5972_v33, %v5644_v14  ;;  %v6499_v20 = vpop.xlane.xlu2 %6498  ;;  %v11823_v61 = vpop.f32.mrf.mxu2  ;;  %v5647_v14 = vadd.f32 %v11736_v49, %v5318_v23 }
 0x6d1   : > { %v6718_v18 = vmul.f32 0.01, %v6499_v20 }
 0x6d2   : > { %v6216_v58 = vmax.f32 %v5973_v47, 0.0 }
 0x6d3   : > { %6894 = vst [vmem:[%s9682_s22 + $0x2a0] sm:$0xff] %v6718_v18  ;;  %5705 = vmatmul.bf16.gmra.mxu3 %v8150_v48  ;;  %v8130_v48 = vor.u32 %v8803_v13, %v8127_v57 }
 0x6d4   : > { %v6349_v44 = vsel %vm6295_vm4, %v6216_v58, 0.0  ;;  %v5320_v58 = vadd.f32 %v11797_v59, %v4991_v63  ;;  %v8237_v63 = vld [vmem:[#allocation8 + $0x580] sm:$0xf] }
 0x6d5   : > { %6528 = vadd.xlane.f32.xlu2 %v6349_v44  ;;  %5366 = vmatmul.bf16.gmra.mxu2 %v8114_v10 }
 0x6d6   : > { %v11832_v16 = vpop.f32.mrf.mxu0  ;;  %v11840_v49 = vpop.f32.mrf.mxu3  ;;  %v5649_v4 = vadd.f32 %v11749_v45, %v5320_v58  ;;  %v8796_v45 = vld [vmem:[#allocation8 + $0x46c] sm:$0xf] }
 0x6d7   : > { %v5975_v33 = vpop.f32.mrf.mxu1 }
 0x6d8   : > { %v5976_v47 = vadd.f32 %v5975_v33, %v5647_v14  ;;  %v6501_v20 = vpop.xlane.xlu0 %6500  ;;  %v11836_v18 = vpop.f32.mrf.mxu2 }
 0x6d9   : > { %v6719_v10 = vmul.f32 0.01, %v6501_v20  ;;  %5072 = vmatmul.bf16.gmra.mxu0 %v8222_v51  ;;  %v12876_v51 = vld [vmem:[#allocation50_spill] sm:$0xff]  ;;  %v8103_v20 = vld [vmem:[#allocation8 + $0x478] sm:$0xf0] }
 0x6da   : > { %v6217_v15 = vmax.f32 %v5976_v47, 0.0  ;;  %6014 = vmatmul.bf16.gmra.mxu1 %v8090_v9  ;;  %v4994_v59 = vadd.f32 %v11624_v46, %v12876_v51  ;;  %v8833_v47 = vld [vmem:[#allocation8 + $0x58c] sm:$0xf0]  ;;  %v8106_v13 = vor.u32 %v8796_v45, %v8103_v20  ;;  %v8807_v45 = vld [vmem:[#allocation8 + $0x4c4] sm:$0xf] }
 0x6db   : > { %6895 = vst [vmem:[%s9682_s22 + $0x2a8] sm:$0xff] %v6719_v10  ;;  %v8238_v46 = vor.u32 %v8833_v47, %v8237_v63  ;;  %v12877_v51 = vld [vmem:[#allocation55_spill] sm:$0xff] }
 0x6dc   : > { %v6350_v23 = vsel %vm6295_vm4, %v6217_v15, 0.0  ;;  %v5323_v33 = vadd.f32 %v11810_v7, %v4994_v59  ;;  %v8165_v15 = vld [vmem:[#allocation8 + $0x4e8] sm:$0xf]  ;;  %v4996_v59 = vadd.f32 %v11637_v21, %v12877_v51  ;;  %v8143_v20 = vld [vmem:[#allocation8 + $0x4d0] sm:$0xf0] }
 0x6dd   : > { %6530 = vadd.xlane.f32.xlu0 %v6350_v23  ;;  %v8814_v23 = vld [vmem:[#allocation8 + $0x4f4] sm:$0xf0] }
 0x6de   : > { %v11845_v41 = vpop.f32.mrf.mxu0  ;;  %v11853_v10 = vpop.f32.mrf.mxu3  ;;  %v8166_v57 = vor.u32 %v8814_v23, %v8165_v15 }
 0x6df   : > { %v5977_v44 = vpop.f32.mrf.mxu1 }
 0x6e0   : > { %v5978_v1 = vadd.f32 %v5977_v44, %v5649_v4  ;;  %v6503_v38 = vpop.xlane.xlu1 %6502  ;;  %v11849_v14 = vpop.f32.mrf.mxu2  ;;  %v5652_v4 = vadd.f32 %v11762_v6, %v5323_v33 }
 0x6e1   : > { %v6720_v9 = vmul.f32 0.01, %v6503_v38 }
 0x6e2   : > { %v6218_v8 = vmax.f32 %v5978_v1, 0.0 }
 0x6e3   : > { %6896 = vst [vmem:[%s9682_s22 + $0x2b0] sm:$0xff] %v6720_v9  ;;  %5710 = vmatmul.bf16.gmra.mxu3 %v8166_v57  ;;  %v8146_v57 = vor.u32 %v8807_v45, %v8143_v20 }
 0x6e4   : > { %v6351_v58 = vsel %vm6295_vm4, %v6218_v8, 0.0  ;;  %v5325_v8 = vadd.f32 %v11823_v61, %v4996_v59  ;;  %v8253_v59 = vld [vmem:[#allocation8 + $0x5a0] sm:$0xf] }
 0x6e5   : > { %6532 = vadd.xlane.f32.xlu1 %v6351_v58  ;;  %5371 = vmatmul.bf16.gmra.mxu2 %v8130_v48 }
 0x6e6   : > { %v11858_v7 = vpop.f32.mrf.mxu0  ;;  %v11866_v6 = vpop.f32.mrf.mxu3  ;;  %v5654_v21 = vadd.f32 %v11775_v53, %v5325_v8  ;;  %v8800_v53 = vld [vmem:[#allocation8 + $0x48c] sm:$0xf] }
 0x6e7   : > { %v5980_v44 = vpop.f32.mrf.mxu1 }
 0x6e8   : > { %v5981_v1 = vadd.f32 %v5980_v44, %v5652_v4  ;;  %v6505_v38 = vpop.xlane.xlu2 %6504  ;;  %v11862_v9 = vpop.f32.mrf.mxu2 }
 0x6e9   : > { %v6721_v48 = vmul.f32 0.01, %v6505_v38  ;;  %5077 = vmatmul.bf16.gmra.mxu0 %v8238_v46  ;;  %v12878_v46 = vld [vmem:[#allocation51_spill] sm:$0xff]  ;;  %v8119_v38 = vld [vmem:[#allocation8 + $0x498] sm:$0xf0] }
 0x6ea   : > { %v6219_v63 = vmax.f32 %v5981_v1, 0.0  ;;  %6019 = vmatmul.bf16.gmra.mxu1 %v8106_v13  ;;  %v4999_v61 = vadd.f32 %v11650_v43, %v12878_v46  ;;  %v8837_v1 = vld [vmem:[#allocation8 + $0x5ac] sm:$0xf0]  ;;  %v12879_v46 = vld [vmem:[#allocation56_spill] sm:$0xff] }
 0x6eb   : > { %6897 = vst [vmem:[%s9682_s22 + $0x2b8] sm:$0xff] %v6721_v48  ;;  %v8254_v43 = vor.u32 %v8837_v1, %v8253_v59  ;;  %v8811_v1 = vld [vmem:[#allocation8 + $0x4e4] sm:$0xf] }
 0x6ec   : > { %v6352_v33 = vsel %vm6295_vm4, %v6219_v63, 0.0  ;;  %v5328_v44 = vadd.f32 %v11836_v18, %v4999_v61  ;;  %v8181_v63 = vld [vmem:[#allocation8 + $0x508] sm:$0xf]  ;;  %v8122_v18 = vor.u32 %v8800_v53, %v8119_v38  ;;  %v5001_v61 = vadd.f32 %v11663_v2, %v12879_v46  ;;  %v8159_v53 = vld [vmem:[#allocation8 + $0x4f0] sm:$0xf0] }
 0x6ed   : > { %6534 = vadd.xlane.f32.xlu2 %v6352_v33  ;;  %v8818_v33 = vld [vmem:[#allocation8 + $0x514] sm:$0xf0] }
 0x6ee   : > { %v11871_v47 = vpop.f32.mrf.mxu0  ;;  %v11879_v48 = vpop.f32.mrf.mxu3  ;;  %v8182_v45 = vor.u32 %v8818_v33, %v8181_v63 }
 0x6ef   : > { %v5982_v58 = vpop.f32.mrf.mxu1 }
 0x6f0   : > { %v5983_v15 = vadd.f32 %v5982_v58, %v5654_v21  ;;  %v6507_v23 = vpop.xlane.xlu0 %6506  ;;  %v11875_v4 = vpop.f32.mrf.mxu2  ;;  %v5657_v21 = vadd.f32 %v11788_v24, %v5328_v44 }
 0x6f1   : > { %v6722_v13 = vmul.f32 0.01, %v6507_v23 }
 0x6f2   : > { %v6220_v51 = vmax.f32 %v5983_v15, 0.0 }
 0x6f3   : > { %6898 = vst [vmem:[%s9682_s22 + $0x2c0] sm:$0xff] %v6722_v13  ;;  %5715 = vmatmul.bf16.gmra.mxu3 %v8182_v45  ;;  %v8162_v45 = vor.u32 %v8811_v1, %v8159_v53 }
 0x6f4   : > { %v6353_v8 = vsel %vm6295_vm4, %v6220_v51, 0.0  ;;  %v5330_v51 = vadd.f32 %v11849_v14, %v5001_v61  ;;  %v8269_v61 = vld [vmem:[#allocation8 + $0x5c0] sm:$0xf] }
 0x6f5   : > { %6536 = vadd.xlane.f32.xlu0 %v6353_v8  ;;  %5376 = vmatmul.bf16.gmra.mxu2 %v8146_v57  ;;  %v12880_v8 = vld [vmem:[#allocation58_spill] sm:$0xff] }
 0x6f6   : > { %v11884_v20 = vpop.f32.mrf.mxu0  ;;  %v11892_v24 = vpop.f32.mrf.mxu3  ;;  %v5659_v2 = vadd.f32 %v11801_v55, %v5330_v51  ;;  %v8804_v55 = vld [vmem:[#allocation8 + $0x4ac] sm:$0xf] }
 0x6f7   : > { %v5985_v58 = vpop.f32.mrf.mxu1 }
 0x6f8   : > { %v5986_v15 = vadd.f32 %v5985_v58, %v5657_v21  ;;  %v6509_v23 = vpop.xlane.xlu1 %6508  ;;  %v11888_v13 = vpop.f32.mrf.mxu2 }
 0x6f9   : > { %v6723_v57 = vmul.f32 0.01, %v6509_v23  ;;  %5082 = vmatmul.bf16.gmra.mxu0 %v8254_v43  ;;  %v5004_v43 = vadd.f32 %v11676_v39, %v12880_v8  ;;  %v8135_v23 = vld [vmem:[#allocation8 + $0x4b8] sm:$0xf0] }
 0x6fa   : > { %v6221_v59 = vmax.f32 %v5986_v15, 0.0  ;;  %6024 = vmatmul.bf16.gmra.mxu1 %v8122_v18  ;;  %v8841_v15 = vld [vmem:[#allocation8 + $0x5cc] sm:$0xf0] }
 0x6fb   : > { %6899 = vst [vmem:[%s9682_s22 + $0x2c8] sm:$0xff] %v6723_v57  ;;  %v5333_v58 = vadd.f32 %v11862_v9, %v5004_v43  ;;  %v8270_v51 = vor.u32 %v8841_v15, %v8269_v61  ;;  %v8138_v9 = vor.u32 %v8804_v55, %v8135_v23  ;;  %v8815_v15 = vld [vmem:[#allocation8 + $0x504] sm:$0xf]  ;;  %v8175_v55 = vld [vmem:[#allocation8 + $0x510] sm:$0xf0] }
 0x6fc   : > { %v6354_v44 = vsel %vm6295_vm4, %v6221_v59, 0.0  ;;  %v8197_v59 = vld [vmem:[#allocation8 + $0x528] sm:$0xf] }
 0x6fd   : > { %6538 = vadd.xlane.f32.xlu1 %v6354_v44  ;;  %v8822_v44 = vld [vmem:[#allocation8 + $0x534] sm:$0xf0] }
 0x6fe   : > { %v11901_v21 = vpop.f32.mrf.mxu0  ;;  %v11905_v57 = vpop.f32.mrf.mxu3  ;;  %v8198_v1 = vor.u32 %v8822_v44, %v8197_v59 }
 0x6ff   : > { %v5987_v38 = vpop.f32.mrf.mxu1 }
 0x700   : > { %v5988_v63 = vadd.f32 %v5987_v38, %v5659_v2  ;;  %v6511_v14 = vpop.xlane.xlu2 %6510  ;;  %v11899_v33 = vpop.f32.mrf.mxu2  ;;  %v5662_v2 = vadd.f32 %v11814_v36, %v5333_v58  ;;  %v12881_v38 = vld [vmem:[#allocation57_spill] sm:$0xff] }
 0x701   : > { %v6724_v18 = vmul.f32 0.01, %v6511_v14  ;;  %v5006_v8 = vadd.f32 %v11689_v3, %v12881_v38  ;;  %v8285_v38 = vld [vmem:[#allocation8 + $0x5e0] sm:$0xf] }
 0x702   : > { %v6222_v46 = vmax.f32 %v5988_v63, 0.0 }
 0x703   : > { %6900 = vst [vmem:[%s9682_s22 + $0x2d0] sm:$0xff] %v6724_v18  ;;  %5720 = vmatmul.bf16.gmra.mxu3 %v8198_v1 }
 0x704   : > { %v6355_v39 = vsel %vm6295_vm4, %v6222_v46, 0.0 }
 0x705   : > { %6540 = vadd.xlane.f32.xlu2 %v6355_v39  ;;  %5381 = vmatmul.bf16.gmra.mxu2 %v8162_v45  ;;  %v5335_v45 = vadd.f32 %v11875_v4, %v5006_v8  ;;  %v12882_v39 = vld [vmem:[#allocation59_spill] sm:$0xff] }
 0x706   : > { %v11915_v61 = vpop.f32.mrf.mxu0  ;;  %v11918_v36 = vpop.f32.mrf.mxu3  ;;  %v5009_v4 = vadd.f32 %v11702_v27, %v12882_v39  ;;  %v8845_v8 = vld [vmem:[#allocation8 + $0x5ec] sm:$0xf0] }
 0x707   : > { %v5990_v53 = vpop.f32.mrf.mxu1  ;;  %v5664_v3 = vadd.f32 %v11827_v25, %v5335_v45  ;;  %v8151_v25 = vld [vmem:[#allocation8 + $0x4d8] sm:$0xf0]  ;;  %v8286_v45 = vor.u32 %v8845_v8, %v8285_v38  ;;  %v8191_v8 = vld [vmem:[#allocation8 + $0x530] sm:$0xf0] }
 0x708   : > { %v5991_v43 = vadd.f32 %v5990_v53, %v5662_v2  ;;  %v6513_v63 = vpop.xlane.xlu0 %6512  ;;  %v11912_v14 = vpop.f32.mrf.mxu2  ;;  %v5338_v1 = vadd.f32 %v11888_v13, %v5009_v4 }
 0x709   : > { %v6725_v18 = vmul.f32 0.01, %v6513_v63  ;;  %5087 = vmatmul.bf16.gmra.mxu0 %v8270_v51 }
 0x70a   : > { %v6223_v46 = vmax.f32 %v5991_v43, 0.0  ;;  %6029 = vmatmul.bf16.gmra.mxu1 %v8138_v9  ;;  %v8178_v9 = vor.u32 %v8815_v15, %v8175_v55  ;;  %v8808_v43 = vld [vmem:[#allocation8 + $0x4cc] sm:$0xf]  ;;  %v5667_v13 = vadd.f32 %v11840_v49, %v5338_v1  ;;  %v8819_v1 = vld [vmem:[#allocation8 + $0x524] sm:$0xf] }
 0x70b   : > { %6901 = vst [vmem:[%s9682_s22 + $0x2d8] sm:$0xff] %v6725_v18 }
 0x70c   : > { %v6356_v58 = vsel %vm6295_vm4, %v6223_v46, 0.0  ;;  %v8213_v46 = vld [vmem:[#allocation8 + $0x548] sm:$0xf] }
 0x70d   : > { %6542 = vadd.xlane.f32.xlu0 %v6356_v58  ;;  %v8826_v58 = vld [vmem:[#allocation8 + $0x554] sm:$0xf0] }
 0x70e   : > { %v11929_v63 = vpop.f32.mrf.mxu3  ;;  %v11933_v27 = vpop.f32.mrf.mxu0  ;;  %v8214_v15 = vor.u32 %v8826_v58, %v8213_v46 }
 0x70f   : > { %v5992_v23 = vpop.f32.mrf.mxu1 }
 0x710   : > { %v5993_v51 = vadd.f32 %v5992_v23, %v5664_v3  ;;  %v6515_v59 = vpop.xlane.xlu1 %6514  ;;  %v11925_v44 = vpop.f32.mrf.mxu2  ;;  %v8154_v3 = vor.u32 %v8808_v43, %v8151_v25  ;;  %v12883_v23 = vld [vmem:[#allocation61_spill] sm:$0xff] }
 0x711   : > { %v6726_v2 = vmul.f32 0.01, %v6515_v59  ;;  %v5011_v39 = vadd.f32 %v11715_v40, %v12883_v23  ;;  %v8301_v23 = vld [vmem:[#allocation8 + $0x600] sm:$0xf] }
 0x712   : > { %v6224_v53 = vmax.f32 %v5993_v51, 0.0 }
 0x713   : > { %6902 = vst [vmem:[%s9682_s22 + $0x2e0] sm:$0xff] %v6726_v2  ;;  %5725 = vmatmul.bf16.gmra.mxu3 %v8214_v15 }
 0x714   : > { %v6357_v18 = vsel %vm6295_vm4, %v6224_v53, 0.0 }
 0x715   : > { %6544 = vadd.xlane.f32.xlu1 %v6357_v18  ;;  %5386 = vmatmul.bf16.gmra.mxu2 %v8178_v9  ;;  %v5340_v9 = vadd.f32 %v11899_v33, %v5011_v39  ;;  %v12884_v18 = vld [vmem:[#allocation60_spill] sm:$0xff]  ;;  %v8849_v39 = vld [vmem:[#allocation8 + $0x60c] sm:$0xf0] }
 0x716   : > { %v11942_v38 = vpop.f32.mrf.mxu3  ;;  %v11947_v43 = vpop.f32.mrf.mxu0  ;;  %v5014_v33 = vadd.f32 %v11728_v19, %v12884_v18  ;;  %v8302_v19 = vor.u32 %v8849_v39, %v8301_v23  ;;  %v8823_v23 = vld [vmem:[#allocation8 + $0x544] sm:$0xf]  ;;  %v8207_v39 = vld [vmem:[#allocation8 + $0x550] sm:$0xf0] }
 0x717   : > { %v5995_v55 = vpop.f32.mrf.mxu1  ;;  %v5669_v40 = vadd.f32 %v11853_v10, %v5340_v9  ;;  %v8812_v10 = vld [vmem:[#allocation8 + $0x4ec] sm:$0xf]  ;;  %v8229_v9 = vld [vmem:[#allocation8 + $0x568] sm:$0xf] }
 0x718   : > { %v5996_v4 = vadd.f32 %v5995_v55, %v5667_v13  ;;  %v6517_v51 = vpop.xlane.xlu2 %6516  ;;  %v11938_v59 = vpop.f32.mrf.mxu2  ;;  %v5343_v15 = vadd.f32 %v11912_v14, %v5014_v33 }
 0x719   : > { %v6727_v2 = vmul.f32 0.01, %v6517_v51  ;;  %5092 = vmatmul.bf16.gmra.mxu0 %v8286_v45 }
 0x71a   : > { %v6225_v53 = vmax.f32 %v5996_v4, 0.0  ;;  %6034 = vmatmul.bf16.gmra.mxu1 %v8154_v3  ;;  %v8194_v3 = vor.u32 %v8819_v1, %v8191_v8  ;;  %v8167_v4 = vld [vmem:[#allocation8 + $0x4f8] sm:$0xf0]  ;;  %v12885_v8 = vld [vmem:[#allocation62_spill] sm:$0xff] }
 0x71b   : > { %6903 = vst [vmem:[%s9682_s22 + $0x2e8] sm:$0xff] %v6727_v2  ;;  %v8170_v14 = vor.u32 %v8812_v10, %v8167_v4  ;;  %v12886_v4 = vld [vmem:[#allocation64_spill] sm:$0xff] }
 0x71c   : > { %v6358_v49 = vsel %vm6295_vm4, %v6225_v53, 0.0  ;;  %v8830_v53 = vld [vmem:[#allocation8 + $0x574] sm:$0xf0] }
 0x71d   : > { %6546 = vadd.xlane.f32.xlu2 %v6358_v49  ;;  %v5672_v49 = vadd.f32 %v11866_v6, %v5343_v15 }
 0x71e   : > { %v11955_v51 = vpop.f32.mrf.mxu3 }
 0x71f   : > { %v5997_v25 = vpop.f32.mrf.mxu1 }
 0x720   : > { %v5998_v45 = vadd.f32 %v5997_v25, %v5669_v40  ;;  %v6519_v46 = vpop.xlane.xlu0 %6518  ;;  %v11951_v58 = vpop.f32.mrf.mxu2  ;;  %v8230_v40 = vor.u32 %v8830_v53, %v8229_v9  ;;  %v5016_v25 = vadd.f32 %v11741_v50, %v12885_v8  ;;  %v8853_v8 = vld [vmem:[#allocation8 + $0x62c] sm:$0xf0] }
 0x721   : > { %v6728_v13 = vmul.f32 0.01, %v6519_v46  ;;  %v11964_v46 = vpop.f32.mrf.mxu0 }
 0x722   : > { %v6226_v55 = vmax.f32 %v5998_v45, 0.0 }
 0x723   : > { %6904 = vst [vmem:[%s9682_s22 + $0x2f0] sm:$0xff] %v6728_v13  ;;  %5730 = vmatmul.bf16.gmra.mxu3 %v8230_v40 }
 0x724   : > { %v6359_v2 = vsel %vm6295_vm4, %v6226_v55, 0.0 }
 0x725   : > { %6548 = vadd.xlane.f32.xlu0 %v6359_v2  ;;  %5391 = vmatmul.bf16.gmra.mxu2 %v8194_v3  ;;  %v5345_v3 = vadd.f32 %v11925_v44, %v5016_v25  ;;  %v5019_v2 = vadd.f32 %v11754_v30, %v12886_v4 }
 0x726   : > { %v11968_v6 = vpop.f32.mrf.mxu3 }
 0x727   : > { %v6000_v1 = vpop.f32.mrf.mxu1  ;;  %v5674_v50 = vadd.f32 %v11879_v48, %v5345_v3  ;;  %v8816_v48 = vld [vmem:[#allocation8 + $0x50c] sm:$0xf]  ;;  %v8245_v3 = vld [vmem:[#allocation8 + $0x588] sm:$0xf] }
 0x728   : > { %v6001_v18 = vadd.f32 %v6000_v1, %v5672_v49  ;;  %v6521_v33 = vpop.xlane.xlu1 %6520  ;;  %v11962_v45 = vpop.f32.mrf.mxu2  ;;  %v8210_v49 = vor.u32 %v8823_v23, %v8207_v39  ;;  %v8317_v1 = vld [vmem:[#allocation8 + $0x620] sm:$0xf]  ;;  %v12887_v39 = vld [vmem:[#allocation63_spill] sm:$0xff] }
 0x729   : > { %v6729_v13 = vmul.f32 0.01, %v6521_v33  ;;  %5097 = vmatmul.bf16.gmra.mxu0 %v8302_v19  ;;  %v11978_v25 = vpop.f32.mrf.mxu0 }
 0x72a   : > { %v6227_v55 = vmax.f32 %v6001_v18, 0.0  ;;  %6039 = vmatmul.bf16.gmra.mxu1 %v8170_v14  ;;  %v5348_v14 = vadd.f32 %v11938_v59, %v5019_v2  ;;  %v8183_v18 = vld [vmem:[#allocation8 + $0x518] sm:$0xf0] }
 0x72b   : > { %6905 = vst [vmem:[%s9682_s22 + $0x2f8] sm:$0xff] %v6729_v13  ;;  %v8318_v13 = vor.u32 %v8853_v8, %v8317_v1  ;;  %v8827_v1 = vld [vmem:[#allocation8 + $0x564] sm:$0xf]  ;;  %v8223_v8 = vld [vmem:[#allocation8 + $0x570] sm:$0xf0] }
 0x72c   : > { %v6360_v15 = vsel %vm6295_vm4, %v6227_v55, 0.0  ;;  %v8834_v55 = vld [vmem:[#allocation8 + $0x594] sm:$0xf0]  ;;  %v5677_v59 = vadd.f32 %v11892_v24, %v5348_v14 }
 0x72d   : > { %6550 = vadd.xlane.f32.xlu1 %v6360_v15  ;;  %v8186_v15 = vor.u32 %v8816_v48, %v8183_v18  ;;  %v12888_v18 = vld [vmem:[#allocation65_spill] sm:$0xff] }
 0x72e   : > { %v11981_v33 = vpop.f32.mrf.mxu3 }
 0x72f   : > { %v6002_v10 = vpop.f32.mrf.mxu1 }
 0x730   : > { %v6003_v19 = vadd.f32 %v6002_v10, %v5674_v50  ;;  %v6523_v44 = vpop.xlane.xlu2 %6522  ;;  %v11975_v9 = vpop.f32.mrf.mxu2  ;;  %v8246_v50 = vor.u32 %v8834_v55, %v8245_v3  ;;  %v5021_v10 = vadd.f32 %v11767_v54, %v12887_v39  ;;  %v8857_v39 = vld [vmem:[#allocation8 + $0x64c] sm:$0xf0] }
 0x731   : > { %v6730_v53 = vmul.f32 0.01, %v6523_v44  ;;  %v11996_v14 = vpop.f32.mrf.mxu0 }
 0x732   : > { %v6228_v40 = vmax.f32 %v6003_v19, 0.0 }
 0x733   : > { %6906 = vst [vmem:[%s9682_s22 + $0x300] sm:$0xff] %v6730_v53  ;;  %5735 = vmatmul.bf16.gmra.mxu3 %v8246_v50  ;;  %v5350_v53 = vadd.f32 %v11951_v58, %v5021_v10  ;;  %v5024_v58 = vadd.f32 %v11780_v31, %v12888_v18  ;;  %v8820_v10 = vld [vmem:[#allocation8 + $0x52c] sm:$0xf] }
 0x734   : > { %v6361_v30 = vsel %vm6295_vm4, %v6228_v40, 0.0 }
 0x735   : > { %6552 = vadd.xlane.f32.xlu2 %v6361_v30  ;;  %5396 = vmatmul.bf16.gmra.mxu2 %v8210_v49  ;;  %v5679_v54 = vadd.f32 %v11905_v57, %v5350_v53  ;;  %v8199_v57 = vld [vmem:[#allocation8 + $0x538] sm:$0xf0]  ;;  %v8838_v53 = vld [vmem:[#allocation8 + $0x5b4] sm:$0xf0] }
 0x736   : > { %v11992_v40 = vpop.f32.mrf.mxu3 }
 0x737   : > { %v6005_v23 = vpop.f32.mrf.mxu1 }
 0x738   : > { %v6006_v4 = vadd.f32 %v6005_v23, %v5677_v59  ;;  %v6525_v2 = vpop.xlane.xlu0 %6524  ;;  %v11988_v19 = vpop.f32.mrf.mxu2  ;;  %v8226_v59 = vor.u32 %v8827_v1, %v8223_v8  ;;  %v8333_v23 = vld [vmem:[#allocation8 + $0x640] sm:$0xf]  ;;  %v12889_v8 = vld [vmem:[#allocation67_spill] sm:$0xff] }
 0x739   : > { %v6731_v44 = vmul.f32 0.01, %v6525_v2  ;;  %5102 = vmatmul.bf16.gmra.mxu0 %v8318_v13  ;;  %v8334_v31 = vor.u32 %v8857_v39, %v8333_v23  ;;  %v8239_v23 = vld [vmem:[#allocation8 + $0x590] sm:$0xf0] }
 0x73a   : > { %v6229_v49 = vmax.f32 %v6006_v4, 0.0  ;;  %6044 = vmatmul.bf16.gmra.mxu1 %v8186_v15  ;;  %v5353_v15 = vadd.f32 %v11962_v45, %v5024_v58  ;;  %v8202_v45 = vor.u32 %v8820_v10, %v8199_v57  ;;  %v12890_v10 = vld [vmem:[#allocation66_spill] sm:$0xff] }
 0x73b   : > { %6907 = vst [vmem:[%s9682_s22 + $0x308] sm:$0xff] %v6731_v44  ;;  %v8261_v44 = vld [vmem:[#allocation8 + $0x5a8] sm:$0xf]  ;;  %v5029_v57 = vadd.f32 %v11806_v62, %v12890_v10 }
 0x73c   : > { %v6362_v24 = vsel %vm6295_vm4, %v6229_v49, 0.0  ;;  %v5682_v49 = vadd.f32 %v11918_v36, %v5353_v15 }
 0x73d   : > { %6554 = vadd.xlane.f32.xlu0 %v6362_v24  ;;  %v8262_v24 = vor.u32 %v8838_v53, %v8261_v44 }
 0x73e   : > { %v12005_v4 = vpop.f32.mrf.mxu3 }
 0x73f   : > { %v6007_v48 = vpop.f32.mrf.mxu1 }
 0x740   : > { %v6008_v30 = vadd.f32 %v6007_v48, %v5679_v54  ;;  %v6527_v13 = vpop.xlane.xlu1 %6526  ;;  %v12001_v3 = vpop.f32.mrf.mxu2  ;;  %v5026_v48 = vadd.f32 %v11793_v29, %v12889_v8  ;;  %v8861_v8 = vld [vmem:[#allocation8 + $0x66c] sm:$0xf0] }
 0x741   : > { %v6732_v55 = vmul.f32 0.01, %v6527_v13  ;;  %v12010_v54 = vpop.f32.mrf.mxu0 }
 0x742   : > { %v6230_v50 = vmax.f32 %v6008_v30, 0.0 }
 0x743   : > { %6908 = vst [vmem:[%s9682_s22 + $0x310] sm:$0xff] %v6732_v55  ;;  %5740 = vmatmul.bf16.gmra.mxu3 %v8262_v24  ;;  %v5355_v55 = vadd.f32 %v11975_v9, %v5026_v48  ;;  %v8215_v48 = vld [vmem:[#allocation8 + $0x558] sm:$0xf0] }
 0x744   : > { %v6363_v2 = vsel %vm6295_vm4, %v6230_v50, 0.0  ;;  %v8831_v50 = vld [vmem:[#allocation8 + $0x584] sm:$0xf] }
 0x745   : > { %6556 = vadd.xlane.f32.xlu1 %v6363_v2  ;;  %5401 = vmatmul.bf16.gmra.mxu2 %v8226_v59  ;;  %v5684_v29 = vadd.f32 %v11929_v63, %v5355_v55  ;;  %v8824_v63 = vld [vmem:[#allocation8 + $0x54c] sm:$0xf]  ;;  %v8842_v55 = vld [vmem:[#allocation8 + $0x5d4] sm:$0xf0] }
 0x746   : > { %v12018_v36 = vpop.f32.mrf.mxu3 }
 0x747   : > { %v6010_v1 = vpop.f32.mrf.mxu1 }
 0x748   : > { %v6011_v18 = vadd.f32 %v6010_v1, %v5682_v49  ;;  %v6529_v58 = vpop.xlane.xlu2 %6528  ;;  %v12014_v30 = vpop.f32.mrf.mxu2  ;;  %v8242_v49 = vor.u32 %v8831_v50, %v8239_v23  ;;  %v8349_v1 = vld [vmem:[#allocation8 + $0x660] sm:$0xf]  ;;  %v12891_v50 = vld [vmem:[#allocation68_spill] sm:$0xff] }
 0x749   : > { %v6733_v13 = vmul.f32 0.01, %v6529_v58  ;;  %5107 = vmatmul.bf16.gmra.mxu0 %v8334_v31  ;;  %v12027_v44 = vpop.f32.mrf.mxu0  ;;  %v8350_v58 = vor.u32 %v8861_v8, %v8349_v1  ;;  %v5031_v23 = vadd.f32 %v11819_v0, %v12891_v50  ;;  %v8255_v1 = vld [vmem:[#allocation8 + $0x5b0] sm:$0xf0]  ;;  %v8828_v50 = vld [vmem:[#allocation8 + $0x56c] sm:$0xf] }
 0x74a   : > { %v6231_v59 = vmax.f32 %v6011_v18, 0.0  ;;  %6049 = vmatmul.bf16.gmra.mxu1 %v8202_v45  ;;  %v5358_v45 = vadd.f32 %v11988_v19, %v5029_v57  ;;  %v8218_v19 = vor.u32 %v8824_v63, %v8215_v48  ;;  %v12892_v63 = vld [vmem:[#allocation70_spill] sm:$0xff] }
 0x74b   : > { %6909 = vst [vmem:[%s9682_s22 + $0x318] sm:$0xff] %v6733_v13  ;;  %v8277_v13 = vld [vmem:[#allocation8 + $0x5c8] sm:$0xf] }
 0x74c   : > { %v6364_v15 = vsel %vm6295_vm4, %v6231_v59, 0.0  ;;  %v5687_v59 = vadd.f32 %v11942_v38, %v5358_v45 }
 0x74d   : > { %6558 = vadd.xlane.f32.xlu2 %v6364_v15  ;;  %v8278_v15 = vor.u32 %v8842_v55, %v8277_v13 }
 0x74e   : > { %v12031_v18 = vpop.f32.mrf.mxu3 }
 0x74f   : > { %v6012_v39 = vpop.f32.mrf.mxu1 }
 0x750   : > { %v6013_v2 = vadd.f32 %v6012_v39, %v5684_v29  ;;  %v6531_v9 = vpop.xlane.xlu0 %6530  ;;  %v12025_v31 = vpop.f32.mrf.mxu2 }
 0x751   : > { %v6734_v53 = vmul.f32 0.01, %v6531_v9  ;;  %v5360_v9 = vadd.f32 %v12001_v3, %v5031_v23  ;;  %v5034_v3 = vadd.f32 %v11832_v16, %v12892_v63 }
 0x752   : > { %v6232_v24 = vmax.f32 %v6013_v2, 0.0 }
 0x753   : > { %6910 = vst [vmem:[%s9682_s22 + $0x320] sm:$0xff] %v6734_v53  ;;  %5745 = vmatmul.bf16.gmra.mxu3 %v8278_v15  ;;  %v5689_v0 = vadd.f32 %v11955_v51, %v5360_v9  ;;  %v8365_v15 = vld [vmem:[#allocation8 + $0x680] sm:$0xf]  ;;  %v8231_v51 = vld [vmem:[#allocation8 + $0x578] sm:$0xf0] }
 0x754   : > { %v6365_v62 = vsel %vm6295_vm4, %v6232_v24, 0.0  ;;  %v8835_v24 = vld [vmem:[#allocation8 + $0x5a4] sm:$0xf]  ;;  %v8846_v9 = vld [vmem:[#allocation8 + $0x5f4] sm:$0xf0] }
 0x755   : > { %6560 = vadd.xlane.f32.xlu0 %v6365_v62  ;;  %5406 = vmatmul.bf16.gmra.mxu2 %v8242_v49  ;;  %v12041_v49 = vpop.f32.mrf.mxu0  ;;  %v8258_v55 = vor.u32 %v8835_v24, %v8255_v1  ;;  %v12893_v24 = vld [vmem:[#allocation69_spill] sm:$0xff] }
 0x756   : > { %v12044_v38 = vpop.f32.mrf.mxu3  ;;  %v5036_v1 = vadd.f32 %v11845_v41, %v12893_v24  ;;  %v8247_v24 = vld [vmem:[#allocation8 + $0x598] sm:$0xf0] }
 0x757   : > { %v6015_v29 = vpop.f32.mrf.mxu1 }
 0x758   : > { %v6016_v39 = vadd.f32 %v6015_v29, %v5687_v59  ;;  %v6533_v10 = vpop.xlane.xlu1 %6532  ;;  %v12038_v57 = vpop.f32.mrf.mxu2  ;;  %v5363_v59 = vadd.f32 %v12014_v30, %v5034_v3  ;;  %v8865_v29 = vld [vmem:[#allocation8 + $0x68c] sm:$0xf0] }
 0x759   : > { %v6735_v2 = vmul.f32 0.01, %v6533_v10  ;;  %5112 = vmatmul.bf16.gmra.mxu0 %v8350_v58  ;;  %v8366_v10 = vor.u32 %v8865_v29, %v8365_v15 }
 0x75a   : > { %v6233_v53 = vmax.f32 %v6016_v39, 0.0  ;;  %6054 = vmatmul.bf16.gmra.mxu1 %v8218_v19  ;;  %v5692_v30 = vadd.f32 %v11968_v6, %v5363_v59  ;;  %v8839_v59 = vld [vmem:[#allocation8 + $0x5c4] sm:$0xf] }
 0x75b   : > { %6911 = vst [vmem:[%s9682_s22 + $0x328] sm:$0xff] %v6735_v2  ;;  %v8293_v2 = vld [vmem:[#allocation8 + $0x5e8] sm:$0xf] }
 0x75c   : > { %v6366_v45 = vsel %vm6295_vm4, %v6233_v53, 0.0  ;;  %v8234_v53 = vor.u32 %v8828_v50, %v8231_v51  ;;  %v12894_v50 = vld [vmem:[#allocation71_spill] sm:$0xff] }
 0x75d   : > { %6562 = vadd.xlane.f32.xlu1 %v6366_v45  ;;  %v12059_v16 = vpop.f32.mrf.mxu0  ;;  %v8294_v45 = vor.u32 %v8846_v9, %v8293_v2 }
 0x75e   : > { %v12055_v23 = vpop.f32.mrf.mxu3 }
 0x75f   : > { %v6017_v8 = vpop.f32.mrf.mxu1 }
 0x760   : > { %v6018_v48 = vadd.f32 %v6017_v8, %v5689_v0  ;;  %v6535_v62 = vpop.xlane.xlu2 %6534  ;;  %v12051_v58 = vpop.f32.mrf.mxu2 }
 0x761   : > { %v6736_v13 = vmul.f32 0.01, %v6535_v62  ;;  %v5365_v62 = vadd.f32 %v12025_v31, %v5036_v1  ;;  %v5039_v31 = vadd.f32 %v11858_v7, %v12894_v50 }
 0x762   : > { %v6234_v19 = vmax.f32 %v6018_v48, 0.0 }
 0x763   : > { %6912 = vst [vmem:[%s9682_s22 + $0x330] sm:$0xff] %v6736_v13  ;;  %5750 = vmatmul.bf16.gmra.mxu3 %v8294_v45  ;;  %v5694_v41 = vadd.f32 %v11981_v33, %v5365_v62  ;;  %v8381_v45 = vld [vmem:[#allocation8 + $0x6a0] sm:$0xf]  ;;  %v8832_v33 = vld [vmem:[#allocation8 + $0x58c] sm:$0xf] }
 0x764   : > { %v6367_v39 = vsel %vm6295_vm4, %v6234_v19, 0.0  ;;  %v8271_v19 = vld [vmem:[#allocation8 + $0x5d0] sm:$0xf0] }
 0x765   : > { %6564 = vadd.xlane.f32.xlu2 %v6367_v39  ;;  %5411 = vmatmul.bf16.gmra.mxu2 %v8258_v55  ;;  %v12073_v15 = vpop.f32.mrf.mxu0  ;;  %v8274_v9 = vor.u32 %v8839_v59, %v8271_v19 }
 0x766   : > { %v12068_v55 = vpop.f32.mrf.mxu3 }
 0x767   : > { %v6020_v0 = vpop.f32.mrf.mxu1 }
 0x768   : > { %v6021_v8 = vadd.f32 %v6020_v0, %v5692_v30  ;;  %v6537_v63 = vpop.xlane.xlu0 %6536  ;;  %v12064_v3 = vpop.f32.mrf.mxu2  ;;  %v5368_v30 = vadd.f32 %v12038_v57, %v5039_v31  ;;  %v8869_v0 = vld [vmem:[#allocation8 + $0x6ac] sm:$0xf0]  ;;  %v8250_v57 = vor.u32 %v8832_v33, %v8247_v24 }
 0x769   : > { %v6737_v48 = vmul.f32 0.01, %v6537_v63  ;;  %5117 = vmatmul.bf16.gmra.mxu0 %v8366_v10  ;;  %v8382_v7 = vor.u32 %v8869_v0, %v8381_v45  ;;  %v8309_v63 = vld [vmem:[#allocation8 + $0x608] sm:$0xf]  ;;  %v12896_v0 = vld [vmem:[#allocation72_spill] sm:$0xff] }
 0x76a   : > { %v6235_v13 = vmax.f32 %v6021_v8, 0.0  ;;  %6059 = vmatmul.bf16.gmra.mxu1 %v8234_v53  ;;  %v5697_v62 = vadd.f32 %v11992_v40, %v5368_v30  ;;  %v8843_v30 = vld [vmem:[#allocation8 + $0x5e4] sm:$0xf]  ;;  %v5044_v33 = vadd.f32 %v11884_v20, %v12896_v0 }
 0x76b   : > { %6913 = vst [vmem:[%s9682_s22 + $0x338] sm:$0xff] %v6737_v48  ;;  %v8850_v48 = vld [vmem:[#allocation8 + $0x614] sm:$0xf0] }
 0x76c   : > { %v6368_v6 = vsel %vm6295_vm4, %v6235_v13, 0.0  ;;  %v8310_v13 = vor.u32 %v8850_v48, %v8309_v63  ;;  %v5373_v48 = vadd.f32 %v12064_v3, %v5044_v33 }
 0x76d   : > { %6566 = vadd.xlane.f32.xlu0 %v6368_v6  ;;  %v12090_v31 = vpop.f32.mrf.mxu0 }
 0x76e   : > { %v12081_v1 = vpop.f32.mrf.mxu3  ;;  %v5702_v3 = vadd.f32 %v12018_v36, %v5373_v48  ;;  %v8847_v48 = vld [vmem:[#allocation8 + $0x604] sm:$0xf] }
 0x76f   : > { %v6022_v29 = vpop.f32.mrf.mxu1 }
 0x770   : > { %v6023_v51 = vadd.f32 %v6022_v29, %v5694_v41  ;;  %v6539_v39 = vpop.xlane.xlu1 %6538  ;;  %v12077_v10 = vpop.f32.mrf.mxu2  ;;  %v12895_v41 = vld [vmem:[#allocation73_spill] sm:$0xff] }
 0x771   : > { %v6738_v2 = vmul.f32 0.01, %v6539_v39  ;;  %v5041_v59 = vadd.f32 %v11871_v47, %v12895_v41  ;;  %v8263_v41 = vld [vmem:[#allocation8 + $0x5b8] sm:$0xf0] }
 0x772   : > { %v6236_v53 = vmax.f32 %v6023_v51, 0.0 }
 0x773   : > { %6914 = vst [vmem:[%s9682_s22 + $0x340] sm:$0xff] %v6738_v2  ;;  %5755 = vmatmul.bf16.gmra.mxu3 %v8310_v13  ;;  %v5370_v39 = vadd.f32 %v12051_v58, %v5041_v59  ;;  %v8873_v13 = vld [vmem:[#allocation8 + $0x6cc] sm:$0xf0] }
 0x774   : > { %v6369_v8 = vsel %vm6295_vm4, %v6236_v53, 0.0  ;;  %v8287_v53 = vld [vmem:[#allocation8 + $0x5f0] sm:$0xf0] }
 0x775   : > { %6568 = vadd.xlane.f32.xlu1 %v6369_v8  ;;  %5416 = vmatmul.bf16.gmra.mxu2 %v8274_v9  ;;  %v5699_v47 = vadd.f32 %v12005_v4, %v5370_v39  ;;  %v8290_v63 = vor.u32 %v8843_v30, %v8287_v53  ;;  %v8836_v4 = vld [vmem:[#allocation8 + $0x5ac] sm:$0xf] }
 0x776   : > { %v12094_v40 = vpop.f32.mrf.mxu3  ;;  %v8266_v39 = vor.u32 %v8836_v4, %v8263_v41 }
 0x777   : > { %v6025_v6 = vpop.f32.mrf.mxu1 }
 0x778   : > { %v6026_v19 = vadd.f32 %v6025_v6, %v5697_v62  ;;  %v6541_v29 = vpop.xlane.xlu2 %6540  ;;  %v12088_v50 = vpop.f32.mrf.mxu2 }
 0x779   : > { %v6739_v51 = vmul.f32 0.01, %v6541_v29  ;;  %5122 = vmatmul.bf16.gmra.mxu0 %v8382_v7  ;;  %v12104_v6 = vpop.f32.mrf.mxu0  ;;  %v8325_v29 = vld [vmem:[#allocation8 + $0x628] sm:$0xf] }
 0x77a   : > { %v6237_v2 = vmax.f32 %v6026_v19, 0.0  ;;  %6064 = vmatmul.bf16.gmra.mxu1 %v8250_v57  ;;  %v8397_v57 = vld [vmem:[#allocation8 + $0x6c0] sm:$0xf] }
 0x77b   : > { %6915 = vst [vmem:[%s9682_s22 + $0x348] sm:$0xff] %v6739_v51  ;;  %v8398_v19 = vor.u32 %v8873_v13, %v8397_v57  ;;  %v8854_v51 = vld [vmem:[#allocation8 + $0x634] sm:$0xf0] }
 0x77c   : > { %v6370_v9 = vsel %vm6295_vm4, %v6237_v2, 0.0  ;;  %v8326_v2 = vor.u32 %v8854_v51, %v8325_v29  ;;  %v12898_v13 = vld [vmem:[#allocation76_spill] sm:$0xff] }
 0x77d   : > { %6570 = vadd.xlane.f32.xlu2 %v6370_v9 }
 0x77e   : > { %v12107_v59 = vpop.f32.mrf.mxu3 }
 0x77f   : > { %v6027_v45 = vpop.f32.mrf.mxu1 }
 0x780   : > { %v6028_v24 = vadd.f32 %v6027_v45, %v5699_v47  ;;  %v6543_v58 = vpop.xlane.xlu0 %6542  ;;  %v12101_v8 = vpop.f32.mrf.mxu2  ;;  %v12897_v47 = vld [vmem:[#allocation74_spill] sm:$0xff] }
 0x781   : > { %v6740_v7 = vmul.f32 0.01, %v6543_v58  ;;  %v5046_v30 = vadd.f32 %v11901_v21, %v12897_v47 }
 0x782   : > { %v6238_v62 = vmax.f32 %v6028_v24, 0.0 }
 0x783   : > { %6916 = vst [vmem:[%s9682_s22 + $0x350] sm:$0xff] %v6740_v7  ;;  %5760 = vmatmul.bf16.gmra.mxu3 %v8326_v2  ;;  %v5375_v24 = vadd.f32 %v12077_v10, %v5046_v30  ;;  %v5049_v10 = vadd.f32 %v11915_v61, %v12898_v13  ;;  %v8877_v2 = vld [vmem:[#allocation8 + $0x6ec] sm:$0xf0] }
 0x784   : > { %v6371_v20 = vsel %vm6295_vm4, %v6238_v62, 0.0  ;;  %v8303_v62 = vld [vmem:[#allocation8 + $0x610] sm:$0xf0] }
 0x785   : > { %6572 = vadd.xlane.f32.xlu0 %v6371_v20  ;;  %5421 = vmatmul.bf16.gmra.mxu2 %v8290_v63  ;;  %v12122_v63 = vpop.f32.mrf.mxu0  ;;  %v5704_v21 = vadd.f32 %v12031_v18, %v5375_v24  ;;  %v8306_v29 = vor.u32 %v8847_v48, %v8303_v62  ;;  %v5378_v51 = vadd.f32 %v12088_v50, %v5049_v10  ;;  %v8279_v18 = vld [vmem:[#allocation8 + $0x5d8] sm:$0xf0] }
 0x786   : > { %v12118_v7 = vpop.f32.mrf.mxu3 }
 0x787   : > { %v6030_v9 = vpop.f32.mrf.mxu1 }
 0x788   : > { %v6031_v53 = vadd.f32 %v6030_v9, %v5702_v3  ;;  %v6545_v45 = vpop.xlane.xlu1 %6544  ;;  %v12114_v0 = vpop.f32.mrf.mxu2  ;;  %v8840_v9 = vld [vmem:[#allocation8 + $0x5cc] sm:$0xf] }
 0x789   : > { %v6741_v33 = vmul.f32 0.01, %v6545_v45  ;;  %5127 = vmatmul.bf16.gmra.mxu0 %v8398_v19  ;;  %v8858_v45 = vld [vmem:[#allocation8 + $0x654] sm:$0xf0]  ;;  %v8282_v50 = vor.u32 %v8840_v9, %v8279_v18 }
 0x78a   : > { %v6239_v58 = vmax.f32 %v6031_v53, 0.0  ;;  %6069 = vmatmul.bf16.gmra.mxu1 %v8266_v39  ;;  %v8413_v39 = vld [vmem:[#allocation8 + $0x6e0] sm:$0xf]  ;;  %v8341_v53 = vld [vmem:[#allocation8 + $0x648] sm:$0xf] }
 0x78b   : > { %6917 = vst [vmem:[%s9682_s22 + $0x358] sm:$0xff] %v6741_v33  ;;  %v8414_v61 = vor.u32 %v8877_v2, %v8413_v39  ;;  %v5707_v33 = vadd.f32 %v12044_v38, %v5378_v51  ;;  %v8342_v24 = vor.u32 %v8858_v45, %v8341_v53  ;;  %v8319_v51 = vld [vmem:[#allocation8 + $0x630] sm:$0xf0]  ;;  %v12900_v39 = vld [vmem:[#allocation77_spill] sm:$0xff] }
 0x78c   : > { %v6372_v36 = vsel %vm6295_vm4, %v6239_v58, 0.0  ;;  %v5054_v2 = vadd.f32 %v11947_v43, %v12900_v39 }
 0x78d   : > { %6574 = vadd.xlane.f32.xlu1 %v6372_v36  ;;  %v12136_v58 = vpop.f32.mrf.mxu0 }
 0x78e   : > { %v12131_v47 = vpop.f32.mrf.mxu3  ;;  %v5383_v45 = vadd.f32 %v12114_v0, %v5054_v2 }
 0x78f   : > { %v6032_v57 = vpop.f32.mrf.mxu1 }
 0x790   : > { %v6033_v4 = vadd.f32 %v6032_v57, %v5704_v21  ;;  %v6547_v41 = vpop.xlane.xlu2 %6546  ;;  %v12127_v20 = vpop.f32.mrf.mxu2  ;;  %v12899_v21 = vld [vmem:[#allocation75_spill] sm:$0xff] }
 0x791   : > { %v6742_v19 = vmul.f32 0.01, %v6547_v41  ;;  %v5051_v48 = vadd.f32 %v11933_v27, %v12899_v21 }
 0x792   : > { %v6240_v3 = vmax.f32 %v6033_v4, 0.0 }
 0x793   : > { %6918 = vst [vmem:[%s9682_s22 + $0x360] sm:$0xff] %v6742_v19  ;;  %5765 = vmatmul.bf16.gmra.mxu3 %v8342_v24  ;;  %v5380_v4 = vadd.f32 %v12101_v8, %v5051_v48  ;;  %v8881_v24 = vld [vmem:[#allocation8 + $0x70c] sm:$0xf0] }
 0x794   : > { %v6373_v30 = vsel %vm6295_vm4, %v6240_v3, 0.0 }
 0x795   : > { %6576 = vadd.xlane.f32.xlu2 %v6373_v30  ;;  %5426 = vmatmul.bf16.gmra.mxu2 %v8306_v29  ;;  %v5709_v27 = vadd.f32 %v12055_v23, %v5380_v4  ;;  %v8851_v29 = vld [vmem:[#allocation8 + $0x624] sm:$0xf]  ;;  %v12153_v30 = vpop.f32.mrf.mxu0  ;;  %v8844_v23 = vld [vmem:[#allocation8 + $0x5ec] sm:$0xf] }
 0x796   : > { %v12144_v38 = vpop.f32.mrf.mxu3  ;;  %v8322_v53 = vor.u32 %v8851_v29, %v8319_v51 }
 0x797   : > { %v6035_v36 = vpop.f32.mrf.mxu1 }
 0x798   : > { %v6036_v62 = vadd.f32 %v6035_v36, %v5707_v33  ;;  %v6549_v57 = vpop.xlane.xlu0 %6548  ;;  %v12140_v13 = vpop.f32.mrf.mxu2  ;;  %v8295_v36 = vld [vmem:[#allocation8 + $0x5f8] sm:$0xf0] }
 0x799   : > { %v6743_v10 = vmul.f32 0.01, %v6549_v57  ;;  %5132 = vmatmul.bf16.gmra.mxu0 %v8414_v61  ;;  %v8862_v57 = vld [vmem:[#allocation8 + $0x674] sm:$0xf0]  ;;  %v8298_v0 = vor.u32 %v8844_v23, %v8295_v36 }
 0x79a   : > { %v6241_v41 = vmax.f32 %v6036_v62, 0.0  ;;  %6074 = vmatmul.bf16.gmra.mxu1 %v8282_v50  ;;  %v8429_v50 = vld [vmem:[#allocation8 + $0x700] sm:$0xf]  ;;  %v8357_v62 = vld [vmem:[#allocation8 + $0x668] sm:$0xf] }
 0x79b   : > { %6919 = vst [vmem:[%s9682_s22 + $0x368] sm:$0xff] %v6743_v10  ;;  %v8430_v48 = vor.u32 %v8881_v24, %v8429_v50  ;;  %v5712_v10 = vadd.f32 %v12068_v55, %v5383_v45  ;;  %v8358_v4 = vor.u32 %v8862_v57, %v8357_v62  ;;  %v8335_v45 = vld [vmem:[#allocation8 + $0x650] sm:$0xf0]  ;;  %v12902_v50 = vld [vmem:[#allocation78_spill] sm:$0xff] }
 0x79c   : > { %v6374_v19 = vsel %vm6295_vm4, %v6241_v41, 0.0 }
 0x79d   : > { %6578 = vadd.xlane.f32.xlu0 %v6374_v19  ;;  %v12901_v19 = vld [vmem:[#allocation79_spill] sm:$0xff] }
 0x79e   : > { %v12157_v21 = vpop.f32.mrf.mxu3 }
 0x79f   : > { %v6037_v3 = vpop.f32.mrf.mxu1 }
 0x7a0   : > { %v6038_v9 = vadd.f32 %v6037_v3, %v5709_v27  ;;  %v6551_v8 = vpop.xlane.xlu1 %6550  ;;  %v12151_v18 = vpop.f32.mrf.mxu2  ;;  %v5056_v27 = vadd.f32 %v11964_v46, %v12901_v19 }
 0x7a1   : > { %v6744_v61 = vmul.f32 0.01, %v6551_v8  ;;  %v12167_v8 = vpop.f32.mrf.mxu0 }
 0x7a2   : > { %v6242_v33 = vmax.f32 %v6038_v9, 0.0  ;;  %v5385_v2 = vadd.f32 %v12127_v20, %v5056_v27  ;;  %v5059_v20 = vadd.f32 %v11978_v25, %v12902_v50 }
 0x7a3   : > { %6920 = vst [vmem:[%s9682_s22 + $0x370] sm:$0xff] %v6744_v61  ;;  %5770 = vmatmul.bf16.gmra.mxu3 %v8358_v4  ;;  %v8848_v4 = vld [vmem:[#allocation8 + $0x60c] sm:$0xf] }
 0x7a4   : > { %v6375_v43 = vsel %vm6295_vm4, %v6242_v33, 0.0  ;;  %v5714_v46 = vadd.f32 %v12081_v1, %v5385_v2  ;;  %v5388_v62 = vadd.f32 %v12140_v13, %v5059_v20  ;;  %v8311_v1 = vld [vmem:[#allocation8 + $0x618] sm:$0xf0] }
 0x7a5   : > { %6580 = vadd.xlane.f32.xlu1 %v6375_v43  ;;  %5431 = vmatmul.bf16.gmra.mxu2 %v8322_v53  ;;  %v8855_v53 = vld [vmem:[#allocation8 + $0x644] sm:$0xf] }
 0x7a6   : > { %v12170_v55 = vpop.f32.mrf.mxu3  ;;  %v5717_v13 = vadd.f32 %v12094_v40, %v5388_v62 }
 0x7a7   : > { %v6040_v41 = vpop.f32.mrf.mxu1 }
 0x7a8   : > { %v6041_v29 = vadd.f32 %v6040_v41, %v5712_v10  ;;  %v6553_v51 = vpop.xlane.xlu2 %6552  ;;  %v12164_v3 = vpop.f32.mrf.mxu2  ;;  %v8445_v10 = vld [vmem:[#allocation8 + $0x720] sm:$0xf] }
 0x7a9   : > { %v6745_v39 = vmul.f32 0.01, %v6553_v51  ;;  %5137 = vmatmul.bf16.gmra.mxu0 %v8430_v48  ;;  %v8338_v48 = vor.u32 %v8855_v53, %v8335_v45  ;;  %v12185_v25 = vpop.f32.mrf.mxu0  ;;  %v8866_v51 = vld [vmem:[#allocation8 + $0x694] sm:$0xf0] }
 0x7aa   : > { %v6243_v9 = vmax.f32 %v6041_v29, 0.0  ;;  %6079 = vmatmul.bf16.gmra.mxu1 %v8298_v0  ;;  %v8885_v0 = vld [vmem:[#allocation8 + $0x72c] sm:$0xf0]  ;;  %v8373_v29 = vld [vmem:[#allocation8 + $0x688] sm:$0xf] }
 0x7ab   : > { %6921 = vst [vmem:[%s9682_s22 + $0x378] sm:$0xff] %v6745_v39  ;;  %v8446_v27 = vor.u32 %v8885_v0, %v8445_v10  ;;  %v8314_v39 = vor.u32 %v8848_v4, %v8311_v1  ;;  %v8374_v2 = vor.u32 %v8866_v51, %v8373_v29  ;;  %v12904_v10 = vld [vmem:[#allocation82_spill] sm:$0xff] }
 0x7ac   : > { %v6376_v61 = vsel %vm6295_vm4, %v6243_v9, 0.0 }
 0x7ad   : > { %6582 = vadd.xlane.f32.xlu2 %v6376_v61  ;;  %v12903_v61 = vld [vmem:[#allocation80_spill] sm:$0xff] }
 0x7ae   : > { %v12181_v41 = vpop.f32.mrf.mxu3 }
 0x7af   : > { %v6042_v33 = vpop.f32.mrf.mxu1 }
 0x7b0   : > { %v6043_v24 = vadd.f32 %v6042_v33, %v5714_v46  ;;  %v6555_v23 = vpop.xlane.xlu0 %6554  ;;  %v12177_v36 = vpop.f32.mrf.mxu2  ;;  %v5061_v46 = vadd.f32 %v11996_v14, %v12903_v61 }
 0x7b1   : > { %v6746_v43 = vmul.f32 0.01, %v6555_v23  ;;  %v12199_v62 = vpop.f32.mrf.mxu0 }
 0x7b2   : > { %v6244_v57 = vmax.f32 %v6043_v24, 0.0  ;;  %v5390_v20 = vadd.f32 %v12151_v18, %v5061_v46  ;;  %v5064_v18 = vadd.f32 %v12010_v54, %v12904_v10  ;;  %v8389_v46 = vld [vmem:[#allocation8 + $0x6a8] sm:$0xf] }
 0x7b3   : > { %6922 = vst [vmem:[%s9682_s22 + $0x380] sm:$0xff] %v6746_v43  ;;  %5775 = vmatmul.bf16.gmra.mxu3 %v8374_v2  ;;  %v8859_v43 = vld [vmem:[#allocation8 + $0x664] sm:$0xf]  ;;  %v8327_v2 = vld [vmem:[#allocation8 + $0x638] sm:$0xf0] }
 0x7b4   : > { %v6377_v19 = vsel %vm6295_vm4, %v6244_v57, 0.0  ;;  %v5719_v14 = vadd.f32 %v12107_v59, %v5390_v20  ;;  %v5393_v29 = vadd.f32 %v12164_v3, %v5064_v18  ;;  %v8852_v59 = vld [vmem:[#allocation8 + $0x62c] sm:$0xf] }
 0x7b5   : > { %6584 = vadd.xlane.f32.xlu0 %v6377_v19  ;;  %5436 = vmatmul.bf16.gmra.mxu2 %v8338_v48  ;;  %v8351_v48 = vld [vmem:[#allocation8 + $0x670] sm:$0xf0]  ;;  %v8330_v3 = vor.u32 %v8852_v59, %v8327_v2 }
 0x7b6   : > { %v12194_v23 = vpop.f32.mrf.mxu3 }
 0x7b7   : > { %v6045_v9 = vpop.f32.mrf.mxu1 }
 0x7b8   : > { %v6046_v53 = vadd.f32 %v6045_v9, %v5717_v13  ;;  %v6557_v45 = vpop.xlane.xlu1 %6556  ;;  %v12190_v33 = vpop.f32.mrf.mxu2  ;;  %v8461_v13 = vld [vmem:[#allocation8 + $0x740] sm:$0xf] }
 0x7b9   : > { %v6747_v50 = vmul.f32 0.01, %v6557_v45  ;;  %5142 = vmatmul.bf16.gmra.mxu0 %v8446_v27  ;;  %v8354_v27 = vor.u32 %v8859_v43, %v8351_v48  ;;  %v5722_v45 = vadd.f32 %v12118_v7, %v5393_v29 }
 0x7ba   : > { %v6245_v24 = vmax.f32 %v6046_v53, 0.0  ;;  %6084 = vmatmul.bf16.gmra.mxu1 %v8314_v39  ;;  %v8889_v39 = vld [vmem:[#allocation8 + $0x74c] sm:$0xf0]  ;;  %v8870_v53 = vld [vmem:[#allocation8 + $0x6b4] sm:$0xf0] }
 0x7bb   : > { %6923 = vst [vmem:[%s9682_s22 + $0x388] sm:$0xff] %v6747_v50  ;;  %v8462_v54 = vor.u32 %v8889_v39, %v8461_v13  ;;  %v8390_v50 = vor.u32 %v8870_v53, %v8389_v46  ;;  %v8477_v53 = vld [vmem:[#allocation8 + $0x760] sm:$0xf] }
 0x7bc   : > { %v6378_v40 = vsel %vm6295_vm4, %v6245_v24, 0.0  ;;  %v12905_v24 = vld [vmem:[#allocation81_spill] sm:$0xff] }
 0x7bd   : > { %6586 = vadd.xlane.f32.xlu1 %v6378_v40  ;;  %v5066_v40 = vadd.f32 %v12027_v44, %v12905_v24 }
 0x7be   : > { %v12207_v9 = vpop.f32.mrf.mxu3 }
 0x7bf   : > { %v6047_v57 = vpop.f32.mrf.mxu1  ;;  %v5395_v18 = vadd.f32 %v12177_v36, %v5066_v40  ;;  %v8405_v40 = vld [vmem:[#allocation8 + $0x6c8] sm:$0xf] }
 0x7c0   : > { %v6048_v0 = vadd.f32 %v6047_v57, %v5719_v14  ;;  %v6559_v4 = vpop.xlane.xlu2 %6558  ;;  %v12203_v1 = vpop.f32.mrf.mxu2 }
 0x7c1   : > { %v6748_v19 = vmul.f32 0.01, %v6559_v4  ;;  %v12216_v57 = vpop.f32.mrf.mxu0  ;;  %v5724_v44 = vadd.f32 %v12131_v47, %v5395_v18  ;;  %v8856_v47 = vld [vmem:[#allocation8 + $0x64c] sm:$0xf] }
 0x7c2   : > { %v6246_v51 = vmax.f32 %v6048_v0, 0.0 }
 0x7c3   : > { %6924 = vst [vmem:[%s9682_s22 + $0x390] sm:$0xff] %v6748_v19  ;;  %5780 = vmatmul.bf16.gmra.mxu3 %v8390_v50  ;;  %v8863_v19 = vld [vmem:[#allocation8 + $0x684] sm:$0xf]  ;;  %v8343_v50 = vld [vmem:[#allocation8 + $0x658] sm:$0xf0] }
 0x7c4   : > { %v6379_v61 = vsel %vm6295_vm4, %v6246_v51, 0.0  ;;  %v12906_v51 = vld [vmem:[#allocation83_spill] sm:$0xff] }
 0x7c5   : > { %6588 = vadd.xlane.f32.xlu2 %v6379_v61  ;;  %5441 = vmatmul.bf16.gmra.mxu2 %v8354_v27  ;;  %v8367_v27 = vld [vmem:[#allocation8 + $0x690] sm:$0xf0]  ;;  %v5069_v13 = vadd.f32 %v12041_v49, %v12906_v51 }
 0x7c6   : > { %v12220_v7 = vpop.f32.mrf.mxu3  ;;  %v8370_v61 = vor.u32 %v8863_v19, %v8367_v27 }
 0x7c7   : > { %v6050_v20 = vpop.f32.mrf.mxu1 }
 0x7c8   : > { %v6051_v14 = vadd.f32 %v6050_v20, %v5722_v45  ;;  %v6561_v43 = vpop.xlane.xlu0 %6560  ;;  %v12214_v48 = vpop.f32.mrf.mxu2  ;;  %v8893_v45 = vld [vmem:[#allocation8 + $0x76c] sm:$0xf0] }
 0x7c9   : > { %v6749_v10 = vmul.f32 0.01, %v6561_v43  ;;  %5147 = vmatmul.bf16.gmra.mxu0 %v8462_v54  ;;  %v5398_v54 = vadd.f32 %v12190_v33, %v5069_v13  ;;  %v8478_v24 = vor.u32 %v8893_v45, %v8477_v53  ;;  %v8346_v43 = vor.u32 %v8856_v47, %v8343_v50 }
 0x7ca   : > { %v6247_v0 = vmax.f32 %v6051_v14, 0.0  ;;  %6089 = vmatmul.bf16.gmra.mxu1 %v8330_v3  ;;  %v12230_v3 = vpop.f32.mrf.mxu0  ;;  %v8874_v14 = vld [vmem:[#allocation8 + $0x6d4] sm:$0xf0] }
 0x7cb   : > { %6925 = vst [vmem:[%s9682_s22 + $0x398] sm:$0xff] %v6749_v10  ;;  %v5727_v33 = vadd.f32 %v12144_v38, %v5398_v54  ;;  %v8406_v10 = vor.u32 %v8874_v14, %v8405_v40  ;;  %v8493_v14 = vld [vmem:[#allocation8 + $0x780] sm:$0xf] }
 0x7cc   : > { %v6380_v4 = vsel %vm6295_vm4, %v6247_v0, 0.0  ;;  %v12907_v0 = vld [vmem:[#allocation85_spill] sm:$0xff] }
 0x7cd   : > { %6590 = vadd.xlane.f32.xlu0 %v6380_v4  ;;  %v5071_v4 = vadd.f32 %v12059_v16, %v12907_v0  ;;  %v8421_v0 = vld [vmem:[#allocation8 + $0x6e8] sm:$0xf] }
 0x7ce   : > { %v12233_v20 = vpop.f32.mrf.mxu3 }
 0x7cf   : > { %v6052_v29 = vpop.f32.mrf.mxu1  ;;  %v5400_v51 = vadd.f32 %v12203_v1, %v5071_v4  ;;  %v8878_v4 = vld [vmem:[#allocation8 + $0x6f4] sm:$0xf0] }
 0x7d0   : > { %v6053_v39 = vadd.f32 %v6052_v29, %v5724_v44  ;;  %v6563_v36 = vpop.xlane.xlu1 %6562  ;;  %v12227_v59 = vpop.f32.mrf.mxu2 }
 0x7d1   : > { %v6750_v2 = vmul.f32 0.01, %v6563_v36  ;;  %v5729_v16 = vadd.f32 %v12157_v21, %v5400_v51  ;;  %v8359_v21 = vld [vmem:[#allocation8 + $0x678] sm:$0xf0] }
 0x7d2   : > { %v6248_v46 = vmax.f32 %v6053_v39, 0.0  ;;  %v12248_v36 = vpop.f32.mrf.mxu0 }
 0x7d3   : > { %6926 = vst [vmem:[%s9682_s22 + $0x3a0] sm:$0xff] %v6750_v2  ;;  %5785 = vmatmul.bf16.gmra.mxu3 %v8406_v10  ;;  %v8867_v2 = vld [vmem:[#allocation8 + $0x6a4] sm:$0xf] }
 0x7d4   : > { %v6381_v49 = vsel %vm6295_vm4, %v6248_v46, 0.0  ;;  %v12908_v46 = vld [vmem:[#allocation84_spill] sm:$0xff] }
 0x7d5   : > { %6592 = vadd.xlane.f32.xlu1 %v6381_v49  ;;  %5446 = vmatmul.bf16.gmra.mxu2 %v8370_v61  ;;  %v8383_v61 = vld [vmem:[#allocation8 + $0x6b0] sm:$0xf0]  ;;  %v5074_v1 = vadd.f32 %v12073_v15, %v12908_v46 }
 0x7d6   : > { %v12244_v39 = vpop.f32.mrf.mxu3  ;;  %v8386_v49 = vor.u32 %v8867_v2, %v8383_v61 }
 0x7d7   : > { %v6055_v18 = vpop.f32.mrf.mxu1 }
 0x7d8   : > { %v6056_v44 = vadd.f32 %v6055_v18, %v5727_v33  ;;  %v6565_v19 = vpop.xlane.xlu2 %6564  ;;  %v12240_v27 = vpop.f32.mrf.mxu2  ;;  %v8897_v33 = vld [vmem:[#allocation8 + $0x78c] sm:$0xf0] }
 0x7d9   : > { %v6751_v29 = vmul.f32 0.01, %v6565_v19  ;;  %5152 = vmatmul.bf16.gmra.mxu0 %v8478_v24  ;;  %v5403_v24 = vadd.f32 %v12214_v48, %v5074_v1  ;;  %v8494_v15 = vor.u32 %v8897_v33, %v8493_v14  ;;  %v8422_v19 = vor.u32 %v8878_v4, %v8421_v0  ;;  %v8509_v4 = vld [vmem:[#allocation8 + $0x7a0] sm:$0xf] }
 0x7da   : > { %v6249_v13 = vmax.f32 %v6056_v44, 0.0  ;;  %6094 = vmatmul.bf16.gmra.mxu1 %v8346_v43  ;;  %v8860_v43 = vld [vmem:[#allocation8 + $0x66c] sm:$0xf] }
 0x7db   : > { %6927 = vst [vmem:[%s9682_s22 + $0x3a8] sm:$0xff] %v6751_v29  ;;  %v5732_v44 = vadd.f32 %v12170_v55, %v5403_v24  ;;  %v8362_v48 = vor.u32 %v8860_v43, %v8359_v21  ;;  %v12262_v29 = vpop.f32.mrf.mxu0  ;;  %v12910_v24 = vld [vmem:[#allocation89_spill] sm:$0xff] }
 0x7dc   : > { %v6382_v38 = vsel %vm6295_vm4, %v6249_v13, 0.0  ;;  %v12909_v13 = vld [vmem:[#allocation86_spill] sm:$0xff] }
 0x7dd   : > { %6594 = vadd.xlane.f32.xlu2 %v6382_v38  ;;  %v5076_v38 = vadd.f32 %v12090_v31, %v12909_v13  ;;  %v8437_v13 = vld [vmem:[#allocation8 + $0x708] sm:$0xf] }
 0x7de   : > { %v12257_v10 = vpop.f32.mrf.mxu3 }
 0x7df   : > { %v6057_v54 = vpop.f32.mrf.mxu1  ;;  %v5405_v46 = vadd.f32 %v12227_v59, %v5076_v38  ;;  %v8882_v38 = vld [vmem:[#allocation8 + $0x714] sm:$0xf0] }
 0x7e0   : > { %v6058_v53 = vadd.f32 %v6057_v54, %v5729_v16  ;;  %v6567_v45 = vpop.xlane.xlu0 %6566  ;;  %v12253_v47 = vpop.f32.mrf.mxu2 }
 0x7e1   : > { %v6752_v50 = vmul.f32 0.01, %v6567_v45  ;;  %v5734_v31 = vadd.f32 %v12181_v41, %v5405_v46  ;;  %v8871_v45 = vld [vmem:[#allocation8 + $0x6c4] sm:$0xf]  ;;  %v8864_v41 = vld [vmem:[#allocation8 + $0x68c] sm:$0xf] }
 0x7e2   : > { %v6250_v40 = vmax.f32 %v6058_v53, 0.0  ;;  %v12911_v46 = vld [vmem:[#allocation88_spill] sm:$0xff] }
 0x7e3   : > { %6928 = vst [vmem:[%s9682_s22 + $0x3b0] sm:$0xff] %v6752_v50  ;;  %5790 = vmatmul.bf16.gmra.mxu3 %v8422_v19  ;;  %v8399_v50 = vld [vmem:[#allocation8 + $0x6d0] sm:$0xf0]  ;;  %v12279_v43 = vpop.f32.mrf.mxu0 }
 0x7e4   : > { %v6383_v18 = vsel %vm6295_vm4, %v6250_v40, 0.0  ;;  %v5079_v40 = vadd.f32 %v12104_v6, %v12910_v24 }
 0x7e5   : > { %6596 = vadd.xlane.f32.xlu0 %v6383_v18  ;;  %5451 = vmatmul.bf16.gmra.mxu2 %v8386_v49  ;;  %v8402_v18 = vor.u32 %v8871_v45, %v8399_v50 }
 0x7e6   : > { %v12270_v55 = vpop.f32.mrf.mxu3 }
 0x7e7   : > { %v6060_v51 = vpop.f32.mrf.mxu1 }
 0x7e8   : > { %v6061_v16 = vadd.f32 %v6060_v51, %v5732_v44  ;;  %v6569_v2 = vpop.xlane.xlu1 %6568  ;;  %v12266_v61 = vpop.f32.mrf.mxu2  ;;  %v8901_v44 = vld [vmem:[#allocation8 + $0x7ac] sm:$0xf0] }
 0x7e9   : > { %v6753_v54 = vmul.f32 0.01, %v6569_v2  ;;  %5157 = vmatmul.bf16.gmra.mxu0 %v8494_v15  ;;  %v5408_v15 = vadd.f32 %v12240_v27, %v5079_v40  ;;  %v8510_v51 = vor.u32 %v8901_v44, %v8509_v4  ;;  %v8438_v2 = vor.u32 %v8882_v38, %v8437_v13  ;;  %v8905_v13 = vld [vmem:[#allocation8 + $0x7cc] sm:$0xf0]  ;;  %v8868_v38 = vld [vmem:[#allocation8 + $0x6ac] sm:$0xf] }
 0x7ea   : > { %v6251_v1 = vmax.f32 %v6061_v16, 0.0  ;;  %6099 = vmatmul.bf16.gmra.mxu1 %v8362_v48  ;;  %v8375_v48 = vld [vmem:[#allocation8 + $0x698] sm:$0xf0] }
 0x7eb   : > { %6929 = vst [vmem:[%s9682_s22 + $0x3b8] sm:$0xff] %v6753_v54  ;;  %v5737_v16 = vadd.f32 %v12194_v23, %v5408_v15  ;;  %v8378_v27 = vor.u32 %v8864_v41, %v8375_v48  ;;  %v12293_v40 = vpop.f32.mrf.mxu0 }
 0x7ec   : > { %v6384_v53 = vsel %vm6295_vm4, %v6251_v1, 0.0  ;;  %v5081_v1 = vadd.f32 %v12122_v63, %v12911_v46 }
 0x7ed   : > { %6598 = vadd.xlane.f32.xlu1 %v6384_v53 }
 0x7ee   : > { %v12283_v19 = vpop.f32.mrf.mxu3 }
 0x7ef   : > { %v6062_v49 = vpop.f32.mrf.mxu1 }
 0x7f0   : > { %v6063_v14 = vadd.f32 %v6062_v49, %v5734_v31  ;;  %v6571_v59 = vpop.xlane.xlu2 %6570  ;;  %v12277_v33 = vpop.f32.mrf.mxu2  ;;  %v5410_v49 = vadd.f32 %v12253_v47, %v5081_v1  ;;  %v5084_v47 = vadd.f32 %v12136_v58, %v11098_v32 }
 0x7f1   : > { %v6754_v21 = vmul.f32 0.01, %v6571_v59  ;;  %v8875_v59 = vld [vmem:[#allocation8 + $0x6e4] sm:$0xf] }
 0x7f2   : > { %v6252_v0 = vmax.f32 %v6063_v14, 0.0  ;;  %v5739_v63 = vadd.f32 %v12207_v9, %v5410_v49  ;;  %v5413_v48 = vadd.f32 %v12266_v61, %v5084_v47  ;;  %v8391_v9 = vld [vmem:[#allocation8 + $0x6b8] sm:$0xf0] }
 0x7f3   : > { %6930 = vst [vmem:[%s9682_s22 + $0x3c0] sm:$0xff] %v6754_v21  ;;  %5795 = vmatmul.bf16.gmra.mxu3 %v8438_v2  ;;  %v8415_v21 = vld [vmem:[#allocation8 + $0x6f0] sm:$0xf0]  ;;  %v12311_v32 = vpop.f32.mrf.mxu0  ;;  %v8453_v2 = vld [vmem:[#allocation8 + $0x728] sm:$0xf]  ;;  %v8394_v46 = vor.u32 %v8868_v38, %v8391_v9 }
 0x7f4   : > { %v6385_v6 = vsel %vm6295_vm4, %v6252_v0, 0.0  ;;  %v8418_v41 = vor.u32 %v8875_v59, %v8415_v21  ;;  %v5742_v61 = vadd.f32 %v12220_v7, %v5413_v48  ;;  %v8541_v9 = vld [vmem:[#allocation8 + $0x7e0] sm:$0xf] }
 0x7f5   : > { %6600 = vadd.xlane.f32.xlu2 %v6385_v6  ;;  %5456 = vmatmul.bf16.gmra.mxu2 %v8402_v18 }
 0x7f6   : > { %v12296_v23 = vpop.f32.mrf.mxu3 }
 0x7f7   : > { %v6065_v54 = vpop.f32.mrf.mxu1 }
 0x7f8   : > { %v6066_v53 = vadd.f32 %v6065_v54, %v5737_v16  ;;  %v6573_v31 = vpop.xlane.xlu0 %6572  ;;  %v12290_v45 = vpop.f32.mrf.mxu2  ;;  %v8886_v54 = vld [vmem:[#allocation8 + $0x734] sm:$0xf0] }
 0x7f9   : > { %v6755_v50 = vmul.f32 0.01, %v6573_v31  ;;  %5162 = vmatmul.bf16.gmra.mxu0 %v8510_v51  ;;  %v8525_v51 = vld [vmem:[#allocation8 + $0x7c0] sm:$0xf]  ;;  %v8454_v1 = vor.u32 %v8886_v54, %v8453_v2  ;;  %v5086_v31 = vadd.f32 %v12153_v30, %v11114_v28  ;;  %v8879_v30 = vld [vmem:[#allocation8 + $0x704] sm:$0xf] }
 0x7fa   : > { %v6253_v24 = vmax.f32 %v6066_v53, 0.0  ;;  %6104 = vmatmul.bf16.gmra.mxu1 %v8378_v27  ;;  %v8526_v58 = vor.u32 %v8905_v13, %v8525_v51 }
 0x7fb   : > { %6931 = vst [vmem:[%s9682_s22 + $0x3c8] sm:$0xff] %v6755_v50  ;;  %v12325_v47 = vpop.f32.mrf.mxu0 }
 0x7fc   : > { %v6386_v14 = vsel %vm6295_vm4, %v6253_v24, 0.0 }
 0x7fd   : > { %6602 = vadd.xlane.f32.xlu0 %v6386_v14 }
 0x7fe   : > { %v12307_v16 = vpop.f32.mrf.mxu3 }
 0x7ff   : > { %v6067_v18 = vpop.f32.mrf.mxu1 }
 0x800   : > { %v6068_v15 = vadd.f32 %v6067_v18, %v5739_v63  ;;  %v6575_v0 = vpop.xlane.xlu1 %6574  ;;  %v12303_v4 = vpop.f32.mrf.mxu2  ;;  %v5415_v63 = vadd.f32 %v12277_v33, %v5086_v31  ;;  %v8431_v18 = vld [vmem:[#allocation8 + $0x710] sm:$0xf0] }
 0x801   : > { %v6756_v44 = vmul.f32 0.01, %v6575_v0  ;;  %v12912_v0 = vld [vmem:[#allocation90_spill] sm:$0xff]  ;;  %v8434_v51 = vor.u32 %v8879_v30, %v8431_v18 }
 0x802   : > { %v6254_v6 = vmax.f32 %v6068_v15, 0.0  ;;  %v5744_v28 = vadd.f32 %v12233_v20, %v5415_v63  ;;  %v5089_v33 = vadd.f32 %v12167_v8, %v12912_v0  ;;  %v8872_v20 = vld [vmem:[#allocation8 + $0x6cc] sm:$0xf]  ;;  %v8883_v0 = vld [vmem:[#allocation8 + $0x724] sm:$0xf] }
 0x803   : > { %6932 = vst [vmem:[%s9682_s22 + $0x3d0] sm:$0xff] %v6756_v44  ;;  %5800 = vmatmul.bf16.gmra.mxu3 %v8454_v1 }
 0x804   : > { %v6387_v27 = vsel %vm6295_vm4, %v6254_v6, 0.0  ;;  %v5418_v13 = vadd.f32 %v12290_v45, %v5089_v33  ;;  %v8447_v33 = vld [vmem:[#allocation8 + $0x730] sm:$0xf0] }
 0x805   : > { %6604 = vadd.xlane.f32.xlu1 %v6387_v27  ;;  %5461 = vmatmul.bf16.gmra.mxu2 %v8418_v41  ;;  %v8909_v27 = vld [vmem:[#allocation8 + $0x7ec] sm:$0xf0] }
 0x806   : > { %v12320_v21 = vpop.f32.mrf.mxu3  ;;  %v8542_v8 = vor.u32 %v8909_v27, %v8541_v9  ;;  %v5747_v1 = vadd.f32 %v12244_v39, %v5418_v13 }
 0x807   : > { %v6070_v53 = vpop.f32.mrf.mxu1 }
 0x808   : > { %v6071_v50 = vadd.f32 %v6070_v53, %v5742_v61  ;;  %v6577_v49 = vpop.xlane.xlu2 %6576  ;;  %v12316_v24 = vpop.f32.mrf.mxu2  ;;  %v8469_v61 = vld [vmem:[#allocation8 + $0x748] sm:$0xf] }
 0x809   : > { %v6757_v14 = vmul.f32 0.01, %v6577_v49  ;;  %5167 = vmatmul.bf16.gmra.mxu0 %v8526_v58  ;;  %v8407_v58 = vld [vmem:[#allocation8 + $0x6d8] sm:$0xf0] }
 0x80a   : > { %v6255_v59 = vmax.f32 %v6071_v50, 0.0  ;;  %6109 = vmatmul.bf16.gmra.mxu1 %v8394_v46  ;;  %v8890_v46 = vld [vmem:[#allocation8 + $0x754] sm:$0xf0]  ;;  %v8410_v45 = vor.u32 %v8872_v20, %v8407_v58  ;;  %v12913_v50 = vld [vmem:[#allocation91_spill] sm:$0xff]  ;;  %v8876_v20 = vld [vmem:[#allocation8 + $0x6ec] sm:$0xf] }
 0x80b   : > { %6933 = vst [vmem:[%s9682_s22 + $0x3d8] sm:$0xff] %v6757_v14  ;;  %v8470_v53 = vor.u32 %v8890_v46, %v8469_v61  ;;  %v5091_v49 = vadd.f32 %v12185_v25, %v12913_v50  ;;  %v8423_v58 = vld [vmem:[#allocation8 + $0x6f8] sm:$0xf0] }
 0x80c   : > { %v6388_v7 = vsel %vm6295_vm4, %v6255_v59, 0.0 }
 0x80d   : > { %6606 = vadd.xlane.f32.xlu2 %v6388_v7  ;;  %v12340_v7 = vpop.f32.mrf.mxu0  ;;  %v5420_v30 = vadd.f32 %v12303_v4, %v5091_v49 }
 0x80e   : > { %v12333_v2 = vpop.f32.mrf.mxu3 }
 0x80f   : > { %v6072_v15 = vpop.f32.mrf.mxu1  ;;  %v5749_v25 = vadd.f32 %v12257_v10, %v5420_v30  ;;  %v8887_v30 = vld [vmem:[#allocation8 + $0x744] sm:$0xf] }
 0x810   : > { %v6073_v44 = vadd.f32 %v6072_v15, %v5744_v28  ;;  %v6579_v41 = vpop.xlane.xlu0 %6578  ;;  %v12329_v48 = vpop.f32.mrf.mxu2 }
 0x811   : > { %v6758_v6 = vmul.f32 0.01, %v6579_v41  ;;  %v5094_v41 = vadd.f32 %v12199_v62, %v11135_v56  ;;  %v8426_v62 = vor.u32 %v8876_v20, %v8423_v58 }
 0x812   : > { %v6256_v38 = vmax.f32 %v6073_v44, 0.0 }
 0x813   : > { %6934 = vst [vmem:[%s9682_s22 + $0x3e0] sm:$0xff] %v6758_v6  ;;  %5805 = vmatmul.bf16.gmra.mxu3 %v8470_v53  ;;  %v5423_v9 = vadd.f32 %v12316_v24, %v5094_v41  ;;  %v12914_v24 = vld [vmem:[#allocation92_spill] sm:$0xff] }
 0x814   : > { %v6389_v54 = vsel %vm6295_vm4, %v6256_v38, 0.0  ;;  %v8450_v38 = vor.u32 %v8883_v0, %v8447_v33 }
 0x815   : > { %6608 = vadd.xlane.f32.xlu0 %v6389_v54  ;;  %5466 = vmatmul.bf16.gmra.mxu2 %v8434_v51  ;;  %v8485_v54 = vld [vmem:[#allocation8 + $0x768] sm:$0xf]  ;;  %v5752_v56 = vadd.f32 %v12270_v55, %v5423_v9  ;;  %v8439_v9 = vld [vmem:[#allocation8 + $0x718] sm:$0xf0] }
 0x816   : > { %v12346_v15 = vpop.f32.mrf.mxu3 }
 0x817   : > { %v6075_v31 = vpop.f32.mrf.mxu1 }
 0x818   : > { %v6076_v14 = vadd.f32 %v6075_v31, %v5747_v1  ;;  %v6581_v63 = vpop.xlane.xlu1 %6580  ;;  %v5427_v59 = vpop.f32.mrf.mxu2 }
 0x819   : > { %v6759_v28 = vmul.f32 0.01, %v6581_v63  ;;  %5172 = vmatmul.bf16.gmra.mxu0 %v8542_v8  ;;  %v8894_v8 = vld [vmem:[#allocation8 + $0x774] sm:$0xf0] }
 0x81a   : > { %v6257_v18 = vmax.f32 %v6076_v14, 0.0  ;;  %6114 = vmatmul.bf16.gmra.mxu1 %v8410_v45  ;;  %v8486_v61 = vor.u32 %v8894_v8, %v8485_v54  ;;  %v5096_v45 = vadd.f32 %v12216_v57, %v12914_v24  ;;  %v12916_v8 = vld [vmem:[#allocation95_spill] sm:$0xff] }
 0x81b   : > { %6935 = vst [vmem:[%s9682_s22 + $0x3e8] sm:$0xff] %v6759_v28 }
 0x81c   : > { %v6390_v39 = vsel %vm6295_vm4, %v6257_v18, 0.0  ;;  %v5425_v14 = vadd.f32 %v12329_v48, %v5096_v45  ;;  %v8463_v18 = vld [vmem:[#allocation8 + $0x750] sm:$0xf0] }
 0x81d   : > { %6610 = vadd.xlane.f32.xlu1 %v6390_v39  ;;  %v12915_v39 = vld [vmem:[#allocation93_spill] sm:$0xff]  ;;  %v8466_v41 = vor.u32 %v8887_v30, %v8463_v18 }
 0x81e   : > { %v12356_v1 = vpop.f32.mrf.mxu3  ;;  %v5754_v28 = vadd.f32 %v12283_v19, %v5425_v14  ;;  %v12383_v14 = vpop.f32.mrf.mxu0 }
 0x81f   : > { %v6077_v44 = vpop.f32.mrf.mxu1 }
 0x820   : > { %v6078_v6 = vadd.f32 %v6077_v44, %v5749_v25  ;;  %v6583_v4 = vpop.xlane.xlu2 %6582  ;;  %v5429_v51 = vpop.f32.mrf.mxu2  ;;  %v5099_v25 = vadd.f32 %v12230_v3, %v12915_v39  ;;  %v8501_v3 = vld [vmem:[#allocation8 + $0x788] sm:$0xf] }
 0x821   : > { %v6760_v13 = vmul.f32 0.01, %v6583_v4 }
 0x822   : > { %v6258_v27 = vmax.f32 %v6078_v6, 0.0  ;;  %v5428_v4 = vadd.f32 %v5427_v59, %v5099_v25  ;;  %v5101_v59 = vadd.f32 %v12248_v36, %v12916_v8  ;;  %v8479_v36 = vld [vmem:[#allocation8 + $0x770] sm:$0xf0] }
 0x823   : > { %6936 = vst [vmem:[%s9682_s22 + $0x3f0] sm:$0xff] %v6760_v13  ;;  %5810 = vmatmul.bf16.gmra.mxu3 %v8486_v61 }
 0x824   : > { %v6391_v10 = vsel %vm6295_vm4, %v6258_v27, 0.0  ;;  %v8898_v27 = vld [vmem:[#allocation8 + $0x794] sm:$0xf0]  ;;  %v5757_v20 = vadd.f32 %v12296_v23, %v5428_v4  ;;  %v5430_v24 = vadd.f32 %v5429_v51, %v5101_v59  ;;  %v8517_v4 = vld [vmem:[#allocation8 + $0x7a8] sm:$0xf] }
 0x825   : > { %6612 = vadd.xlane.f32.xlu2 %v6391_v10  ;;  %5471 = vmatmul.bf16.gmra.mxu2 %v8450_v38  ;;  %v8880_v38 = vld [vmem:[#allocation8 + $0x70c] sm:$0xf]  ;;  %v8502_v10 = vor.u32 %v8898_v27, %v8501_v3 }
 0x826   : > { %v12369_v6 = vpop.f32.mrf.mxu3  ;;  %v8442_v58 = vor.u32 %v8880_v38, %v8439_v9 }
 0x827   : > { %v6080_v46 = vpop.f32.mrf.mxu1 }
 0x828   : > { %v6081_v53 = vadd.f32 %v6080_v46, %v5752_v56  ;;  %v6585_v31 = vpop.xlane.xlu0 %6584  ;;  %v5432_v50 = vpop.f32.mrf.mxu2 }
 0x829   : > { %v6761_v49 = vmul.f32 0.01, %v6585_v31  ;;  %v5759_v31 = vadd.f32 %v12307_v16, %v5430_v24 }
 0x82a   : > { %v6259_v63 = vmax.f32 %v6081_v53, 0.0  ;;  %6119 = vmatmul.bf16.gmra.mxu1 %v8426_v62 }
 0x82b   : > { %6937 = vst [vmem:[%s9682_s22 + $0x3f8] sm:$0xff] %v6761_v49  ;;  %v8891_v49 = vld [vmem:[#allocation8 + $0x764] sm:$0xf] }
 0x82c   : > { %v6392_v55 = vsel %vm6295_vm4, %v6259_v63, 0.0  ;;  %v8482_v39 = vor.u32 %v8891_v49, %v8479_v36 }
 0x82d   : > { %6614 = vadd.xlane.f32.xlu0 %v6392_v55  ;;  %v12917_v55 = vld [vmem:[#allocation94_spill] sm:$0xff] }
 0x82e   : > { %v12378_v53 = vpop.f32.mrf.mxu3  ;;  %v5104_v51 = vadd.f32 %v12262_v29, %v12917_v55  ;;  %v8902_v29 = vld [vmem:[#allocation8 + $0x7b4] sm:$0xf0]  ;;  %v8471_v55 = vld [vmem:[#allocation8 + $0x758] sm:$0xf0] }
 0x82f   : > { %v6082_v57 = vpop.f32.mrf.mxu1  ;;  %v8518_v9 = vor.u32 %v8902_v29, %v8517_v4 }
 0x830   : > { %v6083_v0 = vadd.f32 %v6082_v57, %v5754_v28  ;;  %v6587_v33 = vpop.xlane.xlu1 %6586  ;;  %v12367_v44 = vpop.f32.mrf.mxu2  ;;  %v5433_v25 = vadd.f32 %v5432_v50, %v5104_v51  ;;  %v5106_v50 = vadd.f32 %v12279_v43, %v11160_v22  ;;  %v8895_v22 = vld [vmem:[#allocation8 + $0x784] sm:$0xf]  ;;  %v8495_v43 = vld [vmem:[#allocation8 + $0x790] sm:$0xf0] }
 0x831   : > { %v6762_v48 = vmul.f32 0.01, %v6587_v33  ;;  %v8884_v33 = vld [vmem:[#allocation8 + $0x72c] sm:$0xf] }
 0x832   : > { %v6260_v13 = vmax.f32 %v6083_v0, 0.0 }
 0x833   : > { %6938 = vst [vmem:[%s9682_s22 + $0x400] sm:$0xff] %v6762_v48  ;;  %5815 = vmatmul.bf16.gmra.mxu3 %v8502_v10  ;;  %v8455_v48 = vld [vmem:[#allocation8 + $0x738] sm:$0xf0] }
 0x834   : > { %v6393_v19 = vsel %vm6295_vm4, %v6260_v13, 0.0  ;;  %v5762_v13 = vadd.f32 %v12320_v21, %v5433_v25  ;;  %v8458_v38 = vor.u32 %v8884_v33, %v8455_v48 }
 0x835   : > { %6616 = vadd.xlane.f32.xlu1 %v6393_v19  ;;  %5476 = vmatmul.bf16.gmra.mxu2 %v8466_v41 }
 0x836   : > { %v12392_v41 = vpop.f32.mrf.mxu3 }
 0x837   : > { %v6085_v54 = vpop.f32.mrf.mxu1 }
 0x838   : > { %v6086_v56 = vadd.f32 %v6085_v54, %v5757_v20  ;;  %v6589_v62 = vpop.xlane.xlu2 %6588  ;;  %v5437_v61 = vpop.f32.mrf.mxu2  ;;  %v5435_v54 = vadd.f32 %v12367_v44, %v5106_v50 }
 0x839   : > { %v6763_v46 = vmul.f32 0.01, %v6589_v62 }
 0x83a   : > { %v6261_v45 = vmax.f32 %v6086_v56, 0.0  ;;  %6124 = vmatmul.bf16.gmra.mxu1 %v8442_v58  ;;  %v12397_v58 = vpop.f32.mrf.mxu0  ;;  %v5764_v59 = vadd.f32 %v12333_v2, %v5435_v54  ;;  %v8888_v2 = vld [vmem:[#allocation8 + $0x74c] sm:$0xf] }
 0x83b   : > { %6939 = vst [vmem:[%s9682_s22 + $0x408] sm:$0xff] %v6763_v46  ;;  %v5109_v46 = vadd.f32 %v12293_v40, %v11176_v11  ;;  %v8906_v11 = vld [vmem:[#allocation8 + $0x7d4] sm:$0xf0] }
 0x83c   : > { %v6394_v23 = vsel %vm6295_vm4, %v6261_v45, 0.0 }
 0x83d   : > { %6618 = vadd.xlane.f32.xlu2 %v6394_v23  ;;  %v5438_v49 = vadd.f32 %v5437_v61, %v5109_v46  ;;  %v12918_v61 = vld [vmem:[#allocation96_spill] sm:$0xff] }
 0x83e   : > { %v12404_v62 = vpop.f32.mrf.mxu3  ;;  %v5111_v25 = vadd.f32 %v12311_v32, %v12918_v61  ;;  %v12920_v61 = vld [vmem:[#allocation98_spill] sm:$0xff] }
 0x83f   : > { %v6087_v63 = vpop.f32.mrf.mxu1  ;;  %v5767_v40 = vadd.f32 %v12346_v15, %v5438_v49 }
 0x840   : > { %v6088_v28 = vadd.f32 %v6087_v63, %v5759_v31  ;;  %v6591_v30 = vpop.xlane.xlu0 %6590  ;;  %v12387_v18 = vpop.f32.mrf.mxu2  ;;  %v8498_v31 = vor.u32 %v8895_v22, %v8495_v43  ;;  %v8892_v43 = vld [vmem:[#allocation8 + $0x76c] sm:$0xf] }
 0x841   : > { %v6764_v57 = vmul.f32 0.01, %v6591_v30  ;;  %v8474_v30 = vor.u32 %v8888_v2, %v8471_v55  ;;  %v5440_v29 = vadd.f32 %v12387_v18, %v5111_v25  ;;  %v5119_v25 = vadd.f32 %v12383_v14, %v12920_v61 }
 0x842   : > { %v6262_v0 = vmax.f32 %v6088_v28, 0.0  ;;  %v12410_v63 = vpop.f32.mrf.mxu0  ;;  %v8533_v28 = vld [vmem:[#allocation8 + $0x7c8] sm:$0xf] }
 0x843   : > { %6940 = vst [vmem:[%s9682_s22 + $0x410] sm:$0xff] %v6764_v57  ;;  %5820 = vmatmul.bf16.gmra.mxu3 %v8518_v9  ;;  %v8534_v57 = vor.u32 %v8906_v11, %v8533_v28  ;;  %v5769_v32 = vadd.f32 %v12356_v1, %v5440_v29  ;;  %v8899_v9 = vld [vmem:[#allocation8 + $0x7a4] sm:$0xf] }
 0x844   : > { %v6395_v16 = vsel %vm6295_vm4, %v6262_v0, 0.0 }
 0x845   : > { %6620 = vadd.xlane.f32.xlu0 %v6395_v16  ;;  %5481 = vmatmul.bf16.gmra.mxu2 %v8482_v39 }
 0x846   : > { %v12418_v4 = vpop.f32.mrf.mxu3 }
 0x847   : > { %v6090_v19 = vpop.f32.mrf.mxu1 }
 0x848   : > { %v6091_v3 = vadd.f32 %v6090_v19, %v5762_v13  ;;  %v6593_v27 = vpop.xlane.xlu1 %6592  ;;  %v5442_v20 = vpop.f32.mrf.mxu2  ;;  %v8511_v19 = vld [vmem:[#allocation8 + $0x7b0] sm:$0xf0] }
 0x849   : > { %v6765_v10 = vmul.f32 0.01, %v6593_v27 }
 0x84a   : > { %v6263_v8 = vmax.f32 %v6091_v3, 0.0  ;;  %6129 = vmatmul.bf16.gmra.mxu1 %v8458_v38  ;;  %v12424_v38 = vpop.f32.mrf.mxu0  ;;  %v12919_v3 = vld [vmem:[#allocation97_spill] sm:$0xff] }
 0x84b   : > { %6941 = vst [vmem:[%s9682_s22 + $0x418] sm:$0xff] %v6765_v10  ;;  %v5114_v27 = vadd.f32 %v12325_v47, %v12919_v3  ;;  %v8910_v47 = vld [vmem:[#allocation8 + $0x7f4] sm:$0xf0] }
 0x84c   : > { %v6396_v21 = vsel %vm6295_vm4, %v6263_v8, 0.0 }
 0x84d   : > { %6622 = vadd.xlane.f32.xlu1 %v6396_v21  ;;  %v8514_v21 = vor.u32 %v8899_v9, %v8511_v19  ;;  %v8896_v9 = vld [vmem:[#allocation8 + $0x78c] sm:$0xf]  ;;  %v8503_v19 = vld [vmem:[#allocation8 + $0x798] sm:$0xf0] }
 0x84e   : > { %v12430_v46 = vpop.f32.mrf.mxu3 }
 0x84f   : > { %v6092_v56 = vpop.f32.mrf.mxu1 }
 0x850   : > { %v6093_v24 = vadd.f32 %v6092_v56, %v5764_v59  ;;  %v6595_v44 = vpop.xlane.xlu2 %6594  ;;  %v12408_v45 = vpop.f32.mrf.mxu2  ;;  %v5443_v59 = vadd.f32 %v5442_v20, %v5114_v27  ;;  %v8487_v56 = vld [vmem:[#allocation8 + $0x778] sm:$0xf0] }
 0x851   : > { %v6766_v23 = vmul.f32 0.01, %v6595_v44 }
 0x852   : > { %v6264_v36 = vmax.f32 %v6093_v24, 0.0  ;;  %v8549_v24 = vld [vmem:[#allocation8 + $0x7e8] sm:$0xf]  ;;  %v5772_v44 = vadd.f32 %v12369_v6, %v5443_v59  ;;  %v12435_v49 = vpop.f32.mrf.mxu0 }
 0x853   : > { %6942 = vst [vmem:[%s9682_s22 + $0x420] sm:$0xff] %v6766_v23  ;;  %5825 = vmatmul.bf16.gmra.mxu3 %v8534_v57  ;;  %v8490_v23 = vor.u32 %v8892_v43, %v8487_v56 }
 0x854   : > { %v6397_v51 = vsel %vm6295_vm4, %v6264_v36, 0.0  ;;  %v5116_v36 = vadd.f32 %v12340_v7, %v11197_v12  ;;  %v8903_v12 = vld [vmem:[#allocation8 + $0x7c4] sm:$0xf]  ;;  %v8527_v7 = vld [vmem:[#allocation8 + $0x7d0] sm:$0xf0] }
 0x855   : > { %6624 = vadd.xlane.f32.xlu2 %v6397_v51  ;;  %5486 = vmatmul.bf16.gmra.mxu2 %v8498_v31  ;;  %v8550_v31 = vor.u32 %v8910_v47, %v8549_v24  ;;  %v8543_v24 = vld [vmem:[#allocation8 + $0x7f0] sm:$0xf0] }
 0x856   : > { %v5445_v11 = vadd.f32 %v12408_v45, %v5116_v36 }
 0x857   : > { %v6095_v39 = vpop.f32.mrf.mxu1 }
 0x858   : > { %v6096_v0 = vadd.f32 %v6095_v39, %v5767_v40  ;;  %v6597_v33 = vpop.xlane.xlu0 %6596  ;;  %v5447_v48 = vpop.f32.mrf.mxu2  ;;  %v5774_v57 = vadd.f32 %v12378_v53, %v5445_v11  ;;  %v8519_v11 = vld [vmem:[#allocation8 + $0x7b8] sm:$0xf0] }
 0x859   : > { %v6767_v16 = vmul.f32 0.01, %v6597_v33 }
 0x85a   : > { %v6265_v13 = vmax.f32 %v6096_v0, 0.0  ;;  %6134 = vmatmul.bf16.gmra.mxu1 %v8474_v30  ;;  %v12443_v30 = vpop.f32.mrf.mxu3 }
 0x85b   : > { %6943 = vst [vmem:[%s9682_s22 + $0x428] sm:$0xff] %v6767_v16  ;;  %v12448_v16 = vpop.f32.mrf.mxu0 }
 0x85c   : > { %v6398_v15 = vsel %vm6295_vm4, %v6265_v13, 0.0  ;;  %v8530_v13 = vor.u32 %v8903_v12, %v8527_v7  ;;  %v12922_v12 = vld [vmem:[#allocation99_spill] sm:$0xff] }
 0x85d   : > { %6626 = vadd.xlane.f32.xlu0 %v6398_v15  ;;  %v5448_v15 = vadd.f32 %v5447_v48, %v5119_v25  ;;  %v5126_v7 = vadd.f32 %v12424_v38, %v12922_v12 }
 0x85f   : > { %v6097_v50 = vpop.f32.mrf.mxu1  ;;  %v5777_v14 = vadd.f32 %v12392_v41, %v5448_v15 }
 0x860   : > { %v6098_v10 = vadd.f32 %v6097_v50, %v5769_v32  ;;  %v6599_v18 = vpop.xlane.xlu1 %6598  ;;  %v5449_v54 = vpop.f32.mrf.mxu2  ;;  %v8506_v50 = vor.u32 %v8896_v9, %v8503_v19 }
 0x861   : > { %v6768_v8 = vmul.f32 0.01, %v6599_v18 }
 0x862   : > { %v6266_v22 = vmax.f32 %v6098_v10, 0.0  ;;  %v12454_v27 = vpop.f32.mrf.mxu3  ;;  %v5121_v10 = vadd.f32 %v12397_v58, %v11203_v37  ;;  %v12921_v58 = vld [vmem:[#allocation100_spill] sm:$0xff] }
 0x863   : > { %6944 = vst [vmem:[%s9682_s22 + $0x430] sm:$0xff] %v6768_v8  ;;  %5830 = vmatmul.bf16.gmra.mxu3 %v8550_v31  ;;  %v12458_v43 = vpop.f32.mrf.mxu0  ;;  %v5124_v47 = vadd.f32 %v12410_v63, %v12921_v58 }
 0x864   : > { %v6399_v1 = vsel %vm6295_vm4, %v6266_v22, 0.0  ;;  %v5450_v59 = vadd.f32 %v5449_v54, %v5121_v10  ;;  %v8904_v10 = vld [vmem:[#allocation8 + $0x7cc] sm:$0xf] }
 0x865   : > { %6628 = vadd.xlane.f32.xlu1 %v6399_v1  ;;  %5491 = vmatmul.bf16.gmra.mxu2 %v8514_v21  ;;  %v8907_v1 = vld [vmem:[#allocation8 + $0x7e4] sm:$0xf] }
 0x866   : > { %v5779_v56 = vadd.f32 %v12404_v62, %v5450_v59 }
 0x867   : > { %v6100_v20 = vpop.f32.mrf.mxu1 }
 0x868   : > { %v6101_v2 = vadd.f32 %v6100_v20, %v5772_v44  ;;  %v6601_v55 = vpop.xlane.xlu2 %6600  ;;  %v5452_v51 = vpop.f32.mrf.mxu2  ;;  %v8546_v20 = vor.u32 %v8907_v1, %v8543_v24 }
 0x869   : > { %v6769_v28 = vmul.f32 0.01, %v6601_v55 }
 0x86a   : > { %v6267_v40 = vmax.f32 %v6101_v2, 0.0  ;;  %6139 = vmatmul.bf16.gmra.mxu1 %v8490_v23  ;;  %v12466_v36 = vpop.f32.mrf.mxu3  ;;  %v5453_v2 = vadd.f32 %v5452_v51, %v5124_v47 }
 0x86b   : > { %6945 = vst [vmem:[%s9682_s22 + $0x438] sm:$0xff] %v6769_v28  ;;  %v8900_v28 = vld [vmem:[#allocation8 + $0x7ac] sm:$0xf] }
 0x86c   : > { %v6400_v6 = vsel %vm6295_vm4, %v6267_v40, 0.0  ;;  %v12471_v40 = vpop.f32.mrf.mxu0  ;;  %v5782_v63 = vadd.f32 %v12418_v4, %v5453_v2 }
 0x86d   : > { %6630 = vadd.xlane.f32.xlu2 %v6400_v6  ;;  %v8522_v6 = vor.u32 %v8900_v28, %v8519_v11  ;;  %v8908_v11 = vld [vmem:[#allocation8 + $0x7ec] sm:$0xf] }
 0x86f   : > { %v6102_v39 = vpop.f32.mrf.mxu1 }
 0x870   : > { %v6103_v0 = vadd.f32 %v6102_v39, %v5774_v57  ;;  %v6603_v45 = vpop.xlane.xlu0 %6602  ;;  %v5454_v33 = vpop.f32.mrf.mxu2 }
 0x871   : > { %v6770_v29 = vmul.f32 0.01, %v6603_v45 }
 0x872   : > { %v6268_v32 = vmax.f32 %v6103_v0, 0.0  ;;  %v5455_v0 = vadd.f32 %v5454_v33, %v5126_v7 }
 0x873   : > { %6946 = vst [vmem:[%s9682_s22 + $0x440] sm:$0xff] %v6770_v29  ;;  %v12477_v29 = vpop.f32.mrf.mxu3 }
 0x874   : > { %v6401_v53 = vsel %vm6295_vm4, %v6268_v32, 0.0  ;;  %v5784_v4 = vadd.f32 %v12430_v46, %v5455_v0  ;;  %v12482_v15 = vpop.f32.mrf.mxu0  ;;  %v12923_v32 = vld [vmem:[#allocation101_spill] sm:$0xff] }
 0x875   : > { %6632 = vadd.xlane.f32.xlu0 %v6401_v53  ;;  %5496 = vmatmul.bf16.gmra.mxu2 %v8530_v13  ;;  %v5129_v9 = vadd.f32 %v12435_v49, %v12923_v32  ;;  %v5131_v49 = vadd.f32 %v12448_v16, %v11238_v17  ;;  %v5134_v17 = vadd.f32 %v12458_v43, %v11228_v52  ;;  %v12924_v52 = vld [vmem:[#allocation102_spill] sm:$0xff] }
 0x876   : > { %v5136_v43 = vadd.f32 %v12471_v40, %v12924_v52  ;;  %v5139_v40 = vadd.f32 %v12482_v15, %v11260_v42  ;;  %v12926_v52 = vld [vmem:[#allocation104_spill] sm:$0xff] }
 0x877   : > { %v6105_v3 = vpop.f32.mrf.mxu1 }
 0x878   : > { %v6106_v48 = vadd.f32 %v6105_v3, %v5777_v14  ;;  %v6605_v18 = vpop.xlane.xlu1 %6604  ;;  %v5457_v8 = vpop.f32.mrf.mxu2 }
 0x879   : > { %v6771_v21 = vmul.f32 0.01, %v6605_v18 }
 0x87a   : > { %v6269_v22 = vmax.f32 %v6106_v48, 0.0  ;;  %6144 = vmatmul.bf16.gmra.mxu1 %v8506_v50  ;;  %v5458_v50 = vadd.f32 %v5457_v8, %v5129_v9  ;;  %v8535_v48 = vld [vmem:[#allocation8 + $0x7d8] sm:$0xf0] }
 0x87b   : > { %6947 = vst [vmem:[%s9682_s22 + $0x448] sm:$0xff] %v6771_v21  ;;  %v5796_v46 = vpop.f32.mrf.mxu3  ;;  %v8538_v59 = vor.u32 %v8904_v10, %v8535_v48  ;;  %v12925_v48 = vld [vmem:[#allocation103_spill] sm:$0xff] }
 0x87c   : > { %v6402_v41 = vsel %vm6295_vm4, %v6269_v22, 0.0  ;;  %v5787_v21 = vadd.f32 %v12443_v30, %v5458_v50  ;;  %v5140_v1 = vpop.f32.mrf.mxu0 }
 0x87d   : > { %6634 = vadd.xlane.f32.xlu1 %v6402_v41 }
 0x87f   : > { %v6107_v37 = vpop.f32.mrf.mxu1 }
 0x880   : > { %v6108_v44 = vadd.f32 %v6107_v37, %v5779_v56  ;;  %v6607_v54 = vpop.xlane.xlu2 %6606  ;;  %v5459_v23 = vpop.f32.mrf.mxu2 }
 0x881   : > { %v6772_v31 = vmul.f32 0.01, %v6607_v54  ;;  %v5460_v37 = vadd.f32 %v5459_v23, %v5131_v49 }
 0x882   : > { %v6270_v55 = vmax.f32 %v6108_v44, 0.0 }
 0x883   : > { %6948 = vst [vmem:[%s9682_s22 + $0x450] sm:$0xff] %v6772_v31  ;;  %v5789_v30 = vadd.f32 %v12454_v27, %v5460_v37  ;;  %v5798_v54 = vpop.f32.mrf.mxu3 }
 0x884   : > { %v6403_v62 = vsel %vm6295_vm4, %v6270_v55, 0.0  ;;  %v5143_v28 = vpop.f32.mrf.mxu0 }
 0x885   : > { %6636 = vadd.xlane.f32.xlu2 %v6403_v62  ;;  %5501 = vmatmul.bf16.gmra.mxu2 %v8546_v20  ;;  %v8551_v62 = vld [vmem:[#allocation8 + $0x7f8] sm:$0xf0] }
 0x887   : > { %v6110_v57 = vpop.f32.mrf.mxu1 }
 0x888   : > { %v6111_v51 = vadd.f32 %v6110_v57, %v5782_v63  ;;  %v6609_v39 = vpop.xlane.xlu0 %6608  ;;  %v5462_v61 = vpop.f32.mrf.mxu2 }
 0x889   : > { %v6773_v25 = vmul.f32 0.01, %v6609_v39  ;;  %v5463_v23 = vadd.f32 %v5462_v61, %v5134_v17 }
 0x88a   : > { %v6271_v45 = vmax.f32 %v6111_v51, 0.0  ;;  %6149 = vmatmul.bf16.gmra.mxu1 %v8522_v6  ;;  %v8554_v6 = vor.u32 %v8908_v11, %v8551_v62 }
 0x88b   : > { %6949 = vst [vmem:[%s9682_s22 + $0x458] sm:$0xff] %v6773_v25  ;;  %v5792_v27 = vadd.f32 %v12466_v36, %v5463_v23  ;;  %v5801_v61 = vpop.f32.mrf.mxu3 }
 0x88c   : > { %v6404_v13 = vsel %vm6295_vm4, %v6271_v45, 0.0 }
 0x88d   : > { %6638 = vadd.xlane.f32.xlu0 %v6404_v13  ;;  %v5145_v13 = vpop.f32.mrf.mxu0 }
 0x88f   : > { %v6112_v38 = vpop.f32.mrf.mxu1 }
 0x890   : > { %v6113_v19 = vadd.f32 %v6112_v38, %v5784_v4  ;;  %v6611_v33 = vpop.xlane.xlu1 %6610  ;;  %v5464_v53 = vpop.f32.mrf.mxu2 }
 0x891   : > { %v6774_v14 = vmul.f32 0.01, %v6611_v33  ;;  %v5465_v25 = vadd.f32 %v5464_v53, %v5136_v43 }
 0x892   : > { %v6272_v3 = vmax.f32 %v6113_v19, 0.0 }
 0x893   : > { %6950 = vst [vmem:[%s9682_s22 + $0x460] sm:$0xff] %v6774_v14  ;;  %v5794_v36 = vadd.f32 %v12477_v29, %v5465_v25  ;;  %v5803_v14 = vpop.f32.mrf.mxu3 }
 0x894   : > { %v6405_v18 = vsel %vm6295_vm4, %v6272_v3, 0.0 }
 0x895   : > { %6640 = vadd.xlane.f32.xlu1 %v6405_v18  ;;  %v5148_v10 = vpop.f32.mrf.mxu0  ;;  %v5141_v18 = vadd.f32 %v5140_v1, %v12925_v48 }
 0x896   : > { %v5149_v43 = vadd.f32 %v5148_v10, %v12926_v52 }
 0x897   : > { %v6115_v22 = vpop.f32.mrf.mxu1 }
 0x898   : > { %v6116_v41 = vadd.f32 %v6115_v22, %v5787_v21  ;;  %v6613_v56 = vpop.xlane.xlu2 %6612  ;;  %v5467_v8 = vpop.f32.mrf.mxu2 }
 0x899   : > { %v6775_v24 = vmul.f32 0.01, %v6613_v56  ;;  %v5468_v33 = vadd.f32 %v5467_v8, %v5139_v40 }
 0x89a   : > { %v6273_v58 = vmax.f32 %v6116_v41, 0.0  ;;  %6154 = vmatmul.bf16.gmra.mxu1 %v8538_v59 }
 0x89b   : > { %6951 = vst [vmem:[%s9682_s22 + $0x468] sm:$0xff] %v6775_v24  ;;  %v5797_v3 = vadd.f32 %v5796_v46, %v5468_v33  ;;  %v5806_v56 = vpop.f32.mrf.mxu3  ;;  %v5144_v46 = vadd.f32 %v5143_v28, %v11265_v26 }
 0x89c   : > { %v6406_v47 = vsel %vm6295_vm4, %v6273_v58, 0.0 }
 0x89d   : > { %6642 = vadd.xlane.f32.xlu2 %v6406_v47  ;;  %v5150_v1 = vpop.f32.mrf.mxu0 }
 0x89f   : > { %v6117_v44 = vpop.f32.mrf.mxu1 }
 0x8a0   : > { %v6118_v16 = vadd.f32 %v6117_v44, %v5789_v30  ;;  %v6615_v31 = vpop.xlane.xlu0 %6614  ;;  %v5469_v20 = vpop.f32.mrf.mxu2 }
 0x8a1   : > { %v6776_v2 = vmul.f32 0.01, %v6615_v31  ;;  %v5470_v22 = vadd.f32 %v5469_v20, %v5141_v18 }
 0x8a2   : > { %v6274_v55 = vmax.f32 %v6118_v16, 0.0 }
 0x8a3   : > { %6952 = vst [vmem:[%s9682_s22 + $0x470] sm:$0xff] %v6776_v2  ;;  %v5799_v8 = vadd.f32 %v5798_v54, %v5470_v22  ;;  %v5808_v20 = vpop.f32.mrf.mxu3  ;;  %v5146_v54 = vadd.f32 %v5145_v13, %v11281_v34 }
 0x8a4   : > { %v6407_v63 = vsel %vm6295_vm4, %v6274_v55, 0.0 }
 0x8a5   : > { %6644 = vadd.xlane.f32.xlu0 %v6407_v63  ;;  %v5153_v62 = vpop.f32.mrf.mxu0 }
 0x8a7   : > { %v6120_v57 = vpop.f32.mrf.mxu1 }
 0x8a8   : > { %v6121_v12 = vadd.f32 %v6120_v57, %v5792_v27  ;;  %v6617_v7 = vpop.xlane.xlu1 %6616  ;;  %v5472_v51 = vpop.f32.mrf.mxu2 }
 0x8a9   : > { %v6777_v39 = vmul.f32 0.01, %v6617_v7  ;;  %v5473_v30 = vadd.f32 %v5472_v51, %v5144_v46 }
 0x8aa   : > { %v6275_v0 = vmax.f32 %v6121_v12, 0.0  ;;  %6159 = vmatmul.bf16.gmra.mxu1 %v8554_v6 }
 0x8ab   : > { %6953 = vst [vmem:[%s9682_s22 + $0x478] sm:$0xff] %v6777_v39  ;;  %v5802_v31 = vadd.f32 %v5801_v61, %v5473_v30  ;;  %v5811_v34 = vpop.f32.mrf.mxu3 }
 0x8ac   : > { %v6408_v45 = vsel %vm6295_vm4, %v6275_v0, 0.0 }
 0x8ad   : > { %6646 = vadd.xlane.f32.xlu1 %v6408_v45  ;;  %v5155_v0 = vpop.f32.mrf.mxu0 }
 0x8af   : > { %v6122_v4 = vpop.f32.mrf.mxu1 }
 0x8b0   : > { %v6123_v38 = vadd.f32 %v6122_v4, %v5794_v36  ;;  %v6619_v32 = vpop.xlane.xlu2 %6618  ;;  %v5474_v9 = vpop.f32.mrf.mxu2  ;;  %v12927_v4 = vld [vmem:[#allocation105_spill] sm:$0xff] }
 0x8b1   : > { %v6778_v19 = vmul.f32 0.01, %v6619_v32  ;;  %v5475_v28 = vadd.f32 %v5474_v9, %v5146_v54  ;;  %v5151_v40 = vadd.f32 %v5150_v1, %v12927_v4 }
 0x8b2   : > { %v6276_v53 = vmax.f32 %v6123_v38, 0.0 }
 0x8b3   : > { %6954 = vst [vmem:[%s9682_s22 + $0x480] sm:$0xff] %v6778_v19  ;;  %v5804_v6 = vadd.f32 %v5803_v14, %v5475_v28 }
 0x8b4   : > { %v6409_v50 = vsel %vm6295_vm4, %v6276_v53, 0.0  ;;  %v5813_v53 = vpop.f32.mrf.mxu3 }
 0x8b5   : > { %6648 = vadd.xlane.f32.xlu2 %v6409_v50 }
 0x8b7   : > { %v6125_v29 = vpop.f32.mrf.mxu1 }
 0x8b8   : > { %v6126_v21 = vadd.f32 %v6125_v29, %v5797_v3  ;;  %v6621_v42 = vpop.xlane.xlu0 %6620  ;;  %v5477_v59 = vpop.f32.mrf.mxu2  ;;  %v5154_v29 = vadd.f32 %v5153_v62, %v11303_v5 }
 0x8b9   : > { %v6779_v15 = vmul.f32 0.01, %v6621_v42  ;;  %v5478_v39 = vadd.f32 %v5477_v59, %v5149_v43  ;;  %v5158_v3 = vpop.f32.mrf.mxu0 }
 0x8ba   : > { %v6277_v49 = vmax.f32 %v6126_v21, 0.0 }
 0x8bb   : > { %6955 = vst [vmem:[%s9682_s22 + $0x488] sm:$0xff] %v6779_v15  ;;  %v5807_v45 = vadd.f32 %v5806_v56, %v5478_v39 }
 0x8bc   : > { %v6410_v41 = vsel %vm6295_vm4, %v6277_v49, 0.0  ;;  %v5816_v49 = vpop.f32.mrf.mxu3 }
 0x8bd   : > { %6650 = vadd.xlane.f32.xlu0 %v6410_v41 }
 0x8bf   : > { %v6127_v24 = vpop.f32.mrf.mxu1 }
 0x8c0   : > { %v6128_v37 = vadd.f32 %v6127_v24, %v5799_v8  ;;  %v6623_v58 = vpop.xlane.xlu1 %6622  ;;  %v5479_v17 = vpop.f32.mrf.mxu2  ;;  %v12928_v8 = vld [vmem:[#allocation106_spill] sm:$0xff] }
 0x8c1   : > { %v6780_v47 = vmul.f32 0.01, %v6623_v58  ;;  %v5480_v19 = vadd.f32 %v5479_v17, %v5151_v40  ;;  %v5156_v24 = vadd.f32 %v5155_v0, %v12928_v8  ;;  %v5160_v5 = vpop.f32.mrf.mxu0 }
 0x8c2   : > { %v6278_v44 = vmax.f32 %v6128_v37, 0.0 }
 0x8c3   : > { %6956 = vst [vmem:[%s9682_s22 + $0x490] sm:$0xff] %v6780_v47  ;;  %v5809_v50 = vadd.f32 %v5808_v20, %v5480_v19  ;;  %v12929_v20 = vld [vmem:[#allocation107_spill] sm:$0xff] }
 0x8c4   : > { %v6411_v16 = vsel %vm6295_vm4, %v6278_v44, 0.0 }
 0x8c5   : > { %6652 = vadd.xlane.f32.xlu1 %v6411_v16  ;;  %v5818_v16 = vpop.f32.mrf.mxu3 }
 0x8c7   : > { %v6130_v2 = vpop.f32.mrf.mxu1 }
 0x8c8   : > { %v6131_v23 = vadd.f32 %v6130_v2, %v5802_v31  ;;  %v6625_v26 = vpop.xlane.xlu2 %6624  ;;  %v5482_v27 = vpop.f32.mrf.mxu2  ;;  %v5159_v2 = vadd.f32 %v5158_v3, %v12929_v20 }
 0x8c9   : > { %v6781_v55 = vmul.f32 0.01, %v6625_v26  ;;  %v5483_v15 = vadd.f32 %v5482_v27, %v5154_v29 }
 0x8ca   : > { %v6279_v11 = vmax.f32 %v6131_v23, 0.0 }
 0x8cb   : > { %6957 = vst [vmem:[%s9682_s22 + $0x498] sm:$0xff] %v6781_v55  ;;  %v5812_v41 = vadd.f32 %v5811_v34, %v5483_v15 }
 0x8cc   : > { %v6412_v63 = vsel %vm6295_vm4, %v6279_v11, 0.0  ;;  %v5163_v11 = vpop.f32.mrf.mxu0 }
 0x8cd   : > { %6654 = vadd.xlane.f32.xlu2 %v6412_v63 }
 0x8cf   : > { %v6132_v57 = vpop.f32.mrf.mxu1 }
 0x8d0   : > { %v6133_v12 = vadd.f32 %v6132_v57, %v5804_v6  ;;  %v6627_v7 = vpop.xlane.xlu0 %6626  ;;  %v5484_v13 = vpop.f32.mrf.mxu2  ;;  %v12930_v57 = vld [vmem:[#allocation109_spill] sm:$0xff] }
 0x8d1   : > { %v6782_v51 = vmul.f32 0.01, %v6627_v7  ;;  %v5485_v1 = vadd.f32 %v5484_v13, %v5156_v24  ;;  %v5161_v52 = vadd.f32 %v5160_v5, %v12930_v57  ;;  %v5821_v7 = vpop.f32.mrf.mxu3 }
 0x8d2   : > { %v6280_v61 = vmax.f32 %v6133_v12, 0.0 }
 0x8d3   : > { %6958 = vst [vmem:[%s9682_s22 + $0x4a0] sm:$0xff] %v6782_v51  ;;  %v5814_v17 = vadd.f32 %v5813_v53, %v5485_v1 }
 0x8d4   : > { %v6413_v25 = vsel %vm6295_vm4, %v6280_v61, 0.0 }
 0x8d5   : > { %6656 = vadd.xlane.f32.xlu0 %v6413_v25  ;;  %v5165_v25 = vpop.f32.mrf.mxu0 }
 0x8d7   : > { %v6135_v36 = vpop.f32.mrf.mxu1 }
 0x8d8   : > { %v6136_v38 = vadd.f32 %v6135_v36, %v5807_v45  ;;  %v6629_v32 = vpop.xlane.xlu1 %6628  ;;  %v5487_v21 = vpop.f32.mrf.mxu2  ;;  %v12931_v36 = vld [vmem:[#allocation108_spill] sm:$0xff] }
 0x8d9   : > { %v6783_v9 = vmul.f32 0.01, %v6629_v32  ;;  %v5488_v55 = vadd.f32 %v5487_v21, %v5159_v2  ;;  %v5164_v4 = vadd.f32 %v5163_v11, %v12931_v36 }
 0x8da   : > { %v6281_v33 = vmax.f32 %v6136_v38, 0.0 }
 0x8db   : > { %6959 = vst [vmem:[%s9682_s22 + $0x4a8] sm:$0xff] %v6783_v9  ;;  %v5817_v27 = vadd.f32 %v5816_v49, %v5488_v55 }
 0x8dc   : > { %v6414_v14 = vsel %vm6295_vm4, %v6281_v33, 0.0  ;;  %v5823_v33 = vpop.f32.mrf.mxu3 }
 0x8dd   : > { %6658 = vadd.xlane.f32.xlu1 %v6414_v14 }
 0x8df   : > { %v6137_v10 = vpop.f32.mrf.mxu1 }
 0x8e0   : > { %v6138_v48 = vadd.f32 %v6137_v10, %v5809_v50  ;;  %v6631_v18 = vpop.xlane.xlu2 %6630  ;;  %v5489_v30 = vpop.f32.mrf.mxu2  ;;  %v5166_v10 = vadd.f32 %v5165_v25, %v11328_v60 }
 0x8e1   : > { %v6784_v42 = vmul.f32 0.01, %v6631_v18  ;;  %v5490_v51 = vadd.f32 %v5489_v30, %v5161_v52  ;;  %v5168_v50 = vpop.f32.mrf.mxu0 }
 0x8e2   : > { %v6282_v59 = vmax.f32 %v6138_v48, 0.0 }
 0x8e3   : > { %6960 = vst [vmem:[%s9682_s22 + $0x4b0] sm:$0xff] %v6784_v42  ;;  %v5819_v0 = vadd.f32 %v5818_v16, %v5490_v51  ;;  %v12933_v16 = vld [vmem:[#allocation110_spill] sm:$0xff] }
 0x8e4   : > { %v6415_v22 = vsel %vm6295_vm4, %v6282_v59, 0.0 }
 0x8e5   : > { %6660 = vadd.xlane.f32.xlu2 %v6415_v22  ;;  %v5826_v22 = vpop.f32.mrf.mxu3 }
 0x8e7   : > { %v6140_v56 = vpop.f32.mrf.mxu1 }
 0x8e8   : > { %v6141_v46 = vadd.f32 %v6140_v56, %v5812_v41  ;;  %v6633_v37 = vpop.xlane.xlu0 %6632  ;;  %v5492_v63 = vpop.f32.mrf.mxu2  ;;  %v12932_v56 = vld [vmem:[#allocation111_spill] sm:$0xff] }
 0x8e9   : > { %v6785_v58 = vmul.f32 0.01, %v6633_v37  ;;  %v5493_v9 = vadd.f32 %v5492_v63, %v5164_v4  ;;  %v5169_v8 = vadd.f32 %v5168_v50, %v12932_v56  ;;  %v5170_v60 = vpop.f32.mrf.mxu0 }
 0x8ea   : > { %v6283_v47 = vmax.f32 %v6141_v46, 0.0 }
 0x8eb   : > { %6961 = vst [vmem:[%s9682_s22 + $0x4b8] sm:$0xff] %v6785_v58  ;;  %v5822_v14 = vadd.f32 %v5821_v7, %v5493_v9 }
 0x8ec   : > { %v6416_v44 = vsel %vm6295_vm4, %v6283_v47, 0.0 }
 0x8ed   : > { %6662 = vadd.xlane.f32.xlu0 %v6416_v44  ;;  %v5828_v44 = vpop.f32.mrf.mxu3 }
 0x8ef   : > { %v6142_v31 = vpop.f32.mrf.mxu1 }
 0x8f0   : > { %v6143_v54 = vadd.f32 %v6142_v31, %v5814_v17  ;;  %v6635_v23 = vpop.xlane.xlu1 %6634  ;;  %v5494_v45 = vpop.f32.mrf.mxu2  ;;  %v5171_v31 = vadd.f32 %v5170_v60, %v12933_v16 }
 0x8f1   : > { %v6786_v26 = vmul.f32 0.01, %v6635_v23  ;;  %v5495_v42 = vadd.f32 %v5494_v45, %v5166_v10  ;;  %v5173_v55 = vpop.f32.mrf.mxu0  ;;  %v12935_v45 = vld [vmem:[#allocation113_spill] sm:$0xff] }
 0x8f2   : > { %v6284_v28 = vmax.f32 %v6143_v54, 0.0 }
 0x8f3   : > { %6962 = vst [vmem:[%s9682_s22 + $0x4c0] sm:$0xff] %v6786_v26  ;;  %v5824_v49 = vadd.f32 %v5823_v33, %v5495_v42 }
 0x8f4   : > { %v6417_v62 = vsel %vm6295_vm4, %v6284_v28, 0.0 }
 0x8f5   : > { %6664 = vadd.xlane.f32.xlu1 %v6417_v62 }
 0x8f7   : > { %v6145_v6 = vpop.f32.mrf.mxu1 }
 0x8f8   : > { %v6146_v43 = vadd.f32 %v6145_v6, %v5817_v27  ;;  %v6637_v12 = vpop.xlane.xlu2 %6636  ;;  %v5497_v18 = vpop.f32.mrf.mxu2  ;;  %v12934_v27 = vld [vmem:[#allocation112_spill] sm:$0xff] }
 0x8f9   : > { %v6787_v34 = vmul.f32 0.01, %v6637_v12  ;;  %v5498_v5 = vadd.f32 %v5497_v18, %v5169_v8  ;;  %v5174_v6 = vadd.f32 %v5173_v55, %v12934_v27 }
 0x8fa   : > { %v6285_v39 = vmax.f32 %v6146_v43, 0.0  ;;  %v5831_v43 = vpop.f32.mrf.mxu3 }
 0x8fb   : > { %6963 = vst [vmem:[%s9682_s22 + $0x4c8] sm:$0xff] %v6787_v34  ;;  %v5827_v30 = vadd.f32 %v5826_v22, %v5498_v5 }
 0x8fc   : > { %v6418_v61 = vsel %vm6295_vm4, %v6285_v39, 0.0  ;;  %v5175_v39 = vpop.f32.mrf.mxu0 }
 0x8fd   : > { %6666 = vadd.xlane.f32.xlu2 %v6418_v61 }
 0x8ff   : > { %v6147_v13 = vpop.f32.mrf.mxu1 }
 0x900   : > { %v6148_v40 = vadd.f32 %v6147_v13, %v5819_v0  ;;  %v6639_v38 = vpop.xlane.xlu0 %6638  ;;  %v5499_v1 = vpop.f32.mrf.mxu2  ;;  %v5176_v13 = vadd.f32 %v5175_v39, %v12935_v45 }
 0x901   : > { %v6788_v32 = vmul.f32 0.01, %v6639_v38  ;;  %v5500_v23 = vadd.f32 %v5499_v1, %v5171_v31 }
 0x902   : > { %v6286_v19 = vmax.f32 %v6148_v40, 0.0  ;;  %v5833_v9 = vpop.f32.mrf.mxu3 }
 0x903   : > { %6964 = vst [vmem:[%s9682_s22 + $0x4d0] sm:$0xff] %v6788_v32  ;;  %v5829_v62 = vadd.f32 %v5828_v44, %v5500_v23 }
 0x904   : > { %v6419_v53 = vsel %vm6295_vm4, %v6286_v19, 0.0 }
 0x905   : > { %6668 = vadd.xlane.f32.xlu0 %v6419_v53 }
 0x907   : > { %v6150_v3 = vpop.f32.mrf.mxu1 }
 0x908   : > { %v6151_v29 = vadd.f32 %v6150_v3, %v5822_v14  ;;  %v6641_v48 = vpop.xlane.xlu1 %6640  ;;  %v5502_v11 = vpop.f32.mrf.mxu2 }
 0x909   : > { %v6789_v21 = vmul.f32 0.01, %v6641_v48  ;;  %v5503_v7 = vadd.f32 %v5502_v11, %v5174_v6 }
 0x90a   : > { %v6287_v15 = vmax.f32 %v6151_v29, 0.0 }
 0x90b   : > { %6965 = vst [vmem:[%s9682_s22 + $0x4d8] sm:$0xff] %v6789_v21  ;;  %v5832_v61 = vadd.f32 %v5831_v43, %v5503_v7 }
 0x90c   : > { %v6420_v59 = vsel %vm6295_vm4, %v6287_v15, 0.0 }
 0x90d   : > { %6670 = vadd.xlane.f32.xlu1 %v6420_v59 }
 0x90f   : > { %v6152_v41 = vpop.f32.mrf.mxu1 }
 0x910   : > { %v6153_v24 = vadd.f32 %v6152_v41, %v5824_v49  ;;  %v6643_v46 = vpop.xlane.xlu2 %6642  ;;  %v5504_v25 = vpop.f32.mrf.mxu2 }
 0x911   : > { %v6790_v37 = vmul.f32 0.01, %v6643_v46  ;;  %v5505_v38 = vadd.f32 %v5504_v25, %v5176_v13 }
 0x912   : > { %v6288_v58 = vmax.f32 %v6153_v24, 0.0 }
 0x913   : > { %6966 = vst [vmem:[%s9682_s22 + $0x4e0] sm:$0xff] %v6790_v37  ;;  %v5834_v33 = vadd.f32 %v5833_v9, %v5505_v38 }
 0x914   : > { %v6421_v47 = vsel %vm6295_vm4, %v6288_v58, 0.0 }
 0x915   : > { %6672 = vadd.xlane.f32.xlu2 %v6421_v47 }
 0x917   : > { %v6155_v17 = vpop.f32.mrf.mxu1 }
 0x918   : > { %v6156_v20 = vadd.f32 %v6155_v17, %v5827_v30  ;;  %v6645_v2 = vpop.xlane.xlu0 %6644 }
 0x919   : > { %v6791_v54 = vmul.f32 0.01, %v6645_v2 }
 0x91a   : > { %v6289_v26 = vmax.f32 %v6156_v20, 0.0 }
 0x91b   : > { %6967 = vst [vmem:[%s9682_s22 + $0x4e8] sm:$0xff] %v6791_v54 }
 0x91c   : > { %v6422_v28 = vsel %vm6295_vm4, %v6289_v26, 0.0 }
 0x91d   : > { %6674 = vadd.xlane.f32.xlu0 %v6422_v28 }
 0x91f   : > { %v6157_v63 = vpop.f32.mrf.mxu1 }
 0x920   : > { %v6158_v57 = vadd.f32 %v6157_v63, %v5829_v62  ;;  %v6647_v52 = vpop.xlane.xlu1 %6646 }
 0x921   : > { %v6792_v12 = vmul.f32 0.01, %v6647_v52 }
 0x922   : > { %v6290_v34 = vmax.f32 %v6158_v57, 0.0 }
 0x923   : > { %6968 = vst [vmem:[%s9682_s22 + $0x4f0] sm:$0xff] %v6792_v12 }
 0x924   : > { %v6423_v51 = vsel %vm6295_vm4, %v6290_v34, 0.0 }
 0x925   : > { %6676 = vadd.xlane.f32.xlu1 %v6423_v51 }
 0x927   : > { %v6160_v0 = vpop.f32.mrf.mxu1 }
 0x928   : > { %v6161_v36 = vadd.f32 %v6160_v0, %v5832_v61  ;;  %v6649_v4 = vpop.xlane.xlu2 %6648 }
 0x929   : > { %v6793_v40 = vmul.f32 0.01, %v6649_v4 }
 0x92a   : > { %v6291_v32 = vmax.f32 %v6161_v36, 0.0 }
 0x92b   : > { %6969 = vst [vmem:[%s9682_s22 + $0x4f8] sm:$0xff] %v6793_v40 }
 0x92c   : > { %v6424_v19 = vsel %vm6295_vm4, %v6291_v32, 0.0 }
 0x92d   : > { %6678 = vadd.xlane.f32.xlu2 %v6424_v19 }
 0x92f   : > { %v6162_v53 = vpop.f32.mrf.mxu1 }
 0x930   : > { %v6163_v14 = vadd.f32 %v6162_v53, %v5834_v33  ;;  %v6651_v50 = vpop.xlane.xlu0 %6650 }
 0x931   : > { %v6794_v3 = vmul.f32 0.01, %v6651_v50 }
 0x932   : > { %v6292_v10 = vmax.f32 %v6163_v14, 0.0 }
 0x933   : > { %6970 = vst [vmem:[%s9682_s22 + $0x500] sm:$0xff] %v6794_v3 }
 0x934   : > { %v6425_v29 = vsel %vm6295_vm4, %v6292_v10, 0.0 }
 0x935   : > { %6680 = vadd.xlane.f32.xlu0 %v6425_v29 }
 0x938   : > { %v6653_v48 = vpop.xlane.xlu1 %6652 }
 0x939   : > { %v6795_v18 = vmul.f32 0.01, %v6653_v48 }
 0x93b   : > { %6971 = vst [vmem:[%s9682_s22 + $0x508] sm:$0xff] %v6795_v18 }
 0x940   : > { %v6655_v21 = vpop.xlane.xlu2 %6654 }
 0x941   : > { %v6796_v42 = vmul.f32 0.01, %v6655_v21 }
 0x943   : > { %6972 = vst [vmem:[%s9682_s22 + $0x510] sm:$0xff] %v6796_v42 }
 0x948   : > { %v6657_v15 = vpop.xlane.xlu0 %6656 }
 0x949   : > { %v6797_v59 = vmul.f32 0.01, %v6657_v15 }
 0x94b   : > { %6973 = vst [vmem:[%s9682_s22 + $0x518] sm:$0xff] %v6797_v59 }
 0x950   : > { %v6659_v22 = vpop.xlane.xlu1 %6658 }
 0x951   : > { %v6798_v49 = vmul.f32 0.01, %v6659_v22 }
 0x953   : > { %6974 = vst [vmem:[%s9682_s22 + $0x520] sm:$0xff] %v6798_v49 }
 0x958   : > { %v6661_v35 = vpop.xlane.xlu2 %6660 }
 0x959   : > { %v6799_v41 = vmul.f32 0.01, %v6661_v35 }
 0x95b   : > { %6975 = vst [vmem:[%s9682_s22 + $0x528] sm:$0xff] %v6799_v41 }
 0x960   : > { %v6663_v56 = vpop.xlane.xlu0 %6662 }
 0x961   : > { %v6800_v8 = vmul.f32 0.01, %v6663_v56 }
 0x963   : > { %6976 = vst [vmem:[%s9682_s22 + $0x530] sm:$0xff] %v6800_v8 }
 0x968   : > { %v6665_v24 = vpop.xlane.xlu1 %6664 }
 0x969   : > { %v6801_v46 = vmul.f32 0.01, %v6665_v24 }
 0x96b   : > { %6977 = vst [vmem:[%s9682_s22 + $0x538] sm:$0xff] %v6801_v46 }
 0x970   : > { %v6667_v60 = vpop.xlane.xlu2 %6666 }
 0x971   : > { %v6802_v37 = vmul.f32 0.01, %v6667_v60 }
 0x973   : > { %6978 = vst [vmem:[%s9682_s22 + $0x540] sm:$0xff] %v6802_v37 }
 0x978   : > { %v6669_v5 = vpop.xlane.xlu0 %6668 }
 0x979   : > { %v6803_v58 = vmul.f32 0.01, %v6669_v5 }
 0x97b   : > { %6979 = vst [vmem:[%s9682_s22 + $0x548] sm:$0xff] %v6803_v58 }
 0x980   : > { %v6671_v1 = vpop.xlane.xlu1 %6670 }
 0x981   : > { %v6804_v47 = vmul.f32 0.01, %v6671_v1 }
 0x983   : > { %6980 = vst [vmem:[%s9682_s22 + $0x550] sm:$0xff] %v6804_v47 }
 0x988   : > { %v6673_v30 = vpop.xlane.xlu2 %6672 }
 0x989   : > { %v6805_v44 = vmul.f32 0.01, %v6673_v30 }
 0x98b   : > { %6981 = vst [vmem:[%s9682_s22 + $0x558] sm:$0xff] %v6805_v44 }
 0x990   : > { %v6675_v17 = vpop.xlane.xlu0 %6674 }
 0x991   : > { %v6806_v16 = vmul.f32 0.01, %v6675_v17 }
 0x993   : > { %6982 = vst [vmem:[%s9682_s22 + $0x560] sm:$0xff] %v6806_v16 }
 0x998   : > { %v6677_v31 = vpop.xlane.xlu1 %6676 }
 0x999   : > { %v6807_v20 = vmul.f32 0.01, %v6677_v31 }
 0x99b   : > { %6983 = vst [vmem:[%s9682_s22 + $0x568] sm:$0xff] %v6807_v20 }
 0x9a0   : > { %v6679_v2 = vpop.xlane.xlu2 %6678 }
 0x9a1   : > { %v6808_v54 = vmul.f32 0.01, %v6679_v2 }
 0x9a3   : > { %6984 = vst [vmem:[%s9682_s22 + $0x570] sm:$0xff] %v6808_v54 }
 0x9a8   : > { %v6681_v23 = vpop.xlane.xlu0 %6680 }
 0x9a9   : > { %v6809_v26 = vmul.f32 0.01, %v6681_v23 }
 0x9ab   : > { %6985 = vst [vmem:[%s9682_s22 + $0x578] sm:$0xff] %v6809_v26 }
 0x9ac   : > { %9166 = shalt.err (!%p9163_p12)
}
 0x9ad   : > { %s9226_s29 = smov 128   ;;  %s9227_s22 = smov 8  }
 0x9ae   : > { %8943 = dma.vmem_to_hbm [thread:$0]  (%p9373_p3), %s7000_s27, 22528, %s7002_s12, %s6987_s16, %s9226_s29, %s9226_s29, %s9227_s22  }
 0x9af PF: > { %s7016_s23 = sand.u32 1, %s9201_s17   ;;  %p12936_p13 = scmp.ge.s32.totalorder %s9213_s20, 2 }
 0x9b0   : > { %s7017_s28 = scalar_lea.sflag [#allocation4], %s7016_s23 }
 0x9b1   : > { %p8960_p0 = pnand %p12936_p13, %p9323_p6 }
 0x9b3   : > { %p8961_p5 = pneg %p8960_p0 }
 0x9b5   : > { %9196 = dma.done.wait (%p8961_p5), %s7017_s28, 22528  }
 0x9b6   : > { %9198 = vsyncadd (%p8961_p5), %s7017_s28, 4294944768  ;;  %s12937_s25 = sld [smem:[#allocation15_spill]]  ;;  %p26_p7 = scmp.ge.s32.totalorder %s9360_s7, 4  }
 0x9b7   : > { %s12938_s19 = sld [smem:[#allocation16_spill]]  ;;  %s12939_s17 = smov %s9205_s18 }
 0x9b8   : > { %s12941_s20 = smov %s9360_s7  ;;  %28 = sbr.rel (!%p26_p7) target bundleno = 11 (0xb), region = 124 }
 0x9bc   : > { %s12940_s18 = smov %s12937_s25 }
 0x9bd   :  { %7023 = vsyncpa [#allocation3], 1 }
 0x9be   :  { %7025 = vsyncpa [#allocation3 + $0x1], 1 }
 0x9bf   :  { %7026 = vsyncpa [#allocation6], 1 }
 0x9c0   :  { %7027 = vsyncpa [#allocation9], 1 }
 0x9c1   :  { %7028 = vsyncpa [#allocation4], 1 }
 0x9c2   :  { %7030 = vsyncpa [#allocation4 + $0x1], 1 }

</bundles_post_ra>
